<compile_context>
chip_gen: v6e
topology: v6e:2x2x1
jax: 0.10.0
libtpu: 0.0.40
codegen_flags: <defaults>
</compile_context>

<pallas_src>
import functools

import jax
import jax.numpy as jnp
from jax import lax
from jax.experimental import pallas as pl
from jax.experimental.pallas import tpu as pltpu

C1, C2, C3 = 64, 128, 64                       # channel widths of the network
TAPS = [(dy, dx) for dy in range(3) for dx in range(3)]   # t = 3*dy + dx


def _mxu_conv3x3_relu(src_ref, dst_ref, w_ref, b_ref, *, H, W, cin, cout, rows):
    """3x3 'same' conv + bias + ReLU, padded src scratch -> padded dst scratch.

    src_ref: (H+2, W+2, cin)  f32, zero border
    dst_ref: (H+2, W+2, cout) f32, zero border (interior overwritten here)
    w_ref:   (9, cin, cout)   bf16, tap-major (t = 3*dy + dx)
    b_ref:   (1, cout)        f32
    Processed `rows` image rows at a time so the f32 accumulator stays in vregs.
    """
    m = rows * W
    for h0 in range(0, H, rows):
        acc = jnp.zeros((m, cout), jnp.float32)
        for t, (dy, dx) in enumerate(TAPS):
            patch = src_ref[dy + h0:dy + h0 + rows, dx:dx + W, :]   # (rows,W,cin)
            lhs = patch.reshape(m, cin).astype(jnp.bfloat16)
            acc = acc + jnp.dot(lhs, w_ref[t],
                                preferred_element_type=jnp.float32)
        act = jnp.maximum(acc + b_ref[...], 0.0)
        dst_ref[1 + h0:1 + h0 + rows, 1:W + 1, :] = act.reshape(rows, W, cout)


def _generator_kernel(x_ref, w1_ref, b1_ref, w2_ref, b2_ref, w3_ref, b3_ref,
                      w4_ref, b4_ref, o_ref,
                      pad0_ref, pad1_ref, pad2_ref, pad3_ref, *, H, W, rows):
    """One grid step = one image; whole 4-layer network in VMEM."""
    # Re-zero padded scratch every step (borders implement the conv zero-pad;
    # per-step zeroing stays correct if the batch grid is split across cores).
    pad0_ref[...] = jnp.zeros_like(pad0_ref)
    pad1_ref[...] = jnp.zeros_like(pad1_ref)
    pad2_ref[...] = jnp.zeros_like(pad2_ref)
    pad3_ref[...] = jnp.zeros_like(pad3_ref)

    # ---- layer 1: Conv(1 -> 64) + ReLU on the VPU (K=1 matmuls waste the MXU)
    img_flat = x_ref[0]                                    # (H*W, 1) f32
    bcast = jnp.broadcast_to(img_flat, (H * W, C1))        # lane broadcast
    pad0_ref[1:H + 1, 1:W + 1, :] = bcast.reshape(H, W, C1)
    for h0 in range(0, H, rows):
        acc = jnp.zeros((rows, W, C1), jnp.float32)
        for t, (dy, dx) in enumerate(TAPS):
            acc = acc + (pad0_ref[dy + h0:dy + h0 + rows, dx:dx + W, :]
                         * w1_ref[t][None, None, :])
        act = jnp.maximum(acc + b1_ref[0][None, None, :], 0.0)
        pad1_ref[1 + h0:1 + h0 + rows, 1:W + 1, :] = act

    # ---- layers 2 & 3: Conv(64->128)+ReLU, Conv(128->64)+ReLU on the MXU
    _mxu_conv3x3_relu(pad1_ref, pad2_ref, w2_ref, b2_ref,
                      H=H, W=W, cin=C1, cout=C2, rows=rows)
    _mxu_conv3x3_relu(pad2_ref, pad3_ref, w3_ref, b3_ref,
                      H=H, W=W, cin=C2, cout=C3, rows=rows)

    # ---- layer 4: Conv(64 -> 1) + Tanh: VPU FMAs + one channel (lane) reduce
    for h0 in range(0, H, rows):
        acc = jnp.zeros((rows, W, C3), jnp.float32)
        for t, (dy, dx) in enumerate(TAPS):
            acc = acc + (pad3_ref[dy + h0:dy + h0 + rows, dx:dx + W, :]
                         * w4_ref[t][None, None, :])
        pre = jnp.sum(acc, axis=-1) + b4_ref[...]          # (rows, W) + (1,1)
        o_ref[0, h0:h0 + rows, :] = jnp.tanh(pre)


def generator_pallas(x_nchw, params):
    """Forward pass of Generator. Input/output NCHW like PyTorch (Cin=Cout=1)."""
    (w1, b1), (w2, b2), (w3, b3), (w4, b4) = params
    N, _, H, W = x_nchw.shape
    # (N,1,H,W) -> (N, H*W, 1): free metadata reshape; keeps the kernel's
    # channel-broadcast a plain minor-dim lane broadcast.
    x = x_nchw.reshape(N, H * W, 1).astype(jnp.float32)
    rows = 8 if H % 8 == 0 else H                     # M-chunk = rows * W

    kernel = functools.partial(_generator_kernel, H=H, W=W, rows=rows)

    def _full(shape):
        return pl.BlockSpec(shape, lambda *_: (0,) * len(shape))

    out = pl.pallas_call(
        kernel,
        out_shape=jax.ShapeDtypeStruct((N, H, W), jnp.float32),
        grid_spec=pltpu.PrefetchScalarGridSpec(
            num_scalar_prefetch=0,
            grid=(N,),
            in_specs=[
                pl.BlockSpec((1, H * W, 1), lambda n: (n, 0, 0)),   # image
                _full((9, C1)), _full((1, C1)),                     # w1, b1
                _full((9, C1, C2)), _full((1, C2)),                 # w2, b2
                _full((9, C2, C3)), _full((1, C3)),                 # w3, b3
                _full((9, C3)), _full((1, 1)),                      # w4, b4
            ],
            out_specs=pl.BlockSpec((1, H, W), lambda n: (n, 0, 0)),
            scratch_shapes=[
                pltpu.VMEM((H + 2, W + 2, C1), jnp.float32),  # bcast input (padded)
                pltpu.VMEM((H + 2, W + 2, C1), jnp.float32),  # act1 (padded)
                pltpu.VMEM((H + 2, W + 2, C2), jnp.float32),  # act2 (padded)
                pltpu.VMEM((H + 2, W + 2, C3), jnp.float32),  # act3 (padded)
            ],
        ),
        compiler_params=pltpu.CompilerParams(
            dimension_semantics=("parallel",)),
    )(
        x,
        w1.reshape(9, C1).astype(jnp.float32),
        b1.reshape(1, C1).astype(jnp.float32),
        w2.reshape(9, C1, C2).astype(jnp.bfloat16),
        b2.reshape(1, C2).astype(jnp.float32),
        w3.reshape(9, C2, C3).astype(jnp.bfloat16),
        b3.reshape(1, C3).astype(jnp.float32),
        w4.reshape(9, C3).astype(jnp.float32),
        b4.reshape(1, 1).astype(jnp.float32),
    )
    return out.reshape(N, 1, H, W)


def init_generator_params(key):
    """Deterministic synthetic init matching the PyTorch module's shapes.

    Weights stored as HWIO (3,3,Cin,Cout). (If real PyTorch weights were ever
    loaded they are OIHW and would need transpose (2,3,1,0).)
    """
    channels = [(1, C1), (C1, C2), (C2, C3), (C3, 1)]
    params = []
    for i, (cin, cout) in enumerate(channels):
        kw, kb = jax.random.split(jax.random.fold_in(key, i))
        scale = 1.0 / jnp.sqrt(jnp.float32(cin * 9))
        w = jax.random.uniform(kw, (3, 3, cin, cout), jnp.float32,
                               minval=-scale, maxval=scale)
        b = jax.random.uniform(kb, (cout,), jnp.float32,
                               minval=-scale, maxval=scale)
        params.append((w, b))
    return params


@jax.jit
def generator_forward(x_nchw, params):
    return generator_pallas(x_nchw, params)


def _reference_forward(x_nchw, params):
    """Pure-JAX reference (f32, highest precision) for a correctness check."""
    x = jnp.transpose(x_nchw, (0, 2, 3, 1)).astype(jnp.float32)   # NHWC
    acts = ["relu", "relu", "relu", "tanh"]
    for (w, b), act in zip(params, acts):
        x = lax.conv_general_dilated(
            x, w, window_strides=(1, 1), padding="SAME",
            dimension_numbers=("NHWC", "HWIO", "NHWC"),
            precision=lax.Precision.HIGHEST) + b
        x = jnp.maximum(x, 0.0) if act == "relu" else jnp.tanh(x)
    return jnp.transpose(x, (0, 3, 1, 2))


if __name__ == "__main__":
    key = jax.random.PRNGKey(0)
    k_x, k_p = jax.random.split(key)

    # Small shapes consistent with the module: batch=2, 1 input channel, 16x16.
    x = jax.random.normal(k_x, (2, 1, 16, 16), dtype=jnp.float32)
    params = init_generator_params(k_p)

    out = jax.block_until_ready(generator_forward(x, params))

    assert out.shape == (2, 1, 16, 16), out.shape
    assert out.dtype == jnp.float32
    assert bool(jnp.all(jnp.isfinite(out)))
    assert bool(jnp.all(jnp.abs(out) <= 1.0))      # tanh output range

    ref = _reference_forward(x, params)
    err = float(jnp.max(jnp.abs(out - ref)))
    assert err < 5e-2, f"max abs error vs reference conv: {err}"

    print("KERNEL_OK")
</pallas_src>

<mosaic_0001>
module attributes {stable_mosaic.version = 11 : i64} {
  func.func @_generator_kernel(%arg0: i32, %arg1: memref<1x256x1xf32, #tpu.memory_space<vmem>>, %arg2: memref<9x64xf32, #tpu.memory_space<vmem>>, %arg3: memref<1x64xf32, #tpu.memory_space<vmem>>, %arg4: memref<9x64x128xbf16, #tpu.memory_space<vmem>>, %arg5: memref<1x128xf32, #tpu.memory_space<vmem>>, %arg6: memref<9x128x64xbf16, #tpu.memory_space<vmem>>, %arg7: memref<1x64xf32, #tpu.memory_space<vmem>>, %arg8: memref<9x64xf32, #tpu.memory_space<vmem>>, %arg9: memref<1x1xf32, #tpu.memory_space<vmem>>, %arg10: memref<1x16x16xf32, #tpu.memory_space<vmem>>, %arg11: memref<18x18x64xf32, #tpu.memory_space<vmem>>, %arg12: memref<18x18x64xf32, #tpu.memory_space<vmem>>, %arg13: memref<18x18x128xf32, #tpu.memory_space<vmem>>, %arg14: memref<18x18x64xf32, #tpu.memory_space<vmem>>) attributes {dimension_semantics = [#tpu.dimension_semantics<parallel>], iteration_bounds = array<i64: 2>, scalar_prefetch = 0 : i64, scratch_operands = 4 : i64, tpu.core_type = #tpu.core_type<tc>, window_params = [{transform_indices = @transform_0, window_bounds = array<i64: 1, 256, 1>}, {pipeline_mode = #tpu.pipeline_mode<synchronous>, transform_indices = @transform_1, window_bounds = array<i64: 9, 64>}, {pipeline_mode = #tpu.pipeline_mode<synchronous>, transform_indices = @transform_2, window_bounds = array<i64: 1, 64>}, {pipeline_mode = #tpu.pipeline_mode<synchronous>, transform_indices = @transform_3, window_bounds = array<i64: 9, 64, 128>}, {pipeline_mode = #tpu.pipeline_mode<synchronous>, transform_indices = @transform_4, window_bounds = array<i64: 1, 128>}, {pipeline_mode = #tpu.pipeline_mode<synchronous>, transform_indices = @transform_5, window_bounds = array<i64: 9, 128, 64>}, {pipeline_mode = #tpu.pipeline_mode<synchronous>, transform_indices = @transform_6, window_bounds = array<i64: 1, 64>}, {pipeline_mode = #tpu.pipeline_mode<synchronous>, transform_indices = @transform_7, window_bounds = array<i64: 9, 64>}, {pipeline_mode = #tpu.pipeline_mode<synchronous>, transform_indices = @transform_8, window_bounds = array<i64: 1, 1>}, {transform_indices = @transform_9, window_bounds = array<i64: 1, 16, 16>}]} {
    %cst = arith.constant 0.000000e+00 : f32
    %0 = vector.broadcast %cst : f32 to vector<18x18x64xf32>
    %c0 = arith.constant 0 : index
    %c0_0 = arith.constant 0 : index
    %c0_1 = arith.constant 0 : index
    %1 = vector.load %arg11[%c0, %c0_0, %c0_1] : memref<18x18x64xf32, #tpu.memory_space<vmem>>, vector<18x18x64xf32>
    tpu.vector_store %arg11[%c0, %c0_0, %c0_1], %0 {strides = array<i32>} : memref<18x18x64xf32, #tpu.memory_space<vmem>>, vector<18x18x64xf32>,
    %cst_2 = arith.constant 0.000000e+00 : f32
    %2 = vector.broadcast %cst_2 : f32 to vector<18x18x64xf32>
    %c0_3 = arith.constant 0 : index
    %c0_4 = arith.constant 0 : index
    %c0_5 = arith.constant 0 : index
    %3 = vector.load %arg12[%c0_3, %c0_4, %c0_5] : memref<18x18x64xf32, #tpu.memory_space<vmem>>, vector<18x18x64xf32>
    tpu.vector_store %arg12[%c0_3, %c0_4, %c0_5], %2 {strides = array<i32>} : memref<18x18x64xf32, #tpu.memory_space<vmem>>, vector<18x18x64xf32>,
    %cst_6 = arith.constant 0.000000e+00 : f32
    %4 = vector.broadcast %cst_6 : f32 to vector<18x18x128xf32>
    %c0_7 = arith.constant 0 : index
    %c0_8 = arith.constant 0 : index
    %c0_9 = arith.constant 0 : index
    %5 = vector.load %arg13[%c0_7, %c0_8, %c0_9] : memref<18x18x128xf32, #tpu.memory_space<vmem>>, vector<18x18x128xf32>
    tpu.vector_store %arg13[%c0_7, %c0_8, %c0_9], %4 {strides = array<i32>} : memref<18x18x128xf32, #tpu.memory_space<vmem>>, vector<18x18x128xf32>,
    %cst_10 = arith.constant 0.000000e+00 : f32
    %6 = vector.broadcast %cst_10 : f32 to vector<18x18x64xf32>
    %c0_11 = arith.constant 0 : index
    %c0_12 = arith.constant 0 : index
    %c0_13 = arith.constant 0 : index
    %7 = vector.load %arg14[%c0_11, %c0_12, %c0_13] : memref<18x18x64xf32, #tpu.memory_space<vmem>>, vector<18x18x64xf32>
    tpu.vector_store %arg14[%c0_11, %c0_12, %c0_13], %6 {strides = array<i32>} : memref<18x18x64xf32, #tpu.memory_space<vmem>>, vector<18x18x64xf32>,
    %c0_14 = arith.constant 0 : index
    %c0_15 = arith.constant 0 : index
    %c0_16 = arith.constant 0 : index
    %8 = vector.load %arg1[%c0_14, %c0_15, %c0_16] : memref<1x256x1xf32, #tpu.memory_space<vmem>>, vector<1x256x1xf32>
    %9 = vector.shape_cast %8 : vector<1x256x1xf32> to vector<256x1xf32>
    %10 = vector.shape_cast %9 : vector<256x1xf32> to vector<256x1xf32>
    %11 = vector.broadcast %10 : vector<256x1xf32> to vector<256x64xf32>
    %12 = vector.shape_cast %11 : vector<256x64xf32> to vector<16x16x64xf32>
    %c1 = arith.constant 1 : index
    %c1_17 = arith.constant 1 : index
    %c0_18 = arith.constant 0 : index
    %13 = vector.load %arg11[%c1, %c1_17, %c0_18] : memref<18x18x64xf32, #tpu.memory_space<vmem>>, vector<16x16x64xf32>
    tpu.vector_store %arg11[%c1, %c1_17, %c0_18], %12 {strides = array<i32>} : memref<18x18x64xf32, #tpu.memory_space<vmem>>, vector<16x16x64xf32>,
    %cst_19 = arith.constant 0.000000e+00 : f32
    %14 = vector.broadcast %cst_19 : f32 to vector<8x16x64xf32>
    %c0_20 = arith.constant 0 : index
    %c0_21 = arith.constant 0 : index
    %c0_22 = arith.constant 0 : index
    %15 = vector.load %arg11[%c0_20, %c0_21, %c0_22] : memref<18x18x64xf32, #tpu.memory_space<vmem>>, vector<8x16x64xf32>
    %c0_23 = arith.constant 0 : index
    %c0_24 = arith.constant 0 : index
    %16 = vector.load %arg2[%c0_23, %c0_24] : memref<9x64xf32, #tpu.memory_space<vmem>>, vector<1x64xf32>
    %17 = vector.shape_cast %16 : vector<1x64xf32> to vector<64xf32>
    %18 = vector.shape_cast %17 : vector<64xf32> to vector<1x1x64xf32>
    %19 = vector.broadcast %18 : vector<1x1x64xf32> to vector<8x16x64xf32>
    %20 = arith.mulf %15, %19 : vector<8x16x64xf32>
    %21 = arith.addf %14, %20 : vector<8x16x64xf32>
    %c0_25 = arith.constant 0 : index
    %c1_26 = arith.constant 1 : index
    %c0_27 = arith.constant 0 : index
    %22 = vector.load %arg11[%c0_25, %c1_26, %c0_27] : memref<18x18x64xf32, #tpu.memory_space<vmem>>, vector<8x16x64xf32>
    %c1_28 = arith.constant 1 : index
    %c0_29 = arith.constant 0 : index
    %23 = vector.load %arg2[%c1_28, %c0_29] : memref<9x64xf32, #tpu.memory_space<vmem>>, vector<1x64xf32>
    %24 = vector.shape_cast %23 : vector<1x64xf32> to vector<64xf32>
    %25 = vector.shape_cast %24 : vector<64xf32> to vector<1x1x64xf32>
    %26 = vector.broadcast %25 : vector<1x1x64xf32> to vector<8x16x64xf32>
    %27 = arith.mulf %22, %26 : vector<8x16x64xf32>
    %28 = arith.addf %21, %27 : vector<8x16x64xf32>
    %c0_30 = arith.constant 0 : index
    %c2 = arith.constant 2 : index
    %c0_31 = arith.constant 0 : index
    %29 = vector.load %arg11[%c0_30, %c2, %c0_31] : memref<18x18x64xf32, #tpu.memory_space<vmem>>, vector<8x16x64xf32>
    %c2_32 = arith.constant 2 : index
    %c0_33 = arith.constant 0 : index
    %30 = vector.load %arg2[%c2_32, %c0_33] : memref<9x64xf32, #tpu.memory_space<vmem>>, vector<1x64xf32>
    %31 = vector.shape_cast %30 : vector<1x64xf32> to vector<64xf32>
    %32 = vector.shape_cast %31 : vector<64xf32> to vector<1x1x64xf32>
    %33 = vector.broadcast %32 : vector<1x1x64xf32> to vector<8x16x64xf32>
    %34 = arith.mulf %29, %33 : vector<8x16x64xf32>
    %35 = arith.addf %28, %34 : vector<8x16x64xf32>
    %c1_34 = arith.constant 1 : index
    %c0_35 = arith.constant 0 : index
    %c0_36 = arith.constant 0 : index
    %36 = vector.load %arg11[%c1_34, %c0_35, %c0_36] : memref<18x18x64xf32, #tpu.memory_space<vmem>>, vector<8x16x64xf32>
    %c3 = arith.constant 3 : index
    %c0_37 = arith.constant 0 : index
    %37 = vector.load %arg2[%c3, %c0_37] : memref<9x64xf32, #tpu.memory_space<vmem>>, vector<1x64xf32>
    %38 = vector.shape_cast %37 : vector<1x64xf32> to vector<64xf32>
    %39 = vector.shape_cast %38 : vector<64xf32> to vector<1x1x64xf32>
    %40 = vector.broadcast %39 : vector<1x1x64xf32> to vector<8x16x64xf32>
    %41 = arith.mulf %36, %40 : vector<8x16x64xf32>
    %42 = arith.addf %35, %41 : vector<8x16x64xf32>
    %c1_38 = arith.constant 1 : index
    %c1_39 = arith.constant 1 : index
    %c0_40 = arith.constant 0 : index
    %43 = vector.load %arg11[%c1_38, %c1_39, %c0_40] : memref<18x18x64xf32, #tpu.memory_space<vmem>>, vector<8x16x64xf32>
    %c4 = arith.constant 4 : index
    %c0_41 = arith.constant 0 : index
    %44 = vector.load %arg2[%c4, %c0_41] : memref<9x64xf32, #tpu.memory_space<vmem>>, vector<1x64xf32>
    %45 = vector.shape_cast %44 : vector<1x64xf32> to vector<64xf32>
    %46 = vector.shape_cast %45 : vector<64xf32> to vector<1x1x64xf32>
    %47 = vector.broadcast %46 : vector<1x1x64xf32> to vector<8x16x64xf32>
    %48 = arith.mulf %43, %47 : vector<8x16x64xf32>
    %49 = arith.addf %42, %48 : vector<8x16x64xf32>
    %c1_42 = arith.constant 1 : index
    %c2_43 = arith.constant 2 : index
    %c0_44 = arith.constant 0 : index
    %50 = vector.load %arg11[%c1_42, %c2_43, %c0_44] : memref<18x18x64xf32, #tpu.memory_space<vmem>>, vector<8x16x64xf32>
    %c5 = arith.constant 5 : index
    %c0_45 = arith.constant 0 : index
    %51 = vector.load %arg2[%c5, %c0_45] : memref<9x64xf32, #tpu.memory_space<vmem>>, vector<1x64xf32>
    %52 = vector.shape_cast %51 : vector<1x64xf32> to vector<64xf32>
    %53 = vector.shape_cast %52 : vector<64xf32> to vector<1x1x64xf32>
    %54 = vector.broadcast %53 : vector<1x1x64xf32> to vector<8x16x64xf32>
    %55 = arith.mulf %50, %54 : vector<8x16x64xf32>
    %56 = arith.addf %49, %55 : vector<8x16x64xf32>
    %c2_46 = arith.constant 2 : index
    %c0_47 = arith.constant 0 : index
    %c0_48 = arith.constant 0 : index
    %57 = vector.load %arg11[%c2_46, %c0_47, %c0_48] : memref<18x18x64xf32, #tpu.memory_space<vmem>>, vector<8x16x64xf32>
    %c6 = arith.constant 6 : index
    %c0_49 = arith.constant 0 : index
    %58 = vector.load %arg2[%c6, %c0_49] : memref<9x64xf32, #tpu.memory_space<vmem>>, vector<1x64xf32>
    %59 = vector.shape_cast %58 : vector<1x64xf32> to vector<64xf32>
    %60 = vector.shape_cast %59 : vector<64xf32> to vector<1x1x64xf32>
    %61 = vector.broadcast %60 : vector<1x1x64xf32> to vector<8x16x64xf32>
    %62 = arith.mulf %57, %61 : vector<8x16x64xf32>
    %63 = arith.addf %56, %62 : vector<8x16x64xf32>
    %c2_50 = arith.constant 2 : index
    %c1_51 = arith.constant 1 : index
    %c0_52 = arith.constant 0 : index
    %64 = vector.load %arg11[%c2_50, %c1_51, %c0_52] : memref<18x18x64xf32, #tpu.memory_space<vmem>>, vector<8x16x64xf32>
    %c7 = arith.constant 7 : index
    %c0_53 = arith.constant 0 : index
    %65 = vector.load %arg2[%c7, %c0_53] : memref<9x64xf32, #tpu.memory_space<vmem>>, vector<1x64xf32>
    %66 = vector.shape_cast %65 : vector<1x64xf32> to vector<64xf32>
    %67 = vector.shape_cast %66 : vector<64xf32> to vector<1x1x64xf32>
    %68 = vector.broadcast %67 : vector<1x1x64xf32> to vector<8x16x64xf32>
    %69 = arith.mulf %64, %68 : vector<8x16x64xf32>
    %70 = arith.addf %63, %69 : vector<8x16x64xf32>
    %c2_54 = arith.constant 2 : index
    %c2_55 = arith.constant 2 : index
    %c0_56 = arith.constant 0 : index
    %71 = vector.load %arg11[%c2_54, %c2_55, %c0_56] : memref<18x18x64xf32, #tpu.memory_space<vmem>>, vector<8x16x64xf32>
    %c8 = arith.constant 8 : index
    %c0_57 = arith.constant 0 : index
    %72 = vector.load %arg2[%c8, %c0_57] : memref<9x64xf32, #tpu.memory_space<vmem>>, vector<1x64xf32>
    %73 = vector.shape_cast %72 : vector<1x64xf32> to vector<64xf32>
    %74 = vector.shape_cast %73 : vector<64xf32> to vector<1x1x64xf32>
    %75 = vector.broadcast %74 : vector<1x1x64xf32> to vector<8x16x64xf32>
    %76 = arith.mulf %71, %75 : vector<8x16x64xf32>
    %77 = arith.addf %70, %76 : vector<8x16x64xf32>
    %c0_58 = arith.constant 0 : index
    %c0_59 = arith.constant 0 : index
    %78 = vector.load %arg3[%c0_58, %c0_59] : memref<1x64xf32, #tpu.memory_space<vmem>>, vector<1x64xf32>
    %79 = vector.shape_cast %78 : vector<1x64xf32> to vector<64xf32>
    %80 = vector.shape_cast %79 : vector<64xf32> to vector<1x1x64xf32>
    %81 = vector.broadcast %80 : vector<1x1x64xf32> to vector<8x16x64xf32>
    %82 = arith.addf %77, %81 : vector<8x16x64xf32>
    %cst_60 = arith.constant 0.000000e+00 : f32
    %83 = vector.broadcast %cst_60 : f32 to vector<8x16x64xf32>
    %84 = arith.maximumf %82, %83 : vector<8x16x64xf32>
    %c1_61 = arith.constant 1 : index
    %c1_62 = arith.constant 1 : index
    %c0_63 = arith.constant 0 : index
    %85 = vector.load %arg12[%c1_61, %c1_62, %c0_63] : memref<18x18x64xf32, #tpu.memory_space<vmem>>, vector<8x16x64xf32>
    tpu.vector_store %arg12[%c1_61, %c1_62, %c0_63], %84 {strides = array<i32>} : memref<18x18x64xf32, #tpu.memory_space<vmem>>, vector<8x16x64xf32>,
    %cst_64 = arith.constant 0.000000e+00 : f32
    %86 = vector.broadcast %cst_64 : f32 to vector<8x16x64xf32>
    %c8_65 = arith.constant 8 : index
    %c0_66 = arith.constant 0 : index
    %c0_67 = arith.constant 0 : index
    %87 = vector.load %arg11[%c8_65, %c0_66, %c0_67] : memref<18x18x64xf32, #tpu.memory_space<vmem>>, vector<8x16x64xf32>
    %c0_68 = arith.constant 0 : index
    %c0_69 = arith.constant 0 : index
    %88 = vector.load %arg2[%c0_68, %c0_69] : memref<9x64xf32, #tpu.memory_space<vmem>>, vector<1x64xf32>
    %89 = vector.shape_cast %88 : vector<1x64xf32> to vector<64xf32>
    %90 = vector.shape_cast %89 : vector<64xf32> to vector<1x1x64xf32>
    %91 = vector.broadcast %90 : vector<1x1x64xf32> to vector<8x16x64xf32>
    %92 = arith.mulf %87, %91 : vector<8x16x64xf32>
    %93 = arith.addf %86, %92 : vector<8x16x64xf32>
    %c8_70 = arith.constant 8 : index
    %c1_71 = arith.constant 1 : index
    %c0_72 = arith.constant 0 : index
    %94 = vector.load %arg11[%c8_70, %c1_71, %c0_72] : memref<18x18x64xf32, #tpu.memory_space<vmem>>, vector<8x16x64xf32>
    %c1_73 = arith.constant 1 : index
    %c0_74 = arith.constant 0 : index
    %95 = vector.load %arg2[%c1_73, %c0_74] : memref<9x64xf32, #tpu.memory_space<vmem>>, vector<1x64xf32>
    %96 = vector.shape_cast %95 : vector<1x64xf32> to vector<64xf32>
    %97 = vector.shape_cast %96 : vector<64xf32> to vector<1x1x64xf32>
    %98 = vector.broadcast %97 : vector<1x1x64xf32> to vector<8x16x64xf32>
    %99 = arith.mulf %94, %98 : vector<8x16x64xf32>
    %100 = arith.addf %93, %99 : vector<8x16x64xf32>
    %c8_75 = arith.constant 8 : index
    %c2_76 = arith.constant 2 : index
    %c0_77 = arith.constant 0 : index
    %101 = vector.load %arg11[%c8_75, %c2_76, %c0_77] : memref<18x18x64xf32, #tpu.memory_space<vmem>>, vector<8x16x64xf32>
    %c2_78 = arith.constant 2 : index
    %c0_79 = arith.constant 0 : index
    %102 = vector.load %arg2[%c2_78, %c0_79] : memref<9x64xf32, #tpu.memory_space<vmem>>, vector<1x64xf32>
    %103 = vector.shape_cast %102 : vector<1x64xf32> to vector<64xf32>
    %104 = vector.shape_cast %103 : vector<64xf32> to vector<1x1x64xf32>
    %105 = vector.broadcast %104 : vector<1x1x64xf32> to vector<8x16x64xf32>
    %106 = arith.mulf %101, %105 : vector<8x16x64xf32>
    %107 = arith.addf %100, %106 : vector<8x16x64xf32>
    %c9 = arith.constant 9 : index
    %c0_80 = arith.constant 0 : index
    %c0_81 = arith.constant 0 : index
    %108 = vector.load %arg11[%c9, %c0_80, %c0_81] : memref<18x18x64xf32, #tpu.memory_space<vmem>>, vector<8x16x64xf32>
    %c3_82 = arith.constant 3 : index
    %c0_83 = arith.constant 0 : index
    %109 = vector.load %arg2[%c3_82, %c0_83] : memref<9x64xf32, #tpu.memory_space<vmem>>, vector<1x64xf32>
    %110 = vector.shape_cast %109 : vector<1x64xf32> to vector<64xf32>
    %111 = vector.shape_cast %110 : vector<64xf32> to vector<1x1x64xf32>
    %112 = vector.broadcast %111 : vector<1x1x64xf32> to vector<8x16x64xf32>
    %113 = arith.mulf %108, %112 : vector<8x16x64xf32>
    %114 = arith.addf %107, %113 : vector<8x16x64xf32>
    %c9_84 = arith.constant 9 : index
    %c1_85 = arith.constant 1 : index
    %c0_86 = arith.constant 0 : index
    %115 = vector.load %arg11[%c9_84, %c1_85, %c0_86] : memref<18x18x64xf32, #tpu.memory_space<vmem>>, vector<8x16x64xf32>
    %c4_87 = arith.constant 4 : index
    %c0_88 = arith.constant 0 : index
    %116 = vector.load %arg2[%c4_87, %c0_88] : memref<9x64xf32, #tpu.memory_space<vmem>>, vector<1x64xf32>
    %117 = vector.shape_cast %116 : vector<1x64xf32> to vector<64xf32>
    %118 = vector.shape_cast %117 : vector<64xf32> to vector<1x1x64xf32>
    %119 = vector.broadcast %118 : vector<1x1x64xf32> to vector<8x16x64xf32>
    %120 = arith.mulf %115, %119 : vector<8x16x64xf32>
    %121 = arith.addf %114, %120 : vector<8x16x64xf32>
    %c9_89 = arith.constant 9 : index
    %c2_90 = arith.constant 2 : index
    %c0_91 = arith.constant 0 : index
    %122 = vector.load %arg11[%c9_89, %c2_90, %c0_91] : memref<18x18x64xf32, #tpu.memory_space<vmem>>, vector<8x16x64xf32>
    %c5_92 = arith.constant 5 : index
    %c0_93 = arith.constant 0 : index
    %123 = vector.load %arg2[%c5_92, %c0_93] : memref<9x64xf32, #tpu.memory_space<vmem>>, vector<1x64xf32>
    %124 = vector.shape_cast %123 : vector<1x64xf32> to vector<64xf32>
    %125 = vector.shape_cast %124 : vector<64xf32> to vector<1x1x64xf32>
    %126 = vector.broadcast %125 : vector<1x1x64xf32> to vector<8x16x64xf32>
    %127 = arith.mulf %122, %126 : vector<8x16x64xf32>
    %128 = arith.addf %121, %127 : vector<8x16x64xf32>
    %c10 = arith.constant 10 : index
    %c0_94 = arith.constant 0 : index
    %c0_95 = arith.constant 0 : index
    %129 = vector.load %arg11[%c10, %c0_94, %c0_95] : memref<18x18x64xf32, #tpu.memory_space<vmem>>, vector<8x16x64xf32>
    %c6_96 = arith.constant 6 : index
    %c0_97 = arith.constant 0 : index
    %130 = vector.load %arg2[%c6_96, %c0_97] : memref<9x64xf32, #tpu.memory_space<vmem>>, vector<1x64xf32>
    %131 = vector.shape_cast %130 : vector<1x64xf32> to vector<64xf32>
    %132 = vector.shape_cast %131 : vector<64xf32> to vector<1x1x64xf32>
    %133 = vector.broadcast %132 : vector<1x1x64xf32> to vector<8x16x64xf32>
    %134 = arith.mulf %129, %133 : vector<8x16x64xf32>
    %135 = arith.addf %128, %134 : vector<8x16x64xf32>
    %c10_98 = arith.constant 10 : index
    %c1_99 = arith.constant 1 : index
    %c0_100 = arith.constant 0 : index
    %136 = vector.load %arg11[%c10_98, %c1_99, %c0_100] : memref<18x18x64xf32, #tpu.memory_space<vmem>>, vector<8x16x64xf32>
    %c7_101 = arith.constant 7 : index
    %c0_102 = arith.constant 0 : index
    %137 = vector.load %arg2[%c7_101, %c0_102] : memref<9x64xf32, #tpu.memory_space<vmem>>, vector<1x64xf32>
    %138 = vector.shape_cast %137 : vector<1x64xf32> to vector<64xf32>
    %139 = vector.shape_cast %138 : vector<64xf32> to vector<1x1x64xf32>
    %140 = vector.broadcast %139 : vector<1x1x64xf32> to vector<8x16x64xf32>
    %141 = arith.mulf %136, %140 : vector<8x16x64xf32>
    %142 = arith.addf %135, %141 : vector<8x16x64xf32>
    %c10_103 = arith.constant 10 : index
    %c2_104 = arith.constant 2 : index
    %c0_105 = arith.constant 0 : index
    %143 = vector.load %arg11[%c10_103, %c2_104, %c0_105] : memref<18x18x64xf32, #tpu.memory_space<vmem>>, vector<8x16x64xf32>
    %c8_106 = arith.constant 8 : index
    %c0_107 = arith.constant 0 : index
    %144 = vector.load %arg2[%c8_106, %c0_107] : memref<9x64xf32, #tpu.memory_space<vmem>>, vector<1x64xf32>
    %145 = vector.shape_cast %144 : vector<1x64xf32> to vector<64xf32>
    %146 = vector.shape_cast %145 : vector<64xf32> to vector<1x1x64xf32>
    %147 = vector.broadcast %146 : vector<1x1x64xf32> to vector<8x16x64xf32>
    %148 = arith.mulf %143, %147 : vector<8x16x64xf32>
    %149 = arith.addf %142, %148 : vector<8x16x64xf32>
    %c0_108 = arith.constant 0 : index
    %c0_109 = arith.constant 0 : index
    %150 = vector.load %arg3[%c0_108, %c0_109] : memref<1x64xf32, #tpu.memory_space<vmem>>, vector<1x64xf32>
    %151 = vector.shape_cast %150 : vector<1x64xf32> to vector<64xf32>
    %152 = vector.shape_cast %151 : vector<64xf32> to vector<1x1x64xf32>
    %153 = vector.broadcast %152 : vector<1x1x64xf32> to vector<8x16x64xf32>
    %154 = arith.addf %149, %153 : vector<8x16x64xf32>
    %cst_110 = arith.constant 0.000000e+00 : f32
    %155 = vector.broadcast %cst_110 : f32 to vector<8x16x64xf32>
    %156 = arith.maximumf %154, %155 : vector<8x16x64xf32>
    %c9_111 = arith.constant 9 : index
    %c1_112 = arith.constant 1 : index
    %c0_113 = arith.constant 0 : index
    %157 = vector.load %arg12[%c9_111, %c1_112, %c0_113] : memref<18x18x64xf32, #tpu.memory_space<vmem>>, vector<8x16x64xf32>
    tpu.vector_store %arg12[%c9_111, %c1_112, %c0_113], %156 {strides = array<i32>} : memref<18x18x64xf32, #tpu.memory_space<vmem>>, vector<8x16x64xf32>,
    %cst_114 = arith.constant 0.000000e+00 : f32
    %158 = vector.broadcast %cst_114 : f32 to vector<128x128xf32>
    %c0_115 = arith.constant 0 : index
    %c0_116 = arith.constant 0 : index
    %c0_117 = arith.constant 0 : index
    %159 = vector.load %arg12[%c0_115, %c0_116, %c0_117] : memref<18x18x64xf32, #tpu.memory_space<vmem>>, vector<8x16x64xf32>
    %160 = vector.shape_cast %159 : vector<8x16x64xf32> to vector<128x64xf32>
    %161 = arith.truncf %160 : vector<128x64xf32> to vector<128x64xbf16>
    %c0_118 = arith.constant 0 : index
    %c0_119 = arith.constant 0 : index
    %c0_120 = arith.constant 0 : index
    %162 = vector.load %arg4[%c0_118, %c0_119, %c0_120] : memref<9x64x128xbf16, #tpu.memory_space<vmem>>, vector<1x64x128xbf16>
    %163 = vector.shape_cast %162 : vector<1x64x128xbf16> to vector<64x128xbf16>
    %cst_121 = arith.constant dense<0.000000e+00> : vector<128x128xf32>
    %164 = tpu.matmul %161, %163, %cst_121 {dimension_numbers = #tpu.dot_dimension_numbers<[1], [0], [0], [1], [0, 0, 1, 1], [], []>} : vector<128x64xbf16>, vector<64x128xbf16>, vector<128x128xf32> -> vector<128x128xf32>
    %165 = arith.addf %158, %164 : vector<128x128xf32>
    %c0_122 = arith.constant 0 : index
    %c1_123 = arith.constant 1 : index
    %c0_124 = arith.constant 0 : index
    %166 = vector.load %arg12[%c0_122, %c1_123, %c0_124] : memref<18x18x64xf32, #tpu.memory_space<vmem>>, vector<8x16x64xf32>
    %167 = vector.shape_cast %166 : vector<8x16x64xf32> to vector<128x64xf32>
    %168 = arith.truncf %167 : vector<128x64xf32> to vector<128x64xbf16>
    %c1_125 = arith.constant 1 : index
    %c0_126 = arith.constant 0 : index
    %c0_127 = arith.constant 0 : index
    %169 = vector.load %arg4[%c1_125, %c0_126, %c0_127] : memref<9x64x128xbf16, #tpu.memory_space<vmem>>, vector<1x64x128xbf16>
    %170 = vector.shape_cast %169 : vector<1x64x128xbf16> to vector<64x128xbf16>
    %cst_128 = arith.constant dense<0.000000e+00> : vector<128x128xf32>
    %171 = tpu.matmul %168, %170, %cst_128 {dimension_numbers = #tpu.dot_dimension_numbers<[1], [0], [0], [1], [0, 0, 1, 1], [], []>} : vector<128x64xbf16>, vector<64x128xbf16>, vector<128x128xf32> -> vector<128x128xf32>
    %172 = arith.addf %165, %171 : vector<128x128xf32>
    %c0_129 = arith.constant 0 : index
    %c2_130 = arith.constant 2 : index
    %c0_131 = arith.constant 0 : index
    %173 = vector.load %arg12[%c0_129, %c2_130, %c0_131] : memref<18x18x64xf32, #tpu.memory_space<vmem>>, vector<8x16x64xf32>
    %174 = vector.shape_cast %173 : vector<8x16x64xf32> to vector<128x64xf32>
    %175 = arith.truncf %174 : vector<128x64xf32> to vector<128x64xbf16>
    %c2_132 = arith.constant 2 : index
    %c0_133 = arith.constant 0 : index
    %c0_134 = arith.constant 0 : index
    %176 = vector.load %arg4[%c2_132, %c0_133, %c0_134] : memref<9x64x128xbf16, #tpu.memory_space<vmem>>, vector<1x64x128xbf16>
    %177 = vector.shape_cast %176 : vector<1x64x128xbf16> to vector<64x128xbf16>
    %cst_135 = arith.constant dense<0.000000e+00> : vector<128x128xf32>
    %178 = tpu.matmul %175, %177, %cst_135 {dimension_numbers = #tpu.dot_dimension_numbers<[1], [0], [0], [1], [0, 0, 1, 1], [], []>} : vector<128x64xbf16>, vector<64x128xbf16>, vector<128x128xf32> -> vector<128x128xf32>
    %179 = arith.addf %172, %178 : vector<128x128xf32>
    %c1_136 = arith.constant 1 : index
    %c0_137 = arith.constant 0 : index
    %c0_138 = arith.constant 0 : index
    %180 = vector.load %arg12[%c1_136, %c0_137, %c0_138] : memref<18x18x64xf32, #tpu.memory_space<vmem>>, vector<8x16x64xf32>
    %181 = vector.shape_cast %180 : vector<8x16x64xf32> to vector<128x64xf32>
    %182 = arith.truncf %181 : vector<128x64xf32> to vector<128x64xbf16>
    %c3_139 = arith.constant 3 : index
    %c0_140 = arith.constant 0 : index
    %c0_141 = arith.constant 0 : index
    %183 = vector.load %arg4[%c3_139, %c0_140, %c0_141] : memref<9x64x128xbf16, #tpu.memory_space<vmem>>, vector<1x64x128xbf16>
    %184 = vector.shape_cast %183 : vector<1x64x128xbf16> to vector<64x128xbf16>
    %cst_142 = arith.constant dense<0.000000e+00> : vector<128x128xf32>
    %185 = tpu.matmul %182, %184, %cst_142 {dimension_numbers = #tpu.dot_dimension_numbers<[1], [0], [0], [1], [0, 0, 1, 1], [], []>} : vector<128x64xbf16>, vector<64x128xbf16>, vector<128x128xf32> -> vector<128x128xf32>
    %186 = arith.addf %179, %185 : vector<128x128xf32>
    %c1_143 = arith.constant 1 : index
    %c1_144 = arith.constant 1 : index
    %c0_145 = arith.constant 0 : index
    %187 = vector.load %arg12[%c1_143, %c1_144, %c0_145] : memref<18x18x64xf32, #tpu.memory_space<vmem>>, vector<8x16x64xf32>
    %188 = vector.shape_cast %187 : vector<8x16x64xf32> to vector<128x64xf32>
    %189 = arith.truncf %188 : vector<128x64xf32> to vector<128x64xbf16>
    %c4_146 = arith.constant 4 : index
    %c0_147 = arith.constant 0 : index
    %c0_148 = arith.constant 0 : index
    %190 = vector.load %arg4[%c4_146, %c0_147, %c0_148] : memref<9x64x128xbf16, #tpu.memory_space<vmem>>, vector<1x64x128xbf16>
    %191 = vector.shape_cast %190 : vector<1x64x128xbf16> to vector<64x128xbf16>
    %cst_149 = arith.constant dense<0.000000e+00> : vector<128x128xf32>
    %192 = tpu.matmul %189, %191, %cst_149 {dimension_numbers = #tpu.dot_dimension_numbers<[1], [0], [0], [1], [0, 0, 1, 1], [], []>} : vector<128x64xbf16>, vector<64x128xbf16>, vector<128x128xf32> -> vector<128x128xf32>
    %193 = arith.addf %186, %192 : vector<128x128xf32>
    %c1_150 = arith.constant 1 : index
    %c2_151 = arith.constant 2 : index
    %c0_152 = arith.constant 0 : index
    %194 = vector.load %arg12[%c1_150, %c2_151, %c0_152] : memref<18x18x64xf32, #tpu.memory_space<vmem>>, vector<8x16x64xf32>
    %195 = vector.shape_cast %194 : vector<8x16x64xf32> to vector<128x64xf32>
    %196 = arith.truncf %195 : vector<128x64xf32> to vector<128x64xbf16>
    %c5_153 = arith.constant 5 : index
    %c0_154 = arith.constant 0 : index
    %c0_155 = arith.constant 0 : index
    %197 = vector.load %arg4[%c5_153, %c0_154, %c0_155] : memref<9x64x128xbf16, #tpu.memory_space<vmem>>, vector<1x64x128xbf16>
    %198 = vector.shape_cast %197 : vector<1x64x128xbf16> to vector<64x128xbf16>
    %cst_156 = arith.constant dense<0.000000e+00> : vector<128x128xf32>
    %199 = tpu.matmul %196, %198, %cst_156 {dimension_numbers = #tpu.dot_dimension_numbers<[1], [0], [0], [1], [0, 0, 1, 1], [], []>} : vector<128x64xbf16>, vector<64x128xbf16>, vector<128x128xf32> -> vector<128x128xf32>
    %200 = arith.addf %193, %199 : vector<128x128xf32>
    %c2_157 = arith.constant 2 : index
    %c0_158 = arith.constant 0 : index
    %c0_159 = arith.constant 0 : index
    %201 = vector.load %arg12[%c2_157, %c0_158, %c0_159] : memref<18x18x64xf32, #tpu.memory_space<vmem>>, vector<8x16x64xf32>
    %202 = vector.shape_cast %201 : vector<8x16x64xf32> to vector<128x64xf32>
    %203 = arith.truncf %202 : vector<128x64xf32> to vector<128x64xbf16>
    %c6_160 = arith.constant 6 : index
    %c0_161 = arith.constant 0 : index
    %c0_162 = arith.constant 0 : index
    %204 = vector.load %arg4[%c6_160, %c0_161, %c0_162] : memref<9x64x128xbf16, #tpu.memory_space<vmem>>, vector<1x64x128xbf16>
    %205 = vector.shape_cast %204 : vector<1x64x128xbf16> to vector<64x128xbf16>
    %cst_163 = arith.constant dense<0.000000e+00> : vector<128x128xf32>
    %206 = tpu.matmul %203, %205, %cst_163 {dimension_numbers = #tpu.dot_dimension_numbers<[1], [0], [0], [1], [0, 0, 1, 1], [], []>} : vector<128x64xbf16>, vector<64x128xbf16>, vector<128x128xf32> -> vector<128x128xf32>
    %207 = arith.addf %200, %206 : vector<128x128xf32>
    %c2_164 = arith.constant 2 : index
    %c1_165 = arith.constant 1 : index
    %c0_166 = arith.constant 0 : index
    %208 = vector.load %arg12[%c2_164, %c1_165, %c0_166] : memref<18x18x64xf32, #tpu.memory_space<vmem>>, vector<8x16x64xf32>
    %209 = vector.shape_cast %208 : vector<8x16x64xf32> to vector<128x64xf32>
    %210 = arith.truncf %209 : vector<128x64xf32> to vector<128x64xbf16>
    %c7_167 = arith.constant 7 : index
    %c0_168 = arith.constant 0 : index
    %c0_169 = arith.constant 0 : index
    %211 = vector.load %arg4[%c7_167, %c0_168, %c0_169] : memref<9x64x128xbf16, #tpu.memory_space<vmem>>, vector<1x64x128xbf16>
    %212 = vector.shape_cast %211 : vector<1x64x128xbf16> to vector<64x128xbf16>
    %cst_170 = arith.constant dense<0.000000e+00> : vector<128x128xf32>
    %213 = tpu.matmul %210, %212, %cst_170 {dimension_numbers = #tpu.dot_dimension_numbers<[1], [0], [0], [1], [0, 0, 1, 1], [], []>} : vector<128x64xbf16>, vector<64x128xbf16>, vector<128x128xf32> -> vector<128x128xf32>
    %214 = arith.addf %207, %213 : vector<128x128xf32>
    %c2_171 = arith.constant 2 : index
    %c2_172 = arith.constant 2 : index
    %c0_173 = arith.constant 0 : index
    %215 = vector.load %arg12[%c2_171, %c2_172, %c0_173] : memref<18x18x64xf32, #tpu.memory_space<vmem>>, vector<8x16x64xf32>
    %216 = vector.shape_cast %215 : vector<8x16x64xf32> to vector<128x64xf32>
    %217 = arith.truncf %216 : vector<128x64xf32> to vector<128x64xbf16>
    %c8_174 = arith.constant 8 : index
    %c0_175 = arith.constant 0 : index
    %c0_176 = arith.constant 0 : index
    %218 = vector.load %arg4[%c8_174, %c0_175, %c0_176] : memref<9x64x128xbf16, #tpu.memory_space<vmem>>, vector<1x64x128xbf16>
    %219 = vector.shape_cast %218 : vector<1x64x128xbf16> to vector<64x128xbf16>
    %cst_177 = arith.constant dense<0.000000e+00> : vector<128x128xf32>
    %220 = tpu.matmul %217, %219, %cst_177 {dimension_numbers = #tpu.dot_dimension_numbers<[1], [0], [0], [1], [0, 0, 1, 1], [], []>} : vector<128x64xbf16>, vector<64x128xbf16>, vector<128x128xf32> -> vector<128x128xf32>
    %221 = arith.addf %214, %220 : vector<128x128xf32>
    %c0_178 = arith.constant 0 : index
    %c0_179 = arith.constant 0 : index
    %222 = vector.load %arg5[%c0_178, %c0_179] : memref<1x128xf32, #tpu.memory_space<vmem>>, vector<1x128xf32>
    %223 = vector.broadcast %222 : vector<1x128xf32> to vector<128x128xf32>
    %224 = arith.addf %221, %223 : vector<128x128xf32>
    %cst_180 = arith.constant 0.000000e+00 : f32
    %225 = vector.broadcast %cst_180 : f32 to vector<128x128xf32>
    %226 = arith.maximumf %224, %225 : vector<128x128xf32>
    %227 = vector.shape_cast %226 : vector<128x128xf32> to vector<8x16x128xf32>
    %c1_181 = arith.constant 1 : index
    %c1_182 = arith.constant 1 : index
    %c0_183 = arith.constant 0 : index
    %228 = vector.load %arg13[%c1_181, %c1_182, %c0_183] : memref<18x18x128xf32, #tpu.memory_space<vmem>>, vector<8x16x128xf32>
    tpu.vector_store %arg13[%c1_181, %c1_182, %c0_183], %227 {strides = array<i32>} : memref<18x18x128xf32, #tpu.memory_space<vmem>>, vector<8x16x128xf32>,
    %cst_184 = arith.constant 0.000000e+00 : f32
    %229 = vector.broadcast %cst_184 : f32 to vector<128x128xf32>
    %c8_185 = arith.constant 8 : index
    %c0_186 = arith.constant 0 : index
    %c0_187 = arith.constant 0 : index
    %230 = vector.load %arg12[%c8_185, %c0_186, %c0_187] : memref<18x18x64xf32, #tpu.memory_space<vmem>>, vector<8x16x64xf32>
    %231 = vector.shape_cast %230 : vector<8x16x64xf32> to vector<128x64xf32>
    %232 = arith.truncf %231 : vector<128x64xf32> to vector<128x64xbf16>
    %c0_188 = arith.constant 0 : index
    %c0_189 = arith.constant 0 : index
    %c0_190 = arith.constant 0 : index
    %233 = vector.load %arg4[%c0_188, %c0_189, %c0_190] : memref<9x64x128xbf16, #tpu.memory_space<vmem>>, vector<1x64x128xbf16>
    %234 = vector.shape_cast %233 : vector<1x64x128xbf16> to vector<64x128xbf16>
    %cst_191 = arith.constant dense<0.000000e+00> : vector<128x128xf32>
    %235 = tpu.matmul %232, %234, %cst_191 {dimension_numbers = #tpu.dot_dimension_numbers<[1], [0], [0], [1], [0, 0, 1, 1], [], []>} : vector<128x64xbf16>, vector<64x128xbf16>, vector<128x128xf32> -> vector<128x128xf32>
    %236 = arith.addf %229, %235 : vector<128x128xf32>
    %c8_192 = arith.constant 8 : index
    %c1_193 = arith.constant 1 : index
    %c0_194 = arith.constant 0 : index
    %237 = vector.load %arg12[%c8_192, %c1_193, %c0_194] : memref<18x18x64xf32, #tpu.memory_space<vmem>>, vector<8x16x64xf32>
    %238 = vector.shape_cast %237 : vector<8x16x64xf32> to vector<128x64xf32>
    %239 = arith.truncf %238 : vector<128x64xf32> to vector<128x64xbf16>
    %c1_195 = arith.constant 1 : index
    %c0_196 = arith.constant 0 : index
    %c0_197 = arith.constant 0 : index
    %240 = vector.load %arg4[%c1_195, %c0_196, %c0_197] : memref<9x64x128xbf16, #tpu.memory_space<vmem>>, vector<1x64x128xbf16>
    %241 = vector.shape_cast %240 : vector<1x64x128xbf16> to vector<64x128xbf16>
    %cst_198 = arith.constant dense<0.000000e+00> : vector<128x128xf32>
    %242 = tpu.matmul %239, %241, %cst_198 {dimension_numbers = #tpu.dot_dimension_numbers<[1], [0], [0], [1], [0, 0, 1, 1], [], []>} : vector<128x64xbf16>, vector<64x128xbf16>, vector<128x128xf32> -> vector<128x128xf32>
    %243 = arith.addf %236, %242 : vector<128x128xf32>
    %c8_199 = arith.constant 8 : index
    %c2_200 = arith.constant 2 : index
    %c0_201 = arith.constant 0 : index
    %244 = vector.load %arg12[%c8_199, %c2_200, %c0_201] : memref<18x18x64xf32, #tpu.memory_space<vmem>>, vector<8x16x64xf32>
    %245 = vector.shape_cast %244 : vector<8x16x64xf32> to vector<128x64xf32>
    %246 = arith.truncf %245 : vector<128x64xf32> to vector<128x64xbf16>
    %c2_202 = arith.constant 2 : index
    %c0_203 = arith.constant 0 : index
    %c0_204 = arith.constant 0 : index
    %247 = vector.load %arg4[%c2_202, %c0_203, %c0_204] : memref<9x64x128xbf16, #tpu.memory_space<vmem>>, vector<1x64x128xbf16>
    %248 = vector.shape_cast %247 : vector<1x64x128xbf16> to vector<64x128xbf16>
    %cst_205 = arith.constant dense<0.000000e+00> : vector<128x128xf32>
    %249 = tpu.matmul %246, %248, %cst_205 {dimension_numbers = #tpu.dot_dimension_numbers<[1], [0], [0], [1], [0, 0, 1, 1], [], []>} : vector<128x64xbf16>, vector<64x128xbf16>, vector<128x128xf32> -> vector<128x128xf32>
    %250 = arith.addf %243, %249 : vector<128x128xf32>
    %c9_206 = arith.constant 9 : index
    %c0_207 = arith.constant 0 : index
    %c0_208 = arith.constant 0 : index
    %251 = vector.load %arg12[%c9_206, %c0_207, %c0_208] : memref<18x18x64xf32, #tpu.memory_space<vmem>>, vector<8x16x64xf32>
    %252 = vector.shape_cast %251 : vector<8x16x64xf32> to vector<128x64xf32>
    %253 = arith.truncf %252 : vector<128x64xf32> to vector<128x64xbf16>
    %c3_209 = arith.constant 3 : index
    %c0_210 = arith.constant 0 : index
    %c0_211 = arith.constant 0 : index
    %254 = vector.load %arg4[%c3_209, %c0_210, %c0_211] : memref<9x64x128xbf16, #tpu.memory_space<vmem>>, vector<1x64x128xbf16>
    %255 = vector.shape_cast %254 : vector<1x64x128xbf16> to vector<64x128xbf16>
    %cst_212 = arith.constant dense<0.000000e+00> : vector<128x128xf32>
    %256 = tpu.matmul %253, %255, %cst_212 {dimension_numbers = #tpu.dot_dimension_numbers<[1], [0], [0], [1], [0, 0, 1, 1], [], []>} : vector<128x64xbf16>, vector<64x128xbf16>, vector<128x128xf32> -> vector<128x128xf32>
    %257 = arith.addf %250, %256 : vector<128x128xf32>
    %c9_213 = arith.constant 9 : index
    %c1_214 = arith.constant 1 : index
    %c0_215 = arith.constant 0 : index
    %258 = vector.load %arg12[%c9_213, %c1_214, %c0_215] : memref<18x18x64xf32, #tpu.memory_space<vmem>>, vector<8x16x64xf32>
    %259 = vector.shape_cast %258 : vector<8x16x64xf32> to vector<128x64xf32>
    %260 = arith.truncf %259 : vector<128x64xf32> to vector<128x64xbf16>
    %c4_216 = arith.constant 4 : index
    %c0_217 = arith.constant 0 : index
    %c0_218 = arith.constant 0 : index
    %261 = vector.load %arg4[%c4_216, %c0_217, %c0_218] : memref<9x64x128xbf16, #tpu.memory_space<vmem>>, vector<1x64x128xbf16>
    %262 = vector.shape_cast %261 : vector<1x64x128xbf16> to vector<64x128xbf16>
    %cst_219 = arith.constant dense<0.000000e+00> : vector<128x128xf32>
    %263 = tpu.matmul %260, %262, %cst_219 {dimension_numbers = #tpu.dot_dimension_numbers<[1], [0], [0], [1], [0, 0, 1, 1], [], []>} : vector<128x64xbf16>, vector<64x128xbf16>, vector<128x128xf32> -> vector<128x128xf32>
    %264 = arith.addf %257, %263 : vector<128x128xf32>
    %c9_220 = arith.constant 9 : index
    %c2_221 = arith.constant 2 : index
    %c0_222 = arith.constant 0 : index
    %265 = vector.load %arg12[%c9_220, %c2_221, %c0_222] : memref<18x18x64xf32, #tpu.memory_space<vmem>>, vector<8x16x64xf32>
    %266 = vector.shape_cast %265 : vector<8x16x64xf32> to vector<128x64xf32>
    %267 = arith.truncf %266 : vector<128x64xf32> to vector<128x64xbf16>
    %c5_223 = arith.constant 5 : index
    %c0_224 = arith.constant 0 : index
    %c0_225 = arith.constant 0 : index
    %268 = vector.load %arg4[%c5_223, %c0_224, %c0_225] : memref<9x64x128xbf16, #tpu.memory_space<vmem>>, vector<1x64x128xbf16>
    %269 = vector.shape_cast %268 : vector<1x64x128xbf16> to vector<64x128xbf16>
    %cst_226 = arith.constant dense<0.000000e+00> : vector<128x128xf32>
    %270 = tpu.matmul %267, %269, %cst_226 {dimension_numbers = #tpu.dot_dimension_numbers<[1], [0], [0], [1], [0, 0, 1, 1], [], []>} : vector<128x64xbf16>, vector<64x128xbf16>, vector<128x128xf32> -> vector<128x128xf32>
    %271 = arith.addf %264, %270 : vector<128x128xf32>
    %c10_227 = arith.constant 10 : index
    %c0_228 = arith.constant 0 : index
    %c0_229 = arith.constant 0 : index
    %272 = vector.load %arg12[%c10_227, %c0_228, %c0_229] : memref<18x18x64xf32, #tpu.memory_space<vmem>>, vector<8x16x64xf32>
    %273 = vector.shape_cast %272 : vector<8x16x64xf32> to vector<128x64xf32>
    %274 = arith.truncf %273 : vector<128x64xf32> to vector<128x64xbf16>
    %c6_230 = arith.constant 6 : index
    %c0_231 = arith.constant 0 : index
    %c0_232 = arith.constant 0 : index
    %275 = vector.load %arg4[%c6_230, %c0_231, %c0_232] : memref<9x64x128xbf16, #tpu.memory_space<vmem>>, vector<1x64x128xbf16>
    %276 = vector.shape_cast %275 : vector<1x64x128xbf16> to vector<64x128xbf16>
    %cst_233 = arith.constant dense<0.000000e+00> : vector<128x128xf32>
    %277 = tpu.matmul %274, %276, %cst_233 {dimension_numbers = #tpu.dot_dimension_numbers<[1], [0], [0], [1], [0, 0, 1, 1], [], []>} : vector<128x64xbf16>, vector<64x128xbf16>, vector<128x128xf32> -> vector<128x128xf32>
    %278 = arith.addf %271, %277 : vector<128x128xf32>
    %c10_234 = arith.constant 10 : index
    %c1_235 = arith.constant 1 : index
    %c0_236 = arith.constant 0 : index
    %279 = vector.load %arg12[%c10_234, %c1_235, %c0_236] : memref<18x18x64xf32, #tpu.memory_space<vmem>>, vector<8x16x64xf32>
    %280 = vector.shape_cast %279 : vector<8x16x64xf32> to vector<128x64xf32>
    %281 = arith.truncf %280 : vector<128x64xf32> to vector<128x64xbf16>
    %c7_237 = arith.constant 7 : index
    %c0_238 = arith.constant 0 : index
    %c0_239 = arith.constant 0 : index
    %282 = vector.load %arg4[%c7_237, %c0_238, %c0_239] : memref<9x64x128xbf16, #tpu.memory_space<vmem>>, vector<1x64x128xbf16>
    %283 = vector.shape_cast %282 : vector<1x64x128xbf16> to vector<64x128xbf16>
    %cst_240 = arith.constant dense<0.000000e+00> : vector<128x128xf32>
    %284 = tpu.matmul %281, %283, %cst_240 {dimension_numbers = #tpu.dot_dimension_numbers<[1], [0], [0], [1], [0, 0, 1, 1], [], []>} : vector<128x64xbf16>, vector<64x128xbf16>, vector<128x128xf32> -> vector<128x128xf32>
    %285 = arith.addf %278, %284 : vector<128x128xf32>
    %c10_241 = arith.constant 10 : index
    %c2_242 = arith.constant 2 : index
    %c0_243 = arith.constant 0 : index
    %286 = vector.load %arg12[%c10_241, %c2_242, %c0_243] : memref<18x18x64xf32, #tpu.memory_space<vmem>>, vector<8x16x64xf32>
    %287 = vector.shape_cast %286 : vector<8x16x64xf32> to vector<128x64xf32>
    %288 = arith.truncf %287 : vector<128x64xf32> to vector<128x64xbf16>
    %c8_244 = arith.constant 8 : index
    %c0_245 = arith.constant 0 : index
    %c0_246 = arith.constant 0 : index
    %289 = vector.load %arg4[%c8_244, %c0_245, %c0_246] : memref<9x64x128xbf16, #tpu.memory_space<vmem>>, vector<1x64x128xbf16>
    %290 = vector.shape_cast %289 : vector<1x64x128xbf16> to vector<64x128xbf16>
    %cst_247 = arith.constant dense<0.000000e+00> : vector<128x128xf32>
    %291 = tpu.matmul %288, %290, %cst_247 {dimension_numbers = #tpu.dot_dimension_numbers<[1], [0], [0], [1], [0, 0, 1, 1], [], []>} : vector<128x64xbf16>, vector<64x128xbf16>, vector<128x128xf32> -> vector<128x128xf32>
    %292 = arith.addf %285, %291 : vector<128x128xf32>
    %c0_248 = arith.constant 0 : index
    %c0_249 = arith.constant 0 : index
    %293 = vector.load %arg5[%c0_248, %c0_249] : memref<1x128xf32, #tpu.memory_space<vmem>>, vector<1x128xf32>
    %294 = vector.broadcast %293 : vector<1x128xf32> to vector<128x128xf32>
    %295 = arith.addf %292, %294 : vector<128x128xf32>
    %cst_250 = arith.constant 0.000000e+00 : f32
    %296 = vector.broadcast %cst_250 : f32 to vector<128x128xf32>
    %297 = arith.maximumf %295, %296 : vector<128x128xf32>
    %298 = vector.shape_cast %297 : vector<128x128xf32> to vector<8x16x128xf32>
    %c9_251 = arith.constant 9 : index
    %c1_252 = arith.constant 1 : index
    %c0_253 = arith.constant 0 : index
    %299 = vector.load %arg13[%c9_251, %c1_252, %c0_253] : memref<18x18x128xf32, #tpu.memory_space<vmem>>, vector<8x16x128xf32>
    tpu.vector_store %arg13[%c9_251, %c1_252, %c0_253], %298 {strides = array<i32>} : memref<18x18x128xf32, #tpu.memory_space<vmem>>, vector<8x16x128xf32>,
    %cst_254 = arith.constant 0.000000e+00 : f32
    %300 = vector.broadcast %cst_254 : f32 to vector<128x64xf32>
    %c0_255 = arith.constant 0 : index
    %c0_256 = arith.constant 0 : index
    %c0_257 = arith.constant 0 : index
    %301 = vector.load %arg13[%c0_255, %c0_256, %c0_257] : memref<18x18x128xf32, #tpu.memory_space<vmem>>, vector<8x16x128xf32>
    %302 = vector.shape_cast %301 : vector<8x16x128xf32> to vector<128x128xf32>
    %303 = arith.truncf %302 : vector<128x128xf32> to vector<128x128xbf16>
    %c0_258 = arith.constant 0 : index
    %c0_259 = arith.constant 0 : index
    %c0_260 = arith.constant 0 : index
    %304 = vector.load %arg6[%c0_258, %c0_259, %c0_260] : memref<9x128x64xbf16, #tpu.memory_space<vmem>>, vector<1x128x64xbf16>
    %305 = vector.shape_cast %304 : vector<1x128x64xbf16> to vector<128x64xbf16>
    %cst_261 = arith.constant dense<0.000000e+00> : vector<128x64xf32>
    %306 = tpu.matmul %303, %305, %cst_261 {dimension_numbers = #tpu.dot_dimension_numbers<[1], [0], [0], [1], [0, 0, 1, 1], [], []>} : vector<128x128xbf16>, vector<128x64xbf16>, vector<128x64xf32> -> vector<128x64xf32>
    %307 = arith.addf %300, %306 : vector<128x64xf32>
    %c0_262 = arith.constant 0 : index
    %c1_263 = arith.constant 1 : index
    %c0_264 = arith.constant 0 : index
    %308 = vector.load %arg13[%c0_262, %c1_263, %c0_264] : memref<18x18x128xf32, #tpu.memory_space<vmem>>, vector<8x16x128xf32>
    %309 = vector.shape_cast %308 : vector<8x16x128xf32> to vector<128x128xf32>
    %310 = arith.truncf %309 : vector<128x128xf32> to vector<128x128xbf16>
    %c1_265 = arith.constant 1 : index
    %c0_266 = arith.constant 0 : index
    %c0_267 = arith.constant 0 : index
    %311 = vector.load %arg6[%c1_265, %c0_266, %c0_267] : memref<9x128x64xbf16, #tpu.memory_space<vmem>>, vector<1x128x64xbf16>
    %312 = vector.shape_cast %311 : vector<1x128x64xbf16> to vector<128x64xbf16>
    %cst_268 = arith.constant dense<0.000000e+00> : vector<128x64xf32>
    %313 = tpu.matmul %310, %312, %cst_268 {dimension_numbers = #tpu.dot_dimension_numbers<[1], [0], [0], [1], [0, 0, 1, 1], [], []>} : vector<128x128xbf16>, vector<128x64xbf16>, vector<128x64xf32> -> vector<128x64xf32>
    %314 = arith.addf %307, %313 : vector<128x64xf32>
    %c0_269 = arith.constant 0 : index
    %c2_270 = arith.constant 2 : index
    %c0_271 = arith.constant 0 : index
    %315 = vector.load %arg13[%c0_269, %c2_270, %c0_271] : memref<18x18x128xf32, #tpu.memory_space<vmem>>, vector<8x16x128xf32>
    %316 = vector.shape_cast %315 : vector<8x16x128xf32> to vector<128x128xf32>
    %317 = arith.truncf %316 : vector<128x128xf32> to vector<128x128xbf16>
    %c2_272 = arith.constant 2 : index
    %c0_273 = arith.constant 0 : index
    %c0_274 = arith.constant 0 : index
    %318 = vector.load %arg6[%c2_272, %c0_273, %c0_274] : memref<9x128x64xbf16, #tpu.memory_space<vmem>>, vector<1x128x64xbf16>
    %319 = vector.shape_cast %318 : vector<1x128x64xbf16> to vector<128x64xbf16>
    %cst_275 = arith.constant dense<0.000000e+00> : vector<128x64xf32>
    %320 = tpu.matmul %317, %319, %cst_275 {dimension_numbers = #tpu.dot_dimension_numbers<[1], [0], [0], [1], [0, 0, 1, 1], [], []>} : vector<128x128xbf16>, vector<128x64xbf16>, vector<128x64xf32> -> vector<128x64xf32>
    %321 = arith.addf %314, %320 : vector<128x64xf32>
    %c1_276 = arith.constant 1 : index
    %c0_277 = arith.constant 0 : index
    %c0_278 = arith.constant 0 : index
    %322 = vector.load %arg13[%c1_276, %c0_277, %c0_278] : memref<18x18x128xf32, #tpu.memory_space<vmem>>, vector<8x16x128xf32>
    %323 = vector.shape_cast %322 : vector<8x16x128xf32> to vector<128x128xf32>
    %324 = arith.truncf %323 : vector<128x128xf32> to vector<128x128xbf16>
    %c3_279 = arith.constant 3 : index
    %c0_280 = arith.constant 0 : index
    %c0_281 = arith.constant 0 : index
    %325 = vector.load %arg6[%c3_279, %c0_280, %c0_281] : memref<9x128x64xbf16, #tpu.memory_space<vmem>>, vector<1x128x64xbf16>
    %326 = vector.shape_cast %325 : vector<1x128x64xbf16> to vector<128x64xbf16>
    %cst_282 = arith.constant dense<0.000000e+00> : vector<128x64xf32>
    %327 = tpu.matmul %324, %326, %cst_282 {dimension_numbers = #tpu.dot_dimension_numbers<[1], [0], [0], [1], [0, 0, 1, 1], [], []>} : vector<128x128xbf16>, vector<128x64xbf16>, vector<128x64xf32> -> vector<128x64xf32>
    %328 = arith.addf %321, %327 : vector<128x64xf32>
    %c1_283 = arith.constant 1 : index
    %c1_284 = arith.constant 1 : index
    %c0_285 = arith.constant 0 : index
    %329 = vector.load %arg13[%c1_283, %c1_284, %c0_285] : memref<18x18x128xf32, #tpu.memory_space<vmem>>, vector<8x16x128xf32>
    %330 = vector.shape_cast %329 : vector<8x16x128xf32> to vector<128x128xf32>
    %331 = arith.truncf %330 : vector<128x128xf32> to vector<128x128xbf16>
    %c4_286 = arith.constant 4 : index
    %c0_287 = arith.constant 0 : index
    %c0_288 = arith.constant 0 : index
    %332 = vector.load %arg6[%c4_286, %c0_287, %c0_288] : memref<9x128x64xbf16, #tpu.memory_space<vmem>>, vector<1x128x64xbf16>
    %333 = vector.shape_cast %332 : vector<1x128x64xbf16> to vector<128x64xbf16>
    %cst_289 = arith.constant dense<0.000000e+00> : vector<128x64xf32>
    %334 = tpu.matmul %331, %333, %cst_289 {dimension_numbers = #tpu.dot_dimension_numbers<[1], [0], [0], [1], [0, 0, 1, 1], [], []>} : vector<128x128xbf16>, vector<128x64xbf16>, vector<128x64xf32> -> vector<128x64xf32>
    %335 = arith.addf %328, %334 : vector<128x64xf32>
    %c1_290 = arith.constant 1 : index
    %c2_291 = arith.constant 2 : index
    %c0_292 = arith.constant 0 : index
    %336 = vector.load %arg13[%c1_290, %c2_291, %c0_292] : memref<18x18x128xf32, #tpu.memory_space<vmem>>, vector<8x16x128xf32>
    %337 = vector.shape_cast %336 : vector<8x16x128xf32> to vector<128x128xf32>
    %338 = arith.truncf %337 : vector<128x128xf32> to vector<128x128xbf16>
    %c5_293 = arith.constant 5 : index
    %c0_294 = arith.constant 0 : index
    %c0_295 = arith.constant 0 : index
    %339 = vector.load %arg6[%c5_293, %c0_294, %c0_295] : memref<9x128x64xbf16, #tpu.memory_space<vmem>>, vector<1x128x64xbf16>
    %340 = vector.shape_cast %339 : vector<1x128x64xbf16> to vector<128x64xbf16>
    %cst_296 = arith.constant dense<0.000000e+00> : vector<128x64xf32>
    %341 = tpu.matmul %338, %340, %cst_296 {dimension_numbers = #tpu.dot_dimension_numbers<[1], [0], [0], [1], [0, 0, 1, 1], [], []>} : vector<128x128xbf16>, vector<128x64xbf16>, vector<128x64xf32> -> vector<128x64xf32>
    %342 = arith.addf %335, %341 : vector<128x64xf32>
    %c2_297 = arith.constant 2 : index
    %c0_298 = arith.constant 0 : index
    %c0_299 = arith.constant 0 : index
    %343 = vector.load %arg13[%c2_297, %c0_298, %c0_299] : memref<18x18x128xf32, #tpu.memory_space<vmem>>, vector<8x16x128xf32>
    %344 = vector.shape_cast %343 : vector<8x16x128xf32> to vector<128x128xf32>
    %345 = arith.truncf %344 : vector<128x128xf32> to vector<128x128xbf16>
    %c6_300 = arith.constant 6 : index
    %c0_301 = arith.constant 0 : index
    %c0_302 = arith.constant 0 : index
    %346 = vector.load %arg6[%c6_300, %c0_301, %c0_302] : memref<9x128x64xbf16, #tpu.memory_space<vmem>>, vector<1x128x64xbf16>
    %347 = vector.shape_cast %346 : vector<1x128x64xbf16> to vector<128x64xbf16>
    %cst_303 = arith.constant dense<0.000000e+00> : vector<128x64xf32>
    %348 = tpu.matmul %345, %347, %cst_303 {dimension_numbers = #tpu.dot_dimension_numbers<[1], [0], [0], [1], [0, 0, 1, 1], [], []>} : vector<128x128xbf16>, vector<128x64xbf16>, vector<128x64xf32> -> vector<128x64xf32>
    %349 = arith.addf %342, %348 : vector<128x64xf32>
    %c2_304 = arith.constant 2 : index
    %c1_305 = arith.constant 1 : index
    %c0_306 = arith.constant 0 : index
    %350 = vector.load %arg13[%c2_304, %c1_305, %c0_306] : memref<18x18x128xf32, #tpu.memory_space<vmem>>, vector<8x16x128xf32>
    %351 = vector.shape_cast %350 : vector<8x16x128xf32> to vector<128x128xf32>
    %352 = arith.truncf %351 : vector<128x128xf32> to vector<128x128xbf16>
    %c7_307 = arith.constant 7 : index
    %c0_308 = arith.constant 0 : index
    %c0_309 = arith.constant 0 : index
    %353 = vector.load %arg6[%c7_307, %c0_308, %c0_309] : memref<9x128x64xbf16, #tpu.memory_space<vmem>>, vector<1x128x64xbf16>
    %354 = vector.shape_cast %353 : vector<1x128x64xbf16> to vector<128x64xbf16>
    %cst_310 = arith.constant dense<0.000000e+00> : vector<128x64xf32>
    %355 = tpu.matmul %352, %354, %cst_310 {dimension_numbers = #tpu.dot_dimension_numbers<[1], [0], [0], [1], [0, 0, 1, 1], [], []>} : vector<128x128xbf16>, vector<128x64xbf16>, vector<128x64xf32> -> vector<128x64xf32>
    %356 = arith.addf %349, %355 : vector<128x64xf32>
    %c2_311 = arith.constant 2 : index
    %c2_312 = arith.constant 2 : index
    %c0_313 = arith.constant 0 : index
    %357 = vector.load %arg13[%c2_311, %c2_312, %c0_313] : memref<18x18x128xf32, #tpu.memory_space<vmem>>, vector<8x16x128xf32>
    %358 = vector.shape_cast %357 : vector<8x16x128xf32> to vector<128x128xf32>
    %359 = arith.truncf %358 : vector<128x128xf32> to vector<128x128xbf16>
    %c8_314 = arith.constant 8 : index
    %c0_315 = arith.constant 0 : index
    %c0_316 = arith.constant 0 : index
    %360 = vector.load %arg6[%c8_314, %c0_315, %c0_316] : memref<9x128x64xbf16, #tpu.memory_space<vmem>>, vector<1x128x64xbf16>
    %361 = vector.shape_cast %360 : vector<1x128x64xbf16> to vector<128x64xbf16>
    %cst_317 = arith.constant dense<0.000000e+00> : vector<128x64xf32>
    %362 = tpu.matmul %359, %361, %cst_317 {dimension_numbers = #tpu.dot_dimension_numbers<[1], [0], [0], [1], [0, 0, 1, 1], [], []>} : vector<128x128xbf16>, vector<128x64xbf16>, vector<128x64xf32> -> vector<128x64xf32>
    %363 = arith.addf %356, %362 : vector<128x64xf32>
    %c0_318 = arith.constant 0 : index
    %c0_319 = arith.constant 0 : index
    %364 = vector.load %arg7[%c0_318, %c0_319] : memref<1x64xf32, #tpu.memory_space<vmem>>, vector<1x64xf32>
    %365 = vector.broadcast %364 : vector<1x64xf32> to vector<128x64xf32>
    %366 = arith.addf %363, %365 : vector<128x64xf32>
    %cst_320 = arith.constant 0.000000e+00 : f32
    %367 = vector.broadcast %cst_320 : f32 to vector<128x64xf32>
    %368 = arith.maximumf %366, %367 : vector<128x64xf32>
    %369 = vector.shape_cast %368 : vector<128x64xf32> to vector<8x16x64xf32>
    %c1_321 = arith.constant 1 : index
    %c1_322 = arith.constant 1 : index
    %c0_323 = arith.constant 0 : index
    %370 = vector.load %arg14[%c1_321, %c1_322, %c0_323] : memref<18x18x64xf32, #tpu.memory_space<vmem>>, vector<8x16x64xf32>
    tpu.vector_store %arg14[%c1_321, %c1_322, %c0_323], %369 {strides = array<i32>} : memref<18x18x64xf32, #tpu.memory_space<vmem>>, vector<8x16x64xf32>,
    %cst_324 = arith.constant 0.000000e+00 : f32
    %371 = vector.broadcast %cst_324 : f32 to vector<128x64xf32>
    %c8_325 = arith.constant 8 : index
    %c0_326 = arith.constant 0 : index
    %c0_327 = arith.constant 0 : index
    %372 = vector.load %arg13[%c8_325, %c0_326, %c0_327] : memref<18x18x128xf32, #tpu.memory_space<vmem>>, vector<8x16x128xf32>
    %373 = vector.shape_cast %372 : vector<8x16x128xf32> to vector<128x128xf32>
    %374 = arith.truncf %373 : vector<128x128xf32> to vector<128x128xbf16>
    %c0_328 = arith.constant 0 : index
    %c0_329 = arith.constant 0 : index
    %c0_330 = arith.constant 0 : index
    %375 = vector.load %arg6[%c0_328, %c0_329, %c0_330] : memref<9x128x64xbf16, #tpu.memory_space<vmem>>, vector<1x128x64xbf16>
    %376 = vector.shape_cast %375 : vector<1x128x64xbf16> to vector<128x64xbf16>
    %cst_331 = arith.constant dense<0.000000e+00> : vector<128x64xf32>
    %377 = tpu.matmul %374, %376, %cst_331 {dimension_numbers = #tpu.dot_dimension_numbers<[1], [0], [0], [1], [0, 0, 1, 1], [], []>} : vector<128x128xbf16>, vector<128x64xbf16>, vector<128x64xf32> -> vector<128x64xf32>
    %378 = arith.addf %371, %377 : vector<128x64xf32>
    %c8_332 = arith.constant 8 : index
    %c1_333 = arith.constant 1 : index
    %c0_334 = arith.constant 0 : index
    %379 = vector.load %arg13[%c8_332, %c1_333, %c0_334] : memref<18x18x128xf32, #tpu.memory_space<vmem>>, vector<8x16x128xf32>
    %380 = vector.shape_cast %379 : vector<8x16x128xf32> to vector<128x128xf32>
    %381 = arith.truncf %380 : vector<128x128xf32> to vector<128x128xbf16>
    %c1_335 = arith.constant 1 : index
    %c0_336 = arith.constant 0 : index
    %c0_337 = arith.constant 0 : index
    %382 = vector.load %arg6[%c1_335, %c0_336, %c0_337] : memref<9x128x64xbf16, #tpu.memory_space<vmem>>, vector<1x128x64xbf16>
    %383 = vector.shape_cast %382 : vector<1x128x64xbf16> to vector<128x64xbf16>
    %cst_338 = arith.constant dense<0.000000e+00> : vector<128x64xf32>
    %384 = tpu.matmul %381, %383, %cst_338 {dimension_numbers = #tpu.dot_dimension_numbers<[1], [0], [0], [1], [0, 0, 1, 1], [], []>} : vector<128x128xbf16>, vector<128x64xbf16>, vector<128x64xf32> -> vector<128x64xf32>
    %385 = arith.addf %378, %384 : vector<128x64xf32>
    %c8_339 = arith.constant 8 : index
    %c2_340 = arith.constant 2 : index
    %c0_341 = arith.constant 0 : index
    %386 = vector.load %arg13[%c8_339, %c2_340, %c0_341] : memref<18x18x128xf32, #tpu.memory_space<vmem>>, vector<8x16x128xf32>
    %387 = vector.shape_cast %386 : vector<8x16x128xf32> to vector<128x128xf32>
    %388 = arith.truncf %387 : vector<128x128xf32> to vector<128x128xbf16>
    %c2_342 = arith.constant 2 : index
    %c0_343 = arith.constant 0 : index
    %c0_344 = arith.constant 0 : index
    %389 = vector.load %arg6[%c2_342, %c0_343, %c0_344] : memref<9x128x64xbf16, #tpu.memory_space<vmem>>, vector<1x128x64xbf16>
    %390 = vector.shape_cast %389 : vector<1x128x64xbf16> to vector<128x64xbf16>
    %cst_345 = arith.constant dense<0.000000e+00> : vector<128x64xf32>
    %391 = tpu.matmul %388, %390, %cst_345 {dimension_numbers = #tpu.dot_dimension_numbers<[1], [0], [0], [1], [0, 0, 1, 1], [], []>} : vector<128x128xbf16>, vector<128x64xbf16>, vector<128x64xf32> -> vector<128x64xf32>
    %392 = arith.addf %385, %391 : vector<128x64xf32>
    %c9_346 = arith.constant 9 : index
    %c0_347 = arith.constant 0 : index
    %c0_348 = arith.constant 0 : index
    %393 = vector.load %arg13[%c9_346, %c0_347, %c0_348] : memref<18x18x128xf32, #tpu.memory_space<vmem>>, vector<8x16x128xf32>
    %394 = vector.shape_cast %393 : vector<8x16x128xf32> to vector<128x128xf32>
    %395 = arith.truncf %394 : vector<128x128xf32> to vector<128x128xbf16>
    %c3_349 = arith.constant 3 : index
    %c0_350 = arith.constant 0 : index
    %c0_351 = arith.constant 0 : index
    %396 = vector.load %arg6[%c3_349, %c0_350, %c0_351] : memref<9x128x64xbf16, #tpu.memory_space<vmem>>, vector<1x128x64xbf16>
    %397 = vector.shape_cast %396 : vector<1x128x64xbf16> to vector<128x64xbf16>
    %cst_352 = arith.constant dense<0.000000e+00> : vector<128x64xf32>
    %398 = tpu.matmul %395, %397, %cst_352 {dimension_numbers = #tpu.dot_dimension_numbers<[1], [0], [0], [1], [0, 0, 1, 1], [], []>} : vector<128x128xbf16>, vector<128x64xbf16>, vector<128x64xf32> -> vector<128x64xf32>
    %399 = arith.addf %392, %398 : vector<128x64xf32>
    %c9_353 = arith.constant 9 : index
    %c1_354 = arith.constant 1 : index
    %c0_355 = arith.constant 0 : index
    %400 = vector.load %arg13[%c9_353, %c1_354, %c0_355] : memref<18x18x128xf32, #tpu.memory_space<vmem>>, vector<8x16x128xf32>
    %401 = vector.shape_cast %400 : vector<8x16x128xf32> to vector<128x128xf32>
    %402 = arith.truncf %401 : vector<128x128xf32> to vector<128x128xbf16>
    %c4_356 = arith.constant 4 : index
    %c0_357 = arith.constant 0 : index
    %c0_358 = arith.constant 0 : index
    %403 = vector.load %arg6[%c4_356, %c0_357, %c0_358] : memref<9x128x64xbf16, #tpu.memory_space<vmem>>, vector<1x128x64xbf16>
    %404 = vector.shape_cast %403 : vector<1x128x64xbf16> to vector<128x64xbf16>
    %cst_359 = arith.constant dense<0.000000e+00> : vector<128x64xf32>
    %405 = tpu.matmul %402, %404, %cst_359 {dimension_numbers = #tpu.dot_dimension_numbers<[1], [0], [0], [1], [0, 0, 1, 1], [], []>} : vector<128x128xbf16>, vector<128x64xbf16>, vector<128x64xf32> -> vector<128x64xf32>
    %406 = arith.addf %399, %405 : vector<128x64xf32>
    %c9_360 = arith.constant 9 : index
    %c2_361 = arith.constant 2 : index
    %c0_362 = arith.constant 0 : index
    %407 = vector.load %arg13[%c9_360, %c2_361, %c0_362] : memref<18x18x128xf32, #tpu.memory_space<vmem>>, vector<8x16x128xf32>
    %408 = vector.shape_cast %407 : vector<8x16x128xf32> to vector<128x128xf32>
    %409 = arith.truncf %408 : vector<128x128xf32> to vector<128x128xbf16>
    %c5_363 = arith.constant 5 : index
    %c0_364 = arith.constant 0 : index
    %c0_365 = arith.constant 0 : index
    %410 = vector.load %arg6[%c5_363, %c0_364, %c0_365] : memref<9x128x64xbf16, #tpu.memory_space<vmem>>, vector<1x128x64xbf16>
    %411 = vector.shape_cast %410 : vector<1x128x64xbf16> to vector<128x64xbf16>
    %cst_366 = arith.constant dense<0.000000e+00> : vector<128x64xf32>
    %412 = tpu.matmul %409, %411, %cst_366 {dimension_numbers = #tpu.dot_dimension_numbers<[1], [0], [0], [1], [0, 0, 1, 1], [], []>} : vector<128x128xbf16>, vector<128x64xbf16>, vector<128x64xf32> -> vector<128x64xf32>
    %413 = arith.addf %406, %412 : vector<128x64xf32>
    %c10_367 = arith.constant 10 : index
    %c0_368 = arith.constant 0 : index
    %c0_369 = arith.constant 0 : index
    %414 = vector.load %arg13[%c10_367, %c0_368, %c0_369] : memref<18x18x128xf32, #tpu.memory_space<vmem>>, vector<8x16x128xf32>
    %415 = vector.shape_cast %414 : vector<8x16x128xf32> to vector<128x128xf32>
    %416 = arith.truncf %415 : vector<128x128xf32> to vector<128x128xbf16>
    %c6_370 = arith.constant 6 : index
    %c0_371 = arith.constant 0 : index
    %c0_372 = arith.constant 0 : index
    %417 = vector.load %arg6[%c6_370, %c0_371, %c0_372] : memref<9x128x64xbf16, #tpu.memory_space<vmem>>, vector<1x128x64xbf16>
    %418 = vector.shape_cast %417 : vector<1x128x64xbf16> to vector<128x64xbf16>
    %cst_373 = arith.constant dense<0.000000e+00> : vector<128x64xf32>
    %419 = tpu.matmul %416, %418, %cst_373 {dimension_numbers = #tpu.dot_dimension_numbers<[1], [0], [0], [1], [0, 0, 1, 1], [], []>} : vector<128x128xbf16>, vector<128x64xbf16>, vector<128x64xf32> -> vector<128x64xf32>
    %420 = arith.addf %413, %419 : vector<128x64xf32>
    %c10_374 = arith.constant 10 : index
    %c1_375 = arith.constant 1 : index
    %c0_376 = arith.constant 0 : index
    %421 = vector.load %arg13[%c10_374, %c1_375, %c0_376] : memref<18x18x128xf32, #tpu.memory_space<vmem>>, vector<8x16x128xf32>
    %422 = vector.shape_cast %421 : vector<8x16x128xf32> to vector<128x128xf32>
    %423 = arith.truncf %422 : vector<128x128xf32> to vector<128x128xbf16>
    %c7_377 = arith.constant 7 : index
    %c0_378 = arith.constant 0 : index
    %c0_379 = arith.constant 0 : index
    %424 = vector.load %arg6[%c7_377, %c0_378, %c0_379] : memref<9x128x64xbf16, #tpu.memory_space<vmem>>, vector<1x128x64xbf16>
    %425 = vector.shape_cast %424 : vector<1x128x64xbf16> to vector<128x64xbf16>
    %cst_380 = arith.constant dense<0.000000e+00> : vector<128x64xf32>
    %426 = tpu.matmul %423, %425, %cst_380 {dimension_numbers = #tpu.dot_dimension_numbers<[1], [0], [0], [1], [0, 0, 1, 1], [], []>} : vector<128x128xbf16>, vector<128x64xbf16>, vector<128x64xf32> -> vector<128x64xf32>
    %427 = arith.addf %420, %426 : vector<128x64xf32>
    %c10_381 = arith.constant 10 : index
    %c2_382 = arith.constant 2 : index
    %c0_383 = arith.constant 0 : index
    %428 = vector.load %arg13[%c10_381, %c2_382, %c0_383] : memref<18x18x128xf32, #tpu.memory_space<vmem>>, vector<8x16x128xf32>
    %429 = vector.shape_cast %428 : vector<8x16x128xf32> to vector<128x128xf32>
    %430 = arith.truncf %429 : vector<128x128xf32> to vector<128x128xbf16>
    %c8_384 = arith.constant 8 : index
    %c0_385 = arith.constant 0 : index
    %c0_386 = arith.constant 0 : index
    %431 = vector.load %arg6[%c8_384, %c0_385, %c0_386] : memref<9x128x64xbf16, #tpu.memory_space<vmem>>, vector<1x128x64xbf16>
    %432 = vector.shape_cast %431 : vector<1x128x64xbf16> to vector<128x64xbf16>
    %cst_387 = arith.constant dense<0.000000e+00> : vector<128x64xf32>
    %433 = tpu.matmul %430, %432, %cst_387 {dimension_numbers = #tpu.dot_dimension_numbers<[1], [0], [0], [1], [0, 0, 1, 1], [], []>} : vector<128x128xbf16>, vector<128x64xbf16>, vector<128x64xf32> -> vector<128x64xf32>
    %434 = arith.addf %427, %433 : vector<128x64xf32>
    %c0_388 = arith.constant 0 : index
    %c0_389 = arith.constant 0 : index
    %435 = vector.load %arg7[%c0_388, %c0_389] : memref<1x64xf32, #tpu.memory_space<vmem>>, vector<1x64xf32>
    %436 = vector.broadcast %435 : vector<1x64xf32> to vector<128x64xf32>
    %437 = arith.addf %434, %436 : vector<128x64xf32>
    %cst_390 = arith.constant 0.000000e+00 : f32
    %438 = vector.broadcast %cst_390 : f32 to vector<128x64xf32>
    %439 = arith.maximumf %437, %438 : vector<128x64xf32>
    %440 = vector.shape_cast %439 : vector<128x64xf32> to vector<8x16x64xf32>
    %c9_391 = arith.constant 9 : index
    %c1_392 = arith.constant 1 : index
    %c0_393 = arith.constant 0 : index
    %441 = vector.load %arg14[%c9_391, %c1_392, %c0_393] : memref<18x18x64xf32, #tpu.memory_space<vmem>>, vector<8x16x64xf32>
    tpu.vector_store %arg14[%c9_391, %c1_392, %c0_393], %440 {strides = array<i32>} : memref<18x18x64xf32, #tpu.memory_space<vmem>>, vector<8x16x64xf32>,
    %cst_394 = arith.constant 0.000000e+00 : f32
    %442 = vector.broadcast %cst_394 : f32 to vector<8x16x64xf32>
    %c0_395 = arith.constant 0 : index
    %c0_396 = arith.constant 0 : index
    %c0_397 = arith.constant 0 : index
    %443 = vector.load %arg14[%c0_395, %c0_396, %c0_397] : memref<18x18x64xf32, #tpu.memory_space<vmem>>, vector<8x16x64xf32>
    %c0_398 = arith.constant 0 : index
    %c0_399 = arith.constant 0 : index
    %444 = vector.load %arg8[%c0_398, %c0_399] : memref<9x64xf32, #tpu.memory_space<vmem>>, vector<1x64xf32>
    %445 = vector.shape_cast %444 : vector<1x64xf32> to vector<64xf32>
    %446 = vector.shape_cast %445 : vector<64xf32> to vector<1x1x64xf32>
    %447 = vector.broadcast %446 : vector<1x1x64xf32> to vector<8x16x64xf32>
    %448 = arith.mulf %443, %447 : vector<8x16x64xf32>
    %449 = arith.addf %442, %448 : vector<8x16x64xf32>
    %c0_400 = arith.constant 0 : index
    %c1_401 = arith.constant 1 : index
    %c0_402 = arith.constant 0 : index
    %450 = vector.load %arg14[%c0_400, %c1_401, %c0_402] : memref<18x18x64xf32, #tpu.memory_space<vmem>>, vector<8x16x64xf32>
    %c1_403 = arith.constant 1 : index
    %c0_404 = arith.constant 0 : index
    %451 = vector.load %arg8[%c1_403, %c0_404] : memref<9x64xf32, #tpu.memory_space<vmem>>, vector<1x64xf32>
    %452 = vector.shape_cast %451 : vector<1x64xf32> to vector<64xf32>
    %453 = vector.shape_cast %452 : vector<64xf32> to vector<1x1x64xf32>
    %454 = vector.broadcast %453 : vector<1x1x64xf32> to vector<8x16x64xf32>
    %455 = arith.mulf %450, %454 : vector<8x16x64xf32>
    %456 = arith.addf %449, %455 : vector<8x16x64xf32>
    %c0_405 = arith.constant 0 : index
    %c2_406 = arith.constant 2 : index
    %c0_407 = arith.constant 0 : index
    %457 = vector.load %arg14[%c0_405, %c2_406, %c0_407] : memref<18x18x64xf32, #tpu.memory_space<vmem>>, vector<8x16x64xf32>
    %c2_408 = arith.constant 2 : index
    %c0_409 = arith.constant 0 : index
    %458 = vector.load %arg8[%c2_408, %c0_409] : memref<9x64xf32, #tpu.memory_space<vmem>>, vector<1x64xf32>
    %459 = vector.shape_cast %458 : vector<1x64xf32> to vector<64xf32>
    %460 = vector.shape_cast %459 : vector<64xf32> to vector<1x1x64xf32>
    %461 = vector.broadcast %460 : vector<1x1x64xf32> to vector<8x16x64xf32>
    %462 = arith.mulf %457, %461 : vector<8x16x64xf32>
    %463 = arith.addf %456, %462 : vector<8x16x64xf32>
    %c1_410 = arith.constant 1 : index
    %c0_411 = arith.constant 0 : index
    %c0_412 = arith.constant 0 : index
    %464 = vector.load %arg14[%c1_410, %c0_411, %c0_412] : memref<18x18x64xf32, #tpu.memory_space<vmem>>, vector<8x16x64xf32>
    %c3_413 = arith.constant 3 : index
    %c0_414 = arith.constant 0 : index
    %465 = vector.load %arg8[%c3_413, %c0_414] : memref<9x64xf32, #tpu.memory_space<vmem>>, vector<1x64xf32>
    %466 = vector.shape_cast %465 : vector<1x64xf32> to vector<64xf32>
    %467 = vector.shape_cast %466 : vector<64xf32> to vector<1x1x64xf32>
    %468 = vector.broadcast %467 : vector<1x1x64xf32> to vector<8x16x64xf32>
    %469 = arith.mulf %464, %468 : vector<8x16x64xf32>
    %470 = arith.addf %463, %469 : vector<8x16x64xf32>
    %c1_415 = arith.constant 1 : index
    %c1_416 = arith.constant 1 : index
    %c0_417 = arith.constant 0 : index
    %471 = vector.load %arg14[%c1_415, %c1_416, %c0_417] : memref<18x18x64xf32, #tpu.memory_space<vmem>>, vector<8x16x64xf32>
    %c4_418 = arith.constant 4 : index
    %c0_419 = arith.constant 0 : index
    %472 = vector.load %arg8[%c4_418, %c0_419] : memref<9x64xf32, #tpu.memory_space<vmem>>, vector<1x64xf32>
    %473 = vector.shape_cast %472 : vector<1x64xf32> to vector<64xf32>
    %474 = vector.shape_cast %473 : vector<64xf32> to vector<1x1x64xf32>
    %475 = vector.broadcast %474 : vector<1x1x64xf32> to vector<8x16x64xf32>
    %476 = arith.mulf %471, %475 : vector<8x16x64xf32>
    %477 = arith.addf %470, %476 : vector<8x16x64xf32>
    %c1_420 = arith.constant 1 : index
    %c2_421 = arith.constant 2 : index
    %c0_422 = arith.constant 0 : index
    %478 = vector.load %arg14[%c1_420, %c2_421, %c0_422] : memref<18x18x64xf32, #tpu.memory_space<vmem>>, vector<8x16x64xf32>
    %c5_423 = arith.constant 5 : index
    %c0_424 = arith.constant 0 : index
    %479 = vector.load %arg8[%c5_423, %c0_424] : memref<9x64xf32, #tpu.memory_space<vmem>>, vector<1x64xf32>
    %480 = vector.shape_cast %479 : vector<1x64xf32> to vector<64xf32>
    %481 = vector.shape_cast %480 : vector<64xf32> to vector<1x1x64xf32>
    %482 = vector.broadcast %481 : vector<1x1x64xf32> to vector<8x16x64xf32>
    %483 = arith.mulf %478, %482 : vector<8x16x64xf32>
    %484 = arith.addf %477, %483 : vector<8x16x64xf32>
    %c2_425 = arith.constant 2 : index
    %c0_426 = arith.constant 0 : index
    %c0_427 = arith.constant 0 : index
    %485 = vector.load %arg14[%c2_425, %c0_426, %c0_427] : memref<18x18x64xf32, #tpu.memory_space<vmem>>, vector<8x16x64xf32>
    %c6_428 = arith.constant 6 : index
    %c0_429 = arith.constant 0 : index
    %486 = vector.load %arg8[%c6_428, %c0_429] : memref<9x64xf32, #tpu.memory_space<vmem>>, vector<1x64xf32>
    %487 = vector.shape_cast %486 : vector<1x64xf32> to vector<64xf32>
    %488 = vector.shape_cast %487 : vector<64xf32> to vector<1x1x64xf32>
    %489 = vector.broadcast %488 : vector<1x1x64xf32> to vector<8x16x64xf32>
    %490 = arith.mulf %485, %489 : vector<8x16x64xf32>
    %491 = arith.addf %484, %490 : vector<8x16x64xf32>
    %c2_430 = arith.constant 2 : index
    %c1_431 = arith.constant 1 : index
    %c0_432 = arith.constant 0 : index
    %492 = vector.load %arg14[%c2_430, %c1_431, %c0_432] : memref<18x18x64xf32, #tpu.memory_space<vmem>>, vector<8x16x64xf32>
    %c7_433 = arith.constant 7 : index
    %c0_434 = arith.constant 0 : index
    %493 = vector.load %arg8[%c7_433, %c0_434] : memref<9x64xf32, #tpu.memory_space<vmem>>, vector<1x64xf32>
    %494 = vector.shape_cast %493 : vector<1x64xf32> to vector<64xf32>
    %495 = vector.shape_cast %494 : vector<64xf32> to vector<1x1x64xf32>
    %496 = vector.broadcast %495 : vector<1x1x64xf32> to vector<8x16x64xf32>
    %497 = arith.mulf %492, %496 : vector<8x16x64xf32>
    %498 = arith.addf %491, %497 : vector<8x16x64xf32>
    %c2_435 = arith.constant 2 : index
    %c2_436 = arith.constant 2 : index
    %c0_437 = arith.constant 0 : index
    %499 = vector.load %arg14[%c2_435, %c2_436, %c0_437] : memref<18x18x64xf32, #tpu.memory_space<vmem>>, vector<8x16x64xf32>
    %c8_438 = arith.constant 8 : index
    %c0_439 = arith.constant 0 : index
    %500 = vector.load %arg8[%c8_438, %c0_439] : memref<9x64xf32, #tpu.memory_space<vmem>>, vector<1x64xf32>
    %501 = vector.shape_cast %500 : vector<1x64xf32> to vector<64xf32>
    %502 = vector.shape_cast %501 : vector<64xf32> to vector<1x1x64xf32>
    %503 = vector.broadcast %502 : vector<1x1x64xf32> to vector<8x16x64xf32>
    %504 = arith.mulf %499, %503 : vector<8x16x64xf32>
    %505 = arith.addf %498, %504 : vector<8x16x64xf32>
    %cst_440 = arith.constant dense<0.000000e+00> : vector<8x16xf32>
    %506 = vector.multi_reduction <add>, %505, %cst_440 [2] : vector<8x16x64xf32> to vector<8x16xf32>
    %c0_441 = arith.constant 0 : index
    %c0_442 = arith.constant 0 : index
    %507 = vector.load %arg9[%c0_441, %c0_442] : memref<1x1xf32, #tpu.memory_space<vmem>>, vector<1x1xf32>
    %508 = vector.broadcast %507 : vector<1x1xf32> to vector<8x16xf32>
    %509 = arith.addf %506, %508 : vector<8x16xf32>
    %510 = math.tanh %509 : vector<8x16xf32>
    %c0_443 = arith.constant 0 : index
    %c0_444 = arith.constant 0 : index
    %c0_445 = arith.constant 0 : index
    %511 = vector.load %arg10[%c0_443, %c0_444, %c0_445] : memref<1x16x16xf32, #tpu.memory_space<vmem>>, vector<1x8x16xf32>
    %512 = vector.shape_cast %511 : vector<1x8x16xf32> to vector<8x16xf32>
    %513 = vector.shape_cast %510 : vector<8x16xf32> to vector<1x8x16xf32>
    tpu.vector_store %arg10[%c0_443, %c0_444, %c0_445], %513 {strides = array<i32>} : memref<1x16x16xf32, #tpu.memory_space<vmem>>, vector<1x8x16xf32>,
    %cst_446 = arith.constant 0.000000e+00 : f32
    %514 = vector.broadcast %cst_446 : f32 to vector<8x16x64xf32>
    %c8_447 = arith.constant 8 : index
    %c0_448 = arith.constant 0 : index
    %c0_449 = arith.constant 0 : index
    %515 = vector.load %arg14[%c8_447, %c0_448, %c0_449] : memref<18x18x64xf32, #tpu.memory_space<vmem>>, vector<8x16x64xf32>
    %c0_450 = arith.constant 0 : index
    %c0_451 = arith.constant 0 : index
    %516 = vector.load %arg8[%c0_450, %c0_451] : memref<9x64xf32, #tpu.memory_space<vmem>>, vector<1x64xf32>
    %517 = vector.shape_cast %516 : vector<1x64xf32> to vector<64xf32>
    %518 = vector.shape_cast %517 : vector<64xf32> to vector<1x1x64xf32>
    %519 = vector.broadcast %518 : vector<1x1x64xf32> to vector<8x16x64xf32>
    %520 = arith.mulf %515, %519 : vector<8x16x64xf32>
    %521 = arith.addf %514, %520 : vector<8x16x64xf32>
    %c8_452 = arith.constant 8 : index
    %c1_453 = arith.constant 1 : index
    %c0_454 = arith.constant 0 : index
    %522 = vector.load %arg14[%c8_452, %c1_453, %c0_454] : memref<18x18x64xf32, #tpu.memory_space<vmem>>, vector<8x16x64xf32>
    %c1_455 = arith.constant 1 : index
    %c0_456 = arith.constant 0 : index
    %523 = vector.load %arg8[%c1_455, %c0_456] : memref<9x64xf32, #tpu.memory_space<vmem>>, vector<1x64xf32>
    %524 = vector.shape_cast %523 : vector<1x64xf32> to vector<64xf32>
    %525 = vector.shape_cast %524 : vector<64xf32> to vector<1x1x64xf32>
    %526 = vector.broadcast %525 : vector<1x1x64xf32> to vector<8x16x64xf32>
    %527 = arith.mulf %522, %526 : vector<8x16x64xf32>
    %528 = arith.addf %521, %527 : vector<8x16x64xf32>
    %c8_457 = arith.constant 8 : index
    %c2_458 = arith.constant 2 : index
    %c0_459 = arith.constant 0 : index
    %529 = vector.load %arg14[%c8_457, %c2_458, %c0_459] : memref<18x18x64xf32, #tpu.memory_space<vmem>>, vector<8x16x64xf32>
    %c2_460 = arith.constant 2 : index
    %c0_461 = arith.constant 0 : index
    %530 = vector.load %arg8[%c2_460, %c0_461] : memref<9x64xf32, #tpu.memory_space<vmem>>, vector<1x64xf32>
    %531 = vector.shape_cast %530 : vector<1x64xf32> to vector<64xf32>
    %532 = vector.shape_cast %531 : vector<64xf32> to vector<1x1x64xf32>
    %533 = vector.broadcast %532 : vector<1x1x64xf32> to vector<8x16x64xf32>
    %534 = arith.mulf %529, %533 : vector<8x16x64xf32>
    %535 = arith.addf %528, %534 : vector<8x16x64xf32>
    %c9_462 = arith.constant 9 : index
    %c0_463 = arith.constant 0 : index
    %c0_464 = arith.constant 0 : index
    %536 = vector.load %arg14[%c9_462, %c0_463, %c0_464] : memref<18x18x64xf32, #tpu.memory_space<vmem>>, vector<8x16x64xf32>
    %c3_465 = arith.constant 3 : index
    %c0_466 = arith.constant 0 : index
    %537 = vector.load %arg8[%c3_465, %c0_466] : memref<9x64xf32, #tpu.memory_space<vmem>>, vector<1x64xf32>
    %538 = vector.shape_cast %537 : vector<1x64xf32> to vector<64xf32>
    %539 = vector.shape_cast %538 : vector<64xf32> to vector<1x1x64xf32>
    %540 = vector.broadcast %539 : vector<1x1x64xf32> to vector<8x16x64xf32>
    %541 = arith.mulf %536, %540 : vector<8x16x64xf32>
    %542 = arith.addf %535, %541 : vector<8x16x64xf32>
    %c9_467 = arith.constant 9 : index
    %c1_468 = arith.constant 1 : index
    %c0_469 = arith.constant 0 : index
    %543 = vector.load %arg14[%c9_467, %c1_468, %c0_469] : memref<18x18x64xf32, #tpu.memory_space<vmem>>, vector<8x16x64xf32>
    %c4_470 = arith.constant 4 : index
    %c0_471 = arith.constant 0 : index
    %544 = vector.load %arg8[%c4_470, %c0_471] : memref<9x64xf32, #tpu.memory_space<vmem>>, vector<1x64xf32>
    %545 = vector.shape_cast %544 : vector<1x64xf32> to vector<64xf32>
    %546 = vector.shape_cast %545 : vector<64xf32> to vector<1x1x64xf32>
    %547 = vector.broadcast %546 : vector<1x1x64xf32> to vector<8x16x64xf32>
    %548 = arith.mulf %543, %547 : vector<8x16x64xf32>
    %549 = arith.addf %542, %548 : vector<8x16x64xf32>
    %c9_472 = arith.constant 9 : index
    %c2_473 = arith.constant 2 : index
    %c0_474 = arith.constant 0 : index
    %550 = vector.load %arg14[%c9_472, %c2_473, %c0_474] : memref<18x18x64xf32, #tpu.memory_space<vmem>>, vector<8x16x64xf32>
    %c5_475 = arith.constant 5 : index
    %c0_476 = arith.constant 0 : index
    %551 = vector.load %arg8[%c5_475, %c0_476] : memref<9x64xf32, #tpu.memory_space<vmem>>, vector<1x64xf32>
    %552 = vector.shape_cast %551 : vector<1x64xf32> to vector<64xf32>
    %553 = vector.shape_cast %552 : vector<64xf32> to vector<1x1x64xf32>
    %554 = vector.broadcast %553 : vector<1x1x64xf32> to vector<8x16x64xf32>
    %555 = arith.mulf %550, %554 : vector<8x16x64xf32>
    %556 = arith.addf %549, %555 : vector<8x16x64xf32>
    %c10_477 = arith.constant 10 : index
    %c0_478 = arith.constant 0 : index
    %c0_479 = arith.constant 0 : index
    %557 = vector.load %arg14[%c10_477, %c0_478, %c0_479] : memref<18x18x64xf32, #tpu.memory_space<vmem>>, vector<8x16x64xf32>
    %c6_480 = arith.constant 6 : index
    %c0_481 = arith.constant 0 : index
    %558 = vector.load %arg8[%c6_480, %c0_481] : memref<9x64xf32, #tpu.memory_space<vmem>>, vector<1x64xf32>
    %559 = vector.shape_cast %558 : vector<1x64xf32> to vector<64xf32>
    %560 = vector.shape_cast %559 : vector<64xf32> to vector<1x1x64xf32>
    %561 = vector.broadcast %560 : vector<1x1x64xf32> to vector<8x16x64xf32>
    %562 = arith.mulf %557, %561 : vector<8x16x64xf32>
    %563 = arith.addf %556, %562 : vector<8x16x64xf32>
    %c10_482 = arith.constant 10 : index
    %c1_483 = arith.constant 1 : index
    %c0_484 = arith.constant 0 : index
    %564 = vector.load %arg14[%c10_482, %c1_483, %c0_484] : memref<18x18x64xf32, #tpu.memory_space<vmem>>, vector<8x16x64xf32>
    %c7_485 = arith.constant 7 : index
    %c0_486 = arith.constant 0 : index
    %565 = vector.load %arg8[%c7_485, %c0_486] : memref<9x64xf32, #tpu.memory_space<vmem>>, vector<1x64xf32>
    %566 = vector.shape_cast %565 : vector<1x64xf32> to vector<64xf32>
    %567 = vector.shape_cast %566 : vector<64xf32> to vector<1x1x64xf32>
    %568 = vector.broadcast %567 : vector<1x1x64xf32> to vector<8x16x64xf32>
    %569 = arith.mulf %564, %568 : vector<8x16x64xf32>
    %570 = arith.addf %563, %569 : vector<8x16x64xf32>
    %c10_487 = arith.constant 10 : index
    %c2_488 = arith.constant 2 : index
    %c0_489 = arith.constant 0 : index
    %571 = vector.load %arg14[%c10_487, %c2_488, %c0_489] : memref<18x18x64xf32, #tpu.memory_space<vmem>>, vector<8x16x64xf32>
    %c8_490 = arith.constant 8 : index
    %c0_491 = arith.constant 0 : index
    %572 = vector.load %arg8[%c8_490, %c0_491] : memref<9x64xf32, #tpu.memory_space<vmem>>, vector<1x64xf32>
    %573 = vector.shape_cast %572 : vector<1x64xf32> to vector<64xf32>
    %574 = vector.shape_cast %573 : vector<64xf32> to vector<1x1x64xf32>
    %575 = vector.broadcast %574 : vector<1x1x64xf32> to vector<8x16x64xf32>
    %576 = arith.mulf %571, %575 : vector<8x16x64xf32>
    %577 = arith.addf %570, %576 : vector<8x16x64xf32>
    %cst_492 = arith.constant dense<0.000000e+00> : vector<8x16xf32>
    %578 = vector.multi_reduction <add>, %577, %cst_492 [2] : vector<8x16x64xf32> to vector<8x16xf32>
    %c0_493 = arith.constant 0 : index
    %c0_494 = arith.constant 0 : index
    %579 = vector.load %arg9[%c0_493, %c0_494] : memref<1x1xf32, #tpu.memory_space<vmem>>, vector<1x1xf32>
    %580 = vector.broadcast %579 : vector<1x1xf32> to vector<8x16xf32>
    %581 = arith.addf %578, %580 : vector<8x16xf32>
    %582 = math.tanh %581 : vector<8x16xf32>
    %c0_495 = arith.constant 0 : index
    %c8_496 = arith.constant 8 : index
    %c0_497 = arith.constant 0 : index
    %583 = vector.load %arg10[%c0_495, %c8_496, %c0_497] : memref<1x16x16xf32, #tpu.memory_space<vmem>>, vector<1x8x16xf32>
    %584 = vector.shape_cast %583 : vector<1x8x16xf32> to vector<8x16xf32>
    %585 = vector.shape_cast %582 : vector<8x16xf32> to vector<1x8x16xf32>
    tpu.vector_store %arg10[%c0_495, %c8_496, %c0_497], %585 {strides = array<i32>} : memref<1x16x16xf32, #tpu.memory_space<vmem>>, vector<1x8x16xf32>,
    return
  }
  func.func @transform_0(%arg0: i32) -> (i32, i32, i32) {
    %c0_i32 = arith.constant 0 : i32
    %c0_i32_0 = arith.constant 0 : i32
    %c0_i32_1 = arith.constant 0 : i32
    return %arg0, %c0_i32, %c0_i32_0 : i32, i32, i32
  }
  func.func @transform_1(%arg0: i32) -> (i32, i32) {
    %c0_i32 = arith.constant 0 : i32
    %c0_i32_0 = arith.constant 0 : i32
    %c0_i32_1 = arith.constant 0 : i32
    return %c0_i32, %c0_i32_0 : i32, i32
  }
  func.func @transform_2(%arg0: i32) -> (i32, i32) {
    %c0_i32 = arith.constant 0 : i32
    %c0_i32_0 = arith.constant 0 : i32
    %c0_i32_1 = arith.constant 0 : i32
    return %c0_i32, %c0_i32_0 : i32, i32
  }
  func.func @transform_3(%arg0: i32) -> (i32, i32, i32) {
    %c0_i32 = arith.constant 0 : i32
    %c0_i32_0 = arith.constant 0 : i32
    %c0_i32_1 = arith.constant 0 : i32
    %c0_i32_2 = arith.constant 0 : i32
    return %c0_i32, %c0_i32_0, %c0_i32_1 : i32, i32, i32
  }
  func.func @transform_4(%arg0: i32) -> (i32, i32) {
    %c0_i32 = arith.constant 0 : i32
    %c0_i32_0 = arith.constant 0 : i32
    %c0_i32_1 = arith.constant 0 : i32
    return %c0_i32, %c0_i32_0 : i32, i32
  }
  func.func @transform_5(%arg0: i32) -> (i32, i32, i32) {
    %c0_i32 = arith.constant 0 : i32
    %c0_i32_0 = arith.constant 0 : i32
    %c0_i32_1 = arith.constant 0 : i32
    %c0_i32_2 = arith.constant 0 : i32
    return %c0_i32, %c0_i32_0, %c0_i32_1 : i32, i32, i32
  }
  func.func @transform_6(%arg0: i32) -> (i32, i32) {
    %c0_i32 = arith.constant 0 : i32
    %c0_i32_0 = arith.constant 0 : i32
    %c0_i32_1 = arith.constant 0 : i32
    return %c0_i32, %c0_i32_0 : i32, i32
  }
  func.func @transform_7(%arg0: i32) -> (i32, i32) {
    %c0_i32 = arith.constant 0 : i32
    %c0_i32_0 = arith.constant 0 : i32
    %c0_i32_1 = arith.constant 0 : i32
    return %c0_i32, %c0_i32_0 : i32, i32
  }
  func.func @transform_8(%arg0: i32) -> (i32, i32) {
    %c0_i32 = arith.constant 0 : i32
    %c0_i32_0 = arith.constant 0 : i32
    %c0_i32_1 = arith.constant 0 : i32
    return %c0_i32, %c0_i32_0 : i32, i32
  }
  func.func @transform_9(%arg0: i32) -> (i32, i32, i32) {
    %c0_i32 = arith.constant 0 : i32
    %c0_i32_0 = arith.constant 0 : i32
    %c0_i32_1 = arith.constant 0 : i32
    return %arg0, %c0_i32, %c0_i32_0 : i32, i32, i32
  }
}

</mosaic_0001>

<bundles_post_ra>
// kernel: generator_forward.1
= control target key start
LH: loop header
LB: loop body
LE: loop exit
PB: predicated region body
PF: predicated region fallthrough
CT: control target
= control target key end

     0   :  { %s17902_s0 = inlined_call_operand.vmem [shape: f32[2,256,1], index: 0, kind: input, shape index: {}]   ;;  %s17903_s1 = inlined_call_operand.vmem [shape: f32[9,64], index: 1, kind: input, shape index: {}]   ;;  %s17904_s2 = inlined_call_operand.vmem [shape: f32[1,64], index: 2, kind: input, shape index: {}]   ;;  %s17905_s3 = inlined_call_operand.vmem [shape: bf16[9,64,128], index: 3, kind: input, shape index: {}]   ;;  %s17906_s4 = inlined_call_operand.vmem [shape: f32[1,128], index: 4, kind: input, shape index: {}]   ;;  %s17907_s5 = inlined_call_operand.vmem [shape: bf16[9,128,64], index: 5, kind: input, shape index: {}]   ;;  %s17908_s6 = inlined_call_operand.vmem [shape: f32[1,64], index: 6, kind: input, shape index: {}]   ;;  %s17909_s7 = inlined_call_operand.vmem [shape: f32[9,64], index: 7, kind: input, shape index: {}]   ;;  %s17910_s8 = inlined_call_operand.<no memory space> [shape: f32[1,1], index: 8, kind: input, shape index: {}]   ;;  %s17911_s9 = inlined_call_operand.hbm [shape: f32[2,16,16], index: 9, kind: output, shape index: {}]  }
   0x1   :  { %v14_v0 = vstv %s17910_s8 }
   0x2   :  { %15 = vst [vmem:[#allocation6] sm:$0x1] %v14_v0 }
   0x3   :  { %16 = vsyncpa [#allocation8], 0 }
   0x4   :  { %18 = vsyncpa [#allocation8 + $0x1], 0  ;;  %s13248_s11 = smov 0   ;;  %s13250_s12 = smov 0  }
   0x5   :  { %s13252_s13 = smov 0   ;;  %s13254_s14 = smov 0  }
   0x6 LB: > { %s13269_s8 = sadd.s32 4294967295, %s13188_s14   ;;  %s10476_s15 = sadd.s32 4294967294, %s13188_s14   ;;  %s13188_s14 = sphi %s13254_s14, %s18184_s14   ;;  %s13184_s13 = sphi %s13252_s13, %s18183_s13   ;;  %s13180_s12 = sphi %s13250_s12, %s18182_s12   ;;  %s13176_s11 = sphi %s13248_s11, %s18181_s11  }
   0x7   : > { %s13273_s16 = sadd.s32 1, %s13188_s14   ;;  %s225_s17 = sadd.s32 1, %s13184_s13 }
   0x8   : > { %s222_s18 = ssub.s32 %s13188_s14, %s13273_s16  ;;  %p235_p0 = scmp.ne.s32.totalorder %s13184_s13, %s13180_s12 }
   0x9   : > { %p223_p1 = scmp.eq.s32.totalorder %s222_s18, 0  ;;  %p236_p2 = scmp.eq.s32.totalorder %s13269_s8, 1 }
   0xa   : > { %p241_p3 = scmp.ne.s32.totalorder %s13180_s12, %s13176_s11  ;;  %p242_p4 = scmp.eq.s32.totalorder %s10476_s15, 1 }
   0xb   : > { %s13284_s19 = scalar_select %p223_p1, %s13184_s13, %s225_s17  }
   0xc   : > { %p13286_p5 = por %p236_p2, %p235_p0  ;;  %p13290_p6 = por %p242_p4, %p241_p3 }
   0xd   : > { %p10479_p7 = scmp.ge.s32.totalorder %s13188_s14, 1  ;;  %p292_p8 = scmp.lt.s32.totalorder %s13188_s14, 3 }
   0xf   : > { %p293_p9 = pnand %p10479_p7, %p292_p8 }
  0x11   : > { %296 = sbr.rel (%p293_p9) target bundleno = 1406 (0x57e), region = 56 }
  0x16   : > { %p328_p10 = scmp.lt.s32.totalorder %s13269_s8, 1  ;;  %vm334_vm0 = vcmask 523264   ;;  %v13190_v1 = vmov 0   ;;  %v13191_v2 = vmov 0.0   ;;  %vm337_vm1 = vcmask 517120   ;;  %v12835_v31 = vld [vmem:[%s17905_s3 + $0x38] sm:$0xff]  }
  0x17   : > { %12834 = vset.pattern.permute.xlu1 %v13190_v1  ;;  %12833 = vset.pattern.permute.xlu0 %v13190_v1  ;;  %342 = vst.msk [vmem:[#allocation2 + $0x30] sm:$0xff] %vm334_vm0, %v13191_v2  ;;  %343 = vst.msk [vmem:[#allocation2 + $0x38] sm:$0xff] %vm334_vm0, %v13191_v2  ;;  %v12836_v34 = vld [vmem:[%s17905_s3 + $0x18] sm:$0xff]   ;;  %v12837_v37 = vld [vmem:[%s17905_s3 + $0x30] sm:$0xff]   ;;  %vm9652_vm2 = vcmask 130112   ;;  %vm9717_vm3 = vcmask 1041409  }
  0x18   : > { %335 = vst.msk [vmem:[#allocation2] sm:$0xff] %vm334_vm0, %v13191_v2  ;;  %336 = vst.msk [vmem:[#allocation2 + $0x8] sm:$0xff] %vm334_vm0, %v13191_v2  ;;  %s329_s22 = scalar_select %p328_p10, %s13269_s8, 1  ;;  %11782 = vmatprep.subr.bf16.mxu0 %v12835_v31  ;;  %11806 = vmatprep.subr.bf16.mxu1 %v12836_v34  ;;  %v12838_v38 = vld [vmem:[%s17905_s3 + $0x10] sm:$0xff]   ;;  %v12839_v39 = vld [vmem:[%s17905_s3 + $0x28] sm:$0xff]   ;;  %vm9719_vm4 = vcmask 1042434  }
  0x19   : > { %339 = vst.msk [vmem:[#allocation2 + $0x18] sm:$0xff] %vm334_vm0, %v13191_v2  ;;  %340 = vst.msk [vmem:[#allocation2 + $0x20] sm:$0xff] %vm334_vm0, %v13191_v2  ;;  %11783 = vmatpush3.bf16.msra.mxu0 %v12835_v31  ;;  %11807 = vmatpush3.bf16.msra.mxu1 %v12836_v34  ;;  %v12840_v40 = vld [vmem:[%s17905_s3 + $0x8] sm:$0xff]   ;;  %v12841_v41 = vld [vmem:[%s17905_s3 + $0x20] sm:$0xff]   ;;  %vm9721_vm5 = vcmask 1043459   ;;  %vm9723_vm6 = vcmask 1044484  }
  0x1a   : > { %345 = vst.msk [vmem:[#allocation2 + $0x48] sm:$0xff] %vm334_vm0, %v13191_v2  ;;  %346 = vst.msk [vmem:[#allocation2 + $0x50] sm:$0xff] %vm334_vm0, %v13191_v2  ;;  %s11276_s23 = sshll.u32 %s329_s22, 8  ;;  %11784 = vmatprep.subr.bf16.mxu0 %v12837_v37  ;;  %11808 = vmatprep.subr.bf16.mxu1 %v12838_v38  ;;  %v12842_v42 = vld [vmem:[%s17905_s3] sm:$0xff]   ;;  %v12843_v49 = vld [vmem:[%s17905_s3 + $0x58] sm:$0xff]   ;;  %vm9725_vm7 = vcmask 1045509  }
  0x1b   : > { %348 = vst.msk [vmem:[#allocation2 + $0x60] sm:$0xff] %vm334_vm0, %v13191_v2  ;;  %349 = vst.msk [vmem:[#allocation2 + $0x68] sm:$0xff] %vm334_vm0, %v13191_v2  ;;  %s13573_s26 = scalar_lea.vmem %s17902_s0, %s11276_s23  ;;  %v12844_v50 = vld [vmem:[%s17905_s3 + $0x78] sm:$0xff]   ;;  %v13750_v51 = vld [vmem:[%s17903_s1] ss:$0 sm:$0xff]  ;;  %vm9727_vm8 = vcmask 1046534  }
  0x1c   : > { %351 = vst.msk [vmem:[#allocation2 + $0x78] sm:$0xff] %vm334_vm0, %v13191_v2  ;;  %352 = vst.msk [vmem:[#allocation2 + $0x80] sm:$0xff] %vm334_vm0, %v13191_v2  ;;  %v554_v3 = vld [vmem:[%s13573_s26 + $0x10] sm:$0xff]  ;;  %v552_v4 = vld [vmem:[%s13573_s26] sm:$0xff]  ;;  %s325_s30 = sand.u32 1, %s13180_s12   ;;  %vm9729_vm9 = vcmask 1047559  }
  0x1d   : > { %354 = vst.msk [vmem:[#allocation2 + $0x90] sm:$0xff] %vm334_vm0, %v13191_v2  ;;  %355 = vst.msk [vmem:[#allocation2 + $0x98] sm:$0xff] %vm334_vm0, %v13191_v2  ;;  %596 = vperm.xlu1 %12834, %v554_v3   ;;  %586 = vperm.xlu0 %12833, %v552_v4   ;;  %v555_v5 = vld [vmem:[%s13573_s26 + $0x18] sm:$0xff]  ;;  %v553_v6 = vld [vmem:[%s13573_s26 + $0x8] sm:$0xff]  ;;  %s10480_s10 = sshll.u32 %s325_s30, 4  ;;  %vm9732_vm10 = vcmask 130048  }
  0x1e   : > { %357 = vst.msk [vmem:[#allocation2 + $0xa8] sm:$0xff] %vm334_vm0, %v13191_v2  ;;  %358 = vst.msk [vmem:[#allocation2 + $0xb0] sm:$0xff] %vm334_vm0, %v13191_v2  ;;  %v557_v7 = vld [vmem:[%s13573_s26 + $0x28] sm:$0xff]  ;;  %v556_v8 = vld [vmem:[%s13573_s26 + $0x20] sm:$0xff]  ;;  %11785 = vmatpush3.bf16.msra.mxu0 %v12837_v37  ;;  %11809 = vmatpush3.bf16.msra.mxu1 %v12838_v38  ;;  %s17817_s15 = scalar_lea.vmem [#allocation7], %s10480_s10  ;;  %s11277_s17 = sshll.u32 %s13269_s8, 8 }
  0x1f   : > { %360 = vst.msk [vmem:[#allocation2 + $0xc0] sm:$0xff] %vm334_vm0, %v13191_v2  ;;  %361 = vst.msk [vmem:[#allocation2 + $0xc8] sm:$0xff] %vm334_vm0, %v13191_v2  ;;  %v559_v9 = vld [vmem:[%s13573_s26 + $0x38] sm:$0xff]  ;;  %v558_v10 = vld [vmem:[%s13573_s26 + $0x30] sm:$0xff]  ;;  %11786 = vmatprep.subr.bf16.mxu0 %v12839_v39  ;;  %11810 = vmatprep.subr.bf16.mxu1 %v12840_v40  ;;  %s10414_s18 = sshll.u32 %s17817_s15, 4  ;;  %s17852_s24 = scalar_lea.hbm %s17911_s9, %s11277_s17  ;;  %s17854_s18 = int_to_ptr.vmem [resolvable:$true] %s10414_s18 }
  0x20   : > { %363 = vst.msk [vmem:[#allocation2 + $0xd8] sm:$0xff] %vm334_vm0, %v13191_v2  ;;  %364 = vst.msk [vmem:[#allocation2 + $0xe0] sm:$0xff] %vm334_vm0, %v13191_v2  ;;  %v561_v11 = vld [vmem:[%s13573_s26 + $0x48] sm:$0xff]  ;;  %v560_v12 = vld [vmem:[%s13573_s26 + $0x40] sm:$0xff]  ;;  %s17862_s8 = scalar_lea.sflag [#allocation8], %s325_s30  ;;  %s13128_s25 = scalar_lea.vmem %s17854_s18, 256 }
  0x21   : > { %366 = vst.msk [vmem:[#allocation2 + $0xf0] sm:$0xff] %vm334_vm0, %v13191_v2  ;;  %367 = vst.msk [vmem:[#allocation2 + $0xf8] sm:$0xff] %vm334_vm0, %v13191_v2  ;;  %601 = vperm.xlu1 %12834, %v555_v5   ;;  %591 = vperm.xlu0 %12833, %v553_v6   ;;  %v563_v13 = vld [vmem:[%s13573_s26 + $0x58] sm:$0xff]  ;;  %v562_v14 = vld [vmem:[%s13573_s26 + $0x50] sm:$0xff]  ;;  %p13129_p11 = scmp.ne.s32.totalorder %s17854_s18, %s13128_s25 }
  0x22   : > { %369 = vst.msk [vmem:[#allocation2 + $0x108] sm:$0xff] %vm334_vm0, %v13191_v2  ;;  %370 = vst.msk [vmem:[#allocation2 + $0x110] sm:$0xff] %vm334_vm0, %v13191_v2  ;;  %v565_v15 = vld [vmem:[%s13573_s26 + $0x68] sm:$0xff]  ;;  %v564_v16 = vld [vmem:[%s13573_s26 + $0x60] sm:$0xff]  ;;  %11787 = vmatpush3.bf16.msra.mxu0 %v12839_v39  ;;  %11811 = vmatpush3.bf16.msra.mxu1 %v12840_v40 }
  0x23   : > { %372 = vst.msk [vmem:[#allocation2 + $0x120] sm:$0xff] %vm334_vm0, %v13191_v2  ;;  %373 = vst.msk [vmem:[#allocation2 + $0x128] sm:$0xff] %vm334_vm0, %v13191_v2  ;;  %v567_v17 = vld [vmem:[%s13573_s26 + $0x78] sm:$0xff]  ;;  %v566_v18 = vld [vmem:[%s13573_s26 + $0x70] sm:$0xff]  ;;  %11788 = vmatprep.subr.bf16.mxu0 %v12841_v41  ;;  %11812 = vmatprep.subr.bf16.mxu1 %v12842_v42  ;;  %p13130_p12 = pnand %p13129_p11, %p13286_p5 }
  0x24   : > { %375 = vst.msk [vmem:[#allocation2 + $0x138] sm:$0xff] %vm334_vm0, %v13191_v2  ;;  %376 = vst.msk [vmem:[#allocation2 + $0x140] sm:$0xff] %vm334_vm0, %v13191_v2  ;;  %v569_v19 = vld [vmem:[%s13573_s26 + $0x88] sm:$0xff]  ;;  %v568_v20 = vld [vmem:[%s13573_s26 + $0x80] sm:$0xff] }
  0x25   : > { %378 = vst.msk [vmem:[#allocation2 + $0x150] sm:$0xff] %vm334_vm0, %v13191_v2  ;;  %379 = vst.msk [vmem:[#allocation2 + $0x158] sm:$0xff] %vm334_vm0, %v13191_v2  ;;  %611 = vperm.xlu1 %12834, %v557_v7   ;;  %606 = vperm.xlu0 %12833, %v556_v8   ;;  %v571_v21 = vld [vmem:[%s13573_s26 + $0x98] sm:$0xff]  ;;  %v570_v22 = vld [vmem:[%s13573_s26 + $0x90] sm:$0xff]  ;;  %p13131_p13 = pneg %p13130_p12 }
  0x26   : > { %381 = vst.msk [vmem:[#allocation2 + $0x168] sm:$0xff] %vm334_vm0, %v13191_v2  ;;  %382 = vst.msk [vmem:[#allocation2 + $0x170] sm:$0xff] %vm334_vm0, %v13191_v2  ;;  %v573_v23 = vld [vmem:[%s13573_s26 + $0xa8] sm:$0xff]  ;;  %v572_v24 = vld [vmem:[%s13573_s26 + $0xa0] sm:$0xff]  ;;  %11789 = vmatpush3.bf16.msra.mxu0 %v12841_v41  ;;  %11813 = vmatpush3.bf16.msra.mxu1 %v12842_v42 }
  0x27   : > { %384 = vst.msk [vmem:[#allocation2 + $0x180] sm:$0xff] %vm334_vm0, %v13191_v2  ;;  %385 = vst.msk [vmem:[#allocation2 + $0x188] sm:$0xff] %vm334_vm0, %v13191_v2  ;;  %v575_v25 = vld [vmem:[%s13573_s26 + $0xb8] sm:$0xff]  ;;  %v574_v26 = vld [vmem:[%s13573_s26 + $0xb0] sm:$0xff]  ;;  %11830 = vmatprep.subr.bf16.mxu0 %v12843_v49  ;;  %11854 = vmatprep.subr.bf16.mxu1 %v12844_v50 }
  0x28   : > { %387 = vst.msk [vmem:[#allocation2 + $0x198] sm:$0xff] %vm334_vm0, %v13191_v2  ;;  %388 = vst.msk [vmem:[#allocation2 + $0x1a0] sm:$0xff] %vm334_vm0, %v13191_v2  ;;  %v577_v27 = vld [vmem:[%s13573_s26 + $0xc8] sm:$0xff]  ;;  %v576_v28 = vld [vmem:[%s13573_s26 + $0xc0] sm:$0xff] }
  0x29   : > { %390 = vst.msk [vmem:[#allocation3] sm:$0xff] %vm334_vm0, %v13191_v2  ;;  %391 = vst.msk [vmem:[#allocation3 + $0x8] sm:$0xff] %vm334_vm0, %v13191_v2  ;;  %621 = vperm.xlu1 %12834, %v559_v9   ;;  %616 = vperm.xlu0 %12833, %v558_v10   ;;  %v579_v29 = vld [vmem:[%s13573_s26 + $0xd8] sm:$0xff]  ;;  %v578_v30 = vld [vmem:[%s13573_s26 + $0xd0] sm:$0xff] }
  0x2a   : > { %393 = vst.msk [vmem:[#allocation3 + $0x18] sm:$0xff] %vm334_vm0, %v13191_v2  ;;  %394 = vst.msk [vmem:[#allocation3 + $0x20] sm:$0xff] %vm334_vm0, %v13191_v2  ;;  %v581_v32 = vld [vmem:[%s13573_s26 + $0xe8] sm:$0xff]  ;;  %v580_v33 = vld [vmem:[%s13573_s26 + $0xe0] sm:$0xff] }
  0x2b   : > { %396 = vst.msk [vmem:[#allocation3 + $0x30] sm:$0xff] %vm334_vm0, %v13191_v2  ;;  %397 = vst.msk [vmem:[#allocation3 + $0x38] sm:$0xff] %vm334_vm0, %v13191_v2  ;;  %v583_v35 = vld [vmem:[%s13573_s26 + $0xf8] sm:$0xff]  ;;  %v582_v36 = vld [vmem:[%s13573_s26 + $0xf0] sm:$0xff]  ;;  %s13192_s26 = smov [#allocation7]  }
  0x2c   : > { %399 = vst.msk [vmem:[#allocation3 + $0x48] sm:$0xff] %vm334_vm0, %v13191_v2  ;;  %400 = vst.msk [vmem:[#allocation3 + $0x50] sm:$0xff] %vm334_vm0, %v13191_v2  ;;  %v13755_v52 = vld [vmem:[%s17903_s1 + $0x1] ss:$0 sm:$0xff]  ;;  %v778_v55 = vld [vmem:[#allocation2 + $0x8] sm:$0xff]  ;;  %s13132_s27 = sshll.u32 %s13192_s26, 4  ;;  %s13133_s27 = int_to_ptr.vmem [resolvable:$false] %s13132_s27 }
  0x2d   : > { %402 = vst.msk [vmem:[#allocation3 + $0x60] sm:$0xff] %vm334_vm0, %v13191_v2  ;;  %403 = vst.msk [vmem:[#allocation3 + $0x68] sm:$0xff] %vm334_vm0, %v13191_v2  ;;  %631 = vperm.xlu1 %12834, %v561_v11   ;;  %626 = vperm.xlu0 %12833, %v560_v12   ;;  %v777_v53 = vld [vmem:[#allocation2] sm:$0xff]  ;;  %v799_v1 = vmul.f32 %v13750_v51, %v778_v55  ;;  %s13134_s28 = scalar_lea.vmem %s13133_s27, 512  ;;  %p13135_p0 = scmp.lt.s32.totalorder %s17854_s18, %s13133_s27 }
  0x2e   : > { %405 = vst.msk [vmem:[#allocation3 + $0x78] sm:$0xff] %vm334_vm0, %v13191_v2  ;;  %406 = vst.msk [vmem:[#allocation3 + $0x80] sm:$0xff] %vm334_vm0, %v13191_v2  ;;  %v830_v54 = vld [vmem:[#allocation2 + $0x1] sm:$0xff]  ;;  %v798_v61 = vmul.f32 %v13750_v51, %v777_v53  ;;  %p13136_p1 = scmp.lt.s32.totalorder %s13134_s28, %s13128_s25 }
  0x2f   : > { %408 = vst.msk [vmem:[#allocation3 + $0x90] sm:$0xff] %vm334_vm0, %v13191_v2  ;;  %409 = vst.msk [vmem:[#allocation3 + $0x98] sm:$0xff] %vm334_vm0, %v13191_v2  ;;  %v883_v57 = vld [vmem:[#allocation2 + $0x2] sm:$0xff]  ;;  %v851_v62 = vmul.f32 %v13755_v52, %v830_v54 }
  0x30   : > { %411 = vst.msk [vmem:[#allocation3 + $0xa8] sm:$0xff] %vm334_vm0, %v13191_v2  ;;  %412 = vst.msk [vmem:[#allocation3 + $0xb0] sm:$0xff] %vm334_vm0, %v13191_v2  ;;  %v1879_v43 = vld [vmem:[#allocation3 + $0x1] sm:$0xff]  ;;  %v13760_v58 = vld [vmem:[%s17903_s1 + $0x2] ss:$0 sm:$0xff]  ;;  %p13137_p2 = por %p13136_p1, %p13135_p0 }
  0x31   : > { %414 = vst.msk [vmem:[#allocation3 + $0xc0] sm:$0xff] %vm334_vm0, %v13191_v2  ;;  %415 = vst.msk [vmem:[#allocation3 + $0xc8] sm:$0xff] %vm334_vm0, %v13191_v2  ;;  %641 = vperm.xlu1 %12834, %v563_v13   ;;  %636 = vperm.xlu0 %12833, %v562_v14   ;;  %v1847_v45 = vld [vmem:[#allocation3] sm:$0xff]  ;;  %v1848_v47 = vld [vmem:[#allocation3 + $0x8] sm:$0xff]  ;;  %v867_v4 = vadd.f32 %v851_v62, %v798_v61  ;;  %v904_v5 = vmul.f32 %v13760_v58, %v883_v57 }
  0x32   : > { %417 = vst.msk [vmem:[#allocation3 + $0xd8] sm:$0xff] %vm334_vm0, %v13191_v2  ;;  %418 = vst.msk [vmem:[#allocation3 + $0xe0] sm:$0xff] %vm334_vm0, %v13191_v2  ;;  %v1863_v48 = vpack.c.bf16 %v1848_v47, %v1847_v45  ;;  %v13774_v6 = vld [vmem:[%s17903_s1 + $0x3] ss:$0 sm:$0xff]  ;;  %v13780_v14 = vld [vmem:[%s17903_s1 + $0x4] ss:$0 sm:$0xff]  ;;  %p13138_p3 = pnand %p13137_p2, %p13131_p13 }
  0x33   : > { %420 = vst.msk [vmem:[#allocation3 + $0xf0] sm:$0xff] %vm334_vm0, %v13191_v2  ;;  %421 = vst.msk [vmem:[#allocation3 + $0xf8] sm:$0xff] %vm334_vm0, %v13191_v2 }
  0x34   : > { %423 = vst.msk [vmem:[#allocation3 + $0x108] sm:$0xff] %vm334_vm0, %v13191_v2  ;;  %424 = vst.msk [vmem:[#allocation3 + $0x110] sm:$0xff] %vm334_vm0, %v13191_v2  ;;  %11814 = vmatprep.mubr.msk.bf16.mxu1 %vm334_vm0, %v1863_v48 }
  0x35   : > { %426 = vst.msk [vmem:[#allocation3 + $0x120] sm:$0xff] %vm334_vm0, %v13191_v2  ;;  %427 = vst.msk [vmem:[#allocation3 + $0x128] sm:$0xff] %vm334_vm0, %v13191_v2  ;;  %651 = vperm.xlu1 %12834, %v565_v15   ;;  %646 = vperm.xlu0 %12833, %v564_v16   ;;  %v13785_v15 = vld [vmem:[%s17903_s1 + $0x6] ss:$0 sm:$0xff]  ;;  %v13790_v16 = vld [vmem:[%s17903_s1 + $0x7] ss:$0 sm:$0xff] }
  0x36   : > { %429 = vst.msk [vmem:[#allocation3 + $0x138] sm:$0xff] %vm334_vm0, %v13191_v2  ;;  %430 = vst.msk [vmem:[#allocation3 + $0x140] sm:$0xff] %vm334_vm0, %v13191_v2 }
  0x37   : > { %432 = vst.msk [vmem:[#allocation3 + $0x150] sm:$0xff] %vm334_vm0, %v13191_v2  ;;  %433 = vst.msk [vmem:[#allocation3 + $0x158] sm:$0xff] %vm334_vm0, %v13191_v2 }
  0x38   : > { %435 = vst.msk [vmem:[#allocation3 + $0x168] sm:$0xff] %vm334_vm0, %v13191_v2  ;;  %436 = vst.msk [vmem:[#allocation3 + $0x170] sm:$0xff] %vm334_vm0, %v13191_v2 }
  0x39   : > { %438 = vst.msk [vmem:[#allocation3 + $0x180] sm:$0xff] %vm334_vm0, %v13191_v2  ;;  %439 = vst.msk [vmem:[#allocation3 + $0x188] sm:$0xff] %vm334_vm0, %v13191_v2  ;;  %661 = vperm.xlu1 %12834, %v567_v17   ;;  %656 = vperm.xlu0 %12833, %v566_v18  }
  0x3a   : > { %441 = vst.msk [vmem:[#allocation3 + $0x198] sm:$0xff] %vm334_vm0, %v13191_v2  ;;  %442 = vst.msk [vmem:[#allocation3 + $0x1a0] sm:$0xff] %vm334_vm0, %v13191_v2 }
  0x3b   : > { %444 = vst [vmem:[#allocation4] sm:$0xff] %v13191_v2  ;;  %445 = vst [vmem:[#allocation4 + $0x8] sm:$0xff] %v13191_v2 }
  0x3c   : > { %446 = vst [vmem:[#allocation4 + $0x10] sm:$0x3] %v13191_v2  ;;  %447 = vst [vmem:[#allocation4 + $0x18] sm:$0xff] %v13191_v2 }
  0x3d   : > { %448 = vst [vmem:[#allocation4 + $0x20] sm:$0xff] %v13191_v2  ;;  %449 = vst [vmem:[#allocation4 + $0x28] sm:$0x3] %v13191_v2  ;;  %671 = vperm.xlu1 %12834, %v569_v19   ;;  %666 = vperm.xlu0 %12833, %v568_v20   ;;  %v920_v19 = vadd.f32 %v904_v5, %v867_v4 }
  0x3e   : > { %450 = vst [vmem:[#allocation4 + $0x30] sm:$0xff] %v13191_v2  ;;  %451 = vst [vmem:[#allocation4 + $0x38] sm:$0xff] %v13191_v2 }
  0x3f   : > { %452 = vst [vmem:[#allocation4 + $0x40] sm:$0x3] %v13191_v2  ;;  %453 = vst [vmem:[#allocation4 + $0x48] sm:$0xff] %v13191_v2 }
  0x40   : > { %454 = vst [vmem:[#allocation4 + $0x50] sm:$0xff] %v13191_v2  ;;  %455 = vst [vmem:[#allocation4 + $0x58] sm:$0x3] %v13191_v2 }
  0x41   : > { %456 = vst [vmem:[#allocation4 + $0x60] sm:$0xff] %v13191_v2  ;;  %457 = vst [vmem:[#allocation4 + $0x68] sm:$0xff] %v13191_v2  ;;  %681 = vperm.xlu1 %12834, %v571_v21   ;;  %676 = vperm.xlu0 %12833, %v570_v22  }
  0x42   : > { %458 = vst [vmem:[#allocation4 + $0x70] sm:$0x3] %v13191_v2  ;;  %459 = vst [vmem:[#allocation4 + $0x78] sm:$0xff] %v13191_v2 }
  0x43   : > { %460 = vst [vmem:[#allocation4 + $0x80] sm:$0xff] %v13191_v2  ;;  %461 = vst [vmem:[#allocation4 + $0x88] sm:$0x3] %v13191_v2 }
  0x44   : > { %462 = vst [vmem:[#allocation4 + $0x90] sm:$0xff] %v13191_v2  ;;  %463 = vst [vmem:[#allocation4 + $0x98] sm:$0xff] %v13191_v2 }
  0x45   : > { %464 = vst [vmem:[#allocation4 + $0xa0] sm:$0x3] %v13191_v2  ;;  %465 = vst [vmem:[#allocation4 + $0xa8] sm:$0xff] %v13191_v2  ;;  %691 = vperm.xlu1 %12834, %v573_v23   ;;  %686 = vperm.xlu0 %12833, %v572_v24   ;;  %v13801_v23 = vld [vmem:[%s17903_s1 + $0x5] ss:$0 sm:$0xff] }
  0x46   : > { %466 = vst [vmem:[#allocation4 + $0xb0] sm:$0xff] %v13191_v2  ;;  %467 = vst [vmem:[#allocation4 + $0xb8] sm:$0x3] %v13191_v2 }
  0x47   : > { %468 = vst [vmem:[#allocation4 + $0xc0] sm:$0xff] %v13191_v2  ;;  %469 = vst [vmem:[#allocation4 + $0xc8] sm:$0xff] %v13191_v2 }
  0x48   : > { %470 = vst [vmem:[#allocation4 + $0xd0] sm:$0x3] %v13191_v2  ;;  %471 = vst [vmem:[#allocation4 + $0xd8] sm:$0xff] %v13191_v2 }
  0x49   : > { %472 = vst [vmem:[#allocation4 + $0xe0] sm:$0xff] %v13191_v2  ;;  %473 = vst [vmem:[#allocation4 + $0xe8] sm:$0x3] %v13191_v2  ;;  %701 = vperm.xlu1 %12834, %v575_v25   ;;  %696 = vperm.xlu0 %12833, %v574_v26  }
  0x4a   : > { %474 = vst [vmem:[#allocation4 + $0xf0] sm:$0xff] %v13191_v2  ;;  %475 = vst [vmem:[#allocation4 + $0xf8] sm:$0xff] %v13191_v2 }
  0x4b   : > { %476 = vst [vmem:[#allocation4 + $0x100] sm:$0x3] %v13191_v2  ;;  %477 = vst [vmem:[#allocation4 + $0x108] sm:$0xff] %v13191_v2 }
  0x4c   : > { %478 = vst [vmem:[#allocation4 + $0x110] sm:$0xff] %v13191_v2  ;;  %479 = vst [vmem:[#allocation4 + $0x118] sm:$0x3] %v13191_v2 }
  0x4d   : > { %480 = vst [vmem:[#allocation4 + $0x120] sm:$0xff] %v13191_v2  ;;  %481 = vst [vmem:[#allocation4 + $0x128] sm:$0xff] %v13191_v2  ;;  %711 = vperm.xlu1 %12834, %v577_v27   ;;  %706 = vperm.xlu0 %12833, %v576_v28  }
  0x4e   : > { %482 = vst [vmem:[#allocation4 + $0x130] sm:$0x3] %v13191_v2  ;;  %483 = vst [vmem:[#allocation4 + $0x138] sm:$0xff] %v13191_v2 }
  0x4f   : > { %484 = vst [vmem:[#allocation4 + $0x140] sm:$0xff] %v13191_v2  ;;  %485 = vst [vmem:[#allocation4 + $0x148] sm:$0x3] %v13191_v2 }
  0x50   : > { %486 = vst [vmem:[#allocation4 + $0x150] sm:$0xff] %v13191_v2  ;;  %487 = vst [vmem:[#allocation4 + $0x158] sm:$0xff] %v13191_v2 }
  0x51   : > { %488 = vst [vmem:[#allocation4 + $0x160] sm:$0x3] %v13191_v2  ;;  %489 = vst [vmem:[#allocation4 + $0x168] sm:$0xff] %v13191_v2  ;;  %721 = vperm.xlu1 %12834, %v579_v29   ;;  %716 = vperm.xlu0 %12833, %v578_v30  }
  0x52   : > { %490 = vst [vmem:[#allocation4 + $0x170] sm:$0xff] %v13191_v2  ;;  %491 = vst [vmem:[#allocation4 + $0x178] sm:$0x3] %v13191_v2 }
  0x53   : > { %492 = vst [vmem:[#allocation4 + $0x180] sm:$0xff] %v13191_v2  ;;  %493 = vst [vmem:[#allocation4 + $0x188] sm:$0xff] %v13191_v2 }
  0x54   : > { %494 = vst [vmem:[#allocation4 + $0x190] sm:$0x3] %v13191_v2  ;;  %495 = vst [vmem:[#allocation4 + $0x198] sm:$0xff] %v13191_v2 }
  0x55   : > { %496 = vst [vmem:[#allocation4 + $0x1a0] sm:$0xff] %v13191_v2  ;;  %497 = vst [vmem:[#allocation4 + $0x1a8] sm:$0x3] %v13191_v2  ;;  %731 = vperm.xlu1 %12834, %v581_v32   ;;  %726 = vperm.xlu0 %12833, %v580_v33  }
  0x56   : > { %498 = vst.msk [vmem:[#allocation5] sm:$0xff] %vm334_vm0, %v13191_v2  ;;  %499 = vst.msk [vmem:[#allocation5 + $0x8] sm:$0xff] %vm334_vm0, %v13191_v2 }
  0x57   : > { %501 = vst.msk [vmem:[#allocation5 + $0x18] sm:$0xff] %vm334_vm0, %v13191_v2  ;;  %502 = vst.msk [vmem:[#allocation5 + $0x20] sm:$0xff] %vm334_vm0, %v13191_v2 }
  0x58   : > { %504 = vst.msk [vmem:[#allocation5 + $0x30] sm:$0xff] %vm334_vm0, %v13191_v2  ;;  %505 = vst.msk [vmem:[#allocation5 + $0x38] sm:$0xff] %vm334_vm0, %v13191_v2 }
  0x59   : > { %507 = vst.msk [vmem:[#allocation5 + $0x48] sm:$0xff] %vm334_vm0, %v13191_v2  ;;  %508 = vst.msk [vmem:[#allocation5 + $0x50] sm:$0xff] %vm334_vm0, %v13191_v2  ;;  %741 = vperm.xlu1 %12834, %v583_v35   ;;  %736 = vperm.xlu0 %12833, %v582_v36   ;;  %v13811_v35 = vld [vmem:[%s17903_s1 + $0x8] ss:$0 sm:$0xff] }
  0x5a   : > { %510 = vst.msk [vmem:[#allocation5 + $0x60] sm:$0xff] %vm334_vm0, %v13191_v2  ;;  %511 = vst.msk [vmem:[#allocation5 + $0x68] sm:$0xff] %vm334_vm0, %v13191_v2 }
  0x5b   : > { %513 = vst.msk [vmem:[#allocation5 + $0x78] sm:$0xff] %vm334_vm0, %v13191_v2  ;;  %514 = vst.msk [vmem:[#allocation5 + $0x80] sm:$0xff] %vm334_vm0, %v13191_v2 }
  0x5c   : > { %516 = vst.msk [vmem:[#allocation5 + $0x90] sm:$0xff] %vm334_vm0, %v13191_v2  ;;  %517 = vst.msk [vmem:[#allocation5 + $0x98] sm:$0xff] %vm334_vm0, %v13191_v2 }
  0x5d   : > { %519 = vst.msk [vmem:[#allocation5 + $0xa8] sm:$0xff] %vm334_vm0, %v13191_v2  ;;  %520 = vst.msk [vmem:[#allocation5 + $0xb0] sm:$0xff] %vm334_vm0, %v13191_v2 }
  0x5e   : > { %522 = vst.msk [vmem:[#allocation5 + $0xc0] sm:$0xff] %vm334_vm0, %v13191_v2  ;;  %523 = vst.msk [vmem:[#allocation5 + $0xc8] sm:$0xff] %vm334_vm0, %v13191_v2 }
  0x5f   : > { %525 = vst.msk [vmem:[#allocation5 + $0xd8] sm:$0xff] %vm334_vm0, %v13191_v2  ;;  %526 = vst.msk [vmem:[#allocation5 + $0xe0] sm:$0xff] %vm334_vm0, %v13191_v2 }
  0x60   : > { %528 = vst.msk [vmem:[#allocation5 + $0xf0] sm:$0xff] %vm334_vm0, %v13191_v2  ;;  %529 = vst.msk [vmem:[#allocation5 + $0xf8] sm:$0xff] %vm334_vm0, %v13191_v2 }
  0x61   : > { %531 = vst.msk [vmem:[#allocation5 + $0x108] sm:$0xff] %vm334_vm0, %v13191_v2  ;;  %532 = vst.msk [vmem:[#allocation5 + $0x110] sm:$0xff] %vm334_vm0, %v13191_v2 }
  0x62   : > { %534 = vst.msk [vmem:[#allocation5 + $0x120] sm:$0xff] %vm334_vm0, %v13191_v2  ;;  %535 = vst.msk [vmem:[#allocation5 + $0x128] sm:$0xff] %vm334_vm0, %v13191_v2 }
  0x63   : > { %537 = vst.msk [vmem:[#allocation5 + $0x138] sm:$0xff] %vm334_vm0, %v13191_v2  ;;  %538 = vst.msk [vmem:[#allocation5 + $0x140] sm:$0xff] %vm334_vm0, %v13191_v2 }
  0x64   : > { %540 = vst.msk [vmem:[#allocation5 + $0x150] sm:$0xff] %vm334_vm0, %v13191_v2  ;;  %541 = vst.msk [vmem:[#allocation5 + $0x158] sm:$0xff] %vm334_vm0, %v13191_v2 }
  0x65   : > { %543 = vst.msk [vmem:[#allocation5 + $0x168] sm:$0xff] %vm334_vm0, %v13191_v2  ;;  %544 = vst.msk [vmem:[#allocation5 + $0x170] sm:$0xff] %vm334_vm0, %v13191_v2 }
  0x66   : > { %546 = vst.msk [vmem:[#allocation5 + $0x180] sm:$0xff] %vm334_vm0, %v13191_v2  ;;  %547 = vst.msk [vmem:[#allocation5 + $0x188] sm:$0xff] %vm334_vm0, %v13191_v2 }
  0x67   : > { %549 = vst.msk [vmem:[#allocation5 + $0x198] sm:$0xff] %vm334_vm0, %v13191_v2  ;;  %550 = vst.msk [vmem:[#allocation5 + $0x1a0] sm:$0xff] %vm334_vm0, %v13191_v2 }
  0x68   : > { %344 = vst.msk [vmem:[#allocation2 + $0x40] sm:$0x3] %vm337_vm1, %v13191_v2  ;;  %338 = vst.msk [vmem:[#allocation2 + $0x10] sm:$0x3] %vm337_vm1, %v13191_v2 }
  0x69   : > { %341 = vst.msk [vmem:[#allocation2 + $0x28] sm:$0x3] %vm337_vm1, %v13191_v2  ;;  %347 = vst.msk [vmem:[#allocation2 + $0x58] sm:$0x3] %vm337_vm1, %v13191_v2 }
  0x6a   : > { %350 = vst.msk [vmem:[#allocation2 + $0x70] sm:$0x3] %vm337_vm1, %v13191_v2  ;;  %353 = vst.msk [vmem:[#allocation2 + $0x88] sm:$0x3] %vm337_vm1, %v13191_v2 }
  0x6b   : > { %356 = vst.msk [vmem:[#allocation2 + $0xa0] sm:$0x3] %vm337_vm1, %v13191_v2  ;;  %359 = vst.msk [vmem:[#allocation2 + $0xb8] sm:$0x3] %vm337_vm1, %v13191_v2 }
  0x6c   : > { %362 = vst.msk [vmem:[#allocation2 + $0xd0] sm:$0x3] %vm337_vm1, %v13191_v2  ;;  %365 = vst.msk [vmem:[#allocation2 + $0xe8] sm:$0x3] %vm337_vm1, %v13191_v2 }
  0x6d   : > { %368 = vst.msk [vmem:[#allocation2 + $0x100] sm:$0x3] %vm337_vm1, %v13191_v2  ;;  %371 = vst.msk [vmem:[#allocation2 + $0x118] sm:$0x3] %vm337_vm1, %v13191_v2 }
  0x6e   : > { %374 = vst.msk [vmem:[#allocation2 + $0x130] sm:$0x3] %vm337_vm1, %v13191_v2  ;;  %377 = vst.msk [vmem:[#allocation2 + $0x148] sm:$0x3] %vm337_vm1, %v13191_v2 }
  0x6f   : > { %380 = vst.msk [vmem:[#allocation2 + $0x160] sm:$0x3] %vm337_vm1, %v13191_v2  ;;  %383 = vst.msk [vmem:[#allocation2 + $0x178] sm:$0x3] %vm337_vm1, %v13191_v2  ;;  %v831_v60 = vld [vmem:[#allocation2 + $0x9] sm:$0xff] }
  0x70   : > { %386 = vst.msk [vmem:[#allocation2 + $0x190] sm:$0x3] %vm337_vm1, %v13191_v2  ;;  %389 = vst.msk [vmem:[#allocation2 + $0x1a8] sm:$0x3] %vm337_vm1, %v13191_v2  ;;  %v884_v63 = vld [vmem:[#allocation2 + $0xa] sm:$0xff] }
  0x71   : > { %392 = vst.msk [vmem:[#allocation3 + $0x10] sm:$0x3] %vm337_vm1, %v13191_v2  ;;  %395 = vst.msk [vmem:[#allocation3 + $0x28] sm:$0x3] %vm337_vm1, %v13191_v2  ;;  %v905_v11 = vmul.f32 %v13760_v58, %v884_v63 }
  0x72   : > { %398 = vst.msk [vmem:[#allocation3 + $0x40] sm:$0x3] %vm337_vm1, %v13191_v2  ;;  %401 = vst.msk [vmem:[#allocation3 + $0x58] sm:$0x3] %vm337_vm1, %v13191_v2 }
  0x73   : > { %404 = vst.msk [vmem:[#allocation3 + $0x70] sm:$0x3] %vm337_vm1, %v13191_v2  ;;  %407 = vst.msk [vmem:[#allocation3 + $0x88] sm:$0x3] %vm337_vm1, %v13191_v2 }
  0x74   : > { %410 = vst.msk [vmem:[#allocation3 + $0xa0] sm:$0x3] %vm337_vm1, %v13191_v2  ;;  %413 = vst.msk [vmem:[#allocation3 + $0xb8] sm:$0x3] %vm337_vm1, %v13191_v2 }
  0x75   : > { %416 = vst.msk [vmem:[#allocation3 + $0xd0] sm:$0x3] %vm337_vm1, %v13191_v2  ;;  %419 = vst.msk [vmem:[#allocation3 + $0xe8] sm:$0x3] %vm337_vm1, %v13191_v2 }
  0x76   : > { %422 = vst.msk [vmem:[#allocation3 + $0x100] sm:$0x3] %vm337_vm1, %v13191_v2  ;;  %425 = vst.msk [vmem:[#allocation3 + $0x118] sm:$0x3] %vm337_vm1, %v13191_v2 }
  0x77   : > { %428 = vst.msk [vmem:[#allocation3 + $0x130] sm:$0x3] %vm337_vm1, %v13191_v2  ;;  %431 = vst.msk [vmem:[#allocation3 + $0x148] sm:$0x3] %vm337_vm1, %v13191_v2 }
  0x78   : > { %434 = vst.msk [vmem:[#allocation3 + $0x160] sm:$0x3] %vm337_vm1, %v13191_v2  ;;  %437 = vst.msk [vmem:[#allocation3 + $0x178] sm:$0x3] %vm337_vm1, %v13191_v2  ;;  %v1880_v44 = vld [vmem:[#allocation3 + $0x9] sm:$0xff] }
  0x79   : > { %440 = vst.msk [vmem:[#allocation3 + $0x190] sm:$0x3] %vm337_vm1, %v13191_v2  ;;  %443 = vst.msk [vmem:[#allocation3 + $0x1a8] sm:$0x3] %vm337_vm1, %v13191_v2  ;;  %v1895_v46 = vpack.c.bf16 %v1880_v44, %v1879_v43 }
  0x7a   : > { %500 = vst.msk [vmem:[#allocation5 + $0x10] sm:$0x3] %vm337_vm1, %v13191_v2  ;;  %503 = vst.msk [vmem:[#allocation5 + $0x28] sm:$0x3] %vm337_vm1, %v13191_v2 }
  0x7b   : > { %506 = vst.msk [vmem:[#allocation5 + $0x40] sm:$0x3] %vm337_vm1, %v13191_v2  ;;  %509 = vst.msk [vmem:[#allocation5 + $0x58] sm:$0x3] %vm337_vm1, %v13191_v2  ;;  %11790 = vmatprep.mubr.msk.bf16.mxu0 %vm334_vm0, %v1895_v46 }
  0x7c   : > { %512 = vst.msk [vmem:[#allocation5 + $0x70] sm:$0x3] %vm337_vm1, %v13191_v2  ;;  %515 = vst.msk [vmem:[#allocation5 + $0x88] sm:$0x3] %vm337_vm1, %v13191_v2 }
  0x7d   : > { %518 = vst.msk [vmem:[#allocation5 + $0xa0] sm:$0x3] %vm337_vm1, %v13191_v2  ;;  %521 = vst.msk [vmem:[#allocation5 + $0xb8] sm:$0x3] %vm337_vm1, %v13191_v2 }
  0x7e   : > { %524 = vst.msk [vmem:[#allocation5 + $0xd0] sm:$0x3] %vm337_vm1, %v13191_v2  ;;  %527 = vst.msk [vmem:[#allocation5 + $0xe8] sm:$0x3] %vm337_vm1, %v13191_v2 }
  0x7f   : > { %530 = vst.msk [vmem:[#allocation5 + $0x100] sm:$0x3] %vm337_vm1, %v13191_v2  ;;  %533 = vst.msk [vmem:[#allocation5 + $0x118] sm:$0x3] %vm337_vm1, %v13191_v2 }
  0x80   : > { %536 = vst.msk [vmem:[#allocation5 + $0x130] sm:$0x3] %vm337_vm1, %v13191_v2  ;;  %539 = vst.msk [vmem:[#allocation5 + $0x148] sm:$0x3] %vm337_vm1, %v13191_v2 }
  0x81   : > { %542 = vst.msk [vmem:[#allocation5 + $0x160] sm:$0x3] %vm337_vm1, %v13191_v2  ;;  %545 = vst.msk [vmem:[#allocation5 + $0x178] sm:$0x3] %vm337_vm1, %v13191_v2 }
  0x82   : > { %548 = vst.msk [vmem:[#allocation5 + $0x190] sm:$0x3] %vm337_vm1, %v13191_v2  ;;  %551 = vst.msk [vmem:[#allocation5 + $0x1a8] sm:$0x3] %vm337_vm1, %v13191_v2  ;;  %v852_v2 = vmul.f32 %v13755_v52, %v831_v60 }
  0x84   : > { %v868_v10 = vadd.f32 %v852_v2, %v799_v1 }
  0x86   : > { %v921_v31 = vadd.f32 %v905_v11, %v868_v10 }
  0x98   : > { %v597_v56 = vpop.permute.xlu1 %596  ;;  %v587_v59 = vpop.permute.xlu0 %586 }
  0x99   : > { %747 = vst.msk [vmem:[#allocation2 + $0x31] sm:$0xff] %vm334_vm0, %v597_v56  ;;  %745 = vst.msk [vmem:[#allocation2 + $0x19] sm:$0xff] %vm334_vm0, %v587_v59 }
  0x9c   : > { %v602_v0 = vpop.permute.xlu1 %601  ;;  %v592_v3 = vpop.permute.xlu0 %591 }
  0x9d   : > { %748 = vst.msk [vmem:[#allocation2 + $0x39] sm:$0xff] %vm334_vm0, %v602_v0  ;;  %746 = vst.msk [vmem:[#allocation2 + $0x21] sm:$0xff] %vm334_vm0, %v592_v3 }
  0xa0   : > { %v781_v7 = vld [vmem:[#allocation2 + $0x30] sm:$0xff]  ;;  %v779_v9 = vld [vmem:[#allocation2 + $0x18] sm:$0xff]  ;;  %v612_v12 = vpop.permute.xlu1 %611  ;;  %v607_v13 = vpop.permute.xlu0 %606 }
  0xa1   : > { %v834_v8 = vld [vmem:[#allocation2 + $0x31] sm:$0xff]  ;;  %v802_v17 = vmul.f32 %v13750_v51, %v781_v7  ;;  %v832_v20 = vld [vmem:[#allocation2 + $0x19] sm:$0xff]  ;;  %750 = vst.msk [vmem:[#allocation2 + $0x51] sm:$0xff] %vm334_vm0, %v612_v12  ;;  %749 = vst.msk [vmem:[#allocation2 + $0x49] sm:$0xff] %vm334_vm0, %v607_v13  ;;  %v800_v21 = vmul.f32 %v13750_v51, %v779_v9  ;;  %v957_v24 = vmul.f32 %v13774_v6, %v779_v9 }
  0xa2   : > { %v855_v18 = vmul.f32 %v13755_v52, %v834_v8  ;;  %v853_v22 = vmul.f32 %v13755_v52, %v832_v20  ;;  %v959_v26 = vmul.f32 %v13774_v6, %v781_v7  ;;  %v13806_v27 = vmul.f32 %v13780_v14, %v834_v8 }
  0xa3   : > { %v973_v34 = vadd.f32 %v957_v24, %v920_v19  ;;  %v1117_v41 = vmul.f32 %v13785_v15, %v781_v7  ;;  %v1170_v42 = vmul.f32 %v13790_v16, %v834_v8  ;;  %v1010_v44 = vmul.f32 %v13780_v14, %v832_v20 }
  0xa4   : > { %v871_v25 = vadd.f32 %v855_v18, %v802_v17  ;;  %v782_v28 = vld [vmem:[#allocation2 + $0x38] sm:$0xff]  ;;  %v622_v32 = vpop.permute.xlu1 %621  ;;  %v617_v33 = vpop.permute.xlu0 %616  ;;  %v780_v40 = vld [vmem:[#allocation2 + $0x20] sm:$0xff]  ;;  %v869_v43 = vadd.f32 %v853_v22, %v800_v21 }
  0xa5   : > { %v835_v29 = vld [vmem:[#allocation2 + $0x39] sm:$0xff]  ;;  %v803_v36 = vmul.f32 %v13750_v51, %v782_v28  ;;  %752 = vst.msk [vmem:[#allocation2 + $0x69] sm:$0xff] %vm334_vm0, %v622_v32  ;;  %751 = vst.msk [vmem:[#allocation2 + $0x61] sm:$0xff] %vm334_vm0, %v617_v33  ;;  %v833_v45 = vld [vmem:[#allocation2 + $0x21] sm:$0xff]  ;;  %v960_v48 = vmul.f32 %v13774_v6, %v782_v28  ;;  %v1026_v53 = vadd.f32 %v1010_v44, %v973_v34 }
  0xa6   : > { %v887_v30 = vld [vmem:[#allocation2 + $0x32] sm:$0xff]  ;;  %v856_v37 = vmul.f32 %v13755_v52, %v835_v29  ;;  %v888_v38 = vld [vmem:[#allocation2 + $0x3a] sm:$0xff]  ;;  %v1013_v49 = vmul.f32 %v13780_v14, %v835_v29  ;;  %v886_v57 = vld [vmem:[#allocation2 + $0x22] sm:$0xff]  ;;  %v1118_v61 = vmul.f32 %v13785_v15, %v782_v28  ;;  %v801_v62 = vmul.f32 %v13750_v51, %v780_v40 }
  0xa7   : > { %v908_v39 = vmul.f32 %v13760_v58, %v887_v30  ;;  %v885_v46 = vld [vmem:[#allocation2 + $0x1a] sm:$0xff]  ;;  %v909_v47 = vmul.f32 %v13760_v58, %v888_v38  ;;  %v1065_v50 = vmul.f32 %v13801_v23, %v887_v30  ;;  %v1066_v56 = vmul.f32 %v13801_v23, %v888_v38 }
  0xa8   : > { %v872_v54 = vadd.f32 %v856_v37, %v803_v36  ;;  %v632_v59 = vpop.permute.xlu1 %631  ;;  %v627_v60 = vpop.permute.xlu0 %626  ;;  %v854_v63 = vmul.f32 %v13755_v52, %v833_v45  ;;  %v906_v0 = vmul.f32 %v13760_v58, %v885_v46  ;;  %v837_v1 = vld [vmem:[#allocation2 + $0x51] sm:$0xff]  ;;  %v1171_v3 = vmul.f32 %v13790_v16, %v835_v29  ;;  %v783_v19 = vld [vmem:[#allocation2 + $0x48] sm:$0xff] }
  0xa9   : > { %v924_v55 = vadd.f32 %v908_v39, %v871_v25  ;;  %v13830_v2 = vld [vmem:[#allocation2 + $0x52] sm:$0xff]  ;;  %754 = vst.msk [vmem:[#allocation2 + $0x81] sm:$0xff] %vm334_vm0, %v632_v59  ;;  %753 = vst.msk [vmem:[#allocation2 + $0x79] sm:$0xff] %vm334_vm0, %v627_v60  ;;  %v1223_v4 = vmul.f32 %v13811_v35, %v887_v30  ;;  %v958_v5 = vmul.f32 %v13774_v6, %v780_v40  ;;  %v836_v20 = vld [vmem:[#allocation2 + $0x49] sm:$0xff] }
  0xaa   : > { %v1063_v7 = vmul.f32 %v13801_v23, %v885_v46  ;;  %v1224_v8 = vmul.f32 %v13811_v35, %v888_v38  ;;  %v870_v9 = vadd.f32 %v854_v63, %v801_v62  ;;  %v907_v10 = vmul.f32 %v13760_v58, %v886_v57  ;;  %v784_v34 = vld [vmem:[#allocation2 + $0x50] sm:$0xff] }
  0xab   : > { %v922_v11 = vadd.f32 %v906_v0, %v869_v43  ;;  %v925_v12 = vadd.f32 %v909_v47, %v872_v54  ;;  %v974_v13 = vadd.f32 %v958_v5, %v921_v31  ;;  %v1011_v17 = vmul.f32 %v13780_v14, %v833_v45  ;;  %v13861_v47 = vld [vmem:[%s17904_s2] ss:$0 sm:$0xff] }
  0xac   : > { %v1079_v18 = vadd.f32 %v1063_v7, %v1026_v53  ;;  %v642_v21 = vpop.permute.xlu1 %641  ;;  %v637_v22 = vpop.permute.xlu0 %636  ;;  %v923_v24 = vadd.f32 %v907_v10, %v870_v9  ;;  %v1064_v28 = vmul.f32 %v13801_v23, %v886_v57  ;;  %v858_v29 = vmul.f32 %v13755_v52, %v837_v1 }
  0xad   : > { %v975_v25 = vadd.f32 %v959_v26, %v922_v11  ;;  %756 = vst.msk [vmem:[#allocation2 + $0x99] sm:$0xff] %vm334_vm0, %v642_v21  ;;  %755 = vst.msk [vmem:[#allocation2 + $0x91] sm:$0xff] %vm334_vm0, %v637_v22  ;;  %v1027_v30 = vadd.f32 %v1011_v17, %v974_v13  ;;  %v13847_v31 = vmul.f32 %v13760_v58, %v13830_v2 }
  0xae   : > { %v1133_v32 = vadd.f32 %v1117_v41, %v1079_v18  ;;  %v1015_v33 = vmul.f32 %v13780_v14, %v837_v1  ;;  %v976_v36 = vadd.f32 %v960_v48, %v923_v24  ;;  %v804_v37 = vmul.f32 %v13750_v51, %v783_v19  ;;  %v889_v41 = vld [vmem:[#allocation2 + $0x4a] sm:$0xff] }
  0xaf   : > { %v1028_v26 = vadd.f32 %v13806_v27, %v975_v25  ;;  %v857_v38 = vmul.f32 %v13755_v52, %v836_v20  ;;  %v1080_v39 = vadd.f32 %v1064_v28, %v1027_v30  ;;  %v13855_v43 = vmul.f32 %v13801_v23, %v13830_v2  ;;  %v892_v18 = vld [vmem:[#allocation2 + $0x6a] sm:$0xff]  ;;  %v785_v25 = vld [vmem:[#allocation2 + $0x60] sm:$0xff] }
  0xb0   : > { %v1186_v40 = vadd.f32 %v1170_v42, %v1133_v32  ;;  %v961_v44 = vmul.f32 %v13774_v6, %v783_v19  ;;  %v652_v45 = vpop.permute.xlu1 %651  ;;  %v647_v46 = vpop.permute.xlu0 %646  ;;  %v1173_v27 = vmul.f32 %v13790_v16, %v837_v1  ;;  %v1029_v48 = vadd.f32 %v1013_v49, %v976_v36  ;;  %v786_v32 = vld [vmem:[#allocation2 + $0x68] sm:$0xff] }
  0xb1   : > { %v1081_v53 = vadd.f32 %v1065_v50, %v1028_v26  ;;  %v805_v42 = vmul.f32 %v13750_v51, %v784_v34  ;;  %758 = vst.msk [vmem:[#allocation2 + $0xb1] sm:$0xff] %vm334_vm0, %v652_v45  ;;  %757 = vst.msk [vmem:[#allocation2 + $0xa9] sm:$0xff] %vm334_vm0, %v647_v46  ;;  %v1134_v54 = vadd.f32 %v1118_v61, %v1080_v39 }
  0xb2   : > { %v1239_v57 = vadd.f32 %v1223_v4, %v1186_v40  ;;  %v962_v59 = vmul.f32 %v13774_v6, %v784_v34  ;;  %v977_v60 = vadd.f32 %v961_v44, %v924_v55  ;;  %v1082_v62 = vadd.f32 %v1066_v56, %v1029_v48 }
  0xb3   : > { %v873_v63 = vadd.f32 %v857_v38, %v804_v37  ;;  %v910_v0 = vmul.f32 %v13760_v58, %v889_v41  ;;  %v1014_v5 = vmul.f32 %v13780_v14, %v836_v20  ;;  %v1187_v1 = vadd.f32 %v1171_v3, %v1134_v54 }
  0xb4   : > { %v1262_v49 = vadd.f32 %v13861_v47, %v1239_v57  ;;  %v978_v50 = vadd.f32 %v962_v59, %v925_v12  ;;  %v1119_v7 = vmul.f32 %v13785_v15, %v783_v19  ;;  %v662_v9 = vpop.permute.xlu1 %661  ;;  %v657_v10 = vpop.permute.xlu0 %656  ;;  %v874_v11 = vadd.f32 %v858_v29, %v805_v42  ;;  %v839_v12 = vld [vmem:[#allocation2 + $0x69] sm:$0xff] }
  0xb5   : > { %v1030_v61 = vadd.f32 %v1014_v5, %v977_v60  ;;  %v1067_v4 = vmul.f32 %v13801_v23, %v889_v41  ;;  %v1120_v55 = vmul.f32 %v13785_v15, %v784_v34  ;;  %760 = vst.msk [vmem:[#allocation2 + $0xc9] sm:$0xff] %vm334_vm0, %v662_v9  ;;  %759 = vst.msk [vmem:[#allocation2 + $0xc1] sm:$0xff] %vm334_vm0, %v657_v10  ;;  %v838_v34 = vld [vmem:[#allocation2 + $0x61] sm:$0xff] }
  0xb6   : > { %v1240_v56 = vadd.f32 %v1224_v8, %v1187_v1  ;;  %v1278_v13 = vmax.f32 %v1262_v49, 0.0  ;;  %v1135_v3 = vadd.f32 %v1119_v7, %v1081_v53  ;;  %v1172_v17 = vmul.f32 %v13790_v16, %v836_v20  ;;  %v891_v42 = vld [vmem:[#allocation2 + $0x62] sm:$0xff] }
  0xb7   : > { %v1226_v19 = vmul.f32 %v13811_v35, %v13830_v2  ;;  %v926_v21 = vadd.f32 %v910_v0, %v873_v63  ;;  %v1136_v22 = vadd.f32 %v1120_v55, %v1082_v62  ;;  %v1225_v24 = vmul.f32 %v13811_v35, %v889_v41 }
  0xb8   : > { %v1263_v28 = vadd.f32 %v13861_v47, %v1240_v56  ;;  %1295 = vst.msk [vmem:[#allocation3 + $0x19] sm:$0xff] %vm334_vm0, %v1278_v13  ;;  %v1031_v29 = vadd.f32 %v1015_v33, %v978_v50  ;;  %v1083_v8 = vadd.f32 %v1067_v4, %v1030_v61  ;;  %v1188_v30 = vadd.f32 %v1172_v17, %v1135_v3  ;;  %v672_v20 = vpop.permute.xlu1 %671  ;;  %v667_v36 = vpop.permute.xlu0 %666  ;;  %v841_v61 = vld [vmem:[#allocation2 + $0x81] sm:$0xff] }
  0xb9   : > { %v1189_v26 = vadd.f32 %v1173_v27, %v1136_v22  ;;  %v860_v37 = vmul.f32 %v13755_v52, %v839_v12  ;;  %v913_v2 = vmul.f32 %v13760_v58, %v892_v18  ;;  %v1017_v38 = vmul.f32 %v13780_v14, %v839_v12  ;;  %762 = vst.msk [vmem:[#allocation2 + $0xe1] sm:$0xff] %vm334_vm0, %v672_v20 }
  0xba   : > { %761 = vst.msk [vmem:[#allocation2 + $0xd9] sm:$0xff] %vm334_vm0, %v667_v36  ;;  %v1279_v39 = vmax.f32 %v1263_v28, 0.0  ;;  %v1241_v40 = vadd.f32 %v1225_v24, %v1188_v30  ;;  %v927_v33 = vadd.f32 %v13847_v31, %v874_v11  ;;  %v806_v41 = vmul.f32 %v13750_v51, %v785_v25  ;;  %v787_v24 = vld [vmem:[#allocation2 + $0x78] sm:$0xff]  ;;  %v788_v30 = vld [vmem:[#allocation2 + $0x80] sm:$0xff] }
  0xbb   : > { %v1242_v44 = vadd.f32 %v1226_v19, %v1189_v26  ;;  %v13890_v45 = vmul.f32 %v13801_v23, %v892_v18  ;;  %v807_v46 = vmul.f32 %v13750_v51, %v786_v32  ;;  %v859_v27 = vmul.f32 %v13755_v52, %v838_v34 }
  0xbc   : > { %1296 = vst.msk [vmem:[#allocation3 + $0x21] sm:$0xff] %vm334_vm0, %v1279_v39  ;;  %v1264_v48 = vadd.f32 %v13861_v47, %v1241_v40  ;;  %v1175_v53 = vmul.f32 %v13790_v16, %v839_v12  ;;  %v963_v54 = vmul.f32 %v13774_v6, %v785_v25  ;;  %v964_v31 = vmul.f32 %v13774_v6, %v786_v32  ;;  %v682_v57 = vpop.permute.xlu1 %681  ;;  %v677_v59 = vpop.permute.xlu0 %676 }
  0xbd   : > { %v1265_v60 = vadd.f32 %v13861_v47, %v1242_v44  ;;  %v1084_v62 = vadd.f32 %v13855_v43, %v1031_v29  ;;  %v875_v63 = vadd.f32 %v859_v27, %v806_v41  ;;  %v1016_v0 = vmul.f32 %v13780_v14, %v838_v34  ;;  %764 = vst.msk [vmem:[#allocation2 + $0xf9] sm:$0xff] %vm334_vm0, %v682_v57  ;;  %v894_v43 = vld [vmem:[#allocation2 + $0x82] sm:$0xff] }
  0xbe   : > { %763 = vst.msk [vmem:[#allocation2 + $0xf1] sm:$0xff] %vm334_vm0, %v677_v59  ;;  %v1280_v5 = vmax.f32 %v1264_v48, 0.0  ;;  %v979_v1 = vadd.f32 %v963_v54, %v926_v21  ;;  %v980_v49 = vadd.f32 %v964_v31, %v927_v33  ;;  %v1121_v50 = vmul.f32 %v13785_v15, %v785_v25  ;;  %v840_v25 = vld [vmem:[#allocation2 + $0x79] sm:$0xff] }
  0xbf   : > { %v1281_v7 = vmax.f32 %v1265_v60, 0.0  ;;  %v876_v9 = vadd.f32 %v860_v37, %v807_v46  ;;  %v912_v10 = vmul.f32 %v13760_v58, %v891_v42  ;;  %v1122_v11 = vmul.f32 %v13785_v15, %v786_v32  ;;  %v893_v54 = vld [vmem:[#allocation2 + $0x7a] sm:$0xff] }
  0xc0   : > { %1297 = vst.msk [vmem:[#allocation3 + $0x31] sm:$0xff] %vm334_vm0, %v1280_v5  ;;  %v1228_v4 = vmul.f32 %v13811_v35, %v892_v18  ;;  %v1032_v55 = vadd.f32 %v1016_v0, %v979_v1  ;;  %v1137_v56 = vadd.f32 %v1121_v50, %v1083_v8  ;;  %v1174_v13 = vmul.f32 %v13790_v16, %v838_v34  ;;  %v692_v3 = vpop.permute.xlu1 %691  ;;  %v687_v17 = vpop.permute.xlu0 %686  ;;  %v843_v1 = vld [vmem:[#allocation2 + $0x99] sm:$0xff] }
  0xc1   : > { %1298 = vst.msk [vmem:[#allocation3 + $0x39] sm:$0xff] %vm334_vm0, %v1281_v7  ;;  %v928_v12 = vadd.f32 %v912_v10, %v875_v63  ;;  %v1033_v19 = vadd.f32 %v1017_v38, %v980_v49  ;;  %v1069_v21 = vmul.f32 %v13801_v23, %v891_v42  ;;  %v1138_v22 = vadd.f32 %v1122_v11, %v1084_v62  ;;  %v896_v11 = vld [vmem:[#allocation2 + $0x9a] sm:$0xff] }
  0xc2   : > { %766 = vst.msk [vmem:[#allocation2 + $0x111] sm:$0xff] %vm334_vm0, %v692_v3  ;;  %765 = vst.msk [vmem:[#allocation2 + $0x109] sm:$0xff] %vm334_vm0, %v687_v17  ;;  %v1190_v18 = vadd.f32 %v1174_v13, %v1137_v56  ;;  %v1227_v28 = vmul.f32 %v13811_v35, %v891_v42  ;;  %v862_v29 = vmul.f32 %v13755_v52, %v841_v61  ;;  %v789_v56 = vld [vmem:[#allocation2 + $0x90] sm:$0xff] }
  0xc3   : > { %v915_v8 = vmul.f32 %v13760_v58, %v894_v43  ;;  %v1085_v32 = vadd.f32 %v1069_v21, %v1032_v55  ;;  %v1191_v34 = vadd.f32 %v1175_v53, %v1138_v22  ;;  %v1019_v20 = vmul.f32 %v13780_v14, %v841_v61  ;;  %v842_v21 = vld [vmem:[#allocation2 + $0x91] sm:$0xff] }
  0xc4   : > { %v929_v36 = vadd.f32 %v913_v2, %v876_v9  ;;  %v1243_v26 = vadd.f32 %v1227_v28, %v1190_v18  ;;  %v13919_v37 = vmul.f32 %v13801_v23, %v894_v43  ;;  %v808_v38 = vmul.f32 %v13750_v51, %v787_v24  ;;  %v702_v40 = vpop.permute.xlu1 %701  ;;  %v697_v33 = vpop.permute.xlu0 %696 }
  0xc5   : > { %v861_v39 = vmul.f32 %v13755_v52, %v840_v25  ;;  %v1244_v41 = vadd.f32 %v1228_v4, %v1191_v34  ;;  %v809_v44 = vmul.f32 %v13750_v51, %v788_v30  ;;  %v965_v46 = vmul.f32 %v13774_v6, %v787_v24  ;;  %768 = vst.msk [vmem:[#allocation2 + $0x129] sm:$0xff] %vm334_vm0, %v702_v40 }
  0xc6   : > { %v966_v27 = vmul.f32 %v13774_v6, %v788_v30  ;;  %767 = vst.msk [vmem:[#allocation2 + $0x121] sm:$0xff] %vm334_vm0, %v697_v33  ;;  %v1266_v2 = vadd.f32 %v13861_v47, %v1243_v26  ;;  %v1177_v48 = vmul.f32 %v13790_v16, %v841_v61  ;;  %v1086_v53 = vadd.f32 %v13890_v45, %v1033_v19  ;;  %v790_v19 = vld [vmem:[#allocation2 + $0x98] sm:$0xff] }
  0xc7   : > { %v877_v42 = vadd.f32 %v861_v39, %v808_v38  ;;  %v1267_v31 = vadd.f32 %v13861_v47, %v1244_v41  ;;  %v981_v57 = vadd.f32 %v965_v46, %v928_v12  ;;  %v1018_v60 = vmul.f32 %v13780_v14, %v840_v25  ;;  %v895_v41 = vld [vmem:[#allocation2 + $0x92] sm:$0xff] }
  0xc8   : > { %v982_v59 = vadd.f32 %v966_v27, %v929_v36  ;;  %v1282_v62 = vmax.f32 %v1266_v2, 0.0  ;;  %v1230_v63 = vmul.f32 %v13811_v35, %v894_v43  ;;  %v1123_v0 = vmul.f32 %v13785_v15, %v787_v24  ;;  %v712_v49 = vpop.permute.xlu1 %711  ;;  %v707_v50 = vpop.permute.xlu0 %706 }
  0xc9   : > { %v1124_v5 = vmul.f32 %v13785_v15, %v788_v30  ;;  %v1283_v7 = vmax.f32 %v1267_v31, 0.0  ;;  %v878_v45 = vadd.f32 %v862_v29, %v809_v44  ;;  %v914_v9 = vmul.f32 %v13760_v58, %v893_v54  ;;  %770 = vst.msk [vmem:[#allocation2 + $0x141] sm:$0xff] %vm334_vm0, %v712_v49  ;;  %769 = vst.msk [vmem:[#allocation2 + $0x139] sm:$0xff] %vm334_vm0, %v707_v50 }
  0xca   : > { %v1034_v10 = vadd.f32 %v1018_v60, %v981_v57  ;;  %1299 = vst.msk [vmem:[#allocation3 + $0x49] sm:$0xff] %vm334_vm0, %v1282_v62  ;;  %v1071_v61 = vmul.f32 %v13801_v23, %v893_v54  ;;  %v1139_v43 = vadd.f32 %v1123_v0, %v1085_v32  ;;  %v1176_v55 = vmul.f32 %v13790_v16, %v840_v25  ;;  %v845_v0 = vld [vmem:[#allocation2 + $0xb1] sm:$0xff] }
  0xcb   : > { %v1140_v4 = vadd.f32 %v1124_v5, %v1086_v53  ;;  %1300 = vst.msk [vmem:[#allocation3 + $0x51] sm:$0xff] %vm334_vm0, %v1283_v7  ;;  %v930_v13 = vadd.f32 %v914_v9, %v877_v42  ;;  %v1035_v3 = vadd.f32 %v1019_v20, %v982_v59  ;;  %v1229_v17 = vmul.f32 %v13811_v35, %v893_v54  ;;  %v898_v7 = vld [vmem:[#allocation2 + $0xb2] sm:$0xff] }
  0xcc   : > { %v864_v12 = vmul.f32 %v13755_v52, %v843_v1  ;;  %v1087_v22 = vadd.f32 %v1071_v61, %v1034_v10  ;;  %v1192_v24 = vadd.f32 %v1176_v55, %v1139_v43  ;;  %v917_v28 = vmul.f32 %v13760_v58, %v896_v11  ;;  %v722_v29 = vpop.permute.xlu1 %721  ;;  %v717_v30 = vpop.permute.xlu0 %716  ;;  %v791_v43 = vld [vmem:[#allocation2 + $0xa8] sm:$0xff] }
  0xcd   : > { %v1193_v18 = vadd.f32 %v1177_v48, %v1140_v4  ;;  %v1021_v25 = vmul.f32 %v13780_v14, %v843_v1  ;;  %v13948_v32 = vmul.f32 %v13801_v23, %v896_v11  ;;  %v931_v34 = vadd.f32 %v915_v8, %v878_v45  ;;  %772 = vst.msk [vmem:[#allocation2 + $0x159] sm:$0xff] %vm334_vm0, %v722_v29 }
  0xce   : > { %v810_v20 = vmul.f32 %v13750_v51, %v789_v56  ;;  %771 = vst.msk [vmem:[#allocation2 + $0x151] sm:$0xff] %vm334_vm0, %v717_v30  ;;  %v1245_v36 = vadd.f32 %v1229_v17, %v1192_v24  ;;  %v811_v38 = vmul.f32 %v13750_v51, %v790_v19  ;;  %v863_v39 = vmul.f32 %v13755_v52, %v842_v21 }
  0xcf   : > { %v1246_v26 = vadd.f32 %v1230_v63, %v1193_v18  ;;  %v1179_v40 = vmul.f32 %v13790_v16, %v843_v1  ;;  %v1088_v33 = vadd.f32 %v13919_v37, %v1035_v3  ;;  %v967_v44 = vmul.f32 %v13774_v6, %v789_v56 }
  0xd0   : > { %v968_v8 = vmul.f32 %v13774_v6, %v790_v19  ;;  %v1268_v46 = vadd.f32 %v13861_v47, %v1245_v36  ;;  %v879_v2 = vadd.f32 %v863_v39, %v810_v20  ;;  %v1020_v48 = vmul.f32 %v13780_v14, %v842_v21  ;;  %v732_v53 = vpop.permute.xlu1 %731  ;;  %v727_v42 = vpop.permute.xlu0 %726 }
  0xd1   : > { %v1269_v27 = vadd.f32 %v13861_v47, %v1246_v26  ;;  %v983_v54 = vadd.f32 %v967_v44, %v930_v13  ;;  %v1125_v57 = vmul.f32 %v13785_v15, %v789_v56  ;;  %v1126_v37 = vmul.f32 %v13785_v15, %v790_v19  ;;  %774 = vst.msk [vmem:[#allocation2 + $0x171] sm:$0xff] %vm334_vm0, %v732_v53  ;;  %v844_v19 = vld [vmem:[#allocation2 + $0xa9] sm:$0xff] }
  0xd2   : > { %v984_v31 = vadd.f32 %v968_v8, %v931_v34  ;;  %773 = vst.msk [vmem:[#allocation2 + $0x169] sm:$0xff] %vm334_vm0, %v727_v42  ;;  %v1284_v59 = vmax.f32 %v1268_v46, 0.0  ;;  %v880_v62 = vadd.f32 %v864_v12, %v811_v38  ;;  %v916_v63 = vmul.f32 %v13760_v58, %v895_v41  ;;  %v792_v12 = vld [vmem:[#allocation2 + $0xb0] sm:$0xff] }
  0xd3   : > { %v1285_v60 = vmax.f32 %v1269_v27, 0.0  ;;  %v1036_v5 = vadd.f32 %v1020_v48, %v983_v54  ;;  %v1141_v1 = vadd.f32 %v1125_v57, %v1087_v22  ;;  %v1142_v49 = vadd.f32 %v1126_v37, %v1088_v33  ;;  %v897_v33 = vld [vmem:[#allocation2 + $0xaa] sm:$0xff] }
  0xd4   : > { %v1178_v50 = vmul.f32 %v13790_v16, %v842_v21  ;;  %1301 = vst.msk [vmem:[#allocation3 + $0x61] sm:$0xff] %vm334_vm0, %v1284_v59  ;;  %v1232_v45 = vmul.f32 %v13811_v35, %v896_v11  ;;  %v932_v9 = vadd.f32 %v916_v63, %v879_v2  ;;  %v1037_v10 = vadd.f32 %v1021_v25, %v984_v31  ;;  %v742_v4 = vpop.permute.xlu1 %741  ;;  %v737_v55 = vpop.permute.xlu0 %736  ;;  %v1004_v48 = vld [vmem:[#allocation2 + $0xc9] sm:$0xff] }
  0xd5   : > { %1302 = vst.msk [vmem:[#allocation3 + $0x69] sm:$0xff] %vm334_vm0, %v1285_v60  ;;  %v1073_v61 = vmul.f32 %v13801_v23, %v895_v41  ;;  %v1195_v13 = vadd.f32 %v1179_v40, %v1142_v49  ;;  %v1231_v3 = vmul.f32 %v13811_v35, %v895_v41  ;;  %v866_v17 = vmul.f32 %v13755_v52, %v845_v0  ;;  %v950_v60 = vld [vmem:[#allocation2 + $0xc0] sm:$0xff]  ;;  %v1057_v49 = vld [vmem:[#allocation2 + $0xca] sm:$0xff] }
  0xd6   : > { %v1194_v56 = vadd.f32 %v1178_v50, %v1141_v1  ;;  %776 = vst.msk [vmem:[#allocation2 + $0x189] sm:$0xff] %vm334_vm0, %v742_v4  ;;  %775 = vst.msk [vmem:[#allocation2 + $0x181] sm:$0xff] %vm334_vm0, %v737_v55  ;;  %v919_v21 = vmul.f32 %v13760_v58, %v898_v7  ;;  %v1023_v22 = vmul.f32 %v13780_v14, %v845_v0  ;;  %v1003_v50 = vld [vmem:[#allocation2 + $0xc1] sm:$0xff] }
  0xd7   : > { %v1089_v11 = vadd.f32 %v1073_v61, %v1036_v5  ;;  %v933_v24 = vadd.f32 %v917_v28, %v880_v62  ;;  %v1248_v29 = vadd.f32 %v1232_v45, %v1195_v13  ;;  %v1076_v30 = vmul.f32 %v13801_v23, %v898_v7  ;;  %v951_v62 = vld [vmem:[#allocation2 + $0xc8] sm:$0xff] }
  0xd8   : > { %v1247_v18 = vadd.f32 %v1231_v3, %v1194_v56  ;;  %v812_v25 = vmul.f32 %v13750_v51, %v791_v43  ;;  %v813_v34 = vmul.f32 %v13750_v51, %v792_v12  ;;  %v865_v20 = vmul.f32 %v13755_v52, %v844_v19 }
  0xd9   : > { %v969_v36 = vmul.f32 %v13774_v6, %v791_v43  ;;  %v970_v26 = vmul.f32 %v13774_v6, %v792_v12  ;;  %v1271_v39 = vadd.f32 %v13861_v47, %v1248_v29  ;;  %v1181_v28 = vmul.f32 %v13790_v16, %v845_v0 }
  0xda   : > { %v1270_v38 = vadd.f32 %v13861_v47, %v1247_v18  ;;  %v1090_v40 = vadd.f32 %v13948_v32, %v1037_v10  ;;  %v881_v41 = vadd.f32 %v865_v20, %v812_v25  ;;  %v1022_v51 = vmul.f32 %v13780_v14, %v844_v19 }
  0xdb   : > { %v985_v44 = vadd.f32 %v969_v36, %v932_v9  ;;  %v986_v8 = vadd.f32 %v970_v26, %v933_v24  ;;  %v1287_v52 = vmax.f32 %v1271_v39, 0.0  ;;  %v1127_v27 = vmul.f32 %v13785_v15, %v791_v43 }
  0xdc   : > { %v1286_v46 = vmax.f32 %v1270_v38, 0.0  ;;  %v1128_v2 = vmul.f32 %v13785_v15, %v792_v12  ;;  %v882_v53 = vadd.f32 %v866_v17, %v813_v34  ;;  %v918_v42 = vmul.f32 %v13760_v58, %v897_v33  ;;  %v14001_v58 = vld [vmem:[%s17903_s1 + $0x1] ss:$0 sm:$0xff]  ;;  %v14011_v17 = vld [vmem:[%s17903_s1] ss:$0 sm:$0xff] }
  0xdd   : > { %v1038_v54 = vadd.f32 %v1022_v51, %v985_v44  ;;  %v1039_v31 = vadd.f32 %v1023_v22, %v986_v8  ;;  %1304 = vst.msk [vmem:[#allocation3 + $0x81] sm:$0xff] %vm334_vm0, %v1287_v52  ;;  %v1075_v32 = vmul.f32 %v13801_v23, %v897_v33  ;;  %v1143_v57 = vadd.f32 %v1127_v27, %v1089_v11  ;;  %v1056_v22 = vld [vmem:[#allocation2 + $0xc2] sm:$0xff]  ;;  %v1110_v8 = vld [vmem:[#allocation2 + $0xd8] sm:$0xff] }
  0xde   : > { %1303 = vst.msk [vmem:[#allocation3 + $0x79] sm:$0xff] %vm334_vm0, %v1286_v46  ;;  %v1144_v37 = vadd.f32 %v1128_v2, %v1090_v40  ;;  %v1180_v59 = vmul.f32 %v13790_v16, %v844_v19  ;;  %v1234_v63 = vmul.f32 %v13811_v35, %v898_v7  ;;  %v934_v0 = vadd.f32 %v918_v42, %v881_v41  ;;  %v1111_v51 = vld [vmem:[#allocation2 + $0xe0] sm:$0xff] }
  0xdf   : > { %v1233_v5 = vmul.f32 %v13811_v35, %v897_v33  ;;  %v1025_v1 = vmul.f32 %v13780_v14, %v1004_v48  ;;  %v1091_v45 = vadd.f32 %v1075_v32, %v1038_v54  ;;  %v1183_v61 = vmul.f32 %v13790_v16, %v1004_v48  ;;  %v14031_v42 = vld [vmem:[%s17903_s1 + $0x2] ss:$0 sm:$0xff] }
  0xe0   : > { %v1196_v9 = vadd.f32 %v1180_v59, %v1143_v57  ;;  %v1197_v10 = vadd.f32 %v1181_v28, %v1144_v37  ;;  %v935_v43 = vadd.f32 %v919_v21, %v882_v53  ;;  %v1092_v4 = vadd.f32 %v1076_v30, %v1039_v31  ;;  %v1164_v28 = vld [vmem:[#allocation2 + $0xe1] sm:$0xff] }
  0xe1   : > { %v971_v7 = vmul.f32 %v13774_v6, %v950_v60  ;;  %v972_v55 = vmul.f32 %v13774_v6, %v951_v62  ;;  %v1236_v3 = vmul.f32 %v13811_v35, %v1057_v49  ;;  %v1024_v12 = vmul.f32 %v13780_v14, %v1003_v50  ;;  %v14038_v57 = vld [vmem:[%s17903_s1 + $0x4] ss:$0 sm:$0xff]  ;;  %v14043_v59 = vld [vmem:[%s17903_s1 + $0x3] ss:$0 sm:$0xff] }
  0xe2   : > { %v1249_v56 = vadd.f32 %v1233_v5, %v1196_v9  ;;  %v1250_v13 = vadd.f32 %v1234_v63, %v1197_v10  ;;  %v1129_v21 = vmul.f32 %v13785_v15, %v950_v60  ;;  %v1130_v24 = vmul.f32 %v13785_v15, %v951_v62 }
  0xe3   : > { %v987_v19 = vadd.f32 %v971_v7, %v934_v0  ;;  %v988_v11 = vadd.f32 %v972_v55, %v935_v43  ;;  %v1387_v29 = vmul.f32 %v14001_v58, %v1004_v48  ;;  %v1182_v30 = vmul.f32 %v13790_v16, %v1003_v50 }
  0xe4   : > { %v1272_v6 = vadd.f32 %v13861_v47, %v1249_v56  ;;  %v1273_v18 = vadd.f32 %v13861_v47, %v1250_v13  ;;  %v1145_v20 = vadd.f32 %v1129_v21, %v1091_v45  ;;  %v1146_v36 = vadd.f32 %v1130_v24, %v1092_v4 }
  0xe5   : > { %v1040_v25 = vadd.f32 %v1024_v12, %v987_v19  ;;  %v1041_v34 = vadd.f32 %v1025_v1, %v988_v11  ;;  %v1333_v38 = vmul.f32 %v14011_v17, %v950_v60  ;;  %v1334_v39 = vmul.f32 %v14011_v17, %v951_v62  ;;  %v1163_v60 = vld [vmem:[#allocation2 + $0xd9] sm:$0xff]  ;;  %v14064_v11 = vld [vmem:[%s17903_s1 + $0x5] ss:$0 sm:$0xff] }
  0xe6   : > { %v1288_v14 = vmax.f32 %v1272_v6, 0.0  ;;  %v1289_v26 = vmax.f32 %v1273_v18, 0.0  ;;  %v1198_v40 = vadd.f32 %v1182_v30, %v1145_v20  ;;  %v1199_v33 = vadd.f32 %v1183_v61, %v1146_v36  ;;  %v1216_v1 = vld [vmem:[#allocation2 + $0xda] sm:$0xff]  ;;  %v1316_v18 = vld [vmem:[#allocation2 + $0xf0] sm:$0xff] }
  0xe7   : > { %v1235_v41 = vmul.f32 %v13811_v35, %v1056_v22  ;;  %v1386_v44 = vmul.f32 %v14001_v58, %v1003_v50  ;;  %v1078_v46 = vmul.f32 %v13801_v23, %v1057_v49  ;;  %v1077_v52 = vmul.f32 %v13801_v23, %v1056_v22  ;;  %v1217_v23 = vld [vmem:[#allocation2 + $0xe2] sm:$0xff]  ;;  %v1370_v6 = vld [vmem:[#allocation2 + $0xf9] sm:$0xff] }
  0xe8   : > { %1305 = vst.msk [vmem:[#allocation3 + $0x91] sm:$0xff] %vm334_vm0, %v1288_v14  ;;  %1306 = vst.msk [vmem:[#allocation3 + $0x99] sm:$0xff] %vm334_vm0, %v1289_v26  ;;  %v1403_v27 = vadd.f32 %v1387_v29, %v1334_v39  ;;  %v1252_v48 = vadd.f32 %v1236_v3, %v1199_v33  ;;  %v1440_v54 = vmul.f32 %v14031_v42, %v1057_v49  ;;  %v1317_v39 = vld [vmem:[#allocation2 + $0xf8] sm:$0xff] }
  0xe9   : > { %v1251_v2 = vadd.f32 %v1235_v41, %v1198_v40  ;;  %v1402_v53 = vadd.f32 %v1386_v44, %v1333_v38  ;;  %v1093_v31 = vadd.f32 %v1077_v52, %v1040_v25  ;;  %v1439_v32 = vmul.f32 %v14031_v42, %v1056_v22  ;;  %v1423_v38 = vld [vmem:[#allocation2 + $0xfa] sm:$0xff]  ;;  %v14075_v44 = vld [vmem:[%s17903_s1 + $0x7] ss:$0 sm:$0xff] }
  0xea   : > { %v1094_v37 = vadd.f32 %v1078_v46, %v1041_v34  ;;  %v1275_v63 = vadd.f32 %v13861_v47, %v1252_v48  ;;  %v1185_v0 = vmul.f32 %v13790_v16, %v1164_v28  ;;  %v1389_v5 = vmul.f32 %v14001_v58, %v1164_v28 }
  0xeb   : > { %v1274_v62 = vadd.f32 %v13861_v47, %v1251_v2  ;;  %v1455_v49 = vadd.f32 %v1439_v32, %v1402_v53  ;;  %v1456_v50 = vadd.f32 %v1440_v54, %v1403_v27  ;;  %v1131_v45 = vmul.f32 %v13785_v15, %v1110_v8 }
  0xec   : > { %v1132_v9 = vmul.f32 %v13785_v15, %v1111_v51  ;;  %v1291_v61 = vmax.f32 %v1275_v63, 0.0  ;;  %v1335_v43 = vmul.f32 %v14011_v17, %v1110_v8  ;;  %v1336_v4 = vmul.f32 %v14011_v17, %v1111_v51  ;;  %v1422_v63 = vld [vmem:[#allocation2 + $0xf2] sm:$0xff] }
  0xed   : > { %v1290_v10 = vmax.f32 %v1274_v62, 0.0  ;;  %v1147_v7 = vadd.f32 %v1131_v45, %v1093_v31  ;;  %v1184_v56 = vmul.f32 %v13790_v16, %v1163_v60  ;;  %v1388_v13 = vmul.f32 %v14001_v58, %v1163_v60 }
  0xee   : > { %v1148_v55 = vadd.f32 %v1132_v9, %v1094_v37  ;;  %1308 = vst.msk [vmem:[#allocation3 + $0xb1] sm:$0xff] %vm334_vm0, %v1291_v61  ;;  %v1238_v3 = vmul.f32 %v13811_v35, %v1217_v23  ;;  %v1547_v15 = vmul.f32 %v14038_v57, %v1164_v28  ;;  %v1493_v12 = vmul.f32 %v14043_v59, %v1110_v8  ;;  %v1369_v28 = vld [vmem:[#allocation2 + $0xf1] sm:$0xff]  ;;  %v14080_v8 = vld [vmem:[%s17903_s1 + $0x6] ss:$0 sm:$0xff] }
  0xef   : > { %1307 = vst.msk [vmem:[#allocation3 + $0xa9] sm:$0xff] %vm334_vm0, %v1290_v10  ;;  %v1494_v19 = vmul.f32 %v14043_v59, %v1111_v51  ;;  %v1200_v16 = vadd.f32 %v1184_v56, %v1147_v7  ;;  %v1237_v21 = vmul.f32 %v13811_v35, %v1216_v1  ;;  %v1404_v24 = vadd.f32 %v1388_v13, %v1335_v43  ;;  %v1372_v13 = vld [vmem:[#allocation2 + $0x111] sm:$0xff] }
  0xf0   : > { %v1201_v22 = vadd.f32 %v1185_v0, %v1148_v55  ;;  %v1405_v29 = vadd.f32 %v1389_v5, %v1336_v4  ;;  %v1509_v30 = vadd.f32 %v1493_v12, %v1455_v49  ;;  %v1546_v34 = vmul.f32 %v14038_v57, %v1163_v60  ;;  %v14091_v60 = vld [vmem:[%s17903_s1 + $0x8] ss:$0 sm:$0xff] }
  0xf1   : > { %v1510_v25 = vadd.f32 %v1494_v19, %v1456_v50  ;;  %v1442_v20 = vmul.f32 %v14031_v42, %v1217_v23  ;;  %v1253_v36 = vadd.f32 %v1237_v21, %v1200_v16  ;;  %v1441_v26 = vmul.f32 %v14031_v42, %v1216_v1 }
  0xf2   : > { %v1254_v14 = vadd.f32 %v1238_v3, %v1201_v22  ;;  %v1600_v40 = vmul.f32 %v14064_v11, %v1217_v23  ;;  %v1562_v35 = vadd.f32 %v1546_v34, %v1509_v30  ;;  %v1599_v41 = vmul.f32 %v14064_v11, %v1216_v1  ;;  %v1425_v3 = vld [vmem:[#allocation2 + $0x112] sm:$0xff]  ;;  %v1318_v22 = vld [vmem:[#allocation2 + $0x108] sm:$0xff] }
  0xf3   : > { %v1563_v33 = vadd.f32 %v1547_v15, %v1510_v25  ;;  %v1276_v51 = vadd.f32 %v13861_v47, %v1253_v36  ;;  %v1457_v52 = vadd.f32 %v1441_v26, %v1404_v24  ;;  %v1391_v27 = vmul.f32 %v14001_v58, %v1370_v6  ;;  %v1371_v30 = vld [vmem:[#allocation2 + $0x109] sm:$0xff]  ;;  %v14112_v25 = vld [vmem:[%s17904_s2] ss:$0 sm:$0xff] }
  0xf4   : > { %v1277_v46 = vadd.f32 %v13861_v47, %v1254_v14  ;;  %v1615_v2 = vadd.f32 %v1599_v41, %v1562_v35  ;;  %v1458_v48 = vadd.f32 %v1442_v20, %v1405_v29  ;;  %v1337_v53 = vmul.f32 %v14011_v17, %v1316_v18  ;;  %v1319_v29 = vld [vmem:[#allocation2 + $0x110] sm:$0xff] }
  0xf5   : > { %v1338_v54 = vmul.f32 %v14011_v17, %v1317_v39  ;;  %v1292_v31 = vmax.f32 %v1276_v51, 0.0  ;;  %v1616_v23 = vadd.f32 %v1600_v40, %v1563_v33  ;;  %v1390_v37 = vmul.f32 %v14001_v58, %v1369_v28 }
  0xf6   : > { %v1293_v32 = vmax.f32 %v1277_v46, 0.0  ;;  %v1444_v47 = vmul.f32 %v14031_v42, %v1423_v38  ;;  %v1549_v62 = vmul.f32 %v14038_v57, %v1370_v6  ;;  %v1495_v0 = vmul.f32 %v14043_v59, %v1316_v18 }
  0xf7   : > { %v1496_v5 = vmul.f32 %v14043_v59, %v1317_v39  ;;  %1309 = vst.msk [vmem:[#allocation3 + $0xc1] sm:$0xff] %vm334_vm0, %v1292_v31  ;;  %v1602_v1 = vmul.f32 %v14064_v11, %v1423_v38  ;;  %v1707_v49 = vmul.f32 %v14075_v44, %v1370_v6  ;;  %v1653_v50 = vmul.f32 %v14080_v8, %v1316_v18 }
  0xf8   : > { %1310 = vst.msk [vmem:[#allocation3 + $0xc9] sm:$0xff] %vm334_vm0, %v1293_v32  ;;  %v1654_v45 = vmul.f32 %v14080_v8, %v1317_v39  ;;  %v1406_v9 = vadd.f32 %v1390_v37, %v1337_v53  ;;  %v1407_v10 = vadd.f32 %v1391_v27, %v1338_v54  ;;  %v1511_v61 = vadd.f32 %v1495_v0, %v1457_v52  ;;  %v1882_v32 = vld [vmem:[#allocation3 + $0x21] sm:$0xff] }
  0xf9   : > { %v1512_v43 = vadd.f32 %v1496_v5, %v1458_v48  ;;  %v1548_v4 = vmul.f32 %v14038_v57, %v1369_v28  ;;  %v1669_v7 = vadd.f32 %v1653_v50, %v1615_v2  ;;  %v1706_v56 = vmul.f32 %v14075_v44, %v1369_v28  ;;  %v1424_v2 = vld [vmem:[#allocation2 + $0x10a] sm:$0xff] }
  0xfa   : > { %v1670_v55 = vadd.f32 %v1654_v45, %v1616_v23  ;;  %v1760_v15 = vmul.f32 %v14091_v60, %v1423_v38  ;;  %v1443_v12 = vmul.f32 %v14031_v42, %v1422_v63  ;;  %v1601_v19 = vmul.f32 %v14064_v11, %v1422_v63  ;;  %v1881_v50 = vld [vmem:[#allocation3 + $0x19] sm:$0xff] }
  0xfb   : > { %v1759_v16 = vmul.f32 %v14091_v60, %v1422_v63  ;;  %v1564_v21 = vadd.f32 %v1548_v4, %v1511_v61  ;;  %v1565_v24 = vadd.f32 %v1549_v62, %v1512_v43  ;;  %v1722_v6 = vadd.f32 %v1706_v56, %v1669_v7  ;;  %v1850_v63 = vld [vmem:[#allocation3 + $0x20] sm:$0xff]  ;;  %v1849_v43 = vld [vmem:[#allocation3 + $0x18] sm:$0xff] }
  0xfc   : > { %v1723_v18 = vadd.f32 %v1707_v49, %v1670_v55  ;;  %v1459_v34 = vadd.f32 %v1443_v12, %v1406_v9  ;;  %v1393_v20 = vmul.f32 %v14001_v58, %v1372_v13  ;;  %v14116_v36 = vmul.f32 %v14031_v42, %v1425_v3  ;;  %v1374_v4 = vld [vmem:[#allocation2 + $0x129] sm:$0xff] }
  0xfd   : > { %v1551_v14 = vmul.f32 %v14038_v57, %v1372_v13  ;;  %v1775_v26 = vadd.f32 %v1759_v16, %v1722_v6  ;;  %v1460_v39 = vadd.f32 %v1444_v47, %v1407_v10  ;;  %v1339_v28 = vmul.f32 %v14011_v17, %v1318_v22  ;;  %v12845_v12 = vld [vmem:[%s17905_s3 + $0x50] sm:$0xff]   ;;  %v1373_v6 = vld [vmem:[#allocation2 + $0x121] sm:$0xff] }
  0xfe   : > { %v1776_v38 = vadd.f32 %v1760_v15, %v1723_v18  ;;  %v1340_v40 = vmul.f32 %v14011_v17, %v1319_v29  ;;  %v1392_v35 = vmul.f32 %v14001_v58, %v1371_v30  ;;  %v1497_v33 = vmul.f32 %v14043_v59, %v1318_v22  ;;  %v1427_v15 = vld [vmem:[#allocation2 + $0x12a] sm:$0xff] }
  0xff   : > { %v1498_v41 = vmul.f32 %v14043_v59, %v1319_v29  ;;  %v1617_v51 = vadd.f32 %v1601_v19, %v1564_v21  ;;  %v1798_v46 = vadd.f32 %v14112_v25, %v1775_v26  ;;  %v1618_v27 = vadd.f32 %v1602_v1, %v1565_v24  ;;  %v1320_v24 = vld [vmem:[#allocation2 + $0x120] sm:$0xff] }
 0x100   : > { %v1799_v52 = vadd.f32 %v14112_v25, %v1776_v38  ;;  %v1709_v48 = vmul.f32 %v14075_v44, %v1372_v13  ;;  %v1408_v53 = vadd.f32 %v1392_v35, %v1339_v28  ;;  %v1513_v54 = vadd.f32 %v1497_v33, %v1459_v34 }
 0x101   : > { %v1550_v31 = vmul.f32 %v14038_v57, %v1371_v30  ;;  %v1814_v23 = vmax.f32 %v1798_v46, 0.0  ;;  %v1655_v47 = vmul.f32 %v14080_v8, %v1318_v22  ;;  %v1656_v62 = vmul.f32 %v14080_v8, %v1319_v29  ;;  %v12848_v46 = vld [vmem:[%s17905_s3 + $0x68] sm:$0xff]  }
 0x102   : > { %v1815_v37 = vmax.f32 %v1799_v52, 0.0  ;;  %v1409_v0 = vadd.f32 %v1393_v20, %v1340_v40  ;;  %v1445_v5 = vmul.f32 %v14031_v42, %v1424_v2  ;;  %v1514_v49 = vadd.f32 %v1498_v41, %v1460_v39  ;;  %v1321_v20 = vld [vmem:[#allocation2 + $0x128] sm:$0xff]  ;;  %v13117_v39 = vld [vmem:[%s17905_s3 + $0x78] sm:$0xff]  }
 0x103   : > { %v1566_v1 = vadd.f32 %v1550_v31, %v1513_v54  ;;  %1831 = vst.msk [vmem:[#allocation3 + $0xd9] sm:$0xff] %vm334_vm0, %v1814_v23  ;;  %v1671_v45 = vadd.f32 %v1655_v47, %v1617_v51  ;;  %v1672_v9 = vadd.f32 %v1656_v62, %v1618_v27  ;;  %v1708_v10 = vmul.f32 %v14075_v44, %v1371_v30  ;;  %v13116_v30 = vld [vmem:[%s17905_s3 + $0x58] sm:$0xff]   ;;  %v12847_v40 = vld [vmem:[%s17905_s3 + $0x48] sm:$0xff]  }
 0x104   : > { %1832 = vst.msk [vmem:[#allocation3 + $0xe1] sm:$0xff] %vm334_vm0, %v1815_v37  ;;  %v14134_v61 = vpack.c.bf16 %v1882_v32, %v1881_v50  ;;  %v1604_v7 = vmul.f32 %v14064_v11, %v1425_v3  ;;  %v1762_v55 = vmul.f32 %v14091_v60, %v1425_v3  ;;  %v1603_v56 = vmul.f32 %v14064_v11, %v1424_v2  ;;  %v12846_v3 = vld [vmem:[%s17905_s3 + $0x70] sm:$0xff]   ;;  %v1426_v47 = vld [vmem:[#allocation2 + $0x122] sm:$0xff] }
 0x105   : > { %v14139_v13 = vpack.c.bf16 %v1850_v63, %v1849_v43  ;;  %v1461_v19 = vadd.f32 %v1445_v5, %v1408_v53  ;;  %v1724_v16 = vadd.f32 %v1708_v10, %v1671_v45  ;;  %v1725_v22 = vadd.f32 %v1709_v48, %v1672_v9  ;;  %v1884_v32 = vld [vmem:[#allocation3 + $0x39] sm:$0xff]  ;;  %v1883_v45 = vld [vmem:[#allocation3 + $0x31] sm:$0xff] }
 0x106   : > { %v1761_v21 = vmul.f32 %v14091_v60, %v1424_v2  ;;  %11791 = vmatmul.mubr.msk.bf16.vlgmr.msra.gmra.mxu0 %vm334_vm0, %v14134_v61  ;;  %v1567_v18 = vadd.f32 %v1551_v14, %v1514_v49  ;;  %v1619_v29 = vadd.f32 %v1603_v56, %v1566_v1  ;;  %v1395_v34 = vmul.f32 %v14001_v58, %v1374_v4  ;;  %v1376_v56 = vld [vmem:[#allocation2 + $0x141] sm:$0xff] }
 0x107   : > { %11815 = vmatmul.mubr.msk.bf16.vlgmr.msra.gmra.mxu1 %vm334_vm0, %v14139_v13  ;;  %11831 = vmatpush3.bf16.msra.mxu0 %v13116_v30  ;;  %v1778_v38 = vadd.f32 %v1762_v55, %v1725_v22  ;;  %v14160_v14 = vmul.f32 %v14031_v42, %v1427_v15  ;;  %v1462_v28 = vadd.f32 %v14116_v36, %v1409_v0  ;;  %v1852_v0 = vld [vmem:[#allocation3 + $0x38] sm:$0xff]  ;;  %v1851_v55 = vld [vmem:[#allocation3 + $0x30] sm:$0xff] }
 0x108   : > { %v1777_v26 = vadd.f32 %v1761_v21, %v1724_v16  ;;  %11855 = vmatpush3.bf16.msra.mxu1 %v13117_v39  ;;  %v1553_v35 = vmul.f32 %v14038_v57, %v1374_v4  ;;  %v1341_v33 = vmul.f32 %v14011_v17, %v1320_v24  ;;  %v1394_v41 = vmul.f32 %v14001_v58, %v1373_v6  ;;  %v14194_v22 = vld [vmem:[#allocation2 + $0x142] sm:$0xff]  ;;  %v1322_v21 = vld [vmem:[#allocation2 + $0x138] sm:$0xff] }
 0x109   : > { %v1499_v51 = vmul.f32 %v14043_v59, %v1320_v24  ;;  %11832 = vmatprep.subr.bf16.mxu0 %v12845_v12  ;;  %v1801_v36 = vadd.f32 %v14112_v25, %v1778_v38  ;;  %v14176_v27 = vmul.f32 %v14064_v11, %v1427_v15  ;;  %v1500_v2 = vmul.f32 %v14043_v59, %v1321_v20  ;;  %v1375_v30 = vld [vmem:[#allocation2 + $0x139] sm:$0xff] }
 0x10a   : > { %v1800_v52 = vadd.f32 %v14112_v25, %v1777_v26  ;;  %11856 = vmatprep.subr.bf16.mxu1 %v12846_v3  ;;  %v1620_v48 = vadd.f32 %v1604_v7, %v1567_v18  ;;  %v1342_v53 = vmul.f32 %v14011_v17, %v1321_v20  ;;  %v1552_v31 = vmul.f32 %v14038_v57, %v1373_v6 }
 0x10b   : > { %v1515_v54 = vadd.f32 %v1499_v51, %v1461_v19  ;;  %11833 = vmatpush3.bf16.msra.mxu0 %v12845_v12  ;;  %v1817_v37 = vmax.f32 %v1801_v36, 0.0  ;;  %v1516_v62 = vadd.f32 %v1500_v2, %v1462_v28  ;;  %v1657_v63 = vmul.f32 %v14080_v8, %v1320_v24  ;;  %v1428_v2 = vld [vmem:[#allocation2 + $0x13a] sm:$0xff] }
 0x10c   : > { %v1816_v23 = vmax.f32 %v1800_v52, 0.0  ;;  %11857 = vmatpush3.bf16.msra.mxu1 %v12846_v3  ;;  %11834 = vmatprep.subr.bf16.mxu0 %v12847_v40  ;;  %v1711_v5 = vmul.f32 %v14075_v44, %v1374_v4  ;;  %v1410_v49 = vadd.f32 %v1394_v41, %v1341_v33  ;;  %v1658_v50 = vmul.f32 %v14080_v8, %v1321_v20  ;;  %v14219_v41 = vld [vmem:[%s17905_s3 + $0x98] sm:$0xff]  }
 0x10d   : > { %v1568_v1 = vadd.f32 %v1552_v31, %v1515_v54  ;;  %11858 = vmatprep.subr.bf16.mxu1 %v12848_v46  ;;  %1834 = vst.msk [vmem:[#allocation3 + $0xf9] sm:$0xff] %vm334_vm0, %v1817_v37  ;;  %v1764_v9 = vmul.f32 %v14091_v60, %v1427_v15  ;;  %v1673_v10 = vadd.f32 %v1657_v63, %v1619_v29  ;;  %v12849_v15 = vld [vmem:[%s17905_s3 + $0x40] sm:$0xff]  }
 0x10e   : > { %1833 = vst.msk [vmem:[#allocation3 + $0xf1] sm:$0xff] %vm334_vm0, %v1816_v23  ;;  %v1710_v43 = vmul.f32 %v14075_v44, %v1373_v6  ;;  %v14188_v7 = vpack.c.bf16 %v1884_v32, %v1883_v45  ;;  %v1447_v4 = vmul.f32 %v14031_v42, %v1426_v47  ;;  %v1605_v12 = vmul.f32 %v14064_v11, %v1426_v47  ;;  %v1323_v29 = vld [vmem:[#allocation2 + $0x140] sm:$0xff]  ;;  %v1887_v45 = vld [vmem:[#allocation3 + $0x61] sm:$0xff] }
 0x10f   : > { %v1674_v19 = vadd.f32 %v1658_v50, %v1620_v48  ;;  %v14192_v16 = vpack.c.bf16 %v1852_v0, %v1851_v55  ;;  %11835 = vmatpush3.bf16.msra.mxu0 %v12847_v40  ;;  %v1411_v24 = vadd.f32 %v1395_v34, %v1342_v53  ;;  %v1569_v6 = vadd.f32 %v1553_v35, %v1516_v62  ;;  %v12850_v34 = vld [vmem:[%s17905_s3 + $0x60] sm:$0xff]   ;;  %v14227_v53 = vld [vmem:[%s17905_s3 + $0xb8] sm:$0xff]  }
 0x110   : > { %v1726_v3 = vadd.f32 %v1710_v43, %v1673_v10  ;;  %v1763_v18 = vmul.f32 %v14091_v60, %v1426_v47  ;;  %11794 = vmatprep.mubr.msk.bf16.mxu0 %vm334_vm0, %v14188_v7  ;;  %v1463_v20 = vadd.f32 %v1447_v4, %v1410_v49  ;;  %v1621_v26 = vadd.f32 %v1605_v12, %v1568_v1  ;;  %v1885_v63 = vld [vmem:[#allocation3 + $0x49] sm:$0xff]  ;;  %v1886_v0 = vld [vmem:[#allocation3 + $0x51] sm:$0xff]  ;;  %v1855_v4 = vld [vmem:[#allocation3 + $0x60] sm:$0xff] }
 0x111   : > { %v1727_v38 = vadd.f32 %v1711_v5, %v1674_v19  ;;  %11818 = vmatprep.mubr.msk.bf16.mxu1 %vm334_vm0, %v14192_v16  ;;  %v1397_v39 = vmul.f32 %v14001_v58, %v1376_v56  ;;  %v14210_v40 = vmul.f32 %v14031_v42, %v14194_v22  ;;  %v14213_v35 = vmul.f32 %v14038_v57, %v1376_v56  ;;  %v1853_v5 = vld [vmem:[#allocation3 + $0x48] sm:$0xff]  ;;  %v1854_v50 = vld [vmem:[#allocation3 + $0x50] sm:$0xff] }
 0x112   : > { %v1779_v28 = vadd.f32 %v1763_v18, %v1726_v3  ;;  %v1343_v33 = vmul.f32 %v14011_v17, %v1322_v21  ;;  %11859 = vmatpush3.bf16.msra.mxu1 %v12848_v46  ;;  %v1344_v52 = vmul.f32 %v14011_v17, %v1323_v29  ;;  %v1396_v36 = vmul.f32 %v14001_v58, %v1375_v30  ;;  %v1856_v12 = vld [vmem:[#allocation3 + $0x68] sm:$0xff] }
 0x113   : > { %v1780_v51 = vadd.f32 %v1764_v9, %v1727_v38  ;;  %v1501_v48 = vmul.f32 %v14043_v59, %v1322_v21  ;;  %11836 = vmatprep.subr.bf16.mxu0 %v12849_v15  ;;  %v1464_v54 = vadd.f32 %v14160_v14, %v1411_v24  ;;  %v1622_v31 = vadd.f32 %v14176_v27, %v1569_v6  ;;  %v1888_v9 = vld [vmem:[#allocation3 + $0x69] sm:$0xff] }
 0x114   : > { %v1802_v46 = vadd.f32 %v14112_v25, %v1779_v28  ;;  %v1502_v32 = vmul.f32 %v14043_v59, %v1323_v29  ;;  %11837 = vmatpush3.bf16.msra.mxu0 %v12849_v15  ;;  %v1713_v37 = vmul.f32 %v14075_v44, %v1376_v56  ;;  %v1766_v47 = vmul.f32 %v14091_v60, %v14194_v22  ;;  %v1378_v28 = vld [vmem:[#allocation2 + $0x159] sm:$0xff] }
 0x115   : > { %v1803_v23 = vadd.f32 %v14112_v25, %v1780_v51  ;;  %v1517_v62 = vadd.f32 %v1501_v48, %v1463_v20  ;;  %11860 = vmatprep.subr.bf16.mxu1 %v12850_v34  ;;  %v1449_v14 = vmul.f32 %v14031_v42, %v1428_v2  ;;  %v1659_v27 = vmul.f32 %v14080_v8, %v1322_v21 }
 0x116   : > { %v1818_v49 = vmax.f32 %v1802_v46, 0.0  ;;  %v1660_v1 = vmul.f32 %v14080_v8, %v1323_v29  ;;  %11861 = vmatpush3.bf16.msra.mxu1 %v12850_v34  ;;  %11878 = vmatprep.subr.bf16.mxu0 %v14219_v41  ;;  %v1412_v43 = vadd.f32 %v1396_v36, %v1343_v33  ;;  %v1413_v55 = vadd.f32 %v1397_v39, %v1344_v52  ;;  %v1431_v52 = vld [vmem:[#allocation2 + $0x15a] sm:$0xff]  ;;  %v1377_v36 = vld [vmem:[#allocation2 + $0x151] sm:$0xff] }
 0x117   : > { %v1819_v10 = vmax.f32 %v1803_v23, 0.0  ;;  %v1554_v56 = vmul.f32 %v14038_v57, %v1375_v30  ;;  %11902 = vmatprep.subr.bf16.mxu1 %v14227_v53  ;;  %v1518_v19 = vadd.f32 %v1502_v32, %v1464_v54  ;;  %v1675_v21 = vadd.f32 %v1659_v27, %v1621_v26  ;;  %v1324_v26 = vld [vmem:[#allocation2 + $0x150] sm:$0xff] }
 0x118   : > { %1835 = vst.msk [vmem:[#allocation3 + $0x109] sm:$0xff] %vm334_vm0, %v1818_v49  ;;  %v1676_v15 = vadd.f32 %v1660_v1, %v1622_v31  ;;  %v1712_v24 = vmul.f32 %v14075_v44, %v1375_v30  ;;  %v14246_v3 = vpack.c.bf16 %v1886_v0, %v1885_v63  ;;  %v14248_v18 = vpack.c.bf16 %v1854_v50, %v1853_v5  ;;  %v1430_v5 = vld [vmem:[#allocation2 + $0x152] sm:$0xff] }
 0x119   : > { %1836 = vst.msk [vmem:[#allocation3 + $0x111] sm:$0xff] %vm334_vm0, %v1819_v10  ;;  %v1570_v6 = vadd.f32 %v1554_v56, %v1517_v62  ;;  %v14250_v29 = vpack.c.bf16 %v1888_v9, %v1887_v45  ;;  %v1765_v39 = vmul.f32 %v14091_v60, %v1428_v2  ;;  %v14253_v34 = vpack.c.bf16 %v1856_v12, %v1855_v4 }
 0x11a   : > { %v1728_v20 = vadd.f32 %v1712_v24, %v1675_v21  ;;  %v1729_v38 = vadd.f32 %v1713_v37, %v1676_v15  ;;  %v1608_v30 = vmul.f32 %v14064_v11, %v14194_v22  ;;  %v1465_v33 = vadd.f32 %v1449_v14, %v1412_v43  ;;  %11795 = vmatmul.mubr.msk.bf16.gmra.mxu0 %vm334_vm0, %v14246_v3  ;;  %v1325_v22 = vld [vmem:[#allocation2 + $0x158] sm:$0xff] }
 0x11b   : > { %v1607_v51 = vmul.f32 %v14064_v11, %v1428_v2  ;;  %11819 = vmatmul.mubr.msk.bf16.gmra.mxu1 %vm334_vm0, %v14248_v18  ;;  %v1571_v48 = vadd.f32 %v14213_v35, %v1518_v19  ;;  %11798 = vmatprep.mubr.msk.bf16.mxu0 %vm334_vm0, %v14250_v29  ;;  %v1399_v31 = vmul.f32 %v14001_v58, %v1378_v28  ;;  %v1380_v19 = vld [vmem:[#allocation2 + $0x171] sm:$0xff] }
 0x11c   : > { %v1781_v46 = vadd.f32 %v1765_v39, %v1728_v20  ;;  %v1782_v54 = vadd.f32 %v1766_v47, %v1729_v38  ;;  %11822 = vmatprep.mubr.msk.bf16.mxu1 %vm334_vm0, %v14253_v34  ;;  %v1466_v32 = vadd.f32 %v14210_v40, %v1413_v55  ;;  %v1345_v23 = vmul.f32 %v14011_v17, %v1324_v26 }
 0x11d   : > { %v1623_v2 = vadd.f32 %v1607_v51, %v1570_v6  ;;  %v1452_v47 = vmul.f32 %v14031_v42, %v1431_v52  ;;  %v1398_v62 = vmul.f32 %v14001_v58, %v1377_v36  ;;  %v1557_v63 = vmul.f32 %v14038_v57, %v1378_v28 }
 0x11e   : > { %v1804_v37 = vadd.f32 %v14112_v25, %v1781_v46  ;;  %v1805_v35 = vadd.f32 %v14112_v25, %v1782_v54  ;;  %v1346_v0 = vmul.f32 %v14011_v17, %v1325_v22  ;;  %v1503_v49 = vmul.f32 %v14043_v59, %v1324_v26  ;;  %v1327_v54 = vld [vmem:[#allocation2 + $0x170] sm:$0xff] }
 0x11f   : > { %v1504_v14 = vmul.f32 %v14043_v59, %v1325_v22  ;;  %v1624_v1 = vadd.f32 %v1608_v30, %v1571_v48  ;;  %v1414_v50 = vadd.f32 %v1398_v62, %v1345_v23  ;;  %v1556_v10 = vmul.f32 %v14038_v57, %v1377_v36  ;;  %v1326_v30 = vld [vmem:[#allocation2 + $0x168] sm:$0xff] }
 0x120   : > { %v1820_v40 = vmax.f32 %v1804_v37, 0.0  ;;  %v1821_v27 = vmax.f32 %v1805_v35, 0.0  ;;  %v1519_v45 = vadd.f32 %v1503_v49, %v1465_v33  ;;  %v1661_v43 = vmul.f32 %v14080_v8, %v1324_v26  ;;  %v1379_v33 = vld [vmem:[#allocation2 + $0x169] sm:$0xff] }
 0x121   : > { %v1520_v9 = vadd.f32 %v1504_v14, %v1466_v32  ;;  %v1610_v55 = vmul.f32 %v14064_v11, %v1431_v52  ;;  %v1715_v56 = vmul.f32 %v14075_v44, %v1378_v28  ;;  %v1451_v4 = vmul.f32 %v14031_v42, %v1430_v5  ;;  %v1432_v32 = vld [vmem:[#allocation2 + $0x16a] sm:$0xff] }
 0x122   : > { %1837 = vst.msk [vmem:[#allocation3 + $0x121] sm:$0xff] %vm334_vm0, %v1820_v40  ;;  %1838 = vst.msk [vmem:[#allocation3 + $0x129] sm:$0xff] %vm334_vm0, %v1821_v27  ;;  %v1662_v12 = vmul.f32 %v14080_v8, %v1325_v22  ;;  %v1415_v21 = vadd.f32 %v1399_v31, %v1346_v0  ;;  %v1572_v15 = vadd.f32 %v1556_v10, %v1519_v45  ;;  %v1857_v10 = vld [vmem:[#allocation3 + $0x78] sm:$0xff] }
 0x123   : > { %v1677_v24 = vadd.f32 %v1661_v43, %v1623_v2  ;;  %v1714_v6 = vmul.f32 %v14075_v44, %v1377_v36  ;;  %v1768_v20 = vmul.f32 %v14091_v60, %v1431_v52  ;;  %v1467_v38 = vadd.f32 %v1451_v4, %v1414_v50  ;;  %v1433_v2 = vld [vmem:[#allocation2 + $0x172] sm:$0xff]  ;;  %v1889_v50 = vld [vmem:[#allocation3 + $0x79] sm:$0xff] }
 0x124   : > { %v1609_v39 = vmul.f32 %v14064_v11, %v1430_v5  ;;  %v1678_v26 = vadd.f32 %v1662_v12, %v1624_v1  ;;  %v1573_v51 = vadd.f32 %v1557_v63, %v1520_v9  ;;  %v1767_v48 = vmul.f32 %v14091_v60, %v1430_v5  ;;  %v1858_v43 = vld [vmem:[#allocation3 + $0x80] sm:$0xff] }
 0x125   : > { %v1730_v28 = vadd.f32 %v1714_v6, %v1677_v24  ;;  %v1401_v46 = vmul.f32 %v14001_v58, %v1380_v19  ;;  %v1559_v36 = vmul.f32 %v14038_v57, %v1380_v19  ;;  %v1717_v52 = vmul.f32 %v14075_v44, %v1380_v19  ;;  %v1860_v24 = vld [vmem:[#allocation3 + $0x98] sm:$0xff] }
 0x126   : > { %v1625_v22 = vadd.f32 %v1609_v39, %v1572_v15  ;;  %v1731_v31 = vadd.f32 %v1715_v56, %v1678_v26  ;;  %v1468_v37 = vadd.f32 %v1452_v47, %v1415_v21  ;;  %v1347_v35 = vmul.f32 %v14011_v17, %v1326_v30  ;;  %v1890_v47 = vld [vmem:[#allocation3 + $0x81] sm:$0xff]  ;;  %v1891_v56 = vld [vmem:[#allocation3 + $0x91] sm:$0xff] }
 0x127   : > { %v1783_v23 = vadd.f32 %v1767_v48, %v1730_v28  ;;  %v1400_v62 = vmul.f32 %v14001_v58, %v1379_v33  ;;  %v1348_v0 = vmul.f32 %v14011_v17, %v1327_v54  ;;  %v1505_v5 = vmul.f32 %v14043_v59, %v1326_v30  ;;  %v1859_v15 = vld [vmem:[#allocation3 + $0x90] sm:$0xff] }
 0x128   : > { %v1784_v63 = vadd.f32 %v1768_v20, %v1731_v31  ;;  %v1506_v49 = vmul.f32 %v14043_v59, %v1327_v54  ;;  %v1770_v40 = vmul.f32 %v14091_v60, %v1433_v2  ;;  %v1626_v27 = vadd.f32 %v1610_v55, %v1573_v51  ;;  %v1892_v55 = vld [vmem:[#allocation3 + $0x99] sm:$0xff] }
 0x129   : > { %v1806_v14 = vadd.f32 %v14112_v25, %v1783_v23  ;;  %v1453_v1 = vmul.f32 %v14031_v42, %v1432_v32  ;;  %v1521_v9 = vadd.f32 %v1505_v5, %v1467_v38  ;;  %v1558_v58 = vmul.f32 %v14038_v57, %v1379_v33 }
 0x12a   : > { %v1807_v45 = vadd.f32 %v14112_v25, %v1784_v63  ;;  %v1663_v17 = vmul.f32 %v14080_v8, %v1326_v30  ;;  %v1416_v12 = vadd.f32 %v1400_v62, %v1347_v35  ;;  %v1522_v19 = vadd.f32 %v1506_v49, %v1468_v37  ;;  %v1593_v35 = vld [vmem:[#allocation2 + $0x18a] sm:$0xff] }
 0x12b   : > { %v1822_v4 = vmax.f32 %v1806_v14, 0.0  ;;  %v1664_v21 = vmul.f32 %v14080_v8, %v1327_v54  ;;  %v1417_v20 = vadd.f32 %v1401_v46, %v1348_v0  ;;  %v1716_v38 = vmul.f32 %v14075_v44, %v1379_v33  ;;  %v1540_v46 = vld [vmem:[#allocation2 + $0x189] sm:$0xff]  ;;  %v1646_v14 = vld [vmem:[#allocation2 + $0x198] sm:$0xff] }
 0x12c   : > { %v1823_v6 = vmax.f32 %v1807_v45, 0.0  ;;  %v1679_v39 = vadd.f32 %v1663_v17, %v1625_v22  ;;  %v1574_v26 = vadd.f32 %v1558_v58, %v1521_v9  ;;  %v14307_v51 = vpack.c.bf16 %v1890_v47, %v1889_v50  ;;  %v1539_v50 = vld [vmem:[#allocation2 + $0x181] sm:$0xff] }
 0x12d   : > { %1839 = vst.msk [vmem:[#allocation3 + $0x139] sm:$0xff] %vm334_vm0, %v1822_v4  ;;  %v1680_v30 = vadd.f32 %v1664_v21, %v1626_v27  ;;  %v14309_v28 = vpack.c.bf16 %v1858_v43, %v1857_v10  ;;  %v1769_v54 = vmul.f32 %v14091_v60, %v1432_v32  ;;  %v14313_v31 = vpack.c.bf16 %v1892_v55, %v1891_v56  ;;  %v1487_v27 = vld [vmem:[#allocation2 + $0x188] sm:$0xff]  ;;  %v1893_v10 = vld [vmem:[#allocation3 + $0xa9] sm:$0xff] }
 0x12e   : > { %1840 = vst.msk [vmem:[#allocation3 + $0x141] sm:$0xff] %vm334_vm0, %v1823_v6  ;;  %v1732_v48 = vadd.f32 %v1716_v38, %v1679_v39  ;;  %v14315_v23 = vpack.c.bf16 %v1860_v24, %v1859_v15  ;;  %v1575_v22 = vadd.f32 %v1559_v36, %v1522_v19  ;;  %v1611_v33 = vmul.f32 %v14064_v11, %v1432_v32  ;;  %v1486_v36 = vld [vmem:[#allocation2 + $0x180] sm:$0xff]  ;;  %v1861_v55 = vld [vmem:[#allocation3 + $0xa8] sm:$0xff] }
 0x12f   : > { %v1733_v37 = vadd.f32 %v1717_v52, %v1680_v30  ;;  %11799 = vmatmul.mubr.msk.bf16.gmra.mxu0 %vm334_vm0, %v14307_v51  ;;  %11823 = vmatmul.mubr.msk.bf16.gmra.mxu1 %vm334_vm0, %v14309_v28  ;;  %v1454_v62 = vmul.f32 %v14031_v42, %v1433_v2  ;;  %v1612_v63 = vmul.f32 %v14064_v11, %v1433_v2  ;;  %v1894_v43 = vld [vmem:[#allocation3 + $0xb1] sm:$0xff]  ;;  %v1699_v6 = vld [vmem:[#allocation2 + $0x199] sm:$0xff] }
 0x130   : > { %v1785_v0 = vadd.f32 %v1769_v54, %v1732_v48  ;;  %11802 = vmatprep.mubr.msk.bf16.mxu0 %vm334_vm0, %v14313_v31  ;;  %11826 = vmatprep.mubr.msk.bf16.mxu1 %vm334_vm0, %v14315_v23  ;;  %v1469_v52 = vadd.f32 %v1453_v1, %v1416_v12  ;;  %v1627_v32 = vadd.f32 %v1611_v33, %v1574_v26  ;;  %v1647_v4 = vld [vmem:[#allocation2 + $0x1a0] sm:$0xff]  ;;  %v2202_v26 = vld [vmem:[#allocation3 + $0x2] sm:$0xff] }
 0x131   : > { %v1786_v5 = vadd.f32 %v1770_v40, %v1733_v37  ;;  %v1561_v49 = vmul.f32 %v14038_v57, %v1540_v46  ;;  %v1614_v2 = vmul.f32 %v14064_v11, %v1593_v35  ;;  %v1719_v47 = vmul.f32 %v14075_v44, %v1540_v46  ;;  %v1592_v40 = vld [vmem:[#allocation2 + $0x182] sm:$0xff]  ;;  %v2203_v30 = vld [vmem:[#allocation3 + $0xa] sm:$0xff] }
 0x132   : > { %v1808_v42 = vadd.f32 %v14112_v25, %v1785_v0  ;;  %v1470_v45 = vadd.f32 %v1454_v62, %v1417_v20  ;;  %v1772_v58 = vmul.f32 %v14091_v60, %v1593_v35  ;;  %v1628_v17 = vadd.f32 %v1612_v63, %v1575_v22  ;;  %v1862_v15 = vld [vmem:[#allocation3 + $0xb0] sm:$0xff] }
 0x133   : > { %v1809_v9 = vadd.f32 %v14112_v25, %v1786_v5  ;;  %v1507_v1 = vmul.f32 %v14043_v59, %v1486_v36  ;;  %v1667_v12 = vmul.f32 %v14080_v8, %v1646_v14  ;;  %v1508_v19 = vmul.f32 %v14043_v59, %v1487_v27  ;;  %v1752_v0 = vld [vmem:[#allocation2 + $0x19a] sm:$0xff] }
 0x134   : > { %v1824_v56 = vmax.f32 %v1808_v42, 0.0  ;;  %v1560_v21 = vmul.f32 %v14038_v57, %v1539_v50  ;;  %v1665_v39 = vmul.f32 %v14080_v8, %v1486_v36  ;;  %v1666_v38 = vmul.f32 %v14080_v8, %v1487_v27  ;;  %v1700_v57 = vld [vmem:[#allocation2 + $0x1a1] sm:$0xff] }
 0x135   : > { %v1825_v24 = vmax.f32 %v1809_v9, 0.0  ;;  %v1523_v20 = vadd.f32 %v1507_v1, %v1469_v52  ;;  %v1524_v48 = vadd.f32 %v1508_v19, %v1470_v45  ;;  %v1613_v54 = vmul.f32 %v14064_v11, %v1592_v40 }
 0x136   : > { %1841 = vst.msk [vmem:[#allocation3 + $0x151] sm:$0xff] %vm334_vm0, %v1824_v56  ;;  %v1718_v59 = vmul.f32 %v14075_v44, %v1539_v50  ;;  %v14343_v46 = vpack.c.bf16 %v1894_v43, %v1893_v10  ;;  %v1681_v33 = vadd.f32 %v1665_v39, %v1627_v32  ;;  %v1682_v37 = vadd.f32 %v1666_v38, %v1628_v17  ;;  %v1753_v50 = vld [vmem:[#allocation2 + $0x1a2] sm:$0xff]  ;;  %v2205_v17 = vld [vmem:[#allocation3 + $0x22] sm:$0xff]  ;;  %v2207_v56 = vld [vmem:[#allocation3 + $0x3a] sm:$0xff] }
 0x137   : > { %1842 = vst.msk [vmem:[#allocation3 + $0x159] sm:$0xff] %vm334_vm0, %v1825_v24  ;;  %v1576_v22 = vadd.f32 %v1560_v21, %v1523_v20  ;;  %v14346_v35 = vpack.c.bf16 %v1862_v15, %v1861_v55  ;;  %v1668_v62 = vmul.f32 %v14080_v8, %v1647_v4  ;;  %v1720_v63 = vmul.f32 %v14075_v44, %v1699_v6  ;;  %v2206_v43 = vld [vmem:[#allocation3 + $0x32] sm:$0xff]  ;;  %v12854_v55 = vld [vmem:[%s17905_s3 + $0xb0] sm:$0xff]   ;;  %v2208_v39 = vld [vmem:[#allocation3 + $0x4a] sm:$0xff] }
 0x138   : > { %v1577_v36 = vadd.f32 %v1561_v49, %v1524_v48  ;;  %11803 = vmatmul.mubr.msk.bf16.gmra.mxu0 %vm334_vm0, %v14343_v46  ;;  %v2218_v11 = vpack.c.bf16 %v2203_v30, %v2202_v26  ;;  %v1734_v5 = vadd.f32 %v1718_v59, %v1681_v33  ;;  %v1735_v14 = vadd.f32 %v1719_v47, %v1682_v37  ;;  %v2204_v47 = vld [vmem:[#allocation3 + $0x1a] sm:$0xff]  ;;  %v2209_v38 = vld [vmem:[#allocation3 + $0x52] sm:$0xff]  ;;  %v2210_v26 = vld [vmem:[#allocation3 + $0x62] sm:$0xff] }
 0x139   : > { %v1629_v52 = vadd.f32 %v1613_v54, %v1576_v22  ;;  %v1771_v27 = vmul.f32 %v14091_v60, %v1592_v40  ;;  %11827 = vmatmul.mubr.msk.bf16.gmra.mxu1 %vm334_vm0, %v14346_v35  ;;  %v1721_v32 = vmul.f32 %v14075_v44, %v1700_v57  ;;  %v1773_v49 = vmul.f32 %v14091_v60, %v1752_v0  ;;  %v12855_v6 = vld [vmem:[%s17905_s3 + $0x88] sm:$0xff]   ;;  %v12858_v57 = vld [vmem:[%s17905_s3 + $0xa0] sm:$0xff]   ;;  %v2213_v22 = vld [vmem:[#allocation3 + $0x82] sm:$0xff] }
 0x13a   : > { %v1630_v8 = vadd.f32 %v1614_v2, %v1577_v36  ;;  %11862 = vmatprep.mubr.msk.bf16.mxu1 %vm334_vm0, %v14139_v13  ;;  %11838 = vmatprep.mubr.msk.bf16.mxu0 %vm334_vm0, %v2218_v11  ;;  %v1788_v9 = vadd.f32 %v1772_v58, %v1735_v14  ;;  %v1774_v40 = vmul.f32 %v14091_v60, %v1753_v50  ;;  %v12853_v58 = vld [vmem:[%s17905_s3 + $0x90] sm:$0xff]   ;;  %v12859_v33 = vld [vmem:[%s17905_s3 + $0xd8] sm:$0xff]   ;;  %v2214_v37 = vld [vmem:[#allocation3 + $0x92] sm:$0xff] }
 0x13b   : > { %v1683_v42 = vadd.f32 %v1667_v12, %v1629_v52  ;;  %v1787_v45 = vadd.f32 %v1771_v27, %v1734_v5  ;;  %v14363_v4 = vpack.c.bf16 %v2205_v17, %v2204_v47  ;;  %v14370_v60 = vpack.c.bf16 %v2207_v56, %v2206_v43  ;;  %v2216_v11 = vld [vmem:[#allocation3 + $0xaa] sm:$0xff]  ;;  %v2217_v52 = vld [vmem:[#allocation3 + $0xb2] sm:$0xff]  ;;  %v2410_v5 = vld [vmem:[#allocation3 + $0xc0] sm:$0xff] }
 0x13c   : > { %v1684_v1 = vadd.f32 %v1668_v62, %v1630_v8  ;;  %v1811_v2 = vadd.f32 %v14112_v25, %v1788_v9  ;;  %v14394_v48 = vpack.c.bf16 %v2209_v38, %v2208_v39  ;;  %v2215_v62 = vld [vmem:[#allocation3 + $0x9a] sm:$0xff]  ;;  %v2411_v14 = vld [vmem:[#allocation3 + $0xc8] sm:$0xff]  ;;  %v14431_v27 = vpack.c.bf16 %v2217_v52, %v2216_v11  ;;  %v2979_v43 = vld [vmem:[#allocation3 + $0x30] sm:$0xff] }
 0x13d   : > { %v1736_v10 = vadd.f32 %v1720_v63, %v1683_v42  ;;  %v1810_v44 = vadd.f32 %v14112_v25, %v1787_v45  ;;  %v12860_v63 = vld [vmem:[%s17905_s3 + $0xf8] sm:$0xff]   ;;  %v14421_v36 = vpack.c.bf16 %v2215_v62, %v2214_v37  ;;  %v12861_v50 = vld [vmem:[%s17905_s3 + $0xd0] sm:$0xff]   ;;  %v12866_v42 = vld [vmem:[%s17905_s3 + $0xe0] sm:$0xff]  }
 0x13e   : > { %v1737_v13 = vadd.f32 %v1721_v32, %v1684_v1  ;;  %v1827_v12 = vmax.f32 %v1811_v2, 0.0  ;;  %v14433_v32 = vpack.c.bf16 %v2411_v14, %v2410_v5  ;;  %v12862_v8 = vld [vmem:[%s17905_s3 + $0xf0] sm:$0xff]   ;;  %v12867_v45 = vld [vmem:[%s17905_s3 + $0x118] sm:$0xff]   ;;  %v3662_v37 = vld [vmem:[#allocation3 + $0x151] sm:$0xff] }
 0x13f   : > { %v1789_v19 = vadd.f32 %v1773_v49, %v1736_v10  ;;  %v1826_v21 = vmax.f32 %v1810_v44, 0.0  ;;  %v12865_v49 = vld [vmem:[%s17905_s3 + $0xc0] sm:$0xff]   ;;  %v12868_v9 = vld [vmem:[%s17905_s3 + $0x38] sm:$0xff]   ;;  %v2980_v10 = vld [vmem:[#allocation3 + $0x38] sm:$0xff] }
 0x140   : > { %11839 = vmatmul.mubr.msk.bf16.vlgmr.msra.gmra.mxu0 %vm334_vm0, %v14363_v4  ;;  %v1790_v15 = vadd.f32 %v1774_v40, %v1737_v13  ;;  %1844 = vst.msk [vmem:[#allocation3 + $0x171] sm:$0xff] %vm334_vm0, %v1827_v12  ;;  %v2604_v47 = vld [vmem:[#allocation3 + $0xc1] sm:$0xff]  ;;  %v2605_v17 = vld [vmem:[#allocation3 + $0xc9] sm:$0xff]  ;;  %v3174_v44 = vld [vmem:[#allocation3 + $0x39] sm:$0xff]  ;;  %v2995_v13 = vpack.c.bf16 %v2980_v10, %v2979_v43 }
 0x141   : > { %v1812_v24 = vadd.f32 %v14112_v25, %v1789_v19  ;;  %1843 = vst.msk [vmem:[#allocation3 + $0x169] sm:$0xff] %vm334_vm0, %v1826_v21  ;;  %11863 = vmatmul.mubr.msk.bf16.vlgmr.msra.gmra.mxu1 %vm334_vm0, %v14192_v16  ;;  %11879 = vmatpush3.bf16.msra.mxu0 %v14219_v41  ;;  %v2211_v16 = vld [vmem:[#allocation3 + $0x6a] sm:$0xff]  ;;  %v12856_v41 = vld [vmem:[%s17905_s3 + $0xa8] sm:$0xff]   ;;  %v2798_v1 = vld [vmem:[#allocation3 + $0xc2] sm:$0xff]  ;;  %v2613_v2 = vpack.c.bf16 %v2605_v17, %v2604_v47 }
 0x142   : > { %11842 = vmatprep.mubr.msk.bf16.mxu0 %vm334_vm0, %v14370_v60  ;;  %11866 = vmatprep.mubr.msk.bf16.mxu1 %vm334_vm0, %v14248_v18  ;;  %v1813_v30 = vadd.f32 %v14112_v25, %v1790_v15  ;;  %v14396_v54 = vpack.c.bf16 %v2211_v16, %v2210_v26  ;;  %v2212_v25 = vld [vmem:[#allocation3 + $0x7a] sm:$0xff]  ;;  %v2799_v40 = vld [vmem:[#allocation3 + $0xca] sm:$0xff]  ;;  %v3382_v11 = vld [vmem:[#allocation3 + $0xe2] sm:$0xff] }
 0x143   : > { %v1828_v20 = vmax.f32 %v1812_v24, 0.0  ;;  %11903 = vmatpush3.bf16.msra.mxu1 %v14227_v53  ;;  %11880 = vmatprep.subr.bf16.mxu0 %v12853_v58  ;;  %v12857_v53 = vld [vmem:[%s17905_s3 + $0x80] sm:$0xff]   ;;  %v14419_v0 = vpack.c.bf16 %v2213_v22, %v2212_v25  ;;  %v14491_v56 = vpack.c.bf16 %v2799_v40, %v2798_v1  ;;  %v12869_v21 = vld [vmem:[%s17905_s3 + $0x110] sm:$0xff]   ;;  %v12880_v16 = vld [vmem:[%s17905_s3 + $0x48] sm:$0xff]  }
 0x144   : > { %11904 = vmatprep.subr.bf16.mxu1 %v12854_v55  ;;  %v1829_v59 = vmax.f32 %v1813_v30, 0.0  ;;  %v12870_v12 = vld [vmem:[%s17905_s3 + $0x30] sm:$0xff]   ;;  %v3656_v38 = vld [vmem:[#allocation3 + $0x109] sm:$0xff]  ;;  %v3657_v26 = vld [vmem:[#allocation3 + $0x111] sm:$0xff] }
 0x145   : > { %1845 = vst.msk [vmem:[#allocation3 + $0x181] sm:$0xff] %vm334_vm0, %v1828_v20  ;;  %11881 = vmatpush3.bf16.msra.mxu0 %v12853_v58  ;;  %v12871_v58 = vld [vmem:[%s17905_s3 + $0x108] sm:$0xff]   ;;  %v12878_v39 = vld [vmem:[%s17905_s3 + $0x50] sm:$0xff]   ;;  %v3659_v30 = vld [vmem:[#allocation3 + $0x129] sm:$0xff] }
 0x146   : > { %11882 = vmatprep.subr.bf16.mxu0 %v12855_v6  ;;  %1846 = vst.msk [vmem:[#allocation3 + $0x189] sm:$0xff] %vm334_vm0, %v1829_v59  ;;  %v12882_v59 = vld [vmem:[%s17905_s3 + $0x40] sm:$0xff]   ;;  %v3660_v25 = vld [vmem:[#allocation3 + $0x139] sm:$0xff]  ;;  %v3661_v22 = vld [vmem:[#allocation3 + $0x141] sm:$0xff] }
 0x147   : > { %11905 = vmatpush3.bf16.msra.mxu1 %v12854_v55  ;;  %v3188_v55 = vld [vmem:[#allocation3 + $0xe1] sm:$0xff]  ;;  %v3663_v62 = vld [vmem:[#allocation3 + $0x159] sm:$0xff]  ;;  %v3665_v5 = vld [vmem:[#allocation3 + $0x171] sm:$0xff] }
 0x148   : > { %11843 = vmatmul.mubr.msk.bf16.gmra.mxu0 %vm334_vm0, %v14394_v48  ;;  %11906 = vmatprep.subr.bf16.mxu1 %v12856_v41  ;;  %v3664_v52 = vld [vmem:[#allocation3 + $0x169] sm:$0xff]  ;;  %v12887_v47 = vld [vmem:[%s17905_s3 + $0x68] sm:$0xff]   ;;  %v3626_v10 = vld [vmem:[#allocation3 + $0x120] sm:$0xff] }
 0x149   : > { %11867 = vmatmul.mubr.msk.bf16.gmra.mxu1 %vm334_vm0, %v14253_v34  ;;  %11846 = vmatprep.mubr.msk.bf16.mxu0 %vm334_vm0, %v14396_v54  ;;  %v3625_v17 = vld [vmem:[#allocation3 + $0x110] sm:$0xff]  ;;  %v3980_v43 = vld [vmem:[#allocation3 + $0x122] sm:$0xff] }
 0x14a   : > { %11870 = vmatprep.mubr.msk.bf16.mxu1 %vm334_vm0, %v14309_v28  ;;  %11883 = vmatpush3.bf16.msra.mxu0 %v12855_v6  ;;  %v12877_v6 = vld [vmem:[%s17905_s3 + $0x10] sm:$0xff]   ;;  %v3978_v1 = vld [vmem:[#allocation3 + $0x10a] sm:$0xff]  ;;  %v3979_v40 = vld [vmem:[#allocation3 + $0x112] sm:$0xff] }
 0x14b   : > { %11907 = vmatpush3.bf16.msra.mxu1 %v12856_v41  ;;  %11884 = vmatprep.subr.bf16.mxu0 %v12857_v53  ;;  %v3658_v41 = vld [vmem:[#allocation3 + $0x121] sm:$0xff] }
 0x14c   : > { %11908 = vmatprep.subr.bf16.mxu1 %v12858_v57 }
 0x14e   : > { %11885 = vmatpush3.bf16.msra.mxu0 %v12857_v53  ;;  %v14585_v53 = vpack.c.bf16 %v3659_v30, %v3658_v41  ;;  %v3984_v30 = vld [vmem:[#allocation3 + $0x152] sm:$0xff] }
 0x14f   : > { %11909 = vmatpush3.bf16.msra.mxu1 %v12858_v57  ;;  %11926 = vmatprep.subr.bf16.mxu0 %v12859_v33  ;;  %v12883_v57 = vld [vmem:[%s17905_s3 + $0x78] sm:$0xff]  }
 0x150   : > { %11847 = vmatmul.mubr.msk.bf16.gmra.mxu0 %vm334_vm0, %v14419_v0  ;;  %11950 = vmatprep.subr.bf16.mxu1 %v12860_v63 }
 0x151   : > { %11871 = vmatmul.mubr.msk.bf16.gmra.mxu1 %vm334_vm0, %v14315_v23  ;;  %11850 = vmatprep.mubr.msk.bf16.mxu0 %vm334_vm0, %v14421_v36 }
 0x152   : > { %11874 = vmatprep.mubr.msk.bf16.mxu1 %vm334_vm0, %v14346_v35 }
 0x158   : > { %11851 = vmatmul.mubr.msk.bf16.gmra.mxu0 %vm334_vm0, %v14431_v27 }
 0x159   : > { %11875 = vmatmul.mubr.msk.bf16.gmra.mxu1 %vm334_vm0, %v14433_v32  ;;  %11886 = vmatprep.mubr.msk.bf16.mxu0 %vm334_vm0, %v14134_v61  ;;  %v12863_v61 = vld [vmem:[%s17905_s3 + $0xc8] sm:$0xff]  }
 0x15a   : > { %11910 = vmatprep.mubr.msk.bf16.mxu1 %vm334_vm0, %v14363_v4  ;;  %v3173_v4 = vld [vmem:[#allocation3 + $0x31] sm:$0xff] }
 0x15b   : > { %v3189_v19 = vpack.c.bf16 %v3174_v44, %v3173_v4  ;;  %v3627_v44 = vld [vmem:[#allocation3 + $0x128] sm:$0xff] }
 0x160   : > { %11887 = vmatmul.mubr.msk.bf16.vlgmr.msra.gmra.mxu0 %vm334_vm0, %v14188_v7  ;;  %v12864_v7 = vld [vmem:[%s17905_s3 + $0xe8] sm:$0xff]  }
 0x161   : > { %11911 = vmatmul.mubr.msk.bf16.vlgmr.msra.gmra.mxu1 %vm334_vm0, %v14370_v60  ;;  %11927 = vmatpush3.bf16.msra.mxu0 %v12859_v33  ;;  %v12884_v33 = vld [vmem:[%s17905_s3 + $0x98] sm:$0xff]  }
 0x162   : > { %11890 = vmatprep.mubr.msk.bf16.mxu0 %vm334_vm0, %v14246_v3  ;;  %11914 = vmatprep.mubr.msk.bf16.mxu1 %vm334_vm0, %v14394_v48 }
 0x163   : > { %11951 = vmatpush3.bf16.msra.mxu1 %v12860_v63  ;;  %11928 = vmatprep.subr.bf16.mxu0 %v12861_v50  ;;  %v14602_v63 = vpack.c.bf16 %v3661_v22, %v3660_v25 }
 0x164   : > { %11952 = vmatprep.subr.bf16.mxu1 %v12862_v8 }
 0x165   : > { %11929 = vmatpush3.bf16.msra.mxu0 %v12861_v50  ;;  %v14616_v50 = vpack.c.bf16 %v3665_v5, %v3664_v52  ;;  %v3987_v52 = vld [vmem:[#allocation3 + $0x172] sm:$0xff] }
 0x166   : > { %11930 = vmatprep.subr.bf16.mxu0 %v12863_v61 }
 0x167   : > { %11953 = vmatpush3.bf16.msra.mxu1 %v12862_v8  ;;  %v3623_v8 = vld [vmem:[#allocation3 + $0xf8] sm:$0xff] }
 0x168   : > { %11891 = vmatmul.mubr.msk.bf16.gmra.mxu0 %vm334_vm0, %v14250_v29  ;;  %11954 = vmatprep.subr.bf16.mxu1 %v12864_v7 }
 0x169   : > { %11915 = vmatmul.mubr.msk.bf16.gmra.mxu1 %vm334_vm0, %v14396_v54  ;;  %11894 = vmatprep.mubr.msk.bf16.mxu0 %vm334_vm0, %v14307_v51 }
 0x16a   : > { %11918 = vmatprep.mubr.msk.bf16.mxu1 %vm334_vm0, %v14419_v0  ;;  %11931 = vmatpush3.bf16.msra.mxu0 %v12863_v61  ;;  %v3976_v61 = vld [vmem:[#allocation3 + $0xf2] sm:$0xff] }
 0x16b   : > { %11955 = vmatpush3.bf16.msra.mxu1 %v12864_v7  ;;  %11932 = vmatprep.subr.bf16.mxu0 %v12865_v49  ;;  %v3977_v7 = vld [vmem:[#allocation3 + $0xfa] sm:$0xff] }
 0x16c   : > { %11956 = vmatprep.subr.bf16.mxu1 %v12866_v42 }
 0x16e   : > { %11933 = vmatpush3.bf16.msra.mxu0 %v12865_v49  ;;  %v12885_v49 = vld [vmem:[%s17905_s3 + $0x70] sm:$0xff]  }
 0x16f   : > { %11957 = vmatpush3.bf16.msra.mxu1 %v12866_v42  ;;  %11974 = vmatprep.subr.bf16.mxu0 %v12867_v45 }
 0x170   : > { %11895 = vmatmul.mubr.msk.bf16.gmra.mxu0 %vm334_vm0, %v14313_v31  ;;  %11998 = vmatprep.subr.bf16.mxu1 %v12868_v9 }
 0x171   : > { %11919 = vmatmul.mubr.msk.bf16.gmra.mxu1 %vm334_vm0, %v14421_v36  ;;  %11898 = vmatprep.mubr.msk.bf16.mxu0 %vm334_vm0, %v14343_v46 }
 0x172   : > { %11922 = vmatprep.mubr.msk.bf16.mxu1 %vm334_vm0, %v14431_v27 }
 0x178   : > { %11899 = vmatmul.mubr.msk.bf16.gmra.mxu0 %vm334_vm0, %v2613_v2 }
 0x179   : > { %11923 = vmatmul.mubr.msk.bf16.gmra.mxu1 %vm334_vm0, %v14491_v56  ;;  %11934 = vmatprep.mubr.msk.bf16.mxu0 %vm334_vm0, %v2995_v13 }
 0x17a   : > { %11958 = vmatprep.mubr.msk.bf16.mxu1 %vm334_vm0, %v3189_v19  ;;  %v14652_v19 = vpack.c.bf16 %v3979_v40, %v3978_v1 }
 0x180   : > { %11935 = vmatmul.mubr.msk.bf16.vlgmr.msra.gmra.mxu0 %vm334_vm0, %v14248_v18  ;;  %v12872_v18 = vld [vmem:[%s17905_s3 + $0x28] sm:$0xff]  }
 0x181   : > { %11959 = vmatmul.mubr.msk.bf16.vlgmr.msra.gmra.mxu1 %vm334_vm0, %v14246_v3  ;;  %11975 = vmatpush3.bf16.msra.mxu0 %v12867_v45  ;;  %v12873_v3 = vld [vmem:[%s17905_s3 + $0x100] sm:$0xff]   ;;  %v14633_v45 = vpack.c.bf16 %v3977_v7, %v3976_v61 }
 0x182   : > { %11938 = vmatprep.mubr.msk.bf16.mxu0 %vm334_vm0, %v14253_v34  ;;  %11962 = vmatprep.mubr.msk.bf16.mxu1 %vm334_vm0, %v14250_v29  ;;  %v12874_v29 = vld [vmem:[%s17905_s3 + $0x20] sm:$0xff]   ;;  %v12875_v34 = vld [vmem:[%s17905_s3 + $0x18] sm:$0xff]  }
 0x183   : > { %11999 = vmatpush3.bf16.msra.mxu1 %v12868_v9  ;;  %11976 = vmatprep.subr.bf16.mxu0 %v12869_v21  ;;  %v3624_v9 = vld [vmem:[#allocation3 + $0x108] sm:$0xff] }
 0x184   : > { %12000 = vmatprep.subr.bf16.mxu1 %v12870_v12  ;;  %v14650_v13 = vpack.c.bf16 %v3625_v17, %v3624_v9 }
 0x185   : > { %11977 = vmatpush3.bf16.msra.mxu0 %v12869_v21  ;;  %v14654_v21 = vpack.c.bf16 %v3627_v44, %v3626_v10 }
 0x186   : > { %11978 = vmatprep.subr.bf16.mxu0 %v12871_v58 }
 0x187   : > { %12001 = vmatpush3.bf16.msra.mxu1 %v12870_v12  ;;  %v12889_v12 = vld [vmem:[%s17905_s3 + $0x60] sm:$0xff]  }
 0x188   : > { %11939 = vmatmul.mubr.msk.bf16.gmra.mxu0 %vm334_vm0, %v14309_v28  ;;  %12002 = vmatprep.subr.bf16.mxu1 %v12872_v18  ;;  %v12876_v28 = vld [vmem:[%s17905_s3 + $0x58] sm:$0xff]  }
 0x189   : > { %11963 = vmatmul.mubr.msk.bf16.gmra.mxu1 %vm334_vm0, %v14307_v51  ;;  %11942 = vmatprep.mubr.msk.bf16.mxu0 %vm334_vm0, %v14315_v23  ;;  %v2993_v51 = vld [vmem:[#allocation3 + $0xd8] sm:$0xff] }
 0x18a   : > { %11966 = vmatprep.mubr.msk.bf16.mxu1 %vm334_vm0, %v14313_v31  ;;  %11979 = vmatpush3.bf16.msra.mxu0 %v12871_v58  ;;  %v2994_v31 = vld [vmem:[#allocation3 + $0xe0] sm:$0xff] }
 0x18b   : > { %12003 = vmatpush3.bf16.msra.mxu1 %v12872_v18  ;;  %11980 = vmatprep.subr.bf16.mxu0 %v12873_v3  ;;  %v3187_v23 = vld [vmem:[#allocation3 + $0xd9] sm:$0xff]  ;;  %v14545_v15 = vpack.c.bf16 %v2994_v31, %v2993_v51 }
 0x18c   : > { %12004 = vmatprep.subr.bf16.mxu1 %v12874_v29  ;;  %v14547_v24 = vpack.c.bf16 %v3188_v55, %v3187_v23  ;;  %v3628_v51 = vld [vmem:[#allocation3 + $0x138] sm:$0xff]  ;;  %v3629_v31 = vld [vmem:[#allocation3 + $0x140] sm:$0xff] }
 0x18e   : > { %11981 = vmatpush3.bf16.msra.mxu0 %v12873_v3  ;;  %v12890_v3 = vld [vmem:[%s17905_s3 + $0x80] sm:$0xff]  }
 0x18f   : > { %12005 = vmatpush3.bf16.msra.mxu1 %v12874_v29  ;;  %12022 = vmatprep.subr.bf16.mxu0 %v12875_v34 }
 0x190   : > { %11943 = vmatmul.mubr.msk.bf16.gmra.mxu0 %vm334_vm0, %v14346_v35  ;;  %12046 = vmatprep.subr.bf16.mxu1 %v12876_v28  ;;  %v3655_v35 = vld [vmem:[#allocation3 + $0xf9] sm:$0xff] }
 0x191   : > { %11967 = vmatmul.mubr.msk.bf16.gmra.mxu1 %vm334_vm0, %v14343_v46  ;;  %11946 = vmatprep.mubr.msk.bf16.mxu0 %vm334_vm0, %v14433_v32  ;;  %v3654_v46 = vld [vmem:[#allocation3 + $0xf1] sm:$0xff] }
 0x192   : > { %11970 = vmatprep.mubr.msk.bf16.mxu1 %vm334_vm0, %v2613_v2  ;;  %v14561_v20 = vpack.c.bf16 %v3655_v35, %v3654_v46  ;;  %v3982_v46 = vld [vmem:[#allocation3 + $0x13a] sm:$0xff]  ;;  %v3983_v35 = vld [vmem:[#allocation3 + $0x142] sm:$0xff] }
 0x193   : > { %v14688_v22 = vpack.c.bf16 %v3983_v35, %v3982_v46 }
 0x198   : > { %11947 = vmatmul.mubr.msk.bf16.gmra.mxu0 %vm334_vm0, %v14545_v15 }
 0x199   : > { %11971 = vmatmul.mubr.msk.bf16.gmra.mxu1 %vm334_vm0, %v14547_v24  ;;  %11982 = vmatprep.mubr.msk.bf16.mxu0 %vm334_vm0, %v14370_v60  ;;  %v12879_v60 = vld [vmem:[%s17905_s3 + $0x8] sm:$0xff]  }
 0x19a   : > { %12006 = vmatprep.mubr.msk.bf16.mxu1 %vm334_vm0, %v2613_v2  ;;  %v12888_v2 = vld [vmem:[%s17905_s3 + $0x88] sm:$0xff]  }
 0x1a0   : > { %11983 = vmatmul.mubr.msk.bf16.vlgmr.msra.gmra.mxu0 %vm334_vm0, %v14394_v48  ;;  %v14578_v48 = vpack.c.bf16 %v3657_v26, %v3656_v38  ;;  %v3631_v38 = vld [vmem:[#allocation3 + $0x158] sm:$0xff]  ;;  %v12892_v26 = vld [vmem:[%s17905_s3 + $0xd8] sm:$0xff]  }
 0x1a1   : > { %12007 = vmatmul.mubr.msk.bf16.vlgmr.msra.gmra.mxu1 %vm334_vm0, %v14547_v24  ;;  %12023 = vmatpush3.bf16.msra.mxu0 %v12875_v34 }
 0x1a2   : > { %11986 = vmatprep.mubr.msk.bf16.mxu0 %vm334_vm0, %v14396_v54  ;;  %12010 = vmatprep.mubr.msk.bf16.mxu1 %vm334_vm0, %v14561_v20  ;;  %v12881_v54 = vld [vmem:[%s17905_s3] sm:$0xff]  }
 0x1a3   : > { %12047 = vmatpush3.bf16.msra.mxu1 %v12876_v28  ;;  %12024 = vmatprep.subr.bf16.mxu0 %v12877_v6 }
 0x1a4   : > { %12048 = vmatprep.subr.bf16.mxu1 %v12878_v39 }
 0x1a5   : > { %12025 = vmatpush3.bf16.msra.mxu0 %v12877_v6  ;;  %v12891_v6 = vld [vmem:[%s17905_s3 + $0xb8] sm:$0xff]  }
 0x1a6   : > { %12026 = vmatprep.subr.bf16.mxu0 %v12879_v60 }
 0x1a7   : > { %12049 = vmatpush3.bf16.msra.mxu1 %v12878_v39 }
 0x1a8   : > { %11987 = vmatmul.mubr.msk.bf16.gmra.mxu0 %vm334_vm0, %v14419_v0  ;;  %12050 = vmatprep.subr.bf16.mxu1 %v12880_v16  ;;  %v14606_v0 = vpack.c.bf16 %v3663_v62, %v3662_v37  ;;  %v3632_v62 = vld [vmem:[#allocation3 + $0x168] sm:$0xff] }
 0x1a9   : > { %12011 = vmatmul.mubr.msk.bf16.gmra.mxu1 %vm334_vm0, %v14578_v48  ;;  %11990 = vmatprep.mubr.msk.bf16.mxu0 %vm334_vm0, %v14421_v36  ;;  %v3381_v36 = vld [vmem:[#allocation3 + $0xda] sm:$0xff] }
 0x1aa   : > { %12014 = vmatprep.mubr.msk.bf16.mxu1 %vm334_vm0, %v14585_v53  ;;  %12027 = vmatpush3.bf16.msra.mxu0 %v12879_v60  ;;  %v14614_v14 = vpack.c.bf16 %v3382_v11, %v3381_v36  ;;  %v3630_v60 = vld [vmem:[#allocation3 + $0x150] sm:$0xff] }
 0x1ab   : > { %12051 = vmatpush3.bf16.msra.mxu1 %v12880_v16  ;;  %12028 = vmatprep.subr.bf16.mxu0 %v12881_v54  ;;  %v3633_v36 = vld [vmem:[#allocation3 + $0x170] sm:$0xff] }
 0x1ac   : > { %12052 = vmatprep.subr.bf16.mxu1 %v12882_v59  ;;  %v3986_v11 = vld [vmem:[#allocation3 + $0x16a] sm:$0xff]  ;;  %v14702_v5 = vpack.c.bf16 %v3633_v36, %v3632_v62 }
 0x1ae   : > { %12029 = vmatpush3.bf16.msra.mxu0 %v12881_v54  ;;  %v3985_v54 = vld [vmem:[#allocation3 + $0x15a] sm:$0xff] }
 0x1af   : > { %12053 = vmatpush3.bf16.msra.mxu1 %v12882_v59  ;;  %12070 = vmatprep.subr.bf16.mxu0 %v12883_v57  ;;  %v14694_v37 = vpack.c.bf16 %v3985_v54, %v3984_v30 }
 0x1b0   : > { %11991 = vmatmul.mubr.msk.bf16.gmra.mxu0 %vm334_vm0, %v14431_v27  ;;  %12094 = vmatprep.subr.bf16.mxu1 %v12884_v33  ;;  %v3622_v27 = vld [vmem:[#allocation3 + $0xf0] sm:$0xff] }
 0x1b1   : > { %12015 = vmatmul.mubr.msk.bf16.gmra.mxu1 %vm334_vm0, %v14602_v63  ;;  %11994 = vmatprep.mubr.msk.bf16.mxu0 %vm334_vm0, %v14491_v56  ;;  %v14631_v42 = vpack.c.bf16 %v3623_v8, %v3622_v27  ;;  %v14704_v27 = vpack.c.bf16 %v3987_v52, %v3986_v11 }
 0x1b2   : > { %12018 = vmatprep.mubr.msk.bf16.mxu1 %vm334_vm0, %v14606_v0 }
 0x1b8   : > { %11995 = vmatmul.mubr.msk.bf16.gmra.mxu0 %vm334_vm0, %v14614_v14 }
 0x1b9   : > { %12019 = vmatmul.mubr.msk.bf16.gmra.mxu1 %vm334_vm0, %v14616_v50  ;;  %12030 = vmatprep.mubr.msk.bf16.mxu0 %vm334_vm0, %v14433_v32  ;;  %v12886_v32 = vld [vmem:[%s17905_s3 + $0x90] sm:$0xff]  }
 0x1ba   : > { %12054 = vmatprep.mubr.msk.bf16.mxu1 %vm334_vm0, %v14491_v56  ;;  %v3981_v56 = vld [vmem:[#allocation3 + $0x12a] sm:$0xff] }
 0x1bb   : > { %v14661_v18 = vpack.c.bf16 %v3981_v56, %v3980_v43  ;;  %v12896_v43 = vld [vmem:[%s17905_s3 + $0xc8] sm:$0xff]   ;;  %v12897_v56 = vld [vmem:[%s17905_s3 + $0xa0] sm:$0xff]  }
 0x1c0   : > { %12031 = vmatmul.mubr.msk.bf16.vlgmr.msra.gmra.mxu0 %vm334_vm0, %v14545_v15 }
 0x1c1   : > { %12055 = vmatmul.mubr.msk.bf16.vlgmr.msra.gmra.mxu1 %vm334_vm0, %v14614_v14  ;;  %12071 = vmatpush3.bf16.msra.mxu0 %v12883_v57  ;;  %v14684_v57 = vpack.c.bf16 %v3629_v31, %v3628_v51 }
 0x1c2   : > { %12034 = vmatprep.mubr.msk.bf16.mxu0 %vm334_vm0, %v14631_v42  ;;  %12058 = vmatprep.mubr.msk.bf16.mxu1 %vm334_vm0, %v14633_v45 }
 0x1c3   : > { %12095 = vmatpush3.bf16.msra.mxu1 %v12884_v33  ;;  %12072 = vmatprep.subr.bf16.mxu0 %v12885_v49  ;;  %v14690_v33 = vpack.c.bf16 %v3631_v38, %v3630_v60  ;;  %v4372_v38 = vld [vmem:[#allocation3 + $0x181] sm:$0xff] }
 0x1c4   : > { %12096 = vmatprep.subr.bf16.mxu1 %v12886_v32 }
 0x1c5   : > { %12073 = vmatpush3.bf16.msra.mxu0 %v12885_v49 }
 0x1c6   : > { %12074 = vmatprep.subr.bf16.mxu0 %v12887_v47  ;;  %v11792_v4 = vpop.f32.mrf.mxu0 }
 0x1c7   : > { %12097 = vmatpush3.bf16.msra.mxu1 %v12886_v32  ;;  %v11816_v58 = vpop.f32.mrf.mxu1 }
 0x1c8   : > { %12035 = vmatmul.mubr.msk.bf16.gmra.mxu0 %vm334_vm0, %v14650_v13  ;;  %12098 = vmatprep.subr.bf16.mxu1 %v12888_v2  ;;  %v14666_v29 = vadd.f32 %v11816_v58, %v11792_v4  ;;  %v1994_v34 = vpop.f32.mrf.mxu0  ;;  %v12898_v4 = vld [vmem:[%s17905_s3 + $0xc0] sm:$0xff]   ;;  %v12900_v58 = vld [vmem:[%s17905_s3 + $0x118] sm:$0xff]  }
 0x1c9   : > { %12059 = vmatmul.mubr.msk.bf16.gmra.mxu1 %vm334_vm0, %v14652_v19  ;;  %12038 = vmatprep.mubr.msk.bf16.mxu0 %vm334_vm0, %v14654_v21  ;;  %v2139_v28 = vpop.f32.mrf.mxu1 }
 0x1ca   : > { %12062 = vmatprep.mubr.msk.bf16.mxu1 %vm334_vm0, %v14661_v18  ;;  %12075 = vmatpush3.bf16.msra.mxu0 %v12887_v47  ;;  %v14674_v23 = vadd.f32 %v2139_v28, %v1994_v34  ;;  %v11793_v55 = vpop.f32.mrf.mxu0  ;;  %v12893_v47 = vld [vmem:[%s17905_s3 + $0xb0] sm:$0xff]  }
 0x1cb   : > { %12099 = vmatpush3.bf16.msra.mxu1 %v12888_v2  ;;  %12076 = vmatprep.subr.bf16.mxu0 %v12889_v12  ;;  %v11817_v39 = vpop.f32.mrf.mxu1  ;;  %v12895_v2 = vld [vmem:[%s17905_s3 + $0xa8] sm:$0xff]  }
 0x1cc   : > { %12100 = vmatprep.subr.bf16.mxu1 %v12890_v3  ;;  %v14682_v16 = vadd.f32 %v11817_v39, %v11793_v55  ;;  %v1997_v41 = vpop.f32.mrf.mxu0  ;;  %v4180_v39 = vld [vmem:[#allocation3 + $0x188] sm:$0xff] }
 0x1cd   : > { %v2142_v59 = vpop.f32.mrf.mxu1 }
 0x1ce   : > { %12077 = vmatpush3.bf16.msra.mxu0 %v12889_v12  ;;  %v14686_v25 = vadd.f32 %v2142_v59, %v1997_v41  ;;  %v12899_v12 = vld [vmem:[%s17905_s3 + $0xf8] sm:$0xff]  }
 0x1cf   : > { %12101 = vmatpush3.bf16.msra.mxu1 %v12890_v3  ;;  %12118 = vmatprep.subr.bf16.mxu0 %v12891_v6 }
 0x1d0   : > { %12039 = vmatmul.mubr.msk.bf16.gmra.mxu0 %vm334_vm0, %v14684_v57  ;;  %12142 = vmatprep.subr.bf16.mxu1 %v12892_v26 }
 0x1d1   : > { %12063 = vmatmul.mubr.msk.bf16.gmra.mxu1 %vm334_vm0, %v14688_v22  ;;  %12042 = vmatprep.mubr.msk.bf16.mxu0 %vm334_vm0, %v14690_v33 }
 0x1d2   : > { %12066 = vmatprep.mubr.msk.bf16.mxu1 %vm334_vm0, %v14694_v37 }
 0x1d8   : > { %12043 = vmatmul.mubr.msk.bf16.gmra.mxu0 %vm334_vm0, %v14702_v5 }
 0x1d9   : > { %12067 = vmatmul.mubr.msk.bf16.gmra.mxu1 %vm334_vm0, %v14704_v27  ;;  %12078 = vmatprep.mubr.msk.bf16.mxu0 %vm334_vm0, %v14545_v15  ;;  %v12894_v15 = vld [vmem:[%s17905_s3 + $0xd0] sm:$0xff]  }
 0x1da   : > { %12102 = vmatprep.mubr.msk.bf16.mxu1 %vm334_vm0, %v14547_v24  ;;  %v11796_v8 = vpop.f32.mrf.mxu0 }
 0x1db   : > { %v11820_v61 = vpop.f32.mrf.mxu1 }
 0x1dc   : > { %v14714_v7 = vadd.f32 %v11820_v61, %v11796_v8  ;;  %v2010_v49 = vpop.f32.mrf.mxu0 }
 0x1dd   : > { %v2155_v32 = vpop.f32.mrf.mxu1 }
 0x1de   : > { %v14716_v9 = vadd.f32 %v2155_v32, %v2010_v49  ;;  %v11797_v17 = vpop.f32.mrf.mxu0 }
 0x1df   : > { %v11821_v1 = vpop.f32.mrf.mxu1 }
 0x1e0   : > { %12079 = vmatmul.mubr.msk.bf16.vlgmr.msra.gmra.mxu0 %vm334_vm0, %v14631_v42  ;;  %v14726_v24 = vadd.f32 %v11821_v1, %v11797_v17  ;;  %v2013_v40 = vpop.f32.mrf.mxu0 }
 0x1e1   : > { %12103 = vmatmul.mubr.msk.bf16.vlgmr.msra.gmra.mxu1 %vm334_vm0, %v14561_v20  ;;  %12119 = vmatpush3.bf16.msra.mxu0 %v12891_v6  ;;  %v2158_v10 = vpop.f32.mrf.mxu1  ;;  %v4179_v6 = vld [vmem:[#allocation3 + $0x180] sm:$0xff] }
 0x1e2   : > { %12082 = vmatprep.mubr.msk.bf16.mxu0 %vm334_vm0, %v14650_v13  ;;  %12106 = vmatprep.mubr.msk.bf16.mxu1 %vm334_vm0, %v14578_v48  ;;  %v14734_v44 = vadd.f32 %v2158_v10, %v2013_v40  ;;  %v14778_v59 = vpack.c.bf16 %v4180_v39, %v4179_v6 }
 0x1e3   : > { %12143 = vmatpush3.bf16.msra.mxu1 %v12892_v26  ;;  %12120 = vmatprep.subr.bf16.mxu0 %v12893_v47  ;;  %v4373_v26 = vld [vmem:[#allocation3 + $0x189] sm:$0xff] }
 0x1e4   : > { %12144 = vmatprep.subr.bf16.mxu1 %v12894_v15  ;;  %v14780_v62 = vpack.c.bf16 %v4373_v26, %v4372_v38 }
 0x1e5   : > { %12121 = vmatpush3.bf16.msra.mxu0 %v12893_v47 }
 0x1e6   : > { %12122 = vmatprep.subr.bf16.mxu0 %v12895_v2 }
 0x1e7   : > { %12145 = vmatpush3.bf16.msra.mxu1 %v12894_v15  ;;  %v12901_v15 = vld [vmem:[%s17905_s3 + $0xf0] sm:$0xff]  }
 0x1e8   : > { %12083 = vmatmul.mubr.msk.bf16.gmra.mxu0 %vm334_vm0, %v14654_v21  ;;  %12146 = vmatprep.subr.bf16.mxu1 %v12896_v43 }
 0x1e9   : > { %12107 = vmatmul.mubr.msk.bf16.gmra.mxu1 %vm334_vm0, %v14585_v53  ;;  %12086 = vmatprep.mubr.msk.bf16.mxu0 %vm334_vm0, %v14684_v57 }
 0x1ea   : > { %12110 = vmatprep.mubr.msk.bf16.mxu1 %vm334_vm0, %v14602_v63  ;;  %12123 = vmatpush3.bf16.msra.mxu0 %v12895_v2 }
 0x1eb   : > { %12147 = vmatpush3.bf16.msra.mxu1 %v12896_v43  ;;  %12124 = vmatprep.subr.bf16.mxu0 %v12897_v56 }
 0x1ec   : > { %12148 = vmatprep.subr.bf16.mxu1 %v12898_v4 }
 0x1ee   : > { %12125 = vmatpush3.bf16.msra.mxu0 %v12897_v56  ;;  %v12903_v56 = vld [vmem:[%s17905_s3 + $0xe8] sm:$0xff]  }
 0x1ef   : > { %v11800_v3 = vpop.f32.mrf.mxu0  ;;  %v11824_v34 = vpop.f32.mrf.mxu1  ;;  %12149 = vmatpush3.bf16.msra.mxu1 %v12898_v4  ;;  %12166 = vmatprep.subr.bf16.mxu0 %v12899_v12 }
 0x1f0   : > { %v14762_v28 = vadd.f32 %v11824_v34, %v11800_v3  ;;  %12087 = vmatmul.mubr.msk.bf16.gmra.mxu0 %vm334_vm0, %v14690_v33  ;;  %12190 = vmatprep.subr.bf16.mxu1 %v12900_v58 }
 0x1f1   : > { %12111 = vmatmul.mubr.msk.bf16.gmra.mxu1 %vm334_vm0, %v14606_v0  ;;  %12090 = vmatprep.mubr.msk.bf16.mxu0 %vm334_vm0, %v14702_v5  ;;  %v2026_v51 = vpop.f32.mrf.mxu0  ;;  %v2171_v31 = vpop.f32.mrf.mxu1 }
 0x1f2   : > { %12114 = vmatprep.mubr.msk.bf16.mxu1 %vm334_vm0, %v14616_v50  ;;  %v14772_v55 = vadd.f32 %v2171_v31, %v2026_v51 }
 0x1f3   : > { %v11801_v46 = vpop.f32.mrf.mxu0  ;;  %v11825_v35 = vpop.f32.mrf.mxu1 }
 0x1f4   : > { %v14774_v60 = vadd.f32 %v11825_v35, %v11801_v46  ;;  %v12905_v35 = vld [vmem:[%s17905_s3 + $0xe0] sm:$0xff]  }
 0x1f5   : > { %v2029_v41 = vpop.f32.mrf.mxu0  ;;  %v2174_v30 = vpop.f32.mrf.mxu1 }
 0x1f6   : > { %v14776_v54 = vadd.f32 %v2174_v30, %v2029_v41 }
 0x1f8   : > { %v11804_v36 = vpop.f32.mrf.mxu0  ;;  %12091 = vmatmul.mubr.msk.bf16.gmra.mxu0 %vm334_vm0, %v14778_v59 }
 0x1f9   : > { %v11828_v50 = vpop.f32.mrf.mxu1  ;;  %12115 = vmatmul.mubr.msk.bf16.gmra.mxu1 %vm334_vm0, %v14780_v62  ;;  %12126 = vmatprep.mubr.msk.bf16.mxu0 %vm334_vm0, %v14614_v14 }
 0x1fa   : > { %v14788_v11 = vadd.f32 %v11828_v50, %v11804_v36  ;;  %12150 = vmatprep.mubr.msk.bf16.mxu1 %vm334_vm0, %v14631_v42  ;;  %v2042_v52 = vpop.f32.mrf.mxu0  ;;  %v12902_v42 = vld [vmem:[%s17905_s3 + $0x110] sm:$0xff]  }
 0x1fb   : > { %v2187_v8 = vpop.f32.mrf.mxu1 }
 0x1fc   : > { %v14792_v61 = vadd.f32 %v2187_v8, %v2042_v52  ;;  %v11805_v49 = vpop.f32.mrf.mxu0 }
 0x1fd   : > { %v11829_v32 = vpop.f32.mrf.mxu1 }
 0x1fe   : > { %v14794_v47 = vadd.f32 %v11829_v32, %v11805_v49  ;;  %v2045_v17 = vpop.f32.mrf.mxu0 }
 0x1ff   : > { %v2190_v1 = vpop.f32.mrf.mxu1 }
 0x200   : > { %v14799_v14 = vadd.f32 %v2190_v1, %v2045_v17  ;;  %v11840_v40 = vpop.f32.mrf.mxu0  ;;  %12127 = vmatmul.mubr.msk.bf16.vlgmr.msra.gmra.mxu0 %vm334_vm0, %v14633_v45 }
 0x201   : > { %v2382_v10 = vadd.f32 %v11840_v40, %v14666_v29  ;;  %v11864_v2 = vpop.f32.mrf.mxu1  ;;  %12151 = vmatmul.mubr.msk.bf16.vlgmr.msra.gmra.mxu1 %vm334_vm0, %v14650_v13  ;;  %12167 = vmatpush3.bf16.msra.mxu0 %v12899_v12  ;;  %v12904_v12 = vld [vmem:[%s17905_s3 + $0x108] sm:$0xff]  }
 0x202   : > { %12130 = vmatprep.mubr.msk.bf16.mxu0 %vm334_vm0, %v14652_v19  ;;  %12154 = vmatprep.mubr.msk.bf16.mxu1 %vm334_vm0, %v14654_v21  ;;  %v2317_v43 = vpop.f32.mrf.mxu0 }
 0x203   : > { %v14816_v4 = vadd.f32 %v11864_v2, %v2382_v10  ;;  %v2380_v29 = vadd.f32 %v2317_v43, %v14674_v23  ;;  %v2511_v3 = vpop.f32.mrf.mxu1  ;;  %12191 = vmatpush3.bf16.msra.mxu1 %v12900_v58  ;;  %12168 = vmatprep.subr.bf16.mxu0 %v12901_v15  ;;  %v4760_v10 = vld [vmem:[#allocation3 + $0x1a0] sm:$0xff] }
 0x204   : > { %v11841_v13 = vpop.f32.mrf.mxu0  ;;  %12192 = vmatprep.subr.bf16.mxu1 %v12902_v42 }
 0x205   : > { %v14822_v34 = vadd.f32 %v2511_v3, %v2380_v29  ;;  %v2383_v21 = vadd.f32 %v11841_v13, %v14682_v16  ;;  %v11865_v51 = vpop.f32.mrf.mxu1  ;;  %12169 = vmatpush3.bf16.msra.mxu0 %v12901_v15  ;;  %v12906_v16 = vld [vmem:[%s17905_s3 + $0x100] sm:$0xff]   ;;  %v4565_v29 = vld [vmem:[#allocation3 + $0x182] sm:$0xff] }
 0x206   : > { %v2320_v31 = vpop.f32.mrf.mxu0  ;;  %12170 = vmatprep.subr.bf16.mxu0 %v12903_v56 }
 0x207   : > { %v14825_v46 = vadd.f32 %v11865_v51, %v2383_v21  ;;  %v2381_v23 = vadd.f32 %v2320_v31, %v14686_v25  ;;  %v2514_v58 = vpop.f32.mrf.mxu1  ;;  %12193 = vmatpush3.bf16.msra.mxu1 %v12902_v42  ;;  %v4759_v42 = vld [vmem:[#allocation3 + $0x198] sm:$0xff] }
 0x208   : > { %v11844_v6 = vpop.f32.mrf.mxu0  ;;  %12131 = vmatmul.mubr.msk.bf16.gmra.mxu0 %vm334_vm0, %v14661_v18  ;;  %12194 = vmatprep.subr.bf16.mxu1 %v12904_v12  ;;  %v4768_v21 = vpack.c.bf16 %v4760_v10, %v4759_v42  ;;  %v4948_v10 = vld [vmem:[#allocation3 + $0x169] sm:$0xff] }
 0x209   : > { %v14836_v39 = vadd.f32 %v2514_v58, %v2381_v23  ;;  %v2386_v38 = vadd.f32 %v11844_v6, %v14714_v7  ;;  %v11868_v25 = vpop.f32.mrf.mxu1  ;;  %12155 = vmatmul.mubr.msk.bf16.gmra.mxu1 %vm334_vm0, %v14684_v57  ;;  %12134 = vmatprep.mubr.msk.bf16.mxu0 %vm334_vm0, %v14688_v22  ;;  %v14851_v7 = vld [vmem:[%s17907_s5 + $0x78] sm:$0xff]  }
 0x20a   : > { %12158 = vmatprep.mubr.msk.bf16.mxu1 %vm334_vm0, %v14690_v33  ;;  %v2333_v26 = vpop.f32.mrf.mxu0  ;;  %12171 = vmatpush3.bf16.msra.mxu0 %v12903_v56  ;;  %v14856_v33 = vld [vmem:[%s17907_s5 + $0x38] sm:$0xff]  }
 0x20b   : > { %v14845_v41 = vadd.f32 %v11868_v25, %v2386_v38  ;;  %v2384_v30 = vadd.f32 %v2333_v26, %v14716_v9  ;;  %v2527_v36 = vpop.f32.mrf.mxu1  ;;  %12195 = vmatpush3.bf16.msra.mxu1 %v12904_v12  ;;  %12172 = vmatprep.subr.bf16.mxu0 %v12905_v35 }
 0x20c   : > { %v11845_v57 = vpop.f32.mrf.mxu0  ;;  %12196 = vmatprep.subr.bf16.mxu1 %v12906_v16 }
 0x20d   : > { %v14858_v50 = vadd.f32 %v2527_v36, %v2384_v30  ;;  %v2387_v52 = vadd.f32 %v11845_v57, %v14726_v24  ;;  %v11869_v9 = vpop.f32.mrf.mxu1 }
 0x20e   : > { %v2336_v8 = vpop.f32.mrf.mxu0  ;;  %12173 = vmatpush3.bf16.msra.mxu0 %v12905_v35 }
 0x20f   : > { %v14861_v49 = vadd.f32 %v11869_v9, %v2387_v52  ;;  %v2385_v32 = vadd.f32 %v2336_v8, %v14734_v44  ;;  %v2530_v17 = vpop.f32.mrf.mxu1  ;;  %12197 = vmatpush3.bf16.msra.mxu1 %v12906_v16  ;;  %12214 = vmatprep.subr.bf16.mxu0 %v14851_v7 }
 0x210   : > { %v11848_v1 = vpop.f32.mrf.mxu0  ;;  %12135 = vmatmul.mubr.msk.bf16.gmra.mxu0 %vm334_vm0, %v14694_v37  ;;  %12246 = vmatprep.subr.bf16.mxu1 %v14856_v33 }
 0x211   : > { %v14868_v15 = vadd.f32 %v2530_v17, %v2385_v32  ;;  %v2390_v24 = vadd.f32 %v11848_v1, %v14762_v28  ;;  %v11872_v40 = vpop.f32.mrf.mxu1  ;;  %12159 = vmatmul.mubr.msk.bf16.gmra.mxu1 %vm334_vm0, %v14702_v5  ;;  %12138 = vmatprep.mubr.msk.bf16.mxu0 %vm334_vm0, %v14704_v27  ;;  %v4566_v28 = vld [vmem:[#allocation3 + $0x18a] sm:$0xff]  ;;  %v12911_v17 = vld [vmem:[%s17907_s5 + $0x68] sm:$0xff]  }
 0x212   : > { %12162 = vmatprep.mubr.msk.bf16.mxu1 %vm334_vm0, %v14778_v59  ;;  %v2349_v44 = vpop.f32.mrf.mxu0  ;;  %v14883_v31 = vpack.c.bf16 %v4566_v28, %v4565_v29 }
 0x213   : > { %v14877_v2 = vadd.f32 %v11872_v40, %v2390_v24  ;;  %v2388_v43 = vadd.f32 %v2349_v44, %v14772_v55  ;;  %v2543_v56 = vpop.f32.mrf.mxu1  ;;  %v12914_v40 = vld [vmem:[%s17907_s5 + $0x20] sm:$0xff]  }
 0x214   : > { %v11849_v3 = vpop.f32.mrf.mxu0 }
 0x215   : > { %v14880_v13 = vadd.f32 %v2543_v56, %v2388_v43  ;;  %v2391_v5 = vadd.f32 %v11849_v3, %v14774_v60  ;;  %v11873_v12 = vpop.f32.mrf.mxu1  ;;  %v4949_v43 = vld [vmem:[#allocation3 + $0x171] sm:$0xff]  ;;  %v12915_v56 = vld [vmem:[%s17907_s5 + $0x58] sm:$0xff]  }
 0x216   : > { %v2352_v51 = vpop.f32.mrf.mxu0  ;;  %v4959_v28 = vpack.c.bf16 %v4949_v43, %v4948_v10 }
 0x217   : > { %v14885_v59 = vadd.f32 %v11873_v12, %v2391_v5  ;;  %v2389_v23 = vadd.f32 %v2352_v51, %v14776_v54  ;;  %v2546_v58 = vpop.f32.mrf.mxu1  ;;  %v12917_v5 = vld [vmem:[%s17907_s5 + $0x50] sm:$0xff]  }
 0x218   : > { %v11852_v35 = vpop.f32.mrf.mxu0  ;;  %12139 = vmatmul.mubr.msk.bf16.gmra.mxu0 %vm334_vm0, %v14883_v31 }
 0x219   : > { %v14890_v55 = vadd.f32 %v2546_v58, %v2389_v23  ;;  %v2394_v6 = vadd.f32 %v11852_v35, %v14788_v11  ;;  %v11876_v16 = vpop.f32.mrf.mxu1  ;;  %12163 = vmatmul.mubr.msk.bf16.gmra.mxu1 %vm334_vm0, %v4768_v21  ;;  %12174 = vmatprep.mubr.msk.bf16.mxu0 %vm334_vm0, %v14561_v20  ;;  %v12918_v21 = vld [vmem:[%s17907_s5 + $0x10] sm:$0xff]  }
 0x21a   : > { %12198 = vmatprep.mubr.msk.bf16.mxu1 %vm334_vm0, %v14633_v45  ;;  %v2365_v60 = vpop.f32.mrf.mxu0  ;;  %v12909_v45 = vld [vmem:[%s17907_s5 + $0x70] sm:$0xff]  }
 0x21b   : > { %v14898_v54 = vadd.f32 %v11876_v16, %v2394_v6  ;;  %v2392_v38 = vadd.f32 %v2365_v60, %v14792_v61  ;;  %v2559_v25 = vpop.f32.mrf.mxu1  ;;  %v12910_v61 = vld [vmem:[%s17907_s5 + $0x30] sm:$0xff]   ;;  %v5420_v60 = vld [vmem:[#allocation4 + $0x1] sm:$0xff] }
 0x21c   : > { %v11853_v26 = vpop.f32.mrf.mxu0  ;;  %v4952_v23 = vld [vmem:[#allocation3 + $0x199] sm:$0xff]  ;;  %v4953_v58 = vld [vmem:[#allocation3 + $0x1a1] sm:$0xff] }
 0x21d   : > { %v14901_v30 = vadd.f32 %v2559_v25, %v2392_v38  ;;  %v2395_v11 = vadd.f32 %v11853_v26, %v14794_v47  ;;  %v11877_v36 = vpop.f32.mrf.mxu1  ;;  %v5145_v35 = vld [vmem:[#allocation3 + $0x19a] sm:$0xff]  ;;  %v5146_v16 = vld [vmem:[#allocation3 + $0x1a2] sm:$0xff]  ;;  %v4961_v26 = vpack.c.bf16 %v4953_v58, %v4952_v23 }
 0x21e   : > { %v2368_v57 = vpop.f32.mrf.mxu0  ;;  %v5421_v38 = vld [vmem:[#allocation4 + $0x9] sm:$0xff] }
 0x21f   : > { %17935 = vst [vmem:[#allocation10_spill] sm:$0xff] %v14901_v30  ;;  %v14904_v52 = vadd.f32 %v11877_v36, %v2395_v11  ;;  %v2393_v20 = vadd.f32 %v2368_v57, %v14799_v14  ;;  %v2562_v9 = vpop.f32.mrf.mxu1  ;;  %v5154_v36 = vpack.c.bf16 %v5146_v16, %v5145_v35  ;;  %v5436_v57 = vpack.c.bf16 %v5421_v38, %v5420_v60 }
 0x220   : > { %v14910_v8 = vpop.f32.mrf.mxu0  ;;  %12175 = vmatmul.mubr.msk.bf16.vlgmr.msra.gmra.mxu0 %vm334_vm0, %v14578_v48 }
 0x221   : > { %17936 = vst [vmem:[#allocation11_spill] sm:$0xff] %v14904_v52  ;;  %v14917_v47 = vadd.f32 %v2562_v9, %v2393_v20  ;;  %v14919_v32 = vpop.f32.mrf.mxu1  ;;  %12199 = vmatmul.mubr.msk.bf16.vlgmr.msra.gmra.mxu1 %vm334_vm0, %v14652_v19  ;;  %12178 = vmatprep.mubr.msk.bf16.mxu0 %vm334_vm0, %v14585_v53  ;;  %v12912_v53 = vld [vmem:[%s17907_s5 + $0x28] sm:$0xff]   ;;  %v13118_v9 = vld [vmem:[#allocation4] sm:$0xff] }
 0x222   : > { %12202 = vmatprep.mubr.msk.bf16.mxu1 %vm334_vm0, %v14661_v18  ;;  %v14927_v14 = vpop.f32.mrf.mxu0  ;;  %12215 = vmatpush3.bf16.msra.mxu0 %v14851_v7 }
 0x223   : > { %17937 = vst [vmem:[#allocation12_spill] sm:$0xff] %v14917_v47  ;;  %v14930_v48 = vpop.f32.mrf.mxu1  ;;  %12247 = vmatpush3.bf16.msra.mxu1 %v14856_v33  ;;  %12216 = vmatprep.subr.bf16.mxu0 %v12909_v45  ;;  %v12913_v33 = vld [vmem:[%s17907_s5 + $0x60] sm:$0xff]  }
 0x224   : > { %v14936_v19 = vpop.f32.mrf.mxu0  ;;  %12248 = vmatprep.subr.bf16.mxu1 %v12910_v61 }
 0x225   : > { %v14941_v18 = vpop.f32.mrf.mxu1 }
 0x226   : > { %v14943_v1 = vpop.f32.mrf.mxu0  ;;  %12217 = vmatpush3.bf16.msra.mxu0 %v12909_v45  ;;  %v5396_v45 = vpack.c.bf16 %v13118_v9, %v13118_v9 }
 0x227   : > { %v14945_v7 = vpop.f32.mrf.mxu1  ;;  %12249 = vmatpush3.bf16.msra.mxu1 %v12910_v61  ;;  %12218 = vmatprep.subr.bf16.mxu0 %v12911_v17 }
 0x228   : > { %v14950_v24 = vpop.f32.mrf.mxu0  ;;  %12179 = vmatmul.mubr.msk.bf16.gmra.mxu0 %vm334_vm0, %v14602_v63  ;;  %12250 = vmatprep.subr.bf16.mxu1 %v12912_v53 }
 0x229   : > { %v14957_v44 = vpop.f32.mrf.mxu1  ;;  %12203 = vmatmul.mubr.msk.bf16.gmra.mxu1 %vm334_vm0, %v14688_v22  ;;  %12182 = vmatprep.mubr.msk.bf16.mxu0 %vm334_vm0, %v14606_v0  ;;  %v12916_v0 = vld [vmem:[%s17907_s5 + $0x18] sm:$0xff]  }
 0x22a   : > { %12206 = vmatprep.mubr.msk.bf16.mxu1 %vm334_vm0, %v14694_v37  ;;  %v14965_v42 = vpop.f32.mrf.mxu0  ;;  %12219 = vmatpush3.bf16.msra.mxu0 %v12911_v17  ;;  %v12921_v17 = vld [vmem:[%s17907_s5 + $0x40] sm:$0xff]  }
 0x22b   : > { %v14967_v63 = vpop.f32.mrf.mxu1  ;;  %12251 = vmatpush3.bf16.msra.mxu1 %v12912_v53  ;;  %12220 = vmatprep.subr.bf16.mxu0 %v12913_v33 }
 0x22c   : > { %v14972_v22 = vpop.f32.mrf.mxu0  ;;  %12252 = vmatprep.subr.bf16.mxu1 %v12914_v40 }
 0x22d   : > { %v14977_v37 = vpop.f32.mrf.mxu1 }
 0x22e   : > { %v14979_v29 = vpop.f32.mrf.mxu0  ;;  %12221 = vmatpush3.bf16.msra.mxu0 %v12913_v33  ;;  %v12922_v33 = vld [vmem:[%s17907_s5] sm:$0xff]  }
 0x22f   : > { %v14981_v3 = vpop.f32.mrf.mxu1  ;;  %12253 = vmatpush3.bf16.msra.mxu1 %v12914_v40  ;;  %12222 = vmatprep.subr.bf16.mxu0 %v12915_v56 }
 0x230   : > { %v14986_v12 = vpop.f32.mrf.mxu0  ;;  %12183 = vmatmul.mubr.msk.bf16.gmra.mxu0 %vm334_vm0, %v4959_v28  ;;  %12254 = vmatprep.subr.bf16.mxu1 %v12916_v0  ;;  %v15044_v28 = vld [vmem:[%s17907_s5 + $0xf8] sm:$0xff]  }
 0x231   : > { %v14992_v51 = vpop.f32.mrf.mxu1  ;;  %12207 = vmatmul.mubr.msk.bf16.gmra.mxu1 %vm334_vm0, %v14704_v27  ;;  %12186 = vmatprep.mubr.msk.bf16.mxu0 %vm334_vm0, %v14780_v62  ;;  %v12919_v27 = vld [vmem:[%s17907_s5 + $0x48] sm:$0xff]   ;;  %17944 = vst [vmem:[#allocation19_spill] sm:$0xff] %v15044_v28 }
 0x232   : > { %12210 = vmatprep.mubr.msk.bf16.mxu1 %vm334_vm0, %v14883_v31  ;;  %v15000_v6 = vpop.f32.mrf.mxu0  ;;  %12223 = vmatpush3.bf16.msra.mxu0 %v12915_v56  ;;  %v12920_v31 = vld [vmem:[%s17907_s5 + $0x8] sm:$0xff]   ;;  %v15037_v56 = vld [vmem:[%s17907_s5 + $0xb8] sm:$0xff]  }
 0x233   : > { %v15002_v25 = vpop.f32.mrf.mxu1  ;;  %12255 = vmatpush3.bf16.msra.mxu1 %v12916_v0  ;;  %12224 = vmatprep.subr.bf16.mxu0 %v12917_v5  ;;  %17942 = vst [vmem:[#allocation17_spill] sm:$0xff] %v15037_v56 }
 0x234   : > { %v15007_v62 = vpop.f32.mrf.mxu0  ;;  %12256 = vmatprep.subr.bf16.mxu1 %v12918_v21 }
 0x235   : > { %v15012_v11 = vpop.f32.mrf.mxu1 }
 0x236   : > { %v15014_v20 = vpop.f32.mrf.mxu0  ;;  %12225 = vmatpush3.bf16.msra.mxu0 %v12917_v5 }
 0x237   : > { %v15016_v61 = vpop.f32.mrf.mxu1  ;;  %12257 = vmatpush3.bf16.msra.mxu1 %v12918_v21  ;;  %12226 = vmatprep.subr.bf16.mxu0 %v12919_v27 }
 0x238   : > { %17938 = vst [vmem:[#allocation13_spill] sm:$0xff] %v15016_v61  ;;  %v15021_v53 = vpop.f32.mrf.mxu0  ;;  %12187 = vmatmul.mubr.msk.bf16.gmra.mxu0 %vm334_vm0, %v4961_v26  ;;  %12258 = vmatprep.subr.bf16.mxu1 %v12920_v31 }
 0x239   : > { %v15027_v40 = vpop.f32.mrf.mxu1  ;;  %12211 = vmatmul.mubr.msk.bf16.gmra.mxu1 %vm334_vm0, %v5154_v36  ;;  %12230 = vmatprep.mubr.bf16.mxu0 %v5436_v57 }
 0x23a   : > { %17939 = vst [vmem:[#allocation14_spill] sm:$0xff] %v15027_v40  ;;  %v15030_v10 = vpop.f32.mrf.mxu0  ;;  %12227 = vmatpush3.bf16.msra.mxu0 %v12919_v27  ;;  %12262 = vmatprep.mubr.bf16.mxu1 %v5396_v45 }
 0x23b   : > { %17940 = vst [vmem:[#allocation15_spill] sm:$0xff] %v15030_v10  ;;  %v15032_v43 = vpop.f32.mrf.mxu1  ;;  %12259 = vmatpush3.bf16.msra.mxu1 %v12920_v31  ;;  %12228 = vmatprep.subr.bf16.mxu0 %v12921_v17  ;;  %v2768_v10 = vadd.f32 %v14927_v14, %v14822_v34 }
 0x23c   : > { %17941 = vst [vmem:[#allocation16_spill] sm:$0xff] %v15032_v43  ;;  %v15039_v0 = vpop.f32.mrf.mxu0  ;;  %12260 = vmatprep.subr.bf16.mxu1 %v12922_v33 }
 0x23d   : > { %17943 = vst [vmem:[#allocation18_spill] sm:$0xff] %v15039_v0  ;;  %v15046_v5 = vpop.f32.mrf.mxu1  ;;  %v2770_v0 = vadd.f32 %v14910_v8, %v14816_v4  ;;  %v2769_v4 = vadd.f32 %v14943_v1, %v14836_v39  ;;  %v2772_v39 = vadd.f32 %v14965_v42, %v14858_v50  ;;  %v2773_v42 = vadd.f32 %v14979_v29, %v14868_v15 }
 0x23e   : > { %17945 = vst [vmem:[#allocation20_spill] sm:$0xff] %v15046_v5  ;;  %v15048_v21 = vpop.f32.mrf.mxu0  ;;  %12229 = vmatpush3.bf16.msra.mxu0 %v12921_v17 }
 0x23f   : > { %17946 = vst [vmem:[#allocation21_spill] sm:$0xff] %v15048_v21  ;;  %v15050_v23 = vpop.f32.mrf.mxu1  ;;  %12261 = vmatpush3.bf16.msra.mxu1 %v12922_v33  ;;  %12278 = vmatprep.subr.bf16.mxu0 %v15037_v56 }
 0x240   : > { %17947 = vst [vmem:[#allocation22_spill] sm:$0xff] %v15050_v23  ;;  %v11936_v58 = vpop.f32.mrf.mxu0  ;;  %12310 = vmatprep.subr.bf16.mxu1 %v15044_v28 }
 0x241   : > { %v11960_v35 = vpop.f32.mrf.mxu1 }
 0x242   : > { %v3094_v16 = vpop.f32.mrf.mxu0 }
 0x243   : > { %v3288_v60 = vpop.f32.mrf.mxu1 }
 0x244   : > { %v11937_v38 = vpop.f32.mrf.mxu0 }
 0x245   : > { %v11961_v27 = vpop.f32.mrf.mxu1 }
 0x246   : > { %v3097_v26 = vpop.f32.mrf.mxu0 }
 0x247   : > { %v3291_v31 = vpop.f32.mrf.mxu1 }
 0x248   : > { %v11940_v36 = vpop.f32.mrf.mxu0 }
 0x249   : > { %v15054_v57 = vpop.f32.mrf.mxu1 }
 0x24a   : > { %v3110_v9 = vpop.f32.mrf.mxu0 }
 0x24b   : > { %v15056_v45 = vpop.f32.mrf.mxu1 }
 0x24c   : > { %v11941_v17 = vpop.f32.mrf.mxu0 }
 0x24d   : > { %v15058_v33 = vpop.f32.mrf.mxu1 }
 0x24e   : > { %v15060_v23 = vpop.f32.mrf.mxu0 }
 0x24f   : > { %v15062_v5 = vpop.f32.mrf.mxu1 }
 0x250   : > { %v15064_v28 = vpop.f32.mrf.mxu0 }
 0x251   : > { %v15066_v21 = vpop.f32.mrf.mxu1 }
 0x252   : > { %17948 = vst [vmem:[#allocation23_spill] sm:$0xff] %v15066_v21  ;;  %v15068_v47 = vpop.f32.mrf.mxu0  ;;  %v2964_v21 = vadd.f32 %v14919_v32, %v2770_v0  ;;  %v2774_v32 = vadd.f32 %v14950_v24, %v14845_v41  ;;  %v2963_v0 = vadd.f32 %v14945_v7, %v2769_v4  ;;  %v15117_v41 = vld [vmem:[%s17906_s4] ss:$0 sm:$0xff] }
 0x253   : > { %v15070_v43 = vpop.f32.mrf.mxu1 }
 0x254   : > { %17949 = vst [vmem:[#allocation24_spill] sm:$0xff] %v15070_v43  ;;  %v15072_v56 = vpop.f32.mrf.mxu0  ;;  %v2771_v43 = vadd.f32 %v14936_v19, %v14825_v46 }
 0x255   : > { %17950 = vst [vmem:[#allocation25_spill] sm:$0xff] %v15072_v56  ;;  %v15076_v52 = vpop.f32.mrf.mxu1 }
 0x256   : > { %17951 = vst [vmem:[#allocation26_spill] sm:$0xff] %v15076_v52  ;;  %v15078_v40 = vpop.f32.mrf.mxu0  ;;  %v2962_v52 = vadd.f32 %v14930_v48, %v2768_v10 }
 0x257   : > { %17952 = vst [vmem:[#allocation27_spill] sm:$0xff] %v15078_v40  ;;  %v15082_v30 = vpop.f32.mrf.mxu1  ;;  %v3159_v40 = vadd.f32 %v11936_v58, %v2964_v21 }
 0x258   : > { %17953 = vst [vmem:[#allocation28_spill] sm:$0xff] %v15082_v30  ;;  %v15084_v61 = vpop.f32.mrf.mxu0  ;;  %v2965_v30 = vadd.f32 %v14941_v18, %v2771_v43  ;;  %v3157_v46 = vadd.f32 %v3094_v16, %v2962_v52  ;;  %v2775_v18 = vadd.f32 %v14972_v22, %v14861_v49  ;;  %v3158_v43 = vadd.f32 %v3097_v26, %v2963_v0 }
 0x259   : > { %v15089_v56 = vpop.f32.mrf.mxu1  ;;  %v3353_v48 = vadd.f32 %v11960_v35, %v3159_v40  ;;  %v2968_v52 = vadd.f32 %v14957_v44, %v2774_v32  ;;  %v2778_v44 = vadd.f32 %v14986_v12, %v14877_v2 }
 0x25a   : > { %v15093_v8 = vpop.f32.mrf.mxu0  ;;  %v3160_v10 = vadd.f32 %v11937_v38, %v2965_v30  ;;  %v3351_v7 = vadd.f32 %v3288_v60, %v3157_v46  ;;  %v2966_v30 = vadd.f32 %v14967_v63, %v2772_v39  ;;  %v2969_v26 = vadd.f32 %v14977_v37, %v2775_v18 }
 0x25b   : > { %v15096_v34 = vpop.f32.mrf.mxu1  ;;  %v3163_v22 = vadd.f32 %v11940_v36, %v2968_v52  ;;  %v3352_v60 = vadd.f32 %v3291_v31, %v3158_v43  ;;  %v2776_v36 = vadd.f32 %v15000_v6, %v14880_v13 }
 0x25c   : > { %v15098_v14 = vpop.f32.mrf.mxu0  ;;  %v3354_v49 = vadd.f32 %v11961_v27, %v3160_v10  ;;  %v3161_v32 = vadd.f32 %v3110_v9, %v2966_v30  ;;  %v2967_v27 = vadd.f32 %v14981_v3, %v2773_v42  ;;  %v3164_v0 = vadd.f32 %v11941_v17, %v2969_v26  ;;  %v17957_v26 = vld [vmem:[#allocation23_spill] sm:$0xff] }
 0x25d   : > { %v15103_v19 = vpop.f32.mrf.mxu1  ;;  %v3357_v37 = vadd.f32 %v15054_v57, %v3163_v22  ;;  %v2779_v10 = vadd.f32 %v15007_v62, %v14885_v59 }
 0x25e   : > { %v15108_v1 = vpop.f32.mrf.mxu0  ;;  %v3162_v3 = vadd.f32 %v15060_v23, %v2967_v27  ;;  %v3355_v13 = vadd.f32 %v15056_v45, %v3161_v32  ;;  %v3358_v52 = vadd.f32 %v15058_v33, %v3164_v0 }
 0x25f   : > { %v15110_v21 = vpop.f32.mrf.mxu1  ;;  %v2973_v42 = vadd.f32 %v15012_v11, %v2779_v10  ;;  %v17954_v11 = vld [vmem:[#allocation13_spill] sm:$0xff] }
 0x260   : > { %v11984_v58 = vpop.f32.mrf.mxu0  ;;  %v17963_v10 = vld [vmem:[#allocation17_spill] sm:$0xff] }
 0x261   : > { %v3547_v50 = vadd.f32 %v11984_v58, %v3353_v48  ;;  %v15120_v24 = vpop.f32.mrf.mxu1  ;;  %v2972_v48 = vadd.f32 %v14992_v51, %v2778_v44  ;;  %v2970_v58 = vadd.f32 %v15002_v25, %v2776_v36  ;;  %v2777_v51 = vadd.f32 %v15014_v20, %v14890_v55  ;;  %v17959_v36 = vld [vmem:[#allocation14_spill] sm:$0xff] }
 0x262   : > { %v3482_v40 = vpop.f32.mrf.mxu0  ;;  %v2782_v25 = vadd.f32 %v15021_v53, %v14898_v54  ;;  %v3356_v55 = vadd.f32 %v15062_v5, %v3162_v3  ;;  %v12925_v54 = vld [vmem:[%s17907_s5 + $0xb0] sm:$0xff]   ;;  %v17955_v5 = vld [vmem:[#allocation10_spill] sm:$0xff] }
 0x263   : > { %v3570_v35 = vadd.f32 %v15117_v41, %v3547_v50  ;;  %v3545_v16 = vadd.f32 %v3482_v40, %v3351_v7  ;;  %v15126_v38 = vpop.f32.mrf.mxu1  ;;  %v3167_v59 = vadd.f32 %v15064_v28, %v2972_v48  ;;  %v3165_v20 = vadd.f32 %v15068_v47, %v2970_v58  ;;  %v17956_v47 = vld [vmem:[#allocation15_spill] sm:$0xff]  ;;  %v17964_v3 = vld [vmem:[#allocation24_spill] sm:$0xff] }
 0x264   : > { %v11985_v4 = vpop.f32.mrf.mxu0  ;;  %v2971_v53 = vadd.f32 %v17954_v11, %v2777_v51  ;;  %v2976_v0 = vadd.f32 %v17959_v36, %v2782_v25  ;;  %v12927_v58 = vld [vmem:[%s17907_s5 + $0xa8] sm:$0xff]   ;;  %v17965_v51 = vld [vmem:[#allocation16_spill] sm:$0xff] }
 0x265   : > { %v3586_v63 = vmax.f32 %v3570_v35, 0.0  ;;  %v3568_v46 = vadd.f32 %v15117_v41, %v3545_v16  ;;  %v3548_v15 = vadd.f32 %v11985_v4, %v3354_v49  ;;  %v15132_v29 = vpop.f32.mrf.mxu1  ;;  %v2780_v16 = vadd.f32 %v17956_v47, %v17955_v5  ;;  %v17958_v4 = vld [vmem:[#allocation25_spill] sm:$0xff] }
 0x266   : > { %v3485_v39 = vpop.f32.mrf.mxu0  ;;  %v3361_v44 = vadd.f32 %v17957_v26, %v3167_v59  ;;  %v3168_v32 = vadd.f32 %v17958_v4, %v2973_v42  ;;  %v17966_v59 = vld [vmem:[#allocation12_spill] sm:$0xff]  ;;  %v17968_v42 = vld [vmem:[#allocation26_spill] sm:$0xff] }
 0x267   : > { %3603 = vst [vmem:[#allocation4 + $0x31] sm:$0xff] %v3586_v63  ;;  %v3584_v2 = vmax.f32 %v3568_v46, 0.0  ;;  %v3571_v12 = vadd.f32 %v15117_v41, %v3548_v15  ;;  %v3546_v31 = vadd.f32 %v3485_v39, %v3352_v60  ;;  %v15139_v9 = vpop.f32.mrf.mxu1  ;;  %v17960_v39 = vld [vmem:[#allocation11_spill] sm:$0xff] }
 0x268   : > { %v11988_v18 = vpop.f32.mrf.mxu0  ;;  %v3362_v25 = vadd.f32 %v17968_v42, %v3168_v32 }
 0x269   : > { %3601 = vst [vmem:[#allocation4 + $0x19] sm:$0xff] %v3584_v2  ;;  %v3587_v6 = vmax.f32 %v3571_v12, 0.0  ;;  %v3569_v57 = vadd.f32 %v15117_v41, %v3546_v31  ;;  %v3551_v17 = vadd.f32 %v11988_v18, %v3357_v37  ;;  %v15147_v43 = vpop.f32.mrf.mxu1  ;;  %v17961_v37 = vld [vmem:[#allocation18_spill] sm:$0xff]  ;;  %v17962_v12 = vld [vmem:[#allocation27_spill] sm:$0xff]  ;;  %v3359_v18 = vadd.f32 %v17964_v3, %v3165_v20 }
 0x26a   : > { %v3498_v62 = vpop.f32.mrf.mxu0  ;;  %v3166_v31 = vadd.f32 %v17962_v12, %v2971_v53  ;;  %v17970_v53 = vld [vmem:[#allocation28_spill] sm:$0xff] }
 0x26b   : > { %3604 = vst [vmem:[#allocation4 + $0x39] sm:$0xff] %v3587_v6  ;;  %v15154_v23 = vmax.f32 %v3569_v57, 0.0  ;;  %v3574_v45 = vadd.f32 %v15117_v41, %v3551_v17  ;;  %v3549_v7 = vadd.f32 %v3498_v62, %v3355_v13  ;;  %v15157_v50 = vpop.f32.mrf.mxu1  ;;  %v5438_v30 = vpack.c.bf16 %v3587_v6, %v3586_v63  ;;  %v17967_v62 = vld [vmem:[#allocation21_spill] sm:$0xff] }
 0x26c   : > { %v11989_v28 = vpop.f32.mrf.mxu0  ;;  %v3360_v5 = vadd.f32 %v17970_v53, %v3166_v31 }
 0x26d   : > { %3602 = vst [vmem:[#allocation4 + $0x21] sm:$0xff] %v15154_v23  ;;  %v3590_v33 = vmax.f32 %v3574_v45, 0.0  ;;  %v15166_v40 = vadd.f32 %v15117_v41, %v3549_v7  ;;  %v3552_v49 = vadd.f32 %v11989_v28, %v3358_v52  ;;  %v15168_v22 = vpop.f32.mrf.mxu1  ;;  %v5437_v35 = vpack.c.bf16 %v15154_v23, %v3584_v2 }
 0x26e   : > { %v3501_v60 = vpop.f32.mrf.mxu0  ;;  %v2783_v2 = vadd.f32 %v17961_v37, %v17960_v39  ;;  %v2974_v52 = vadd.f32 %v17965_v51, %v2780_v16  ;;  %v2781_v45 = vadd.f32 %v17967_v62, %v17966_v59  ;;  %v3171_v7 = vadd.f32 %v15084_v61, %v2976_v0  ;;  %v5384_v36 = vld [vmem:[#allocation4 + $0x30] sm:$0xff] }
 0x26f   : > { %3607 = vst [vmem:[#allocation4 + $0x61] sm:$0xff] %v3590_v33  ;;  %v3588_v63 = vmax.f32 %v15166_v40, 0.0  ;;  %v3575_v46 = vadd.f32 %v15117_v41, %v3552_v49  ;;  %v3550_v15 = vadd.f32 %v3501_v60, %v3356_v55  ;;  %v15181_v27 = vpop.f32.mrf.mxu1  ;;  %12231 = vmatmul.mubr.bf16.vlgmr.msra.gmra.mxu0 %v5437_v35  ;;  %v17969_v35 = vld [vmem:[#allocation20_spill] sm:$0xff] }
 0x270   : > { %v11992_v48 = vpop.f32.mrf.mxu0  ;;  %12234 = vmatprep.mubr.bf16.mxu0 %v5438_v30  ;;  %12279 = vmatpush3.bf16.msra.mxu0 %v17963_v10  ;;  %v2977_v11 = vadd.f32 %v17969_v35, %v2783_v2  ;;  %v3169_v47 = vadd.f32 %v15093_v8, %v2974_v52  ;;  %v5382_v16 = vld [vmem:[#allocation4 + $0x18] sm:$0xff]  ;;  %v12926_v8 = vld [vmem:[%s17907_s5 + $0xf0] sm:$0xff]   ;;  %v3365_v0 = vadd.f32 %v15089_v56, %v3171_v7  ;;  %v12929_v56 = vld [vmem:[%s17907_s5 + $0xa0] sm:$0xff]  }
 0x271   : > { %3605 = vst [vmem:[#allocation4 + $0x49] sm:$0xff] %v3588_v63  ;;  %v3591_v13 = vmax.f32 %v3575_v46, 0.0  ;;  %v3573_v6 = vadd.f32 %v15117_v41, %v3550_v15  ;;  %v3555_v57 = vadd.f32 %v11992_v48, %v3361_v44  ;;  %v15190_v17 = vpop.f32.mrf.mxu1  ;;  %12280 = vmatprep.subr.bf16.mxu0 %v12925_v54 }
 0x272   : > { %v3514_v30 = vpop.f32.mrf.mxu0  ;;  %v5385_v49 = vld [vmem:[#allocation4 + $0x38] sm:$0xff]  ;;  %v3172_v12 = vadd.f32 %v15098_v14, %v2977_v11  ;;  %v17972_v14 = vld [vmem:[#allocation19_spill] sm:$0xff] }
 0x273   : > { %3608 = vst [vmem:[#allocation4 + $0x69] sm:$0xff] %v3591_v13  ;;  %v15200_v55 = vmax.f32 %v3573_v6, 0.0  ;;  %v15203_v20 = vadd.f32 %v15117_v41, %v3555_v57  ;;  %v3553_v28 = vadd.f32 %v3514_v30, %v3359_v18  ;;  %v15205_v40 = vpop.f32.mrf.mxu1  ;;  %v5440_v44 = vpack.c.bf16 %v3591_v13, %v3590_v33 }
 0x274   : > { %v11993_v61 = vpop.f32.mrf.mxu0  ;;  %v5383_v26 = vld [vmem:[#allocation4 + $0x20] sm:$0xff]  ;;  %12281 = vmatpush3.bf16.msra.mxu0 %v12925_v54  ;;  %v15224_v37 = vpack.c.bf16 %v5385_v49, %v5384_v36  ;;  %v3366_v62 = vadd.f32 %v15103_v19, %v3172_v12  ;;  %v12932_v12 = vld [vmem:[%s17907_s5 + $0xd8] sm:$0xff]  }
 0x275   : > { %3606 = vst [vmem:[#allocation4 + $0x51] sm:$0xff] %v15200_v55  ;;  %v3594_v60 = vmax.f32 %v15203_v20, 0.0  ;;  %v15213_v4 = vadd.f32 %v15117_v41, %v3553_v28  ;;  %v3556_v32 = vadd.f32 %v11993_v61, %v3362_v25  ;;  %v15215_v46 = vpop.f32.mrf.mxu1  ;;  %v15217_v15 = vpack.c.bf16 %v5383_v26, %v5382_v16  ;;  %12282 = vmatprep.subr.bf16.mxu0 %v12927_v58  ;;  %v17971_v54 = vld [vmem:[#allocation22_spill] sm:$0xff]  ;;  %v12931_v25 = vld [vmem:[%s17907_s5 + $0x98] sm:$0xff]  }
 0x276   : > { %v2975_v33 = vadd.f32 %v17971_v54, %v2781_v45  ;;  %v3517_v39 = vpop.f32.mrf.mxu0  ;;  %v5439_v2 = vpack.c.bf16 %v15200_v55, %v3588_v63  ;;  %v3363_v63 = vadd.f32 %v15096_v34, %v3169_v47  ;;  %v5388_v61 = vld [vmem:[#allocation4 + $0x60] sm:$0xff] }
 0x277   : > { %3611 = vst [vmem:[#allocation4 + $0x91] sm:$0xff] %v3594_v60  ;;  %v3592_v31 = vmax.f32 %v15213_v4, 0.0  ;;  %v3579_v48 = vadd.f32 %v15117_v41, %v3556_v32  ;;  %v3554_v10 = vadd.f32 %v3517_v39, %v3360_v5  ;;  %v15230_v3 = vpop.f32.mrf.mxu1  ;;  %12263 = vmatmul.mubr.bf16.vlgmr.msra.gmra.mxu1 %v15217_v15 }
 0x278   : > { %v3170_v18 = vadd.f32 %v15108_v1, %v2975_v33  ;;  %v11996_v13 = vpop.f32.mrf.mxu0  ;;  %12266 = vmatprep.mubr.bf16.mxu1 %v15224_v37  ;;  %12311 = vmatpush3.bf16.msra.mxu1 %v17972_v14  ;;  %v12928_v1 = vld [vmem:[%s17907_s5 + $0xe8] sm:$0xff]  }
 0x279   : > { %3609 = vst [vmem:[#allocation4 + $0x79] sm:$0xff] %v3592_v31  ;;  %v3595_v6 = vmax.f32 %v3579_v48, 0.0  ;;  %v3577_v57 = vadd.f32 %v15117_v41, %v3554_v10  ;;  %v3559_v51 = vadd.f32 %v11996_v13, %v3365_v0  ;;  %v15241_v52 = vpop.f32.mrf.mxu1  ;;  %12312 = vmatprep.subr.bf16.mxu1 %v12926_v8  ;;  %12235 = vmatmul.mubr.bf16.gmra.mxu0 %v5439_v2  ;;  %v12935_v48 = vld [vmem:[%s17907_s5 + $0x88] sm:$0xff]  }
 0x27a   : > { %v3530_v59 = vpop.f32.mrf.mxu0  ;;  %12238 = vmatprep.mubr.bf16.mxu0 %v5440_v44  ;;  %12283 = vmatpush3.bf16.msra.mxu0 %v12927_v58  ;;  %v5389_v42 = vld [vmem:[#allocation4 + $0x68] sm:$0xff]  ;;  %v3364_v20 = vadd.f32 %v15110_v21, %v3170_v18  ;;  %v12930_v21 = vld [vmem:[%s17907_s5 + $0xe0] sm:$0xff]  }
 0x27b   : > { %3612 = vst [vmem:[#allocation4 + $0x99] sm:$0xff] %v3595_v6  ;;  %v15247_v34 = vmax.f32 %v3577_v57, 0.0  ;;  %v3582_v45 = vadd.f32 %v15117_v41, %v3559_v51  ;;  %v3557_v7 = vadd.f32 %v3530_v59, %v3363_v63  ;;  %v15250_v30 = vpop.f32.mrf.mxu1  ;;  %12284 = vmatprep.subr.bf16.mxu0 %v12929_v56  ;;  %v5386_v58 = vld [vmem:[#allocation4 + $0x48] sm:$0xff]  ;;  %v5442_v49 = vpack.c.bf16 %v3595_v6, %v3594_v60 }
 0x27c   : > { %v11997_v28 = vpop.f32.mrf.mxu0  ;;  %12313 = vmatpush3.bf16.msra.mxu1 %v12926_v8  ;;  %v5387_v19 = vld [vmem:[#allocation4 + $0x50] sm:$0xff]  ;;  %v15265_v26 = vpack.c.bf16 %v5389_v42, %v5388_v61  ;;  %v5751_v13 = vld [vmem:[#allocation4 + $0x2] sm:$0xff] }
 0x27d   : > { %3610 = vst [vmem:[#allocation4 + $0x81] sm:$0xff] %v15247_v34  ;;  %v3598_v35 = vmax.f32 %v3582_v45, 0.0  ;;  %v3580_v11 = vadd.f32 %v15117_v41, %v3557_v7  ;;  %v3560_v53 = vadd.f32 %v11997_v28, %v3366_v62  ;;  %v15258_v5 = vpop.f32.mrf.mxu1  ;;  %v15260_v47 = vpack.c.bf16 %v5387_v19, %v5386_v58  ;;  %12314 = vmatprep.subr.bf16.mxu1 %v12928_v1  ;;  %v12933_v8 = vld [vmem:[%s17907_s5 + $0x90] sm:$0xff]   ;;  %v12937_v58 = vld [vmem:[%s17907_s5 + $0x80] sm:$0xff]  }
 0x27e   : > { %v3533_v16 = vpop.f32.mrf.mxu0  ;;  %12285 = vmatpush3.bf16.msra.mxu0 %v12929_v56  ;;  %v5441_v44 = vpack.c.bf16 %v15247_v34, %v3592_v31  ;;  %v5752_v14 = vld [vmem:[#allocation4 + $0xa] sm:$0xff] }
 0x27f   : > { %3615 = vst [vmem:[#allocation4 + $0xc1] sm:$0xff] %v3598_v35  ;;  %v3596_v60 = vmax.f32 %v3580_v11, 0.0  ;;  %v3583_v4 = vadd.f32 %v15117_v41, %v3560_v53  ;;  %v3558_v32 = vadd.f32 %v3533_v16, %v3364_v20  ;;  %v15269_v36 = vpop.f32.mrf.mxu1  ;;  %12267 = vmatmul.mubr.bf16.gmra.mxu1 %v15260_v47  ;;  %12286 = vmatprep.subr.bf16.mxu0 %v12931_v25  ;;  %v5392_v45 = vld [vmem:[#allocation4 + $0x90] sm:$0xff]  ;;  %v12936_v11 = vld [vmem:[%s17907_s5 + $0xc8] sm:$0xff]  }
 0x280   : > { %v12032_v54 = vpop.f32.mrf.mxu0  ;;  %12270 = vmatprep.mubr.bf16.mxu1 %v15265_v26  ;;  %12315 = vmatpush3.bf16.msra.mxu1 %v12928_v1  ;;  %v5390_v6 = vld [vmem:[#allocation4 + $0x78] sm:$0xff]  ;;  %v5767_v20 = vpack.c.bf16 %v5752_v14, %v5751_v13 }
 0x281   : > { %3613 = vst [vmem:[#allocation4 + $0xa9] sm:$0xff] %v3596_v60  ;;  %v3599_v33 = vmax.f32 %v3583_v4, 0.0  ;;  %v3581_v0 = vadd.f32 %v15117_v41, %v3558_v32  ;;  %v3918_v39 = vadd.f32 %v12032_v54, %v15120_v24  ;;  %v12056_v2 = vpop.f32.mrf.mxu1  ;;  %12316 = vmatprep.subr.bf16.mxu1 %v12930_v21  ;;  %12239 = vmatmul.mubr.bf16.gmra.mxu0 %v5441_v44  ;;  %v5753_v44 = vld [vmem:[#allocation4 + $0x1a] sm:$0xff] }
 0x282   : > { %v3909_v31 = vpop.f32.mrf.mxu0  ;;  %12242 = vmatprep.mubr.bf16.mxu0 %v5442_v49  ;;  %12287 = vmatpush3.bf16.msra.mxu0 %v12931_v25  ;;  %v5393_v18 = vld [vmem:[#allocation4 + $0x98] sm:$0xff] }
 0x283   : > { %3616 = vst [vmem:[#allocation4 + $0xc9] sm:$0xff] %v3599_v33  ;;  %v3597_v10 = vmax.f32 %v3581_v0, 0.0  ;;  %v15284_v56 = vadd.f32 %v12056_v2, %v3918_v39  ;;  %v3910_v41 = vadd.f32 %v3909_v31, %v15126_v38  ;;  %v4086_v24 = vpop.f32.mrf.mxu1  ;;  %12288 = vmatprep.subr.bf16.mxu0 %v12933_v8  ;;  %v12934_v38 = vld [vmem:[%s17907_s5 + $0xd0] sm:$0xff]   ;;  %v15299_v25 = vpack.c.bf16 %v5393_v18, %v5392_v45 }
 0x284   : > { %v12033_v63 = vpop.f32.mrf.mxu0  ;;  %12317 = vmatpush3.bf16.msra.mxu1 %v12930_v21  ;;  %v5391_v57 = vld [vmem:[#allocation4 + $0x80] sm:$0xff]  ;;  %v5755_v2 = vld [vmem:[#allocation4 + $0x32] sm:$0xff]  ;;  %v5757_v45 = vld [vmem:[#allocation4 + $0x4a] sm:$0xff] }
 0x285   : > { %3614 = vst [vmem:[#allocation4 + $0xb1] sm:$0xff] %v3597_v10  ;;  %v15287_v51 = vadd.f32 %v4086_v24, %v3910_v41  ;;  %v3921_v1 = vadd.f32 %v12033_v63, %v15132_v29  ;;  %v12057_v59 = vpop.f32.mrf.mxu1  ;;  %v15290_v62 = vpack.c.bf16 %v5391_v57, %v5390_v6  ;;  %12318 = vmatprep.subr.bf16.mxu1 %v12932_v12  ;;  %v12941_v41 = vld [vmem:[%s17907_s5 + $0x130] sm:$0xff]   ;;  %v12940_v63 = vld [vmem:[%s17907_s5 + $0x178] sm:$0xff]  }
 0x286   : > { %v15295_v7 = vpack.c.bf16 %v3597_v10, %v3596_v60  ;;  %v15297_v42 = vpop.f32.mrf.mxu0  ;;  %12289 = vmatpush3.bf16.msra.mxu0 %v12933_v8  ;;  %v5754_v8 = vld [vmem:[#allocation4 + $0x22] sm:$0xff] }
 0x287   : > { %v15301_v28 = vadd.f32 %v12057_v59, %v3921_v1  ;;  %v15303_v29 = vpop.f32.mrf.mxu1  ;;  %12271 = vmatmul.mubr.bf16.gmra.mxu1 %v15290_v62  ;;  %12290 = vmatprep.subr.bf16.mxu0 %v12935_v48 }
 0x288   : > { %v12036_v19 = vpop.f32.mrf.mxu0  ;;  %12274 = vmatprep.mubr.bf16.mxu1 %v15299_v25  ;;  %12319 = vmatpush3.bf16.msra.mxu1 %v12932_v12  ;;  %v5394_v4 = vld [vmem:[#allocation4 + $0xa8] sm:$0xff]  ;;  %v5756_v12 = vld [vmem:[#allocation4 + $0x3a] sm:$0xff] }
 0x289   : > { %v3934_v49 = vadd.f32 %v12036_v19, %v15147_v43  ;;  %v12060_v35 = vpop.f32.mrf.mxu1  ;;  %12320 = vmatprep.subr.bf16.mxu1 %v12934_v38  ;;  %12243 = vmatmul.mubr.bf16.gmra.mxu0 %v15295_v7  ;;  %v12939_v43 = vld [vmem:[%s17907_s5 + $0x138] sm:$0xff]   ;;  %v15342_v18 = vpack.c.bf16 %v5756_v12, %v5755_v2  ;;  %v5762_v2 = vld [vmem:[#allocation4 + $0x82] sm:$0xff] }
 0x28a   : > { %v3925_v53 = vpop.f32.mrf.mxu0  ;;  %12291 = vmatpush3.bf16.msra.mxu0 %v12935_v48  ;;  %12294 = vmatprep.mubr.bf16.mxu0 %v5767_v20 }
 0x28b   : > { %v15315_v61 = vadd.f32 %v12060_v35, %v3934_v49  ;;  %v3926_v21 = vadd.f32 %v3925_v53, %v15157_v50  ;;  %v4102_v16 = vpop.f32.mrf.mxu1  ;;  %12292 = vmatprep.subr.bf16.mxu0 %v12937_v58  ;;  %v12938_v50 = vld [vmem:[%s17907_s5 + $0xc0] sm:$0xff]   ;;  %v5760_v35 = vld [vmem:[#allocation4 + $0x6a] sm:$0xff] }
 0x28c   : > { %v12037_v60 = vpop.f32.mrf.mxu0  ;;  %12321 = vmatpush3.bf16.msra.mxu1 %v12934_v38  ;;  %v5395_v32 = vld [vmem:[#allocation4 + $0xb0] sm:$0xff]  ;;  %v5759_v49 = vld [vmem:[#allocation4 + $0x62] sm:$0xff] }
 0x28d   : > { %v15321_v54 = vadd.f32 %v4102_v16, %v3926_v21  ;;  %v3937_v33 = vadd.f32 %v12037_v60, %v15168_v22  ;;  %v12061_v0 = vpop.f32.mrf.mxu1  ;;  %v15324_v39 = vpack.c.bf16 %v5395_v32, %v5394_v4  ;;  %12322 = vmatprep.subr.bf16.mxu1 %v12936_v11  ;;  %v15336_v22 = vpack.c.bf16 %v5754_v8, %v5753_v44  ;;  %v5758_v38 = vld [vmem:[#allocation4 + $0x52] sm:$0xff] }
 0x28e   : > { %v15329_v31 = vpop.f32.mrf.mxu0  ;;  %12293 = vmatpush3.bf16.msra.mxu0 %v12937_v58  ;;  %v15369_v16 = vpack.c.bf16 %v5758_v38, %v5757_v45 }
 0x28f   : > { %v15331_v48 = vadd.f32 %v12061_v0, %v3937_v33  ;;  %v15333_v10 = vpop.f32.mrf.mxu1  ;;  %12275 = vmatmul.mubr.bf16.gmra.mxu1 %v15324_v39  ;;  %12342 = vmatprep.subr.bf16.mxu0 %v12939_v43 }
 0x290   : > { %v12040_v24 = vpop.f32.mrf.mxu0  ;;  %12323 = vmatpush3.bf16.msra.mxu1 %v12936_v11  ;;  %12326 = vmatprep.mubr.bf16.mxu1 %v15217_v15 }
 0x291   : > { %v3950_v13 = vadd.f32 %v12040_v24, %v15190_v17  ;;  %v12064_v14 = vpop.f32.mrf.mxu1  ;;  %12324 = vmatprep.subr.bf16.mxu1 %v12938_v50  ;;  %12295 = vmatmul.mubr.bf16.vlgmr.msra.gmra.mxu0 %v15336_v22  ;;  %v12943_v17 = vld [vmem:[%s17907_s5 + $0x128] sm:$0xff]  }
 0x292   : > { %v3941_v6 = vpop.f32.mrf.mxu0  ;;  %12298 = vmatprep.mubr.bf16.mxu0 %v15342_v18  ;;  %12343 = vmatpush3.bf16.msra.mxu0 %v12939_v43  ;;  %v15375_v43 = vpack.c.bf16 %v5760_v35, %v5759_v49  ;;  %v5766_v49 = vld [vmem:[#allocation4 + $0xb2] sm:$0xff] }
 0x293   : > { %v15350_v57 = vadd.f32 %v12064_v14, %v3950_v13  ;;  %v3942_v15 = vadd.f32 %v3941_v6, %v15205_v40  ;;  %v4118_v1 = vpop.f32.mrf.mxu1  ;;  %12344 = vmatprep.subr.bf16.mxu0 %v12941_v41  ;;  %v12942_v40 = vld [vmem:[%s17907_s5 + $0x170] sm:$0xff]   ;;  %v5764_v14 = vld [vmem:[#allocation4 + $0x9a] sm:$0xff] }
 0x294   : > { %v12041_v59 = vpop.f32.mrf.mxu0  ;;  %12325 = vmatpush3.bf16.msra.mxu1 %v12938_v50  ;;  %v5761_v50 = vld [vmem:[#allocation4 + $0x7a] sm:$0xff]  ;;  %v5763_v13 = vld [vmem:[#allocation4 + $0x92] sm:$0xff] }
 0x295   : > { %v15356_v20 = vadd.f32 %v4118_v1, %v3942_v15  ;;  %v3953_v58 = vadd.f32 %v12041_v59, %v15215_v46  ;;  %v12065_v19 = vpop.f32.mrf.mxu1  ;;  %12374 = vmatprep.subr.bf16.mxu1 %v12940_v63  ;;  %v12945_v46 = vld [vmem:[%s17907_s5 + $0x120] sm:$0xff]   ;;  %v15402_v1 = vpack.c.bf16 %v5762_v2, %v5761_v50  ;;  %v15410_v59 = vpack.c.bf16 %v5764_v14, %v5763_v13  ;;  %v5968_v50 = vld [vmem:[#allocation4 + $0xc8] sm:$0xff] }
 0x296   : > { %v15362_v11 = vpop.f32.mrf.mxu0  ;;  %12345 = vmatpush3.bf16.msra.mxu0 %v12941_v41  ;;  %v12954_v14 = vld [vmem:[%s17907_s5 + $0x140] sm:$0xff]  }
 0x297   : > { %17973 = vst [vmem:[#allocation13_spill] sm:$0xff] %v15356_v20  ;;  %v15364_v53 = vadd.f32 %v12065_v19, %v3953_v58  ;;  %v15366_v21 = vpop.f32.mrf.mxu1  ;;  %12327 = vmatmul.mubr.bf16.vlgmr.msra.gmra.mxu1 %v15224_v37  ;;  %12346 = vmatprep.subr.bf16.mxu0 %v12943_v17  ;;  %v12944_v37 = vld [vmem:[%s17907_s5 + $0x168] sm:$0xff]  }
 0x298   : > { %v12044_v44 = vpop.f32.mrf.mxu0  ;;  %12330 = vmatprep.mubr.bf16.mxu1 %v15260_v47  ;;  %12375 = vmatpush3.bf16.msra.mxu1 %v12940_v63 }
 0x299   : > { %17974 = vst [vmem:[#allocation10_spill] sm:$0xff] %v15364_v53  ;;  %v3966_v60 = vadd.f32 %v12044_v44, %v15241_v52  ;;  %v12068_v4 = vpop.f32.mrf.mxu1  ;;  %12376 = vmatprep.subr.bf16.mxu1 %v12942_v40  ;;  %12299 = vmatmul.mubr.bf16.gmra.mxu0 %v15369_v16  ;;  %v12947_v52 = vld [vmem:[%s17907_s5 + $0x118] sm:$0xff]  }
 0x29a   : > { %v3957_v32 = vpop.f32.mrf.mxu0  ;;  %12302 = vmatprep.mubr.bf16.mxu0 %v15375_v43  ;;  %12347 = vmatpush3.bf16.msra.mxu0 %v12943_v17  ;;  %v6155_v44 = vld [vmem:[#allocation4 + $0x19] sm:$0xff] }
 0x29b   : > { %v15383_v8 = vadd.f32 %v12068_v4, %v3966_v60  ;;  %v3958_v47 = vadd.f32 %v3957_v32, %v15250_v30  ;;  %v4134_v33 = vpop.f32.mrf.mxu1  ;;  %12348 = vmatprep.subr.bf16.mxu0 %v12945_v46  ;;  %v12946_v30 = vld [vmem:[%s17907_s5 + $0x160] sm:$0xff]  }
 0x29c   : > { %v12045_v0 = vpop.f32.mrf.mxu0  ;;  %12377 = vmatpush3.bf16.msra.mxu1 %v12942_v40  ;;  %v5765_v40 = vld [vmem:[#allocation4 + $0xaa] sm:$0xff]  ;;  %v12953_v32 = vld [vmem:[%s17907_s5 + $0x100] sm:$0xff]  }
 0x29d   : > { %17975 = vst [vmem:[#allocation15_spill] sm:$0xff] %v15383_v8  ;;  %v15389_v12 = vadd.f32 %v4134_v33, %v3958_v47  ;;  %v3969_v41 = vadd.f32 %v12045_v0, %v15258_v5  ;;  %v12069_v24 = vpop.f32.mrf.mxu1  ;;  %12378 = vmatprep.subr.bf16.mxu1 %v12944_v37  ;;  %v12949_v5 = vld [vmem:[%s17907_s5 + $0x110] sm:$0xff]   ;;  %v6171_v33 = vpack.c.bf16 %v15154_v23, %v6155_v44  ;;  %v12955_v23 = vld [vmem:[%s17907_s5 + $0x1b8] sm:$0xff]  }
 0x29e   : > { %v15395_v63 = vpop.f32.mrf.mxu0  ;;  %12349 = vmatpush3.bf16.msra.mxu0 %v12945_v46  ;;  %v12950_v46 = vld [vmem:[%s17907_s5 + $0x150] sm:$0xff]  }
 0x29f   : > { %17976 = vst [vmem:[#allocation23_spill] sm:$0xff] %v15389_v12  ;;  %v15397_v6 = vadd.f32 %v12069_v24, %v3969_v41  ;;  %v15399_v15 = vpop.f32.mrf.mxu1  ;;  %12331 = vmatmul.mubr.bf16.gmra.mxu1 %v15265_v26  ;;  %12350 = vmatprep.subr.bf16.mxu0 %v12947_v52  ;;  %v12948_v26 = vld [vmem:[%s17907_s5 + $0x158] sm:$0xff]   ;;  %v5967_v41 = vld [vmem:[#allocation4 + $0xc0] sm:$0xff] }
 0x2a0   : > { %v15407_v17 = vpop.f32.mrf.mxu0  ;;  %12334 = vmatprep.mubr.bf16.mxu1 %v15290_v62  ;;  %12379 = vmatpush3.bf16.msra.mxu1 %v12944_v37  ;;  %v12951_v62 = vld [vmem:[%s17907_s5 + $0x108] sm:$0xff]   ;;  %v15438_v37 = vpack.c.bf16 %v5766_v49, %v5765_v40  ;;  %v6158_v24 = vld [vmem:[#allocation4 + $0x39] sm:$0xff]  ;;  %v15464_v13 = vpack.c.bf16 %v5968_v50, %v5967_v41 }
 0x2a1   : > { %17977 = vst [vmem:[#allocation25_spill] sm:$0xff] %v15397_v6  ;;  %v15412_v45 = vpop.f32.mrf.mxu1  ;;  %12380 = vmatprep.subr.bf16.mxu1 %v12946_v30  ;;  %12303 = vmatmul.mubr.bf16.gmra.mxu0 %v15402_v1  ;;  %v12956_v50 = vld [vmem:[%s17907_s5 + $0x1f8] sm:$0xff]   ;;  %v12958_v6 = vld [vmem:[%s17907_s5 + $0x1f0] sm:$0xff]   ;;  %v6161_v12 = vld [vmem:[#allocation4 + $0x61] sm:$0xff] }
 0x2a2   : > { %v15418_v38 = vpop.f32.mrf.mxu0  ;;  %12306 = vmatprep.mubr.bf16.mxu0 %v15410_v59  ;;  %12351 = vmatpush3.bf16.msra.mxu0 %v12947_v52 }
 0x2a3   : > { %v15421_v58 = vpop.f32.mrf.mxu1  ;;  %12352 = vmatprep.subr.bf16.mxu0 %v12949_v5 }
 0x2a4   : > { %v15426_v19 = vpop.f32.mrf.mxu0  ;;  %12381 = vmatpush3.bf16.msra.mxu1 %v12946_v30 }
 0x2a5   : > { %v15428_v35 = vpop.f32.mrf.mxu1  ;;  %12382 = vmatprep.subr.bf16.mxu1 %v12948_v26 }
 0x2a6   : > { %v15433_v60 = vpop.f32.mrf.mxu0  ;;  %12353 = vmatpush3.bf16.msra.mxu0 %v12949_v5  ;;  %v15469_v5 = vld [vmem:[#allocation4 + $0x49] sm:$0xff] }
 0x2a7   : > { %v15435_v4 = vpop.f32.mrf.mxu1  ;;  %12335 = vmatmul.mubr.bf16.gmra.mxu1 %v15299_v25  ;;  %12354 = vmatprep.subr.bf16.mxu0 %v12951_v62  ;;  %v12952_v25 = vld [vmem:[%s17907_s5 + $0x148] sm:$0xff]  }
 0x2a8   : > { %v15443_v47 = vpop.f32.mrf.mxu0  ;;  %12338 = vmatprep.mubr.bf16.mxu1 %v15324_v39  ;;  %12383 = vmatpush3.bf16.msra.mxu1 %v12948_v26 }
 0x2a9   : > { %v15447_v52 = vpop.f32.mrf.mxu1  ;;  %12384 = vmatprep.subr.bf16.mxu1 %v12950_v46  ;;  %12307 = vmatmul.mubr.bf16.gmra.mxu0 %v15438_v37 }
 0x2aa   : > { %v15453_v0 = vpop.f32.mrf.mxu0  ;;  %12355 = vmatpush3.bf16.msra.mxu0 %v12951_v62  ;;  %12358 = vmatprep.mubr.bf16.mxu0 %v6171_v33  ;;  %v6157_v62 = vld [vmem:[#allocation4 + $0x31] sm:$0xff] }
 0x2ab   : > { %v15455_v2 = vpop.f32.mrf.mxu1  ;;  %12356 = vmatprep.subr.bf16.mxu0 %v12953_v32  ;;  %v15476_v49 = vpack.c.bf16 %v6158_v24, %v6157_v62 }
 0x2ac   : > { %v15460_v39 = vpop.f32.mrf.mxu0  ;;  %12385 = vmatpush3.bf16.msra.mxu1 %v12950_v46  ;;  %v12957_v46 = vld [vmem:[%s17907_s5 + $0x1b0] sm:$0xff]  }
 0x2ad   : > { %v15462_v30 = vpop.f32.mrf.mxu1  ;;  %12386 = vmatprep.subr.bf16.mxu1 %v12952_v25 }
 0x2ae   : > { %v15471_v26 = vpop.f32.mrf.mxu0  ;;  %12357 = vmatpush3.bf16.msra.mxu0 %v12953_v32  ;;  %v6173_v32 = vpack.c.bf16 %v15200_v55, %v15469_v5  ;;  %v12959_v55 = vld [vmem:[%s17907_s5 + $0x1a8] sm:$0xff]  }
 0x2af   : > { %v15473_v40 = vpop.f32.mrf.mxu1  ;;  %12339 = vmatmul.mubr.bf16.gmra.mxu1 %v15464_v13  ;;  %12406 = vmatprep.subr.bf16.mxu0 %v12955_v23 }
 0x2b0   : > { %17978 = vst [vmem:[#allocation14_spill] sm:$0xff] %v15473_v40  ;;  %v15481_v44 = vpop.f32.mrf.mxu0  ;;  %12387 = vmatpush3.bf16.msra.mxu1 %v12952_v25  ;;  %12390 = vmatprep.mubr.bf16.mxu1 %v15336_v22  ;;  %v6162_v25 = vld [vmem:[#allocation4 + $0x69] sm:$0xff] }
 0x2b1   : > { %v15486_v33 = vpop.f32.mrf.mxu1  ;;  %12388 = vmatprep.subr.bf16.mxu1 %v12954_v14  ;;  %12359 = vmatmul.mubr.bf16.vlgmr.msra.gmra.mxu0 %v15476_v49  ;;  %v15513_v8 = vpack.c.bf16 %v6162_v25, %v6161_v12 }
 0x2b2   : > { %17979 = vst [vmem:[#allocation11_spill] sm:$0xff] %v15486_v33  ;;  %v15492_v41 = vpop.f32.mrf.mxu0  ;;  %12362 = vmatprep.mubr.bf16.mxu0 %v6173_v32  ;;  %12407 = vmatpush3.bf16.msra.mxu0 %v12955_v23  ;;  %v15506_v32 = vld [vmem:[#allocation4 + $0x79] sm:$0xff] }
 0x2b3   : > { %17980 = vst [vmem:[#allocation18_spill] sm:$0xff] %v15492_v41  ;;  %v15494_v24 = vpop.f32.mrf.mxu1  ;;  %12408 = vmatprep.subr.bf16.mxu0 %v12957_v46  ;;  %v12969_v41 = vld [vmem:[%s17907_s5 + $0x180] sm:$0xff]  }
 0x2b4   : > { %17981 = vst [vmem:[#allocation27_spill] sm:$0xff] %v15494_v24  ;;  %v15499_v22 = vpop.f32.mrf.mxu0  ;;  %12389 = vmatpush3.bf16.msra.mxu1 %v12954_v14  ;;  %v12961_v14 = vld [vmem:[%s17907_s5 + $0x1a0] sm:$0xff]  }
 0x2b5   : > { %17982 = vst [vmem:[#allocation17_spill] sm:$0xff] %v15499_v22  ;;  %v15501_v62 = vpop.f32.mrf.mxu1  ;;  %12438 = vmatprep.subr.bf16.mxu1 %v12956_v50 }
 0x2b6   : > { %17983 = vst [vmem:[#allocation24_spill] sm:$0xff] %v15501_v62  ;;  %v15508_v23 = vpop.f32.mrf.mxu0  ;;  %12409 = vmatpush3.bf16.msra.mxu0 %v12957_v46  ;;  %v6175_v46 = vpack.c.bf16 %v15247_v34, %v15506_v32  ;;  %v12963_v34 = vld [vmem:[%s17907_s5 + $0x198] sm:$0xff]  }
 0x2b7   : > { %17984 = vst [vmem:[#allocation16_spill] sm:$0xff] %v15508_v23  ;;  %v15510_v24 = vpop.f32.mrf.mxu1  ;;  %12391 = vmatmul.mubr.bf16.vlgmr.msra.gmra.mxu1 %v15342_v18  ;;  %12410 = vmatprep.subr.bf16.mxu0 %v12959_v55  ;;  %v12960_v18 = vld [vmem:[%s17907_s5 + $0x1e8] sm:$0xff]  }
 0x2b8   : > { %17985 = vst [vmem:[#allocation12_spill] sm:$0xff] %v15510_v24  ;;  %v15518_v62 = vpop.f32.mrf.mxu0  ;;  %12394 = vmatprep.mubr.bf16.mxu1 %v15369_v16  ;;  %12439 = vmatpush3.bf16.msra.mxu1 %v12956_v50  ;;  %v6166_v50 = vld [vmem:[#allocation4 + $0x99] sm:$0xff] }
 0x2b9   : > { %17986 = vst [vmem:[#allocation21_spill] sm:$0xff] %v15518_v62  ;;  %v15523_v23 = vpop.f32.mrf.mxu1  ;;  %12440 = vmatprep.subr.bf16.mxu1 %v12958_v6  ;;  %12363 = vmatmul.mubr.bf16.gmra.mxu0 %v15513_v8  ;;  %v6169_v62 = vld [vmem:[#allocation4 + $0xc1] sm:$0xff] }
 0x2ba   : > { %17987 = vst [vmem:[#allocation26_spill] sm:$0xff] %v15523_v23  ;;  %v15529_v12 = vpop.f32.mrf.mxu0  ;;  %12366 = vmatprep.mubr.bf16.mxu0 %v6175_v46  ;;  %12411 = vmatpush3.bf16.msra.mxu0 %v12959_v55  ;;  %v6165_v55 = vld [vmem:[#allocation4 + $0x91] sm:$0xff] }
 0x2bb   : > { %17988 = vst [vmem:[#allocation20_spill] sm:$0xff] %v15529_v12  ;;  %v15531_v25 = vpop.f32.mrf.mxu1  ;;  %12412 = vmatprep.subr.bf16.mxu0 %v12961_v14  ;;  %v12962_v12 = vld [vmem:[%s17907_s5 + $0x1e0] sm:$0xff]   ;;  %v15548_v24 = vpack.c.bf16 %v6166_v50, %v6165_v55  ;;  %v6170_v55 = vld [vmem:[#allocation4 + $0xc9] sm:$0xff] }
 0x2bc   : > { %17989 = vst [vmem:[#allocation28_spill] sm:$0xff] %v15531_v25  ;;  %v15536_v16 = vpop.f32.mrf.mxu0  ;;  %12441 = vmatpush3.bf16.msra.mxu1 %v12958_v6  ;;  %v12965_v6 = vld [vmem:[%s17907_s5 + $0x190] sm:$0xff]   ;;  %v15582_v53 = vpack.c.bf16 %v6170_v55, %v6169_v62  ;;  %v6371_v55 = vld [vmem:[#allocation4 + $0xc2] sm:$0xff] }
 0x2bd   : > { %17990 = vst [vmem:[#allocation22_spill] sm:$0xff] %v15536_v16  ;;  %v15538_v23 = vpop.f32.mrf.mxu1  ;;  %12442 = vmatprep.subr.bf16.mxu1 %v12960_v18 }
 0x2be   : > { %17991 = vst [vmem:[#allocation19_spill] sm:$0xff] %v15538_v23  ;;  %v15543_v46 = vpop.f32.mrf.mxu0  ;;  %12413 = vmatpush3.bf16.msra.mxu0 %v12961_v14  ;;  %17995 = vst [vmem:[#allocation32_spill] sm:$0xff] %v15582_v53 }
 0x2bf   : > { %17992 = vst [vmem:[#allocation29_spill] sm:$0xff] %v15543_v46  ;;  %v15545_v25 = vpop.f32.mrf.mxu1  ;;  %12395 = vmatmul.mubr.bf16.gmra.mxu1 %v15375_v43  ;;  %12414 = vmatprep.subr.bf16.mxu0 %v12963_v34  ;;  %v12964_v43 = vld [vmem:[%s17907_s5 + $0x1d8] sm:$0xff]   ;;  %v12966_v46 = vld [vmem:[%s17907_s5 + $0x1d0] sm:$0xff]  }
 0x2c0   : > { %17993 = vst [vmem:[#allocation30_spill] sm:$0xff] %v15545_v25  ;;  %v15553_v23 = vpop.f32.mrf.mxu0  ;;  %12398 = vmatprep.mubr.bf16.mxu1 %v15402_v1  ;;  %12443 = vmatpush3.bf16.msra.mxu1 %v12960_v18  ;;  %v12967_v1 = vld [vmem:[%s17907_s5 + $0x188] sm:$0xff]  }
 0x2c1   : > { %v15556_v16 = vpop.f32.mrf.mxu1  ;;  %12444 = vmatprep.subr.bf16.mxu1 %v12962_v12  ;;  %12367 = vmatmul.mubr.bf16.gmra.mxu0 %v15548_v24 }
 0x2c2   : > { %v15562_v14 = vpop.f32.mrf.mxu0  ;;  %12370 = vmatprep.mubr.bf16.mxu0 %v15295_v7  ;;  %12415 = vmatpush3.bf16.msra.mxu0 %v12963_v34  ;;  %v6561_v7 = vld [vmem:[#allocation4 + $0x38] sm:$0xff] }
 0x2c3   : > { %v15565_v50 = vpop.f32.mrf.mxu1  ;;  %12416 = vmatprep.subr.bf16.mxu0 %v12965_v6 }
 0x2c4   : > { %v15570_v18 = vpop.f32.mrf.mxu0  ;;  %12445 = vmatpush3.bf16.msra.mxu1 %v12962_v12  ;;  %v6560_v12 = vld [vmem:[#allocation4 + $0x30] sm:$0xff] }
 0x2c5   : > { %v15572_v25 = vpop.f32.mrf.mxu1  ;;  %12446 = vmatprep.subr.bf16.mxu1 %v12964_v43  ;;  %v6576_v33 = vpack.c.bf16 %v6561_v7, %v6560_v12  ;;  %v6563_v7 = vld [vmem:[#allocation4 + $0x50] sm:$0xff] }
 0x2c6   : > { %v15577_v34 = vpop.f32.mrf.mxu0  ;;  %12417 = vmatpush3.bf16.msra.mxu0 %v12965_v6 }
 0x2c7   : > { %v15579_v22 = vpop.f32.mrf.mxu1  ;;  %12399 = vmatmul.mubr.bf16.gmra.mxu1 %v15410_v59  ;;  %12418 = vmatprep.subr.bf16.mxu0 %v12967_v1  ;;  %v12968_v59 = vld [vmem:[%s17907_s5 + $0x1c8] sm:$0xff]  }
 0x2c8   : > { %17994 = vst [vmem:[#allocation31_spill] sm:$0xff] %v15579_v22  ;;  %v15587_v20 = vpop.f32.mrf.mxu0  ;;  %12402 = vmatprep.mubr.bf16.mxu1 %v15438_v37  ;;  %12447 = vmatpush3.bf16.msra.mxu1 %v12964_v43  ;;  %v6372_v22 = vld [vmem:[#allocation4 + $0xca] sm:$0xff]  ;;  %v12971_v37 = vld [vmem:[%s17907_s5 + $0x238] sm:$0xff]  }
 0x2c9   : > { %v15590_v6 = vpop.f32.mrf.mxu1  ;;  %12448 = vmatprep.subr.bf16.mxu1 %v12966_v46  ;;  %12371 = vmatmul.mubr.bf16.gmra.mxu0 %v15582_v53  ;;  %v15607_v53 = vpack.c.bf16 %v6372_v22, %v6371_v55  ;;  %v12973_v22 = vld [vmem:[%s17907_s5 + $0x230] sm:$0xff]  }
 0x2ca   : > { %17996 = vst [vmem:[#allocation33_spill] sm:$0xff] %v15590_v6  ;;  %v15596_v62 = vpop.f32.mrf.mxu0  ;;  %12419 = vmatpush3.bf16.msra.mxu0 %v12967_v1  ;;  %12422 = vmatprep.mubr.bf16.mxu0 %v6576_v33  ;;  %v12970_v33 = vld [vmem:[%s17907_s5 + $0x1c0] sm:$0xff]   ;;  %v6565_v1 = vld [vmem:[#allocation4 + $0x68] sm:$0xff] }
 0x2cb   : > { %17997 = vst [vmem:[#allocation34_spill] sm:$0xff] %v15596_v62  ;;  %v15598_v40 = vpop.f32.mrf.mxu1  ;;  %12420 = vmatprep.subr.bf16.mxu0 %v12969_v41  ;;  %18001 = vst [vmem:[#allocation38_spill] sm:$0xff] %v15607_v53  ;;  %v6562_v6 = vld [vmem:[#allocation4 + $0x48] sm:$0xff] }
 0x2cc   : > { %17998 = vst [vmem:[#allocation35_spill] sm:$0xff] %v15598_v40  ;;  %v15603_v43 = vpop.f32.mrf.mxu0  ;;  %12449 = vmatpush3.bf16.msra.mxu1 %v12966_v46  ;;  %v6577_v46 = vpack.c.bf16 %v6563_v7, %v6562_v6  ;;  %v6765_v7 = vld [vmem:[#allocation4 + $0x51] sm:$0xff] }
 0x2cd   : > { %17999 = vst [vmem:[#allocation36_spill] sm:$0xff] %v15603_v43  ;;  %v15605_v12 = vpop.f32.mrf.mxu1  ;;  %12450 = vmatprep.subr.bf16.mxu1 %v12968_v59  ;;  %v6564_v43 = vld [vmem:[#allocation4 + $0x60] sm:$0xff] }
 0x2ce   : > { %18000 = vst [vmem:[#allocation37_spill] sm:$0xff] %v15605_v12  ;;  %v15612_v40 = vpop.f32.mrf.mxu0  ;;  %12421 = vmatpush3.bf16.msra.mxu0 %v12969_v41  ;;  %v6578_v12 = vpack.c.bf16 %v6565_v1, %v6564_v43  ;;  %v12972_v41 = vld [vmem:[%s17907_s5 + $0x78] sm:$0xff]   ;;  %v6567_v1 = vld [vmem:[#allocation4 + $0x80] sm:$0xff] }
 0x2cf   : > { %18002 = vst [vmem:[#allocation39_spill] sm:$0xff] %v15612_v40  ;;  %v15614_v62 = vpop.f32.mrf.mxu1  ;;  %12403 = vmatmul.mubr.bf16.gmra.mxu1 %v15607_v53  ;;  %12470 = vmatprep.subr.bf16.mxu0 %v12971_v37 }
 0x2d0   : > { %v15620_v55 = vpop.f32.mrf.mxu0  ;;  %12451 = vmatpush3.bf16.msra.mxu1 %v12968_v59  ;;  %12454 = vmatprep.mubr.bf16.mxu1 %v15476_v49  ;;  %v12975_v49 = vld [vmem:[%s17907_s5 + $0x228] sm:$0xff]   ;;  %v3913_v59 = vadd.f32 %v15297_v42, %v15139_v9  ;;  %v6566_v9 = vld [vmem:[#allocation4 + $0x78] sm:$0xff]  ;;  %v4342_v42 = vadd.f32 %v15418_v38, %v15287_v51  ;;  %v3929_v51 = vadd.f32 %v15329_v31, %v15181_v27 }
 0x2d1   : > { %v15623_v40 = vpop.f32.mrf.mxu1  ;;  %12452 = vmatprep.subr.bf16.mxu1 %v12970_v33  ;;  %12423 = vmatmul.mubr.bf16.vlgmr.msra.gmra.mxu0 %v6577_v46  ;;  %v4344_v46 = vadd.f32 %v15407_v17, %v15284_v56  ;;  %v6579_v56 = vpack.c.bf16 %v6567_v1, %v6566_v9  ;;  %v6568_v17 = vld [vmem:[#allocation4 + $0x90] sm:$0xff]  ;;  %v4345_v1 = vadd.f32 %v15426_v19, %v15301_v28  ;;  %v6769_v9 = vld [vmem:[#allocation4 + $0x81] sm:$0xff] }
 0x2d2   : > { %18003 = vst [vmem:[#allocation40_spill] sm:$0xff] %v15623_v40  ;;  %v15628_v6 = vpop.f32.mrf.mxu0  ;;  %12426 = vmatprep.mubr.bf16.mxu0 %v6578_v12  ;;  %12471 = vmatpush3.bf16.msra.mxu0 %v12971_v37  ;;  %v6779_v37 = vpack.c.bf16 %v6765_v7, %v15469_v5  ;;  %v6569_v12 = vld [vmem:[#allocation4 + $0x98] sm:$0xff]  ;;  %v12977_v5 = vld [vmem:[%s17907_s5 + $0x220] sm:$0xff]   ;;  %v4150_v7 = vadd.f32 %v15303_v29, %v3913_v59  ;;  %v6571_v29 = vld [vmem:[#allocation4 + $0xb0] sm:$0xff] }
 0x2d3   : > { %18004 = vst [vmem:[#allocation41_spill] sm:$0xff] %v15628_v6  ;;  %v15630_v53 = vpop.f32.mrf.mxu1  ;;  %12472 = vmatprep.subr.bf16.mxu0 %v12973_v22  ;;  %v4537_v38 = vadd.f32 %v15412_v45, %v4344_v46  ;;  %v15675_v45 = vld [vmem:[#allocation4 + $0xb1] sm:$0xff]  ;;  %v4535_v28 = vadd.f32 %v15421_v58, %v4342_v42  ;;  %v6570_v46 = vld [vmem:[#allocation4 + $0xa8] sm:$0xff]  ;;  %v4538_v42 = vadd.f32 %v15428_v35, %v4345_v1 }
 0x2d4   : > { %18005 = vst [vmem:[#allocation42_spill] sm:$0xff] %v15630_v53  ;;  %v15637_v43 = vpop.f32.mrf.mxu0  ;;  %12453 = vmatpush3.bf16.msra.mxu1 %v12970_v33  ;;  %v12974_v53 = vld [vmem:[%s17907_s5 + $0x70] sm:$0xff]   ;;  %v4343_v27 = vadd.f32 %v15433_v60, %v4150_v7  ;;  %v4346_v35 = vadd.f32 %v15453_v0, %v15321_v54 }
 0x2d5   : > { %v15641_v40 = vpop.f32.mrf.mxu1  ;;  %12502 = vmatprep.subr.bf16.mxu1 %v12972_v41  ;;  %v4730_v19 = vadd.f32 %v15553_v23, %v4537_v38  ;;  %v15689_v58 = vld [vmem:[#allocation4 + $0xa9] sm:$0xff]  ;;  %v4154_v23 = vadd.f32 %v15333_v10, %v3929_v51  ;;  %v4731_v51 = vadd.f32 %v15570_v18, %v4538_v42  ;;  %v18013_v42 = vld [vmem:[#allocation10_spill] sm:$0xff] }
 0x2d6   : > { %18006 = vst [vmem:[#allocation43_spill] sm:$0xff] %v15641_v40  ;;  %v15647_v6 = vpop.f32.mrf.mxu0  ;;  %12473 = vmatpush3.bf16.msra.mxu0 %v12973_v22  ;;  %v6580_v22 = vpack.c.bf16 %v6569_v12, %v6568_v17  ;;  %v6781_v12 = vpack.c.bf16 %v6769_v9, %v15506_v32  ;;  %v6783_v7 = vpack.c.bf16 %v15675_v45, %v15689_v58 }
 0x2d7   : > { %v15651_v33 = vpop.f32.mrf.mxu1  ;;  %12455 = vmatmul.mubr.bf16.vlgmr.msra.gmra.mxu1 %v6779_v37  ;;  %12474 = vmatprep.subr.bf16.mxu0 %v12975_v49  ;;  %v4536_v10 = vadd.f32 %v15435_v4, %v4343_v27  ;;  %v18010_v27 = vld [vmem:[#allocation18_spill] sm:$0xff] }
 0x2d8   : > { %v15657_v40 = vpop.f32.mrf.mxu0  ;;  %12458 = vmatprep.mubr.bf16.mxu1 %v15513_v8  ;;  %12503 = vmatpush3.bf16.msra.mxu1 %v12972_v41  ;;  %v12976_v8 = vld [vmem:[%s17907_s5 + $0x68] sm:$0xff]   ;;  %v3945_v41 = vadd.f32 %v15362_v11, %v15230_v3  ;;  %v12979_v3 = vld [vmem:[%s17907_s5 + $0x218] sm:$0xff]   ;;  %v4348_v11 = vadd.f32 %v15443_v47, %v15315_v61  ;;  %v12978_v61 = vld [vmem:[%s17907_s5 + $0x60] sm:$0xff]   ;;  %v3961_v47 = vadd.f32 %v15395_v63, %v15269_v36 }
 0x2d9   : > { %v15665_v37 = vpop.f32.mrf.mxu1  ;;  %12427 = vmatmul.mubr.bf16.gmra.mxu0 %v6579_v56  ;;  %12504 = vmatprep.subr.bf16.mxu1 %v12974_v53  ;;  %v4728_v56 = vadd.f32 %v15562_v14, %v4535_v28  ;;  %v4349_v14 = vadd.f32 %v15460_v39, %v15331_v48  ;;  %v12981_v36 = vld [vmem:[%s17907_s5 + $0x210] sm:$0xff]   ;;  %v4352_v63 = vadd.f32 %v15481_v44, %v15350_v57  ;;  %v18011_v28 = vld [vmem:[#allocation34_spill] sm:$0xff] }
 0x2da   : > { %v15673_v31 = vpop.f32.mrf.mxu0  ;;  %12430 = vmatprep.mubr.bf16.mxu0 %v6580_v22  ;;  %12475 = vmatpush3.bf16.msra.mxu0 %v12975_v49  ;;  %v6581_v49 = vpack.c.bf16 %v6571_v29, %v6570_v46  ;;  %v4924_v22 = vadd.f32 %v15556_v16, %v4730_v19  ;;  %v4541_v54 = vadd.f32 %v15447_v52, %v4348_v11  ;;  %v12980_v52 = vld [vmem:[%s17907_s5 + $0x58] sm:$0xff]   ;;  %v18008_v29 = vld [vmem:[#allocation11_spill] sm:$0xff] }
 0x2db   : > { %v15679_v59 = vpop.f32.mrf.mxu1  ;;  %12476 = vmatprep.subr.bf16.mxu0 %v12977_v5  ;;  %v4922_v4 = vadd.f32 %v15565_v50, %v4728_v56  ;;  %v4729_v0 = vadd.f32 %v15577_v34, %v4536_v10  ;;  %v4539_v57 = vadd.f32 %v15455_v2, %v4346_v35  ;;  %v4542_v18 = vadd.f32 %v15462_v30, %v4349_v14  ;;  %v18007_v2 = vld [vmem:[#allocation14_spill] sm:$0xff]  ;;  %v18014_v56 = vld [vmem:[#allocation17_spill] sm:$0xff]  ;;  %v18015_v10 = vld [vmem:[#allocation16_spill] sm:$0xff] }
 0x2dc   : > { %v15686_v60 = vpop.f32.mrf.mxu0  ;;  %12505 = vmatpush3.bf16.msra.mxu1 %v12974_v53  ;;  %v4158_v53 = vadd.f32 %v15366_v21, %v3945_v41  ;;  %v4347_v21 = vadd.f32 %v15471_v26, %v4154_v23  ;;  %v15729_v26 = vadd.f32 %v15399_v15, %v3961_v47  ;;  %v4734_v44 = vadd.f32 %v15587_v20, %v4541_v54  ;;  %v12983_v20 = vld [vmem:[%s17907_s5 + $0x208] sm:$0xff]   ;;  %v18009_v41 = vld [vmem:[#allocation13_spill] sm:$0xff]  ;;  %v12982_v23 = vld [vmem:[%s17907_s5 + $0x50] sm:$0xff]  }
 0x2dd   : > { %v15694_v17 = vpop.f32.mrf.mxu1  ;;  %12506 = vmatprep.subr.bf16.mxu1 %v12976_v8  ;;  %v4925_v34 = vadd.f32 %v15572_v25, %v4731_v51  ;;  %v4732_v19 = vadd.f32 %v18011_v28, %v4539_v57  ;;  %v18012_v25 = vld [vmem:[#allocation31_spill] sm:$0xff]  ;;  %v4353_v47 = vadd.f32 %v18014_v56, %v18013_v42  ;;  %v18016_v14 = vld [vmem:[#allocation33_spill] sm:$0xff]  ;;  %v18027_v56 = vld [vmem:[#allocation26_spill] sm:$0xff] }
 0x2de   : > { %v15707_v32 = vpop.f32.mrf.mxu0  ;;  %12477 = vmatpush3.bf16.msra.mxu0 %v12977_v5  ;;  %v4540_v9 = vadd.f32 %v18007_v2, %v4347_v21  ;;  %v4923_v46 = vadd.f32 %v18012_v25, %v4729_v0  ;;  %v4351_v35 = vadd.f32 %v18015_v10, %v4158_v53  ;;  %v12985_v53 = vld [vmem:[%s17907_s5 + $0x200] sm:$0xff]   ;;  %v18020_v57 = vld [vmem:[#allocation35_spill] sm:$0xff] }
 0x2df   : > { %v15713_v38 = vpop.f32.mrf.mxu1  ;;  %12459 = vmatmul.mubr.bf16.gmra.mxu1 %v6781_v12  ;;  %12478 = vmatprep.subr.bf16.mxu0 %v12979_v3  ;;  %v12984_v2 = vld [vmem:[%s17907_s5 + $0x48] sm:$0xff]   ;;  %v18025_v28 = vld [vmem:[#allocation37_spill] sm:$0xff] }
 0x2e0   : > { %v12176_v48 = vpop.f32.mrf.mxu0  ;;  %12462 = vmatprep.mubr.bf16.mxu1 %v15548_v24  ;;  %12507 = vmatpush3.bf16.msra.mxu1 %v12976_v8  ;;  %v15736_v24 = vld [vmem:[%s17906_s4] ss:$0 sm:$0xff]  ;;  %v4545_v8 = vadd.f32 %v18008_v29, %v4352_v63  ;;  %v18023_v29 = vld [vmem:[#allocation27_spill] sm:$0xff] }
 0x2e1   : > { %v5117_v39 = vadd.f32 %v12176_v48, %v4924_v22  ;;  %v12200_v16 = vpop.f32.mrf.mxu1  ;;  %12431 = vmatmul.mubr.bf16.gmra.mxu0 %v6581_v49  ;;  %12508 = vmatprep.subr.bf16.mxu1 %v12978_v61  ;;  %v18017_v22 = vld [vmem:[#allocation36_spill] sm:$0xff] }
 0x2e2   : > { %v5052_v50 = vpop.f32.mrf.mxu0  ;;  %12434 = vmatprep.mubr.bf16.mxu0 %v15464_v13  ;;  %12479 = vmatpush3.bf16.msra.mxu0 %v12979_v3  ;;  %v4350_v13 = vadd.f32 %v18010_v27, %v18009_v41  ;;  %v4735_v51 = vadd.f32 %v18017_v22, %v4542_v18 }
 0x2e3   : > { %v5310_v5 = vadd.f32 %v12200_v16, %v5117_v39  ;;  %v5115_v15 = vadd.f32 %v5052_v50, %v4922_v4  ;;  %v5245_v1 = vpop.f32.mrf.mxu1  ;;  %12480 = vmatprep.subr.bf16.mxu0 %v12981_v36  ;;  %v18018_v39 = vld [vmem:[#allocation15_spill] sm:$0xff]  ;;  %v18019_v16 = vld [vmem:[#allocation21_spill] sm:$0xff] }
 0x2e4   : > { %v12177_v30 = vpop.f32.mrf.mxu0  ;;  %12509 = vmatpush3.bf16.msra.mxu1 %v12978_v61  ;;  %v4928_v61 = vadd.f32 %v18016_v14, %v4734_v44  ;;  %v4926_v44 = vadd.f32 %v18020_v57, %v4732_v19  ;;  %v18021_v50 = vld [vmem:[#allocation39_spill] sm:$0xff]  ;;  %v4543_v41 = vadd.f32 %v18023_v29, %v4350_v13  ;;  %v4929_v19 = vadd.f32 %v18025_v28, %v4735_v51  ;;  %v15791_v13 = vld [vmem:[%s17907_s5 + $0x38] sm:$0xff]  }
 0x2e5   : > { %v15751_v3 = vadd.f32 %v15736_v24, %v5310_v5  ;;  %v5308_v11 = vadd.f32 %v5245_v1, %v5115_v15  ;;  %v5118_v12 = vadd.f32 %v12177_v30, %v4925_v34  ;;  %v12201_v49 = vpop.f32.mrf.mxu1  ;;  %12510 = vmatprep.subr.bf16.mxu1 %v12980_v52  ;;  %v4733_v18 = vadd.f32 %v18021_v50, %v4540_v9  ;;  %v18022_v5 = vld [vmem:[#allocation32_spill] sm:$0xff] }
 0x2e6   : > { %v5055_v54 = vpop.f32.mrf.mxu0  ;;  %12481 = vmatpush3.bf16.msra.mxu0 %v12981_v36  ;;  %v4356_v36 = vadd.f32 %v18019_v16, %v18018_v39  ;;  %v18024_v9 = vld [vmem:[#allocation24_spill] sm:$0xff] }
 0x2e7   : > { %v5349_v21 = vmax.f32 %v15751_v3, 0.0  ;;  %v15763_v63 = vadd.f32 %v15736_v24, %v5308_v11  ;;  %v5311_v48 = vadd.f32 %v12201_v49, %v5118_v12  ;;  %v5116_v4 = vadd.f32 %v5055_v54, %v4923_v46  ;;  %v5248_v0 = vpop.f32.mrf.mxu1  ;;  %12463 = vmatmul.mubr.bf16.gmra.mxu1 %v6783_v7  ;;  %12482 = vmatprep.subr.bf16.mxu0 %v12983_v20  ;;  %v18026_v49 = vld [vmem:[#allocation12_spill] sm:$0xff] }
 0x2e8   : > { %v12180_v34 = vpop.f32.mrf.mxu0  ;;  %12466 = vmatprep.mubr.bf16.mxu1 %v18022_v5  ;;  %12511 = vmatpush3.bf16.msra.mxu1 %v12980_v52  ;;  %v4546_v27 = vadd.f32 %v18024_v9, %v4353_v47  ;;  %v4738_v52 = vadd.f32 %v15620_v55, %v4545_v8  ;;  %v4544_v42 = vadd.f32 %v18026_v49, %v4351_v35  ;;  %v18028_v8 = vld [vmem:[#allocation41_spill] sm:$0xff] }
 0x2e9   : > { %5366 = vst [vmem:[#allocation4 + $0xf1] sm:$0xff] %v5349_v21  ;;  %v5347_v45 = vmax.f32 %v15763_v63, 0.0  ;;  %v5334_v58 = vadd.f32 %v15736_v24, %v5311_v48  ;;  %v5309_v7 = vadd.f32 %v5248_v0, %v5116_v4  ;;  %v5121_v15 = vadd.f32 %v12180_v34, %v4928_v61  ;;  %v12204_v1 = vpop.f32.mrf.mxu1  ;;  %12512 = vmatprep.subr.bf16.mxu1 %v12982_v23  ;;  %v12986_v35 = vld [vmem:[%s17907_s5 + $0x40] sm:$0xff]   ;;  %v18029_v63 = vld [vmem:[#allocation23_spill] sm:$0xff]  ;;  %v18031_v4 = vld [vmem:[#allocation40_spill] sm:$0xff] }
 0x2ea   : > { %v5068_v30 = vpop.f32.mrf.mxu0  ;;  %12483 = vmatpush3.bf16.msra.mxu0 %v12983_v20  ;;  %v4549_v55 = vadd.f32 %v18027_v56, %v4356_v36  ;;  %v4927_v20 = vadd.f32 %v15614_v62, %v4733_v18  ;;  %v4736_v47 = vadd.f32 %v18028_v8, %v4543_v41  ;;  %v18030_v62 = vld [vmem:[#allocation20_spill] sm:$0xff]  ;;  %v4932_v0 = vadd.f32 %v18031_v4, %v4738_v52  ;;  %v18032_v34 = vld [vmem:[#allocation25_spill] sm:$0xff] }
 0x2eb   : > { %5364 = vst [vmem:[#allocation4 + $0xd9] sm:$0xff] %v5347_v45  ;;  %v15785_v25 = vmax.f32 %v5334_v58, 0.0  ;;  %v5332_v46 = vadd.f32 %v15736_v24, %v5309_v7  ;;  %v5314_v3 = vadd.f32 %v12204_v1, %v5121_v15  ;;  %v5119_v11 = vadd.f32 %v5068_v30, %v4926_v44  ;;  %v5261_v12 = vpop.f32.mrf.mxu1  ;;  %12484 = vmatprep.subr.bf16.mxu0 %v12985_v53  ;;  %v18033_v58 = vld [vmem:[#allocation22_spill] sm:$0xff]  ;;  %v18035_v52 = vld [vmem:[#allocation28_spill] sm:$0xff] }
 0x2ec   : > { %v12181_v10 = vpop.f32.mrf.mxu0  ;;  %12513 = vmatpush3.bf16.msra.mxu1 %v12982_v23  ;;  %v4354_v48 = vadd.f32 %v18030_v62, %v18029_v63  ;;  %v4739_v23 = vadd.f32 %v15637_v43, %v4546_v27  ;;  %v4357_v7 = vadd.f32 %v18033_v58, %v18032_v34  ;;  %v18034_v43 = vld [vmem:[#allocation42_spill] sm:$0xff] }
 0x2ed   : > { %5367 = vst [vmem:[#allocation4 + $0xf9] sm:$0xff] %v15785_v25  ;;  %v5348_v14 = vmax.f32 %v5332_v46, 0.0  ;;  %v15799_v61 = vadd.f32 %v15736_v24, %v5314_v3  ;;  %v5312_v22 = vadd.f32 %v5261_v12, %v5119_v11  ;;  %v5122_v51 = vadd.f32 %v12181_v10, %v4929_v19  ;;  %v12205_v54 = vpop.f32.mrf.mxu1  ;;  %12514 = vmatprep.subr.bf16.mxu1 %v12984_v2  ;;  %v15827_v19 = vld [vmem:[%s17907_s5 + $0xb8] sm:$0xff]  }
 0x2ee   : > { %v5071_v39 = vpop.f32.mrf.mxu0  ;;  %12485 = vmatpush3.bf16.msra.mxu0 %v12985_v53  ;;  %v15809_v16 = vpack.c.bf16 %v15785_v25, %v5349_v21  ;;  %v4930_v15 = vadd.f32 %v18034_v43, %v4736_v47  ;;  %v4737_v53 = vadd.f32 %v15647_v6, %v4544_v42  ;;  %v4547_v6 = vadd.f32 %v18035_v52, %v4354_v48  ;;  %v6965_v63 = vld [vmem:[#allocation4 + $0x3a] sm:$0xff] }
 0x2ef   : > { %5365 = vst [vmem:[#allocation4 + $0xe1] sm:$0xff] %v5348_v14  ;;  %v5353_v36 = vmax.f32 %v15799_v61, 0.0  ;;  %v15813_v57 = vadd.f32 %v15736_v24, %v5312_v22  ;;  %v5315_v44 = vadd.f32 %v12205_v54, %v5122_v51  ;;  %v5120_v50 = vadd.f32 %v5071_v39, %v4927_v20  ;;  %v5264_v18 = vpop.f32.mrf.mxu1  ;;  %12534 = vmatprep.subr.bf16.mxu0 %v15791_v13  ;;  %v6964_v54 = vld [vmem:[#allocation4 + $0x32] sm:$0xff] }
 0x2f0   : > { %v12184_v21 = vpop.f32.mrf.mxu0  ;;  %v15820_v1 = vpack.c.bf16 %v5348_v14, %v5347_v45  ;;  %12515 = vmatpush3.bf16.msra.mxu1 %v12984_v2  ;;  %v18036_v45 = vld [vmem:[#allocation29_spill] sm:$0xff]  ;;  %v18037_v2 = vld [vmem:[#allocation43_spill] sm:$0xff]  ;;  %v4742_v3 = vadd.f32 %v15657_v40, %v4549_v55  ;;  %v4931_v40 = vadd.f32 %v15651_v33, %v4737_v53  ;;  %v4740_v55 = vadd.f32 %v15673_v31, %v4547_v6 }
 0x2f1   : > { %5370 = vst [vmem:[#allocation4 + $0x121] sm:$0xff] %v5353_v36  ;;  %v5351_v29 = vmax.f32 %v15813_v57, 0.0  ;;  %v5338_v41 = vadd.f32 %v15736_v24, %v5315_v44  ;;  %v5313_v9 = vadd.f32 %v5264_v18, %v5120_v50  ;;  %v5125_v27 = vadd.f32 %v12184_v21, %v4932_v0  ;;  %v12208_v28 = vpop.f32.mrf.mxu1  ;;  %12516 = vmatprep.subr.bf16.mxu1 %v12986_v35 }
 0x2f2   : > { %v4355_v30 = vadd.f32 %v18036_v45, %v15729_v26  ;;  %v4933_v46 = vadd.f32 %v18037_v2, %v4739_v23  ;;  %v5084_v11 = vpop.f32.mrf.mxu0  ;;  %12467 = vmatmul.mubr.bf16.gmra.mxu1 %v15820_v1  ;;  %v18038_v26 = vld [vmem:[#allocation19_spill] sm:$0xff]  ;;  %v4936_v33 = vadd.f32 %v15665_v37, %v4742_v3  ;;  %v6574_v18 = vld [vmem:[#allocation4 + $0xd8] sm:$0xff]  ;;  %v4934_v37 = vadd.f32 %v15679_v59, %v4740_v55 }
 0x2f3   : > { %5368 = vst [vmem:[#allocation4 + $0x109] sm:$0xff] %v5351_v29  ;;  %v15837_v12 = vmax.f32 %v5338_v41, 0.0  ;;  %v15840_v49 = vadd.f32 %v15736_v24, %v5313_v9  ;;  %v5318_v42 = vadd.f32 %v12208_v28, %v5125_v27  ;;  %v5123_v56 = vadd.f32 %v5084_v11, %v4930_v15  ;;  %v5277_v20 = vpop.f32.mrf.mxu1  ;;  %12518 = vmatprep.mubr.bf16.mxu1 %v18022_v5  ;;  %v18039_v5 = vld [vmem:[#allocation30_spill] sm:$0xff]  ;;  %v12990_v41 = vld [vmem:[%s17907_s5 + $0xb0] sm:$0xff]  }
 0x2f4   : > { %v4550_v8 = vadd.f32 %v18038_v26, %v4357_v7  ;;  %v12185_v47 = vpop.f32.mrf.mxu0  ;;  %12517 = vmatpush3.bf16.msra.mxu1 %v12986_v35  ;;  %v4548_v62 = vadd.f32 %v18039_v5, %v4355_v30  ;;  %v6969_v26 = vld [vmem:[#allocation4 + $0x6a] sm:$0xff] }
 0x2f5   : > { %5371 = vst [vmem:[#allocation4 + $0x129] sm:$0xff] %v15837_v12  ;;  %v5352_v10 = vmax.f32 %v15840_v49, 0.0  ;;  %v5341_v14 = vadd.f32 %v15736_v24, %v5318_v42  ;;  %v5316_v61 = vadd.f32 %v5277_v20, %v5123_v56  ;;  %v5126_v22 = vadd.f32 %v12185_v47, %v4933_v46  ;;  %v12209_v51 = vpop.f32.mrf.mxu1  ;;  %12566 = vmatprep.subr.bf16.mxu1 %v15827_v19  ;;  %v6966_v42 = vld [vmem:[#allocation4 + $0x4a] sm:$0xff]  ;;  %v6967_v56 = vld [vmem:[#allocation4 + $0x52] sm:$0xff]  ;;  %v6968_v20 = vld [vmem:[#allocation4 + $0x62] sm:$0xff] }
 0x2f6   : > { %v4743_v31 = vadd.f32 %v15686_v60, %v4550_v8  ;;  %v5087_v35 = vpop.f32.mrf.mxu0  ;;  %v6575_v48 = vld [vmem:[#allocation4 + $0xe0] sm:$0xff]  ;;  %v15854_v4 = vpack.c.bf16 %v15837_v12, %v5353_v36  ;;  %v4741_v60 = vadd.f32 %v15707_v32, %v4548_v62  ;;  %v6980_v36 = vpack.c.bf16 %v6965_v63, %v6964_v54 }
 0x2f7   : > { %5369 = vst [vmem:[#allocation4 + $0x111] sm:$0xff] %v5352_v10  ;;  %v5357_v0 = vmax.f32 %v5341_v14, 0.0  ;;  %v15859_v23 = vadd.f32 %v15736_v24, %v5316_v61  ;;  %v5319_v39 = vadd.f32 %v12209_v51, %v5126_v22  ;;  %v5124_v44 = vadd.f32 %v5087_v35, %v4931_v40  ;;  %v5280_v50 = vpop.f32.mrf.mxu1  ;;  %v12989_v22 = vld [vmem:[%s17907_s5 + $0x30] sm:$0xff]   ;;  %v6971_v35 = vld [vmem:[#allocation4 + $0x82] sm:$0xff] }
 0x2f8   : > { %v12188_v34 = vpop.f32.mrf.mxu0  ;;  %v15863_v58 = vpack.c.bf16 %v6575_v48, %v6574_v18  ;;  %v4937_v59 = vadd.f32 %v15694_v17, %v4743_v31  ;;  %v4935_v17 = vadd.f32 %v15713_v38, %v4741_v60  ;;  %v6981_v61 = vpack.c.bf16 %v6967_v56, %v6966_v42  ;;  %v6970_v31 = vld [vmem:[#allocation4 + $0x7a] sm:$0xff]  ;;  %v12998_v18 = vld [vmem:[%s17907_s5 + $0x90] sm:$0xff]   ;;  %v13008_v42 = vld [vmem:[%s17907_s5 + $0x128] sm:$0xff]  }
 0x2f9   : > { %5374 = vst [vmem:[#allocation4 + $0x151] sm:$0xff] %v5357_v0  ;;  %v5355_v7 = vmax.f32 %v15859_v23, 0.0  ;;  %v5342_v43 = vadd.f32 %v15736_v24, %v5319_v39  ;;  %v5317_v15 = vadd.f32 %v5280_v50, %v5124_v44  ;;  %v5129_v53 = vadd.f32 %v12188_v34, %v4936_v33  ;;  %v12212_v21 = vpop.f32.mrf.mxu1  ;;  %v12994_v33 = vld [vmem:[%s17907_s5 + $0xa0] sm:$0xff]   ;;  %v12996_v44 = vld [vmem:[%s17907_s5 + $0x98] sm:$0xff]   ;;  %v13005_v56 = vld [vmem:[%s17907_s5 + $0xf0] sm:$0xff]  }
 0x2fa   : > { %12435 = vmatmul.mubr.bf16.gmra.mxu0 %v15863_v58  ;;  %v5100_v32 = vpop.f32.mrf.mxu0  ;;  %12519 = vmatmul.mubr.bf16.vlgmr.msra.gmra.mxu1 %v15820_v1  ;;  %v15898_v51 = vpack.c.bf16 %v5352_v10, %v5351_v29  ;;  %v6982_v62 = vpack.c.bf16 %v6969_v26, %v6968_v20  ;;  %v12991_v29 = vld [vmem:[%s17907_s5 + $0x28] sm:$0xff]   ;;  %v6973_v39 = vld [vmem:[#allocation4 + $0x9a] sm:$0xff]  ;;  %v6975_v60 = vld [vmem:[#allocation4 + $0xb2] sm:$0xff] }
 0x2fb   : > { %5372 = vst [vmem:[#allocation4 + $0x139] sm:$0xff] %v5355_v7  ;;  %v15875_v9 = vmax.f32 %v5342_v43, 0.0  ;;  %v15878_v27 = vadd.f32 %v15736_v24, %v5317_v15  ;;  %v5127_v28 = vadd.f32 %v5100_v32, %v4934_v37  ;;  %v5322_v52 = vadd.f32 %v12212_v21, %v5129_v53  ;;  %12486 = vmatprep.mubr.bf16.mxu0 %v6980_v36  ;;  %v5293_v6 = vpop.f32.mrf.mxu1  ;;  %v12995_v23 = vld [vmem:[%s17907_s5 + $0x18] sm:$0xff]   ;;  %v6974_v37 = vld [vmem:[#allocation4 + $0xaa] sm:$0xff]  ;;  %v13002_v15 = vld [vmem:[%s17907_s5 + $0x80] sm:$0xff]  }
 0x2fc   : > { %12522 = vmatprep.mubr.bf16.mxu1 %v15809_v16  ;;  %v12189_v45 = vpop.f32.mrf.mxu0  ;;  %12567 = vmatpush3.bf16.msra.mxu1 %v15827_v19  ;;  %v12992_v16 = vld [vmem:[%s17907_s5 + $0xa8] sm:$0xff]   ;;  %v6985_v34 = vpack.c.bf16 %v6975_v60, %v6974_v37  ;;  %v12997_v36 = vld [vmem:[%s17907_s5 + $0x10] sm:$0xff]  }
 0x2fd   : > { %5375 = vst [vmem:[#allocation4 + $0x159] sm:$0xff] %v15875_v9  ;;  %v5356_v30 = vmax.f32 %v15878_v27, 0.0  ;;  %v5345_v2 = vadd.f32 %v15736_v24, %v5322_v52  ;;  %v5130_v46 = vadd.f32 %v12189_v45, %v4937_v59  ;;  %v5320_v3 = vadd.f32 %v5293_v6, %v5127_v28  ;;  %v12213_v11 = vpop.f32.mrf.mxu1  ;;  %12568 = vmatprep.subr.bf16.mxu1 %v12990_v41  ;;  %v13000_v43 = vld [vmem:[%s17907_s5 + $0x88] sm:$0xff]   ;;  %v13004_v27 = vld [vmem:[%s17907_s5 + $0x138] sm:$0xff]   ;;  %v7223_v28 = vld [vmem:[#allocation4 + $0xc0] sm:$0xff] }
 0x2fe   : > { %v5103_v38 = vpop.f32.mrf.mxu0  ;;  %v7285_v19 = vpack.c.bf16 %v15875_v9, %v5357_v0  ;;  %v6972_v0 = vld [vmem:[#allocation4 + $0x92] sm:$0xff]  ;;  %v18040_v53 = vld [vmem:[#allocation38_spill] sm:$0xff] }
 0x2ff   : > { %5373 = vst [vmem:[#allocation4 + $0x141] sm:$0xff] %v5356_v30  ;;  %v5361_v8 = vmax.f32 %v5345_v2, 0.0  ;;  %v5343_v40 = vadd.f32 %v15736_v24, %v5320_v3  ;;  %v5128_v55 = vadd.f32 %v5103_v38, %v4935_v17  ;;  %v5323_v47 = vadd.f32 %v12213_v11, %v5130_v46  ;;  %v5296_v14 = vpop.f32.mrf.mxu1  ;;  %v12999_v21 = vld [vmem:[%s17907_s5 + $0x8] sm:$0xff]   ;;  %v13001_v6 = vld [vmem:[%s17907_s5] sm:$0xff]   ;;  %v7597_v17 = vld [vmem:[#allocation4 + $0xf2] sm:$0xff] }
 0x300   : > { %12569 = vmatpush3.bf16.msra.mxu1 %v12990_v41  ;;  %v6984_v50 = vpack.c.bf16 %v6973_v39, %v6972_v0  ;;  %v6978_v41 = vld [vmem:[#allocation4 + $0xda] sm:$0xff]  ;;  %v6979_v59 = vld [vmem:[#allocation4 + $0xe2] sm:$0xff]  ;;  %v13006_v2 = vld [vmem:[%s17907_s5 + $0x130] sm:$0xff]  }
 0x301   : > { %5378 = vst [vmem:[#allocation4 + $0x181] sm:$0xff] %v5361_v8  ;;  %v5359_v54 = vmax.f32 %v5343_v40, 0.0  ;;  %v5346_v63 = vadd.f32 %v15736_v24, %v5323_v47  ;;  %v5321_v5 = vadd.f32 %v5296_v14, %v5128_v55  ;;  %12570 = vmatprep.subr.bf16.mxu1 %v12992_v16  ;;  %v7224_v32 = vld [vmem:[#allocation4 + $0xc8] sm:$0xff]  ;;  %v15950_v52 = vpack.c.bf16 %v6979_v59, %v6978_v41  ;;  %v7598_v45 = vld [vmem:[#allocation4 + $0xfa] sm:$0xff]  ;;  %v7600_v38 = vld [vmem:[#allocation4 + $0x112] sm:$0xff] }
 0x302   : > { %12487 = vmatmul.mubr.bf16.vlgmr.msra.gmra.mxu0 %v6981_v61  ;;  %12523 = vmatmul.mubr.bf16.gmra.mxu1 %v15898_v51  ;;  %v15959_v46 = vpack.c.bf16 %v7598_v45, %v7597_v17  ;;  %v13003_v3 = vld [vmem:[%s17907_s5 + $0xf8] sm:$0xff]   ;;  %v7227_v20 = vld [vmem:[#allocation4 + $0xf0] sm:$0xff]  ;;  %v7601_v26 = vld [vmem:[#allocation4 + $0x122] sm:$0xff] }
 0x303   : > { %5376 = vst [vmem:[#allocation4 + $0x169] sm:$0xff] %v5359_v54  ;;  %v5362_v57 = vmax.f32 %v5346_v63, 0.0  ;;  %v5344_v49 = vadd.f32 %v15736_v24, %v5321_v5  ;;  %12535 = vmatpush3.bf16.msra.mxu0 %v15791_v13  ;;  %12490 = vmatprep.mubr.bf16.mxu0 %v6982_v62  ;;  %v6983_v24 = vpack.c.bf16 %v6971_v35, %v6970_v31  ;;  %v12993_v13 = vld [vmem:[%s17907_s5 + $0x20] sm:$0xff]   ;;  %v7228_v11 = vld [vmem:[#allocation4 + $0xf8] sm:$0xff]  ;;  %v13007_v14 = vld [vmem:[%s17907_s5 + $0xe8] sm:$0xff]  }
 0x304   : > { %12536 = vmatprep.subr.bf16.mxu0 %v12989_v22  ;;  %12526 = vmatprep.mubr.bf16.mxu1 %v15854_v4  ;;  %v15918_v4 = vpack.c.bf16 %v5356_v30, %v5355_v7  ;;  %v7239_v30 = vpack.c.bf16 %v7224_v32, %v7223_v28  ;;  %v13010_v55 = vld [vmem:[%s17907_s5 + $0x120] sm:$0xff]   ;;  %v7230_v61 = vld [vmem:[#allocation4 + $0x110] sm:$0xff]  ;;  %v13012_v63 = vld [vmem:[%s17907_s5 + $0x118] sm:$0xff]  }
 0x305   : > { %5379 = vst [vmem:[#allocation4 + $0x189] sm:$0xff] %v5362_v57  ;;  %v5360_v10 = vmax.f32 %v5344_v49, 0.0  ;;  %12571 = vmatpush3.bf16.msra.mxu1 %v12992_v16  ;;  %v15911_v48 = vpack.c.bf16 %v5362_v57, %v5361_v8  ;;  %v7599_v16 = vld [vmem:[#allocation4 + $0x10a] sm:$0xff]  ;;  %v15972_v8 = vpack.c.bf16 %v7228_v11, %v7227_v20  ;;  %v7231_v49 = vld [vmem:[#allocation4 + $0x120] sm:$0xff] }
 0x306   : > { %12572 = vmatprep.subr.bf16.mxu1 %v12994_v33  ;;  %v15975_v40 = vpack.c.bf16 %v7600_v38, %v7599_v16  ;;  %v7229_v5 = vld [vmem:[#allocation4 + $0x108] sm:$0xff]  ;;  %v7603_v62 = vld [vmem:[#allocation4 + $0x13a] sm:$0xff]  ;;  %v13014_v0 = vld [vmem:[%s17907_s5 + $0x110] sm:$0xff]  }
 0x307   : > { %5377 = vst [vmem:[#allocation4 + $0x171] sm:$0xff] %v5360_v10  ;;  %12537 = vmatpush3.bf16.msra.mxu0 %v12989_v22  ;;  %v15933_v7 = vpack.c.bf16 %v5360_v10, %v5359_v54  ;;  %v7232_v22 = vld [vmem:[#allocation4 + $0x128] sm:$0xff]  ;;  %v13009_v54 = vld [vmem:[%s17907_s5 + $0xe0] sm:$0xff]   ;;  %v15994_v57 = vpack.c.bf16 %v7230_v61, %v7229_v5  ;;  %v13022_v38 = vld [vmem:[%s17907_s5 + $0x1b0] sm:$0xff]  }
 0x308   : > { %12538 = vmatprep.subr.bf16.mxu0 %v12991_v29  ;;  %v7606_v10 = vld [vmem:[#allocation4 + $0x15a] sm:$0xff]  ;;  %v15996_v31 = vpack.c.bf16 %v7232_v22, %v7231_v49  ;;  %v13015_v32 = vld [vmem:[%s17907_s5 + $0xc8] sm:$0xff]  }
 0x309   : > { %12573 = vmatpush3.bf16.msra.mxu1 %v12994_v33  ;;  %v7604_v33 = vld [vmem:[#allocation4 + $0x142] sm:$0xff] }
 0x30a   : > { %12491 = vmatmul.mubr.bf16.gmra.mxu0 %v6983_v24  ;;  %12527 = vmatmul.mubr.bf16.gmra.mxu1 %v15918_v4  ;;  %v15999_v35 = vpack.c.bf16 %v7604_v33, %v7603_v62  ;;  %v13011_v24 = vld [vmem:[%s17907_s5 + $0xd8] sm:$0xff]   ;;  %v13018_v41 = vld [vmem:[%s17907_s5 + $0x100] sm:$0xff]   ;;  %v7237_v45 = vld [vmem:[#allocation4 + $0x168] sm:$0xff] }
 0x30b   : > { %12539 = vmatpush3.bf16.msra.mxu0 %v12991_v29  ;;  %12494 = vmatprep.mubr.bf16.mxu0 %v6984_v50  ;;  %v7605_v29 = vld [vmem:[#allocation4 + $0x152] sm:$0xff]  ;;  %v13016_v50 = vld [vmem:[%s17907_s5 + $0x108] sm:$0xff]  }
 0x30c   : > { %12540 = vmatprep.subr.bf16.mxu0 %v12993_v13  ;;  %12574 = vmatprep.subr.bf16.mxu1 %v12996_v44  ;;  %v16005_v39 = vpack.c.bf16 %v7606_v10, %v7605_v29  ;;  %v13026_v10 = vld [vmem:[%s17907_s5 + $0x1a0] sm:$0xff]  }
 0x30d   : > { %12530 = vmatprep.mubr.bf16.mxu1 %v7285_v19  ;;  %12575 = vmatpush3.bf16.msra.mxu1 %v12996_v44  ;;  %v7602_v19 = vld [vmem:[#allocation4 + $0x12a] sm:$0xff]  ;;  %v7236_v44 = vld [vmem:[#allocation4 + $0x158] sm:$0xff] }
 0x30e   : > { %12576 = vmatprep.subr.bf16.mxu1 %v12998_v18  ;;  %v15981_v47 = vpack.c.bf16 %v7602_v19, %v7601_v26  ;;  %v7607_v37 = vld [vmem:[#allocation4 + $0x16a] sm:$0xff]  ;;  %v7608_v60 = vld [vmem:[#allocation4 + $0x172] sm:$0xff] }
 0x30f   : > { %12541 = vmatpush3.bf16.msra.mxu0 %v12993_v13  ;;  %v7234_v13 = vld [vmem:[#allocation4 + $0x140] sm:$0xff] }
 0x310   : > { %12542 = vmatprep.subr.bf16.mxu0 %v12995_v23 }
 0x311   : > { %12577 = vmatpush3.bf16.msra.mxu1 %v12998_v18  ;;  %v7233_v18 = vld [vmem:[#allocation4 + $0x138] sm:$0xff] }
 0x312   : > { %12495 = vmatmul.mubr.bf16.gmra.mxu0 %v6985_v34  ;;  %12531 = vmatmul.mubr.bf16.gmra.mxu1 %v15933_v7  ;;  %v16015_v34 = vpack.c.bf16 %v7234_v13, %v7233_v18 }
 0x313   : > { %12543 = vmatpush3.bf16.msra.mxu0 %v12995_v23  ;;  %12498 = vmatprep.mubr.bf16.mxu0 %v18040_v53 }
 0x314   : > { %12544 = vmatprep.subr.bf16.mxu0 %v12997_v36  ;;  %12578 = vmatprep.subr.bf16.mxu1 %v13000_v43 }
 0x315   : > { %12579 = vmatpush3.bf16.msra.mxu1 %v13000_v43  ;;  %12582 = vmatprep.mubr.bf16.mxu1 %v18040_v53  ;;  %v13013_v43 = vld [vmem:[%s17907_s5 + $0xd0] sm:$0xff]  }
 0x316   : > { %12580 = vmatprep.subr.bf16.mxu1 %v13002_v15 }
 0x317   : > { %12545 = vmatpush3.bf16.msra.mxu0 %v12997_v36  ;;  %v7235_v36 = vld [vmem:[#allocation4 + $0x150] sm:$0xff] }
 0x318   : > { %12546 = vmatprep.subr.bf16.mxu0 %v12999_v21 }
 0x319   : > { %12581 = vmatpush3.bf16.msra.mxu1 %v13002_v15  ;;  %v16020_v15 = vpack.c.bf16 %v7236_v44, %v7235_v36  ;;  %v13023_v44 = vld [vmem:[%s17907_s5 + $0x168] sm:$0xff]   ;;  %v16093_v36 = vld [vmem:[#allocation4 + $0x151] sm:$0xff] }
 0x31a   : > { %12499 = vmatmul.mubr.bf16.gmra.mxu0 %v15950_v52  ;;  %12630 = vmatprep.subr.bf16.mxu1 %v13004_v27 }
 0x31b   : > { %12547 = vmatpush3.bf16.msra.mxu0 %v12999_v21  ;;  %12550 = vmatprep.mubr.bf16.mxu0 %v7239_v30  ;;  %v16023_v21 = vpack.c.bf16 %v7608_v60, %v7607_v37  ;;  %v16037_v30 = vld [vmem:[#allocation4 + $0xf1] sm:$0xff] }
 0x31c   : > { %12548 = vmatprep.subr.bf16.mxu0 %v13001_v6  ;;  %12583 = vmatmul.mubr.bf16.vlgmr.msra.gmra.mxu1 %v15950_v52  ;;  %v8012_v16 = vpack.c.bf16 %v15785_v25, %v16037_v30 }
 0x31d   : > { %12586 = vmatprep.mubr.bf16.mxu1 %v15959_v46  ;;  %12631 = vmatpush3.bf16.msra.mxu1 %v13004_v27  ;;  %v7238_v27 = vld [vmem:[#allocation4 + $0x170] sm:$0xff] }
 0x31e   : > { %12632 = vmatprep.subr.bf16.mxu1 %v13006_v2 }
 0x31f   : > { %12549 = vmatpush3.bf16.msra.mxu0 %v13001_v6  ;;  %v13020_v6 = vld [vmem:[%s17907_s5 + $0x1b8] sm:$0xff]  }
 0x320   : > { %12598 = vmatprep.subr.bf16.mxu0 %v13003_v3 }
 0x321   : > { %12633 = vmatpush3.bf16.msra.mxu1 %v13006_v2 }
 0x322   : > { %12551 = vmatmul.mubr.bf16.vlgmr.msra.gmra.mxu0 %v15863_v58  ;;  %12634 = vmatprep.subr.bf16.mxu1 %v13008_v42 }
 0x323   : > { %12599 = vmatpush3.bf16.msra.mxu0 %v13003_v3  ;;  %12554 = vmatprep.mubr.bf16.mxu0 %v15972_v8  ;;  %v16041_v3 = vpack.c.bf16 %v7238_v27, %v7237_v45  ;;  %v13030_v27 = vld [vmem:[%s17907_s5 + $0x190] sm:$0xff]   ;;  %v13027_v45 = vld [vmem:[%s17907_s5 + $0x158] sm:$0xff]  }
 0x324   : > { %12600 = vmatprep.subr.bf16.mxu0 %v13005_v56  ;;  %12587 = vmatmul.mubr.bf16.gmra.mxu1 %v15975_v40 }
 0x325   : > { %12590 = vmatprep.mubr.bf16.mxu1 %v15981_v47  ;;  %12635 = vmatpush3.bf16.msra.mxu1 %v13008_v42 }
 0x326   : > { %12636 = vmatprep.subr.bf16.mxu1 %v13010_v55 }
 0x327   : > { %12601 = vmatpush3.bf16.msra.mxu0 %v13005_v56 }
 0x328   : > { %12602 = vmatprep.subr.bf16.mxu0 %v13007_v14 }
 0x329   : > { %12637 = vmatpush3.bf16.msra.mxu1 %v13010_v55  ;;  %v13019_v55 = vld [vmem:[%s17907_s5 + $0x178] sm:$0xff]  }
 0x32a   : > { %12555 = vmatmul.mubr.bf16.gmra.mxu0 %v15994_v57  ;;  %12638 = vmatprep.subr.bf16.mxu1 %v13012_v63 }
 0x32b   : > { %12603 = vmatpush3.bf16.msra.mxu0 %v13007_v14  ;;  %12558 = vmatprep.mubr.bf16.mxu0 %v15996_v31 }
 0x32c   : > { %12604 = vmatprep.subr.bf16.mxu0 %v13009_v54  ;;  %12591 = vmatmul.mubr.bf16.gmra.mxu1 %v15999_v35 }
 0x32d   : > { %12594 = vmatprep.mubr.bf16.mxu1 %v16005_v39  ;;  %12639 = vmatpush3.bf16.msra.mxu1 %v13012_v63  ;;  %v16066_v63 = vld [vmem:[#allocation4 + $0x121] sm:$0xff] }
 0x32e   : > { %12640 = vmatprep.subr.bf16.mxu1 %v13014_v0  ;;  %v8014_v29 = vpack.c.bf16 %v15837_v12, %v16066_v63 }
 0x32f   : > { %12605 = vmatpush3.bf16.msra.mxu0 %v13009_v54  ;;  %v12232_v23 = vpop.f32.mrf.mxu0 }
 0x330   : > { %12606 = vmatprep.subr.bf16.mxu0 %v13011_v24 }
 0x331   : > { %12641 = vmatpush3.bf16.msra.mxu1 %v13014_v0  ;;  %v5543_v53 = vpop.f32.mrf.mxu0 }
 0x332   : > { %12559 = vmatmul.mubr.bf16.gmra.mxu0 %v16015_v34  ;;  %12642 = vmatprep.subr.bf16.mxu1 %v13016_v50 }
 0x333   : > { %12607 = vmatpush3.bf16.msra.mxu0 %v13011_v24  ;;  %12562 = vmatprep.mubr.bf16.mxu0 %v16020_v15  ;;  %v12233_v59 = vpop.f32.mrf.mxu0 }
 0x334   : > { %12608 = vmatprep.subr.bf16.mxu0 %v13013_v43  ;;  %12595 = vmatmul.mubr.bf16.gmra.mxu1 %v16023_v21 }
 0x335   : > { %12643 = vmatpush3.bf16.msra.mxu1 %v13016_v50  ;;  %12646 = vmatprep.mubr.bf16.mxu1 %v15820_v1  ;;  %v5546_v28 = vpop.f32.mrf.mxu0  ;;  %v13017_v1 = vld [vmem:[%s17907_s5 + $0xc0] sm:$0xff]  }
 0x336   : > { %12644 = vmatprep.subr.bf16.mxu1 %v13018_v41 }
 0x337   : > { %12609 = vmatpush3.bf16.msra.mxu0 %v13013_v43  ;;  %v12264_v17 = vpop.f32.mrf.mxu1 }
 0x338   : > { %v16039_v2 = vadd.f32 %v12264_v17, %v12232_v23  ;;  %12610 = vmatprep.subr.bf16.mxu0 %v13015_v32  ;;  %v13028_v23 = vld [vmem:[%s17907_s5 + $0x198] sm:$0xff]  }
 0x339   : > { %v5688_v11 = vpop.f32.mrf.mxu1  ;;  %12645 = vmatpush3.bf16.msra.mxu1 %v13018_v41  ;;  %v12236_v42 = vpop.f32.mrf.mxu0 }
 0x33a   : > { %v16046_v56 = vadd.f32 %v5688_v11, %v5543_v53  ;;  %12563 = vmatmul.mubr.bf16.gmra.mxu0 %v16041_v3  ;;  %12694 = vmatprep.subr.bf16.mxu1 %v13020_v6 }
 0x33b   : > { %12611 = vmatpush3.bf16.msra.mxu0 %v13015_v32  ;;  %12614 = vmatprep.mubr.bf16.mxu0 %v15863_v58  ;;  %v12265_v20 = vpop.f32.mrf.mxu1  ;;  %v5559_v26 = vpop.f32.mrf.mxu0  ;;  %v13024_v58 = vld [vmem:[%s17907_s5 + $0x1a8] sm:$0xff]   ;;  %v8016_v32 = vpack.c.bf16 %v15875_v9, %v16093_v36 }
 0x33c   : > { %v16055_v19 = vadd.f32 %v12265_v20, %v12233_v59  ;;  %12612 = vmatprep.subr.bf16.mxu0 %v13017_v1  ;;  %12647 = vmatmul.mubr.bf16.vlgmr.msra.gmra.mxu1 %v8012_v16 }
 0x33d   : > { %v5691_v14 = vpop.f32.mrf.mxu1  ;;  %12650 = vmatprep.mubr.bf16.mxu1 %v15898_v51  ;;  %12695 = vmatpush3.bf16.msra.mxu1 %v13020_v6  ;;  %v12237_v25 = vpop.f32.mrf.mxu0  ;;  %v13021_v51 = vld [vmem:[%s17907_s5 + $0x170] sm:$0xff]  }
 0x33e   : > { %v16061_v61 = vadd.f32 %v5691_v14, %v5546_v28  ;;  %12696 = vmatprep.subr.bf16.mxu1 %v13022_v38 }
 0x33f   : > { %12613 = vmatpush3.bf16.msra.mxu0 %v13017_v1  ;;  %v12268_v22 = vpop.f32.mrf.mxu1  ;;  %v5562_v54 = vpop.f32.mrf.mxu0 }
 0x340   : > { %v16068_v5 = vadd.f32 %v12268_v22, %v12236_v42  ;;  %12662 = vmatprep.subr.bf16.mxu0 %v13019_v55  ;;  %v13032_v42 = vld [vmem:[%s17907_s5 + $0x188] sm:$0xff]  }
 0x341   : > { %v5704_v62 = vpop.f32.mrf.mxu1  ;;  %12697 = vmatpush3.bf16.msra.mxu1 %v13022_v38  ;;  %v12240_v33 = vpop.f32.mrf.mxu0 }
 0x342   : > { %v16073_v49 = vadd.f32 %v5704_v62, %v5559_v26  ;;  %12615 = vmatmul.mubr.bf16.vlgmr.msra.gmra.mxu0 %v15972_v8  ;;  %12698 = vmatprep.subr.bf16.mxu1 %v13024_v58  ;;  %v13029_v26 = vld [vmem:[%s17907_s5 + $0x150] sm:$0xff]   ;;  %v13031_v62 = vld [vmem:[%s17907_s5 + $0x148] sm:$0xff]  }
 0x343   : > { %12663 = vmatpush3.bf16.msra.mxu0 %v13019_v55  ;;  %12618 = vmatprep.mubr.bf16.mxu0 %v15994_v57  ;;  %v12269_v0 = vpop.f32.mrf.mxu1  ;;  %v5575_v24 = vpop.f32.mrf.mxu0 }
 0x344   : > { %v16082_v13 = vadd.f32 %v12269_v0, %v12237_v25  ;;  %12664 = vmatprep.subr.bf16.mxu0 %v13021_v51  ;;  %12651 = vmatmul.mubr.bf16.gmra.mxu1 %v8014_v29  ;;  %v7809_v29 = vld [vmem:[#allocation4 + $0x188] sm:$0xff] }
 0x345   : > { %v5707_v50 = vpop.f32.mrf.mxu1  ;;  %12654 = vmatprep.mubr.bf16.mxu1 %v15918_v4  ;;  %12699 = vmatpush3.bf16.msra.mxu1 %v13024_v58  ;;  %v12241_v12 = vpop.f32.mrf.mxu0  ;;  %v13025_v4 = vld [vmem:[%s17907_s5 + $0x160] sm:$0xff]  }
 0x346   : > { %v16088_v18 = vadd.f32 %v5707_v50, %v5562_v54  ;;  %12700 = vmatprep.subr.bf16.mxu1 %v13026_v10  ;;  %v13034_v58 = vld [vmem:[%s17907_s5 + $0x180] sm:$0xff]  }
 0x347   : > { %12665 = vmatpush3.bf16.msra.mxu0 %v13021_v51  ;;  %v12272_v37 = vpop.f32.mrf.mxu1  ;;  %v5578_v60 = vpop.f32.mrf.mxu0 }
 0x348   : > { %v16095_v43 = vadd.f32 %v12272_v37, %v12240_v33  ;;  %12666 = vmatprep.subr.bf16.mxu0 %v13023_v44 }
 0x349   : > { %v5720_v53 = vpop.f32.mrf.mxu1  ;;  %12701 = vmatpush3.bf16.msra.mxu1 %v13026_v10  ;;  %v12244_v41 = vpop.f32.mrf.mxu0 }
 0x34a   : > { %v16100_v59 = vadd.f32 %v5720_v53, %v5575_v24  ;;  %12619 = vmatmul.mubr.bf16.gmra.mxu0 %v15996_v31  ;;  %12702 = vmatprep.subr.bf16.mxu1 %v13028_v23 }
 0x34b   : > { %12667 = vmatpush3.bf16.msra.mxu0 %v13023_v44  ;;  %12622 = vmatprep.mubr.bf16.mxu0 %v16015_v34  ;;  %v12273_v28 = vpop.f32.mrf.mxu1  ;;  %v5591_v6 = vpop.f32.mrf.mxu0  ;;  %v13036_v44 = vld [vmem:[%s17907_s5 + $0x238] sm:$0xff]  }
 0x34c   : > { %v16109_v17 = vadd.f32 %v12273_v28, %v12241_v12  ;;  %12668 = vmatprep.subr.bf16.mxu0 %v13025_v4  ;;  %12655 = vmatmul.mubr.bf16.gmra.mxu1 %v8016_v32  ;;  %v13035_v28 = vld [vmem:[%s17907_s5 + $0x1f8] sm:$0xff]  }
 0x34d   : > { %v5723_v1 = vpop.f32.mrf.mxu1  ;;  %12658 = vmatprep.mubr.bf16.mxu1 %v15933_v7  ;;  %12703 = vmatpush3.bf16.msra.mxu1 %v13028_v23  ;;  %v12245_v9 = vpop.f32.mrf.mxu0 }
 0x34e   : > { %v16115_v11 = vadd.f32 %v5723_v1, %v5578_v60  ;;  %12704 = vmatprep.subr.bf16.mxu1 %v13030_v27 }
 0x34f   : > { %12669 = vmatpush3.bf16.msra.mxu0 %v13025_v4  ;;  %v12276_v16 = vpop.f32.mrf.mxu1  ;;  %v5594_v38 = vpop.f32.mrf.mxu0 }
 0x350   : > { %v16120_v20 = vadd.f32 %v12276_v16, %v12244_v41  ;;  %12670 = vmatprep.subr.bf16.mxu0 %v13027_v45  ;;  %v13038_v41 = vld [vmem:[%s17907_s5 + $0x230] sm:$0xff]  }
 0x351   : > { %v5736_v7 = vpop.f32.mrf.mxu1  ;;  %12705 = vmatpush3.bf16.msra.mxu1 %v13030_v27  ;;  %v12296_v55 = vpop.f32.mrf.mxu0 }
 0x352   : > { %v16125_v14 = vadd.f32 %v5736_v7, %v5591_v6  ;;  %12623 = vmatmul.mubr.bf16.gmra.mxu0 %v16020_v15  ;;  %v5939_v25 = vadd.f32 %v12296_v55, %v16039_v2  ;;  %12706 = vmatprep.subr.bf16.mxu1 %v13032_v42  ;;  %v13042_v55 = vld [vmem:[%s17907_s5 + $0x220] sm:$0xff]  }
 0x353   : > { %12671 = vmatpush3.bf16.msra.mxu0 %v13027_v45  ;;  %12626 = vmatprep.mubr.bf16.mxu0 %v16041_v3  ;;  %v12277_v22 = vpop.f32.mrf.mxu1  ;;  %v5874_v54 = vpop.f32.mrf.mxu0 }
 0x354   : > { %v16133_v51 = vadd.f32 %v12277_v22, %v12245_v9  ;;  %12672 = vmatprep.subr.bf16.mxu0 %v13029_v26  ;;  %v5937_v33 = vadd.f32 %v5874_v54, %v16046_v56  ;;  %12659 = vmatmul.mubr.bf16.gmra.mxu1 %v15911_v48  ;;  %v7808_v56 = vld [vmem:[#allocation4 + $0x180] sm:$0xff]  ;;  %v13040_v9 = vld [vmem:[%s17907_s5 + $0x228] sm:$0xff]  }
 0x355   : > { %v5739_v2 = vpop.f32.mrf.mxu1  ;;  %12707 = vmatpush3.bf16.msra.mxu1 %v13032_v42  ;;  %12710 = vmatprep.mubr.bf16.mxu1 %v15972_v8  ;;  %v12297_v10 = vpop.f32.mrf.mxu0  ;;  %v16149_v23 = vpack.c.bf16 %v7809_v29, %v7808_v56  ;;  %v13033_v8 = vld [vmem:[%s17907_s5 + $0x140] sm:$0xff]   ;;  %v13039_v22 = vld [vmem:[%s17907_s5 + $0x1e8] sm:$0xff]  }
 0x356   : > { %v16141_v0 = vadd.f32 %v5739_v2, %v5594_v38  ;;  %v5940_v24 = vadd.f32 %v12297_v10, %v16055_v19  ;;  %12708 = vmatprep.subr.bf16.mxu1 %v13034_v58 }
 0x357   : > { %12673 = vmatpush3.bf16.msra.mxu0 %v13029_v26  ;;  %v12328_v50 = vpop.f32.mrf.mxu1  ;;  %v5877_v12 = vpop.f32.mrf.mxu0 }
 0x358   : > { %v16147_v48 = vadd.f32 %v12328_v50, %v5939_v25  ;;  %12674 = vmatprep.subr.bf16.mxu0 %v13031_v62  ;;  %v5938_v19 = vadd.f32 %v5877_v12, %v16061_v61  ;;  %v13046_v50 = vld [vmem:[%s17907_s5 + $0x210] sm:$0xff]  }
 0x359   : > { %v6076_v37 = vpop.f32.mrf.mxu1  ;;  %12709 = vmatpush3.bf16.msra.mxu1 %v13034_v58  ;;  %v12300_v60 = vpop.f32.mrf.mxu0 }
 0x35a   : > { %v16155_v4 = vadd.f32 %v6076_v37, %v5937_v33  ;;  %12627 = vmatmul.mubr.bf16.gmra.mxu0 %v16149_v23  ;;  %v5943_v53 = vadd.f32 %v12300_v60, %v16068_v5  ;;  %12758 = vmatprep.subr.bf16.mxu1 %v13036_v44  ;;  %v13044_v33 = vld [vmem:[%s17907_s5 + $0x218] sm:$0xff]   ;;  %v13048_v60 = vld [vmem:[%s17907_s5 + $0x208] sm:$0xff]  }
 0x35b   : > { %12675 = vmatpush3.bf16.msra.mxu0 %v13031_v62  ;;  %12678 = vmatprep.mubr.bf16.mxu0 %v15950_v52  ;;  %v12329_v32 = vpop.f32.mrf.mxu1  ;;  %v5890_v27 = vpop.f32.mrf.mxu0 }
 0x35c   : > { %v16163_v61 = vadd.f32 %v12329_v32, %v5940_v24  ;;  %12676 = vmatprep.subr.bf16.mxu0 %v13033_v8  ;;  %v5941_v6 = vadd.f32 %v5890_v27, %v16073_v49  ;;  %12711 = vmatmul.mubr.bf16.vlgmr.msra.gmra.mxu1 %v15994_v57  ;;  %v13037_v57 = vld [vmem:[%s17907_s5 + $0x1f0] sm:$0xff]   ;;  %v13119_v32 = vld [vmem:[#allocation4] sm:$0xff] }
 0x35d   : > { %v6079_v5 = vpop.f32.mrf.mxu1  ;;  %12714 = vmatprep.mubr.bf16.mxu1 %v15996_v31  ;;  %12759 = vmatpush3.bf16.msra.mxu1 %v13036_v44  ;;  %v12301_v45 = vpop.f32.mrf.mxu0  ;;  %v8421_v27 = vpack.c.bf16 %v13119_v32, %v13119_v32 }
 0x35e   : > { %v16171_v1 = vadd.f32 %v6079_v5, %v5938_v19  ;;  %v5944_v52 = vadd.f32 %v12301_v45, %v16082_v13  ;;  %12760 = vmatprep.subr.bf16.mxu1 %v13038_v41 }
 0x35f   : > { %12677 = vmatpush3.bf16.msra.mxu0 %v13033_v8  ;;  %v12332_v42 = vpop.f32.mrf.mxu1  ;;  %v5893_v16 = vpop.f32.mrf.mxu0  ;;  %v13043_v8 = vld [vmem:[%s17907_s5 + $0x1d8] sm:$0xff]  }
 0x360   : > { %v16177_v49 = vadd.f32 %v12332_v42, %v5943_v53  ;;  %12726 = vmatprep.subr.bf16.mxu0 %v13035_v28  ;;  %v5942_v31 = vadd.f32 %v5893_v16, %v16088_v18 }
 0x361   : > { %v6092_v38 = vpop.f32.mrf.mxu1  ;;  %12761 = vmatpush3.bf16.msra.mxu1 %v13038_v41  ;;  %v12304_v13 = vpop.f32.mrf.mxu0 }
 0x362   : > { %v16183_v26 = vadd.f32 %v6092_v38, %v5941_v6  ;;  %12679 = vmatmul.mubr.bf16.vlgmr.msra.gmra.mxu0 %v15959_v46  ;;  %v5947_v7 = vadd.f32 %v12304_v13, %v16095_v43  ;;  %12762 = vmatprep.subr.bf16.mxu1 %v13040_v9  ;;  %v8211_v38 = vld [vmem:[#allocation4 + $0x18a] sm:$0xff] }
 0x363   : > { %12727 = vmatpush3.bf16.msra.mxu0 %v13035_v28  ;;  %12682 = vmatprep.mubr.bf16.mxu0 %v15975_v40  ;;  %v12333_v25 = vpop.f32.mrf.mxu1  ;;  %v5906_v58 = vpop.f32.mrf.mxu0  ;;  %v8801_v28 = vld [vmem:[#allocation4 + $0xfa] sm:$0xff] }
 0x364   : > { %v16191_v18 = vadd.f32 %v12333_v25, %v5944_v52  ;;  %12728 = vmatprep.subr.bf16.mxu0 %v13037_v57  ;;  %v5945_v46 = vadd.f32 %v5906_v58, %v16100_v59  ;;  %12715 = vmatmul.mubr.bf16.gmra.mxu1 %v16015_v34  ;;  %v13041_v34 = vld [vmem:[%s17907_s5 + $0x1e0] sm:$0xff]   ;;  %v8802_v58 = vld [vmem:[#allocation4 + $0x10a] sm:$0xff] }
 0x365   : > { %v6095_v43 = vpop.f32.mrf.mxu1  ;;  %12718 = vmatprep.mubr.bf16.mxu1 %v16020_v15  ;;  %12763 = vmatpush3.bf16.msra.mxu1 %v13040_v9  ;;  %v12305_v54 = vpop.f32.mrf.mxu0  ;;  %v13050_v52 = vld [vmem:[%s17907_s5 + $0x200] sm:$0xff]  }
 0x366   : > { %v16199_v62 = vadd.f32 %v6095_v43, %v5942_v31  ;;  %v5948_v40 = vadd.f32 %v12305_v54, %v16109_v17  ;;  %12764 = vmatprep.subr.bf16.mxu1 %v13042_v55  ;;  %v8210_v31 = vld [vmem:[#allocation4 + $0x182] sm:$0xff] }
 0x367   : > { %12729 = vmatpush3.bf16.msra.mxu0 %v13037_v57  ;;  %v12336_v2 = vpop.f32.mrf.mxu1  ;;  %v5909_v29 = vpop.f32.mrf.mxu0  ;;  %v13047_v57 = vld [vmem:[%s17907_s5 + $0x1c8] sm:$0xff]   ;;  %v13049_v43 = vld [vmem:[%s17907_s5 + $0x1c0] sm:$0xff]  }
 0x368   : > { %v16205_v59 = vadd.f32 %v12336_v2, %v5947_v7  ;;  %12730 = vmatprep.subr.bf16.mxu0 %v13039_v22  ;;  %v5946_v15 = vadd.f32 %v5909_v29, %v16115_v11  ;;  %v8600_v7 = vld [vmem:[#allocation4 + $0xf9] sm:$0xff]  ;;  %v8804_v54 = vld [vmem:[#allocation4 + $0x122] sm:$0xff] }
 0x369   : > { %v6108_v10 = vpop.f32.mrf.mxu1  ;;  %12765 = vmatpush3.bf16.msra.mxu1 %v13042_v55  ;;  %v12308_v17 = vpop.f32.mrf.mxu0  ;;  %v8615_v2 = vpack.c.bf16 %v8600_v7, %v16037_v30  ;;  %v8604_v30 = vld [vmem:[#allocation4 + $0x129] sm:$0xff] }
 0x36a   : > { %v16211_v24 = vadd.f32 %v6108_v10, %v5945_v46  ;;  %12683 = vmatmul.mubr.bf16.gmra.mxu0 %v15981_v47  ;;  %v5951_v44 = vadd.f32 %v12308_v17, %v16120_v20  ;;  %12766 = vmatprep.subr.bf16.mxu1 %v13044_v33  ;;  %v8219_v46 = vpack.c.bf16 %v8211_v38, %v8210_v31  ;;  %v8810_v31 = vld [vmem:[#allocation4 + $0x16a] sm:$0xff]  ;;  %v8811_v38 = vld [vmem:[#allocation4 + $0x172] sm:$0xff] }
 0x36b   : > { %12731 = vmatpush3.bf16.msra.mxu0 %v13039_v22  ;;  %12686 = vmatprep.mubr.bf16.mxu0 %v15999_v35  ;;  %v12337_v56 = vpop.f32.mrf.mxu1  ;;  %v5922_v12 = vpop.f32.mrf.mxu0  ;;  %v8803_v22 = vld [vmem:[#allocation4 + $0x112] sm:$0xff] }
 0x36c   : > { %v16219_v11 = vadd.f32 %v12337_v56, %v5948_v40  ;;  %12732 = vmatprep.subr.bf16.mxu0 %v13041_v34  ;;  %v5949_v47 = vadd.f32 %v5922_v12, %v16125_v14  ;;  %12719 = vmatmul.mubr.bf16.gmra.mxu1 %v16041_v3  ;;  %v13045_v3 = vld [vmem:[%s17907_s5 + $0x1d0] sm:$0xff]  }
 0x36d   : > { %v6111_v20 = vpop.f32.mrf.mxu1  ;;  %12722 = vmatprep.mubr.bf16.mxu1 %v16149_v23  ;;  %12767 = vmatpush3.bf16.msra.mxu1 %v13044_v33  ;;  %v12309_v19 = vpop.f32.mrf.mxu0  ;;  %v8805_v40 = vld [vmem:[#allocation4 + $0x12a] sm:$0xff] }
 0x36e   : > { %v16227_v37 = vadd.f32 %v6111_v20, %v5946_v15  ;;  %v5952_v35 = vadd.f32 %v12309_v19, %v16133_v51  ;;  %12768 = vmatprep.subr.bf16.mxu1 %v13046_v50  ;;  %v8800_v51 = vld [vmem:[#allocation4 + $0xf2] sm:$0xff]  ;;  %v8818_v17 = vpack.c.bf16 %v8805_v40, %v8804_v54  ;;  %v8806_v20 = vld [vmem:[#allocation4 + $0x13a] sm:$0xff]  ;;  %v8807_v19 = vld [vmem:[#allocation4 + $0x142] sm:$0xff]  ;;  %v8821_v54 = vpack.c.bf16 %v8811_v38, %v8810_v31 }
 0x36f   : > { %12733 = vmatpush3.bf16.msra.mxu0 %v13041_v34  ;;  %v12340_v53 = vpop.f32.mrf.mxu1  ;;  %v5925_v41 = vpop.f32.mrf.mxu0  ;;  %v8816_v42 = vpack.c.bf16 %v8801_v28, %v8800_v51  ;;  %v8817_v34 = vpack.c.bf16 %v8803_v22, %v8802_v58  ;;  %v8819_v32 = vpack.c.bf16 %v8807_v19, %v8806_v20  ;;  %v8612_v20 = vld [vmem:[#allocation4 + $0x189] sm:$0xff]  ;;  %v8614_v31 = vld [vmem:[#allocation4 + $0x1a1] sm:$0xff] }
 0x370   : > { %v16233_v14 = vadd.f32 %v12340_v53, %v5951_v44  ;;  %12734 = vmatprep.subr.bf16.mxu0 %v13043_v8  ;;  %v5950_v23 = vadd.f32 %v5925_v41, %v16141_v0  ;;  %v8809_v53 = vld [vmem:[#allocation4 + $0x15a] sm:$0xff]  ;;  %v8609_v19 = vld [vmem:[#allocation4 + $0x169] sm:$0xff] }
 0x371   : > { %v6124_v6 = vpop.f32.mrf.mxu1  ;;  %12769 = vmatpush3.bf16.msra.mxu1 %v13046_v50  ;;  %v16239_v5 = vpop.f32.mrf.mxu0  ;;  %v8602_v50 = vld [vmem:[#allocation4 + $0x111] sm:$0xff] }
 0x372   : > { %v16241_v45 = vadd.f32 %v6124_v6, %v5949_v47  ;;  %12687 = vmatmul.mubr.bf16.gmra.mxu0 %v16005_v39  ;;  %12770 = vmatprep.subr.bf16.mxu1 %v13048_v60 }
 0x373   : > { %12735 = vmatpush3.bf16.msra.mxu0 %v13043_v8  ;;  %12690 = vmatprep.mubr.bf16.mxu0 %v16023_v21  ;;  %v12341_v0 = vpop.f32.mrf.mxu1  ;;  %v16248_v9 = vpop.f32.mrf.mxu0  ;;  %v8601_v8 = vld [vmem:[#allocation4 + $0x109] sm:$0xff] }
 0x374   : > { %v16250_v16 = vadd.f32 %v12341_v0, %v5952_v35  ;;  %12736 = vmatprep.subr.bf16.mxu0 %v13045_v3  ;;  %12723 = vmatmul.mubr.bf16.gmra.mxu1 %v8421_v27  ;;  %v8616_v35 = vpack.c.bf16 %v8602_v50, %v8601_v8  ;;  %v8815_v8 = vld [vmem:[#allocation4 + $0x1a2] sm:$0xff] }
 0x375   : > { %v6127_v39 = vpop.f32.mrf.mxu1  ;;  %12771 = vmatpush3.bf16.msra.mxu1 %v13048_v60  ;;  %12774 = vmatprep.mubr.bf16.mxu1 %v8816_v42  ;;  %v16255_v13 = vpop.f32.mrf.mxu0  ;;  %v8808_v60 = vld [vmem:[#allocation4 + $0x152] sm:$0xff] }
 0x376   : > { %18041 = vst [vmem:[#allocation14_spill] sm:$0xff] %v16250_v16  ;;  %v16257_v21 = vadd.f32 %v6127_v39, %v5950_v23  ;;  %12772 = vmatprep.subr.bf16.mxu1 %v13050_v52  ;;  %v8820_v28 = vpack.c.bf16 %v8809_v53, %v8808_v60  ;;  %v8608_v42 = vld [vmem:[#allocation4 + $0x159] sm:$0xff]  ;;  %v8611_v53 = vld [vmem:[#allocation4 + $0x181] sm:$0xff] }
 0x377   : > { %12737 = vmatpush3.bf16.msra.mxu0 %v13045_v3  ;;  %v16259_v55 = vpop.f32.mrf.mxu1  ;;  %v16261_v25 = vpop.f32.mrf.mxu0  ;;  %v8617_v3 = vpack.c.bf16 %v8604_v30, %v16066_v63  ;;  %v8605_v63 = vld [vmem:[#allocation4 + $0x139] sm:$0xff]  ;;  %v8619_v22 = vpack.c.bf16 %v8608_v42, %v16093_v36 }
 0x378   : > { %18042 = vst [vmem:[#allocation11_spill] sm:$0xff] %v16257_v21  ;;  %12738 = vmatprep.subr.bf16.mxu0 %v13047_v57  ;;  %v8814_v30 = vld [vmem:[#allocation4 + $0x19a] sm:$0xff] }
 0x379   : > { %v16266_v33 = vpop.f32.mrf.mxu1  ;;  %12773 = vmatpush3.bf16.msra.mxu1 %v13050_v52  ;;  %v16269_v29 = vpop.f32.mrf.mxu0  ;;  %v8606_v52 = vld [vmem:[#allocation4 + $0x141] sm:$0xff] }
 0x37a   : > { %12691 = vmatmul.mubr.bf16.gmra.mxu0 %v8219_v46  ;;  %v8618_v7 = vpack.c.bf16 %v8606_v52, %v8605_v63  ;;  %v8613_v63 = vld [vmem:[#allocation4 + $0x199] sm:$0xff] }
 0x37b   : > { %12739 = vmatpush3.bf16.msra.mxu0 %v13047_v57  ;;  %12742 = vmatprep.mubr.bf16.mxu0 %v8615_v2  ;;  %v16271_v15 = vpop.f32.mrf.mxu1  ;;  %v16273_v10 = vpop.f32.mrf.mxu0  ;;  %v9164_v16 = vld [vmem:[#allocation5 + $0xa] sm:$0xff] }
 0x37c   : > { %12740 = vmatprep.subr.bf16.mxu0 %v13049_v43  ;;  %12775 = vmatmul.mubr.bf16.vlgmr.msra.gmra.mxu1 %v8817_v34 }
 0x37d   : > { %v16275_v44 = vpop.f32.mrf.mxu1  ;;  %12778 = vmatprep.mubr.bf16.mxu1 %v8818_v17  ;;  %v16277_v56 = vpop.f32.mrf.mxu0  ;;  %v8610_v17 = vld [vmem:[#allocation4 + $0x171] sm:$0xff] }
 0x37e   : > { %v8620_v60 = vpack.c.bf16 %v8610_v17, %v8609_v19 }
 0x37f   : > { %12741 = vmatpush3.bf16.msra.mxu0 %v13049_v43  ;;  %v16279_v12 = vpop.f32.mrf.mxu1  ;;  %v16281_v47 = vpop.f32.mrf.mxu0 }
 0x381   : > { %v16283_v41 = vpop.f32.mrf.mxu1  ;;  %v16286_v23 = vpop.f32.mrf.mxu0 }
 0x382   : > { %12743 = vmatmul.mubr.bf16.vlgmr.msra.gmra.mxu0 %v8616_v35 }
 0x383   : > { %12746 = vmatprep.mubr.bf16.mxu0 %v8617_v3  ;;  %v16288_v27 = vpop.f32.mrf.mxu1  ;;  %v16290_v51 = vpop.f32.mrf.mxu0  ;;  %v8823_v3 = vpack.c.bf16 %v8815_v8, %v8814_v30 }
 0x384   : > { %12779 = vmatmul.mubr.bf16.gmra.mxu1 %v8819_v32 }
 0x385   : > { %v16292_v6 = vpop.f32.mrf.mxu1  ;;  %12782 = vmatprep.mubr.bf16.mxu1 %v8820_v28  ;;  %v16294_v0 = vpop.f32.mrf.mxu0  ;;  %v8621_v28 = vpack.c.bf16 %v8612_v20, %v8611_v53 }
 0x387   : > { %v16296_v57 = vpop.f32.mrf.mxu1  ;;  %v16298_v39 = vpop.f32.mrf.mxu0 }
 0x389   : > { %v16300_v58 = vpop.f32.mrf.mxu1  ;;  %v16303_v43 = vpop.f32.mrf.mxu0 }
 0x38a   : > { %12747 = vmatmul.mubr.bf16.gmra.mxu0 %v8618_v7 }
 0x38b   : > { %12750 = vmatprep.mubr.bf16.mxu0 %v8619_v22  ;;  %v16305_v40 = vpop.f32.mrf.mxu1  ;;  %v16307_v2 = vpop.f32.mrf.mxu0  ;;  %v8622_v22 = vpack.c.bf16 %v8614_v31, %v8613_v63 }
 0x38c   : > { %12783 = vmatmul.mubr.bf16.gmra.mxu1 %v8821_v54 }
 0x38d   : > { %v16309_v34 = vpop.f32.mrf.mxu1  ;;  %12786 = vmatprep.mubr.bf16.mxu1 %v8219_v46  ;;  %v16311_v50 = vpop.f32.mrf.mxu0 }
 0x38e   : > { %18043 = vst [vmem:[#allocation13_spill] sm:$0xff] %v16311_v50 }
 0x38f   : > { %v16313_v36 = vpop.f32.mrf.mxu1  ;;  %v16315_v35 = vpop.f32.mrf.mxu0 }
 0x390   : > { %18044 = vst [vmem:[#allocation18_spill] sm:$0xff] %v16313_v36  ;;  %18045 = vst [vmem:[#allocation34_spill] sm:$0xff] %v16315_v35  ;;  %v16390_v35 = vld [vmem:[%s17909_s7 + $0x2] ss:$0 sm:$0xff] }
 0x391   : > { %v16317_v32 = vpop.f32.mrf.mxu1  ;;  %v16319_v52 = vpop.f32.mrf.mxu0 }
 0x392   : > { %18046 = vst [vmem:[#allocation31_spill] sm:$0xff] %v16317_v32  ;;  %12751 = vmatmul.mubr.bf16.gmra.mxu0 %v8620_v60 }
 0x393   : > { %12754 = vmatprep.mubr.bf16.mxu0 %v8621_v28  ;;  %v16321_v46 = vpop.f32.mrf.mxu1  ;;  %v16323_v42 = vpop.f32.mrf.mxu0 }
 0x394   : > { %18047 = vst [vmem:[#allocation10_spill] sm:$0xff] %v16321_v46  ;;  %12787 = vmatmul.mubr.bf16.gmra.mxu1 %v8823_v3 }
 0x395   : > { %v16325_v38 = vpop.f32.mrf.mxu1  ;;  %v16327_v7 = vpop.f32.mrf.mxu0 }
 0x396   : > { %18048 = vst [vmem:[#allocation17_spill] sm:$0xff] %v16325_v38 }
 0x397   : > { %v16329_v54 = vpop.f32.mrf.mxu1  ;;  %v16331_v17 = vpop.f32.mrf.mxu0 }
 0x398   : > { %18049 = vst [vmem:[#allocation16_spill] sm:$0xff] %v16331_v17 }
 0x399   : > { %v16333_v30 = vpop.f32.mrf.mxu1  ;;  %v16337_v20 = vpop.f32.mrf.mxu0 }
 0x39a   : > { %12755 = vmatmul.mubr.bf16.gmra.mxu0 %v8622_v22  ;;  %18051 = vst [vmem:[#allocation36_spill] sm:$0xff] %v16337_v20  ;;  %v9163_v20 = vld [vmem:[#allocation5 + $0x2] sm:$0xff] }
 0x39b   : > { %v16335_v8 = vpop.f32.mrf.mxu1  ;;  %v16343_v53 = vpop.f32.mrf.mxu0 }
 0x39c   : > { %18050 = vst [vmem:[#allocation33_spill] sm:$0xff] %v16335_v8  ;;  %18054 = vst [vmem:[#allocation35_spill] sm:$0xff] %v16343_v53  ;;  %v9185_v8 = vmul.f32 %v16390_v35, %v9164_v16 }
 0x39d   : > { %v16339_v19 = vpop.f32.mrf.mxu1  ;;  %v16349_v63 = vpop.f32.mrf.mxu0 }
 0x39e   : > { %18052 = vst [vmem:[#allocation15_spill] sm:$0xff] %v16339_v19  ;;  %18057 = vst [vmem:[#allocation27_spill] sm:$0xff] %v16349_v63 }
 0x39f   : > { %v16341_v60 = vpop.f32.mrf.mxu1  ;;  %v16355_v22 = vpop.f32.mrf.mxu0 }
 0x3a0   : > { %18053 = vst [vmem:[#allocation21_spill] sm:$0xff] %v16341_v60  ;;  %18060 = vst [vmem:[#allocation12_spill] sm:$0xff] %v16355_v22 }
 0x3a1   : > { %v16345_v3 = vpop.f32.mrf.mxu1  ;;  %v16359_v32 = vpop.f32.mrf.mxu0 }
 0x3a2   : > { %18055 = vst [vmem:[#allocation39_spill] sm:$0xff] %v16345_v3  ;;  %18062 = vst [vmem:[#allocation41_spill] sm:$0xff] %v16359_v32  ;;  %v9057_v3 = vld [vmem:[#allocation5] sm:$0xff]  ;;  %v9058_v32 = vld [vmem:[#allocation5 + $0x8] sm:$0xff] }
 0x3a3   : > { %v16347_v28 = vpop.f32.mrf.mxu1  ;;  %v16363_v60 = vpop.f32.mrf.mxu0 }
 0x3a4   : > { %18056 = vst [vmem:[#allocation32_spill] sm:$0xff] %v16347_v28  ;;  %18064 = vst [vmem:[#allocation20_spill] sm:$0xff] %v16363_v60 }
 0x3a5   : > { %v16351_v31 = vpop.f32.mrf.mxu1  ;;  %v16379_v22 = vpop.f32.mrf.mxu0 }
 0x3a6   : > { %18058 = vst [vmem:[#allocation24_spill] sm:$0xff] %v16351_v31  ;;  %v16372_v31 = vld [vmem:[%s17909_s7] ss:$0 sm:$0xff]  ;;  %18069 = vst [vmem:[#allocation28_spill] sm:$0xff] %v16379_v22 }
 0x3a7   : > { %v16353_v38 = vpop.f32.mrf.mxu1  ;;  %18067 = vst [vmem:[#allocation22_spill] sm:$0xff] %v16372_v31  ;;  %v9079_v21 = vmul.f32 %v16372_v31, %v9058_v32  ;;  %v16394_v22 = vpop.f32.mrf.mxu0  ;;  %v6343_v32 = vadd.f32 %v16239_v5, %v16147_v48  ;;  %v6347_v48 = vadd.f32 %v16269_v29, %v16177_v49  ;;  %v6351_v29 = vadd.f32 %v16286_v23, %v16205_v59 }
 0x3a8   : > { %18059 = vst [vmem:[#allocation37_spill] sm:$0xff] %v16353_v38  ;;  %v9110_v38 = vld [vmem:[#allocation5 + $0x1] sm:$0xff]  ;;  %v6352_v59 = vadd.f32 %v16294_v0, %v16219_v11 }
 0x3a9   : > { %v16357_v46 = vpop.f32.mrf.mxu1  ;;  %v6549_v49 = vadd.f32 %v16279_v12, %v6347_v48 }
 0x3aa   : > { %18061 = vst [vmem:[#allocation26_spill] sm:$0xff] %v16357_v46  ;;  %v16377_v46 = vld [vmem:[%s17909_s7 + $0x1] ss:$0 sm:$0xff]  ;;  %v6554_v11 = vadd.f32 %v16305_v40, %v6352_v59 }
 0x3ab   : > { %v16361_v19 = vpop.f32.mrf.mxu1  ;;  %18068 = vst [vmem:[#allocation42_spill] sm:$0xff] %v16377_v46 }
 0x3ac   : > { %18063 = vst [vmem:[#allocation23_spill] sm:$0xff] %v16361_v19  ;;  %v9111_v19 = vld [vmem:[#allocation5 + $0x9] sm:$0xff] }
 0x3ad   : > { %v16365_v53 = vpop.f32.mrf.mxu1  ;;  %v9132_v50 = vmul.f32 %v16377_v46, %v9111_v19  ;;  %v6341_v19 = vadd.f32 %v16248_v9, %v16155_v4  ;;  %v6345_v4 = vadd.f32 %v16273_v10, %v16183_v26  ;;  %v6346_v26 = vadd.f32 %v16281_v47, %v16199_v62 }
 0x3ae   : > { %18065 = vst [vmem:[#allocation40_spill] sm:$0xff] %v16365_v53  ;;  %v9078_v53 = vmul.f32 %v16372_v31, %v9057_v3  ;;  %v6553_v62 = vadd.f32 %v16296_v57, %v6351_v29  ;;  %v6350_v47 = vadd.f32 %v16298_v39, %v16227_v37  ;;  %v6355_v37 = vadd.f32 %v16303_v43, %v16233_v14  ;;  %v18078_v14 = vld [vmem:[#allocation34_spill] sm:$0xff]  ;;  %v18083_v29 = vld [vmem:[#allocation35_spill] sm:$0xff] }
 0x3af   : > { %v9148_v17 = vadd.f32 %v9132_v50, %v9079_v21  ;;  %v6342_v21 = vadd.f32 %v16261_v25, %v16171_v1  ;;  %v6543_v16 = vadd.f32 %v16266_v33, %v6341_v19  ;;  %v6547_v33 = vadd.f32 %v16283_v41, %v6345_v4  ;;  %v18077_v19 = vld [vmem:[#allocation11_spill] sm:$0xff] }
 0x3b0   : > { %v6548_v41 = vadd.f32 %v16292_v6, %v6346_v26  ;;  %v6552_v0 = vadd.f32 %v16309_v34, %v6350_v47  ;;  %v6353_v39 = vadd.f32 %v16307_v2, %v16241_v45  ;;  %v18076_v34 = vld [vmem:[#allocation13_spill] sm:$0xff]  ;;  %v6354_v43 = vadd.f32 %v18078_v14, %v18077_v19  ;;  %v18091_v19 = vld [vmem:[#allocation24_spill] sm:$0xff] }
 0x3b1   : > { %v6544_v1 = vadd.f32 %v16275_v44, %v6342_v21  ;;  %v6746_v12 = vadd.f32 %v16323_v42, %v6543_v16  ;;  %v18080_v21 = vld [vmem:[#allocation15_spill] sm:$0xff] }
 0x3b2   : > { %v16367_v28 = vpop.f32.mrf.mxu1 }
 0x3b3   : > { %18066 = vst [vmem:[#allocation25_spill] sm:$0xff] %v16367_v28  ;;  %v9131_v28 = vmul.f32 %v16377_v46, %v9110_v38  ;;  %v9184_v38 = vmul.f32 %v16390_v35, %v9163_v20  ;;  %v6344_v20 = vadd.f32 %v16255_v13, %v16163_v61  ;;  %v6348_v13 = vadd.f32 %v16277_v56, %v16191_v18 }
 0x3b4   : > { %v16381_v60 = vpop.f32.mrf.mxu1  ;;  %v6349_v18 = vadd.f32 %v16290_v51, %v16211_v24  ;;  %v6948_v6 = vadd.f32 %v16333_v30, %v6746_v12 }
 0x3b5   : > { %18070 = vst [vmem:[#allocation29_spill] sm:$0xff] %v16381_v60  ;;  %v9147_v3 = vadd.f32 %v9131_v28, %v9078_v53  ;;  %v6545_v53 = vadd.f32 %v16259_v55, %v6343_v32  ;;  %v16428_v55 = vadd.f32 %v9185_v8, %v9148_v17  ;;  %v6546_v61 = vadd.f32 %v16271_v15, %v6344_v20  ;;  %v18072_v17 = vld [vmem:[#allocation33_spill] sm:$0xff]  ;;  %v18073_v8 = vld [vmem:[#allocation16_spill] sm:$0xff] }
 0x3b6   : > { %v16385_v63 = vpop.f32.mrf.mxu1  ;;  %v6550_v44 = vadd.f32 %v16288_v27, %v6348_v13  ;;  %v16459_v27 = vld [vmem:[%s17908_s6] ss:$0 sm:$0xff]  ;;  %v6551_v51 = vadd.f32 %v16300_v58, %v6349_v18  ;;  %v6747_v30 = vadd.f32 %v18073_v8, %v6544_v1  ;;  %v18081_v1 = vld [vmem:[#allocation31_spill] sm:$0xff]  ;;  %v6750_v18 = vadd.f32 %v18083_v29, %v6547_v33 }
 0x3b7   : > { %18071 = vst [vmem:[#allocation43_spill] sm:$0xff] %v16385_v63  ;;  %v16417_v50 = vadd.f32 %v9184_v38, %v9147_v3  ;;  %v6748_v25 = vadd.f32 %v16319_v52, %v6545_v53  ;;  %v6749_v57 = vadd.f32 %v16327_v7, %v6546_v61  ;;  %v18074_v3 = vld [vmem:[#allocation18_spill] sm:$0xff]  ;;  %v18079_v53 = vld [vmem:[#allocation36_spill] sm:$0xff]  ;;  %v6555_v13 = vadd.f32 %v18081_v1, %v6353_v39  ;;  %v18087_v39 = vld [vmem:[#allocation39_spill] sm:$0xff] }
 0x3b8   : > { %v16396_v60 = vpop.f32.mrf.mxu1  ;;  %v6557_v40 = vadd.f32 %v18074_v3, %v6355_v37  ;;  %v18075_v38 = vld [vmem:[#allocation14_spill] sm:$0xff]  ;;  %v6752_v45 = vadd.f32 %v18079_v53, %v6549_v49  ;;  %v6949_v16 = vadd.f32 %v18080_v21, %v6747_v30  ;;  %v18085_v49 = vld [vmem:[#allocation21_spill] sm:$0xff] }
 0x3b9   : > { %v6950_v56 = vadd.f32 %v16329_v54, %v6748_v25  ;;  %v6951_v58 = vadd.f32 %v18072_v17, %v6749_v57  ;;  %v6356_v32 = vadd.f32 %v18076_v34, %v18075_v38  ;;  %v18082_v25 = vld [vmem:[#allocation10_spill] sm:$0xff]  ;;  %v18086_v37 = vld [vmem:[#allocation17_spill] sm:$0xff]  ;;  %v6952_v17 = vadd.f32 %v18087_v39, %v6750_v18 }
 0x3ba   : > { %v16399_v36 = vpop.f32.mrf.mxu0  ;;  %v16401_v63 = vpop.f32.mrf.mxu1  ;;  %v18089_v33 = vld [vmem:[#allocation41_spill] sm:$0xff] }
 0x3bb   : > { %v6558_v26 = vadd.f32 %v18082_v25, %v6356_v32  ;;  %v6756_v30 = vadd.f32 %v18089_v33, %v6553_v62  ;;  %v18095_v25 = vld [vmem:[#allocation28_spill] sm:$0xff] }
 0x3bc   : > { %v16408_v46 = vpop.f32.mrf.mxu0  ;;  %v16410_v31 = vpop.f32.mrf.mxu1  ;;  %v6757_v29 = vadd.f32 %v18095_v25, %v6554_v11 }
 0x3be   : > { %v16424_v5 = vpop.f32.mrf.mxu0  ;;  %v16426_v9 = vpop.f32.mrf.mxu1 }
 0x3bf   : > { %v6761_v21 = vadd.f32 %v16424_v5, %v6558_v26  ;;  %v16523_v5 = vld [vmem:[%s17909_s7 + $0x3] ss:$0 sm:$0xff] }
 0x3c0   : > { %v16441_v10 = vpop.f32.mrf.mxu0  ;;  %v16443_v15 = vpop.f32.mrf.mxu1 }
 0x3c2   : > { %v12488_v23 = vpop.f32.mrf.mxu0  ;;  %v16461_v24 = vpop.f32.mrf.mxu1 }
 0x3c3   : > { %v7152_v52 = vadd.f32 %v12488_v23, %v6950_v56  ;;  %v18084_v56 = vld [vmem:[#allocation27_spill] sm:$0xff]  ;;  %v6954_v23 = vadd.f32 %v18085_v49, %v6752_v45  ;;  %v6760_v45 = vadd.f32 %v16399_v36, %v6557_v40 }
 0x3c4   : > { %v7087_v42 = vpop.f32.mrf.mxu0  ;;  %v16472_v54 = vpop.f32.mrf.mxu1  ;;  %v6753_v12 = vadd.f32 %v18084_v56, %v6550_v44 }
 0x3c5   : > { %v7175_v7 = vadd.f32 %v16459_v27, %v7152_v52  ;;  %v7150_v28 = vadd.f32 %v7087_v42, %v6948_v6  ;;  %v6556_v42 = vadd.f32 %v18086_v37, %v6354_v43  ;;  %v18092_v43 = vld [vmem:[#allocation20_spill] sm:$0xff] }
 0x3c6   : > { %v12489_v2 = vpop.f32.mrf.mxu0  ;;  %v16483_v20 = vpop.f32.mrf.mxu1  ;;  %v6754_v53 = vadd.f32 %v18092_v43, %v6551_v51  ;;  %v6755_v51 = vadd.f32 %v16394_v22, %v6552_v0  ;;  %v16531_v22 = vld [vmem:[%s17909_s7 + $0x6] ss:$0 sm:$0xff]  ;;  %v18098_v0 = vld [vmem:[#allocation23_spill] sm:$0xff] }
 0x3c7   : > { %v7191_v48 = vmax.f32 %v7175_v7, 0.0  ;;  %v7173_v4 = vadd.f32 %v16459_v27, %v7150_v28  ;;  %v7153_v61 = vadd.f32 %v12489_v2, %v6951_v58  ;;  %v18088_v58 = vld [vmem:[#allocation12_spill] sm:$0xff]  ;;  %v6759_v36 = vadd.f32 %v16441_v10, %v6556_v42  ;;  %v16536_v10 = vld [vmem:[%s17909_s7 + $0x7] ss:$0 sm:$0xff] }
 0x3c8   : > { %v7090_v59 = vpop.f32.mrf.mxu0  ;;  %v16491_v47 = vpop.f32.mrf.mxu1  ;;  %v6751_v8 = vadd.f32 %v18088_v58, %v6548_v41  ;;  %v18090_v28 = vld [vmem:[#allocation32_spill] sm:$0xff]  ;;  %v6758_v41 = vadd.f32 %v16408_v46, %v6555_v13  ;;  %v18097_v13 = vld [vmem:[#allocation26_spill] sm:$0xff]  ;;  %v18103_v58 = vld [vmem:[#allocation43_spill] sm:$0xff] }
 0x3c9   : > { %7208 = vst.msk [vmem:[#allocation5 + $0x31] sm:$0xff] %vm334_vm0, %v7191_v48  ;;  %v7189_v6 = vmax.f32 %v7173_v4, 0.0  ;;  %v7176_v57 = vadd.f32 %v16459_v27, %v7153_v61  ;;  %v7151_v52 = vadd.f32 %v7090_v59, %v6949_v16  ;;  %v6955_v3 = vadd.f32 %v18090_v28, %v6753_v12  ;;  %v18094_v61 = vld [vmem:[#allocation37_spill] sm:$0xff]  ;;  %v18099_v59 = vld [vmem:[#allocation40_spill] sm:$0xff]  ;;  %v16558_v28 = vld [vmem:[%s17909_s7 + $0x4] ss:$0 sm:$0xff] }
 0x3ca   : > { %v12492_v44 = vpop.f32.mrf.mxu0  ;;  %v16500_v7 = vpop.f32.mrf.mxu1  ;;  %v6953_v14 = vadd.f32 %v18091_v19, %v6751_v8  ;;  %v6958_v1 = vadd.f32 %v18094_v61, %v6756_v30  ;;  %v6956_v26 = vadd.f32 %v18097_v13, %v6754_v53  ;;  %v6959_v12 = vadd.f32 %v18098_v0, %v6757_v29  ;;  %v18106_v29 = vld [vmem:[#allocation22_spill] sm:$0xff] }
 0x3cb   : > { %7206 = vst.msk [vmem:[#allocation5 + $0x19] sm:$0xff] %vm334_vm0, %v7189_v6  ;;  %v7192_v38 = vmax.f32 %v7176_v57, 0.0  ;;  %v7174_v34 = vadd.f32 %v16459_v27, %v7151_v52  ;;  %v7156_v32 = vadd.f32 %v12492_v44, %v6954_v23  ;;  %v16540_v49 = vadd.f32 %v18099_v59, %v6755_v51  ;;  %v18100_v23 = vld [vmem:[#allocation25_spill] sm:$0xff] }
 0x3cc   : > { %v7103_v62 = vpop.f32.mrf.mxu0  ;;  %v16509_v2 = vpop.f32.mrf.mxu1  ;;  %v16543_v6 = vadd.f32 %v18100_v23, %v6760_v45  ;;  %v18101_v57 = vld [vmem:[#allocation29_spill] sm:$0xff]  ;;  %v16551_v8 = vadd.f32 %v18103_v58, %v6761_v21  ;;  %v16578_v21 = vld [vmem:[%s17909_s7 + $0x8] ss:$0 sm:$0xff] }
 0x3cd   : > { %18093 = vst [vmem:[#allocation19_spill] sm:$0xff] %v16509_v2  ;;  %7209 = vst.msk [vmem:[#allocation5 + $0x39] sm:$0xff] %vm334_vm0, %v7192_v38  ;;  %v7190_v16 = vmax.f32 %v7174_v34, 0.0  ;;  %v7179_v48 = vadd.f32 %v16459_v27, %v7156_v32  ;;  %v7154_v4 = vadd.f32 %v7103_v62, %v6952_v17  ;;  %v16546_v52 = vadd.f32 %v18101_v57, %v6758_v41 }
 0x3ce   : > { %v12493_v46 = vpop.f32.mrf.mxu0  ;;  %v16518_v40 = vpop.f32.mrf.mxu1 }
 0x3cf   : > { %18096 = vst [vmem:[#allocation30_spill] sm:$0xff] %v16518_v40  ;;  %7207 = vst.msk [vmem:[#allocation5 + $0x21] sm:$0xff] %vm334_vm0, %v7190_v16  ;;  %v7195_v18 = vmax.f32 %v7179_v48, 0.0  ;;  %v7177_v56 = vadd.f32 %v16459_v27, %v7154_v4  ;;  %v7157_v11 = vadd.f32 %v12493_v46, %v6955_v3  ;;  %v16561_v3 = vadd.f32 %v16396_v60, %v6759_v36 }
 0x3d0   : > { %v7106_v37 = vpop.f32.mrf.mxu0  ;;  %v16548_v42 = vpop.f32.mrf.mxu1  ;;  %v9376_v39 = vld [vmem:[#allocation5 + $0x30] sm:$0xff] }
 0x3d1   : > { %18102 = vst [vmem:[#allocation38_spill] sm:$0xff] %v16548_v42  ;;  %v9429_v17 = vld [vmem:[#allocation5 + $0x31] sm:$0xff]  ;;  %7212 = vst.msk [vmem:[#allocation5 + $0x61] sm:$0xff] %vm334_vm0, %v7195_v18  ;;  %v7193_v33 = vmax.f32 %v7177_v56, 0.0  ;;  %v7180_v30 = vadd.f32 %v16459_v27, %v7157_v11  ;;  %v7155_v44 = vadd.f32 %v7106_v37, %v6953_v14  ;;  %v9397_v43 = vmul.f32 %v16531_v22, %v9376_v39 }
 0x3d2   : > { %v12496_v38 = vpop.f32.mrf.mxu0  ;;  %v16563_v34 = vpop.f32.mrf.mxu1  ;;  %v9216_v32 = vld [vmem:[#allocation5 + $0x18] sm:$0xff]  ;;  %v16567_v53 = vmul.f32 %v16536_v10, %v9429_v17  ;;  %v16570_v14 = vmul.f32 %v16523_v5, %v9376_v39  ;;  %v9082_v36 = vmul.f32 %v18106_v29, %v9376_v39 }
 0x3d3   : > { %18104 = vst [vmem:[#allocation33_spill] sm:$0xff] %v16563_v34  ;;  %v9269_v19 = vld [vmem:[#allocation5 + $0x19] sm:$0xff]  ;;  %7210 = vst.msk [vmem:[#allocation5 + $0x49] sm:$0xff] %vm334_vm0, %v7193_v33  ;;  %v7196_v45 = vmax.f32 %v7180_v30, 0.0  ;;  %v7178_v41 = vadd.f32 %v16459_v27, %v7155_v44  ;;  %v7160_v60 = vadd.f32 %v12496_v38, %v6958_v1  ;;  %v9237_v62 = vmul.f32 %v16523_v5, %v9216_v32  ;;  %v18108_v33 = vld [vmem:[#allocation42_spill] sm:$0xff] }
 0x3d4   : > { %v7119_v16 = vpop.f32.mrf.mxu0  ;;  %v16580_v48 = vpop.f32.mrf.mxu1  ;;  %v9290_v4 = vmul.f32 %v16558_v28, %v9269_v19  ;;  %v16583_v61 = vld [vmem:[#allocation5 + $0x32] sm:$0xff]  ;;  %v9080_v51 = vmul.f32 %v18106_v29, %v9216_v32  ;;  %v16589_v1 = vmul.f32 %v16558_v28, %v9429_v17  ;;  %v16597_v0 = vld [vmem:[#allocation5 + $0x3a] sm:$0xff]  ;;  %v9135_v30 = vmul.f32 %v18108_v33, %v9429_v17 }
 0x3d5   : > { %18105 = vst [vmem:[#allocation16_spill] sm:$0xff] %v16580_v48  ;;  %v16585_v25 = vld [vmem:[#allocation5 + $0x38] sm:$0xff]  ;;  %7213 = vst.msk [vmem:[#allocation5 + $0x69] sm:$0xff] %vm334_vm0, %v7196_v45  ;;  %v7194_v46 = vmax.f32 %v7178_v41, 0.0  ;;  %v7183_v13 = vadd.f32 %v16459_v27, %v7160_v60  ;;  %v7158_v18 = vadd.f32 %v7119_v16, %v6956_v26  ;;  %v9253_v56 = vadd.f32 %v9237_v62, %v16417_v50  ;;  %v16616_v41 = vld [vmem:[%s17909_s7 + $0x5] ss:$0 sm:$0xff] }
 0x3d6   : > { %v16595_v11 = vld [vmem:[#allocation5 + $0x39] sm:$0xff]  ;;  %v12497_v59 = vpop.f32.mrf.mxu0  ;;  %v16599_v23 = vpop.f32.mrf.mxu1  ;;  %v9503_v37 = vmul.f32 %v16578_v21, %v16583_v61  ;;  %v16605_v58 = vld [vmem:[#allocation5 + $0x21] sm:$0xff]  ;;  %v9398_v26 = vmul.f32 %v16531_v22, %v16585_v25  ;;  %v9133_v50 = vmul.f32 %v18108_v33, %v9269_v19  ;;  %18109 = vst [vmem:[#allocation14_spill] sm:$0xff] %v16616_v41 }
 0x3d7   : > { %18107 = vst [vmem:[#allocation18_spill] sm:$0xff] %v16599_v23  ;;  %v9322_v57 = vld [vmem:[#allocation5 + $0x1a] sm:$0xff]  ;;  %7211 = vst.msk [vmem:[#allocation5 + $0x51] sm:$0xff] %vm334_vm0, %v7194_v46  ;;  %v7199_v44 = vmax.f32 %v7183_v13, 0.0  ;;  %v7181_v38 = vadd.f32 %v16459_v27, %v7158_v18  ;;  %v7161_v32 = vadd.f32 %v12497_v59, %v6959_v12  ;;  %v9306_v45 = vadd.f32 %v9290_v4, %v9253_v56  ;;  %v16623_v19 = vld [vmem:[#allocation5 + $0x22] sm:$0xff] }
 0x3d8   : > { %v16603_v39 = vld [vmem:[#allocation5 + $0x20] sm:$0xff]  ;;  %v7122_v60 = vpop.f32.mrf.mxu0  ;;  %v16618_v62 = vpop.f32.mrf.mxu1  ;;  %v9343_v16 = vmul.f32 %v16616_v41, %v9322_v57  ;;  %v9451_v46 = vmul.f32 %v16536_v10, %v16595_v11  ;;  %v16629_v12 = vmul.f32 %v16578_v21, %v16597_v0  ;;  %v9291_v56 = vmul.f32 %v16558_v28, %v16605_v58 }
 0x3d9   : > { %18110 = vst [vmem:[#allocation13_spill] sm:$0xff] %v16618_v62  ;;  %v9238_v17 = vmul.f32 %v16523_v5, %v16603_v39  ;;  %7216 = vst.msk [vmem:[#allocation5 + $0x91] sm:$0xff] %vm334_vm0, %v7199_v44  ;;  %v7197_v4 = vmax.f32 %v7181_v38, 0.0  ;;  %v7184_v13 = vadd.f32 %v16459_v27, %v7161_v32  ;;  %v7159_v18 = vadd.f32 %v7122_v60, %v16540_v49 }
 0x3da   : > { %v12500_v59 = vpop.f32.mrf.mxu0  ;;  %v9359_v62 = vadd.f32 %v9343_v16, %v9306_v45  ;;  %v9149_v48 = vadd.f32 %v9133_v50, %v9080_v51  ;;  %v9186_v34 = vmul.f32 %v16390_v35, %v9322_v57  ;;  %v9344_v49 = vmul.f32 %v16616_v41, %v16623_v19  ;;  %v16645_v51 = vld [vmem:[#allocation5 + $0x48] sm:$0xff] }
 0x3db   : > { %v9254_v23 = vadd.f32 %v9238_v17, %v16428_v55  ;;  %7214 = vst.msk [vmem:[#allocation5 + $0x79] sm:$0xff] %vm334_vm0, %v7197_v4  ;;  %v7200_v42 = vmax.f32 %v7184_v13, 0.0  ;;  %v7182_v44 = vadd.f32 %v16459_v27, %v7159_v18  ;;  %v7164_v38 = vadd.f32 %v12500_v59, %v16543_v6 }
 0x3dc   : > { %v7135_v32 = vpop.f32.mrf.mxu0  ;;  %v9413_v60 = vadd.f32 %v9397_v43, %v9359_v62  ;;  %v12584_v40 = vpop.f32.mrf.mxu1  ;;  %v9202_v45 = vadd.f32 %v9186_v34, %v9149_v48  ;;  %v9345_v55 = vmul.f32 %v16616_v41, %v16583_v61  ;;  %v9151_v16 = vadd.f32 %v9135_v30, %v9082_v36  ;;  %v16659_v36 = vld [vmem:[#allocation5 + $0x49] sm:$0xff] }
 0x3dd   : > { %v9307_v2 = vadd.f32 %v9291_v56, %v9254_v23  ;;  %7217 = vst.msk [vmem:[#allocation5 + $0x99] sm:$0xff] %vm334_vm0, %v7200_v42  ;;  %v7198_v57 = vmax.f32 %v7182_v44, 0.0  ;;  %v7187_v50 = vadd.f32 %v16459_v27, %v7164_v38  ;;  %v7162_v6 = vadd.f32 %v7135_v32, %v16546_v52 }
 0x3de   : > { %v12501_v17 = vpop.f32.mrf.mxu0  ;;  %v9466_v4 = vadd.f32 %v16567_v53, %v9413_v60  ;;  %v7715_v43 = vpop.f32.mrf.mxu1  ;;  %v9255_v34 = vadd.f32 %v16570_v14, %v9202_v45  ;;  %v9188_v48 = vmul.f32 %v16390_v35, %v16583_v61  ;;  %v9399_v52 = vmul.f32 %v16531_v22, %v16645_v51 }
 0x3df   : > { %v9360_v62 = vadd.f32 %v9344_v49, %v9307_v2  ;;  %7215 = vst.msk [vmem:[#allocation5 + $0x81] sm:$0xff] %vm334_vm0, %v7198_v57  ;;  %v7203_v23 = vmax.f32 %v7187_v50, 0.0  ;;  %v7185_v42 = vadd.f32 %v16459_v27, %v7162_v6  ;;  %v7165_v13 = vadd.f32 %v12501_v17, %v16551_v8  ;;  %v16665_v8 = vld [vmem:[#allocation5 + $0x4a] sm:$0xff]  ;;  %v16675_v6 = vld [vmem:[#allocation5 + $0x60] sm:$0xff] }
 0x3e0   : > { %v7138_v53 = vpop.f32.mrf.mxu0  ;;  %v9519_v30 = vadd.f32 %v9503_v37, %v9466_v4  ;;  %v12585_v18 = vpop.f32.mrf.mxu1  ;;  %v9308_v14 = vadd.f32 %v16589_v1, %v9255_v34  ;;  %v9204_v56 = vadd.f32 %v9188_v48, %v9151_v16  ;;  %v9241_v38 = vmul.f32 %v16523_v5, %v16645_v51 }
 0x3e1   : > { %v9414_v2 = vadd.f32 %v9398_v26, %v9360_v62  ;;  %7220 = vst.msk [vmem:[#allocation5 + $0xc1] sm:$0xff] %vm334_vm0, %v7203_v23  ;;  %v7201_v61 = vmax.f32 %v7185_v42, 0.0  ;;  %v7188_v59 = vadd.f32 %v16459_v27, %v7165_v13  ;;  %v7163_v44 = vadd.f32 %v7138_v53, %v16561_v3  ;;  %v16691_v53 = vld [vmem:[#allocation5 + $0x61] sm:$0xff] }
 0x3e2   : > { %v9535_v49 = vsel %vm334_vm0, %v9519_v30, 0.0  ;;  %v12552_v37 = vpop.f32.mrf.mxu0  ;;  %v9361_v32 = vadd.f32 %v9345_v55, %v9308_v14  ;;  %v7718_v60 = vpop.f32.mrf.mxu1  ;;  %v9294_v1 = vmul.f32 %v16558_v28, %v16659_v36  ;;  %v9257_v50 = vadd.f32 %v9241_v38, %v9204_v56 }
 0x3e3   : > { %v9467_v26 = vadd.f32 %v9451_v46, %v9414_v2  ;;  %7218 = vst.msk [vmem:[#allocation5 + $0xa9] sm:$0xff] %vm334_vm0, %v7201_v61  ;;  %v7204_v45 = vmax.f32 %v7188_v59, 0.0  ;;  %v7186_v57 = vadd.f32 %v16459_v27, %v7163_v44  ;;  %9536 = vadd.xlane.f32.xlu0 %v9535_v49  ;;  %v7539_v3 = vadd.f32 %v12552_v37, %v16401_v63  ;;  %v16699_v59 = vld [vmem:[#allocation5 + $0x62] sm:$0xff] }
 0x3e4   : > { %v7530_v16 = vpop.f32.mrf.mxu0  ;;  %v9415_v46 = vadd.f32 %v9399_v52, %v9361_v32  ;;  %v9452_v55 = vmul.f32 %v16536_v10, %v16659_v36  ;;  %v9347_v4 = vmul.f32 %v16616_v41, %v16665_v8  ;;  %v12588_v62 = vpop.f32.mrf.mxu1  ;;  %v9310_v48 = vadd.f32 %v9294_v1, %v9257_v50 }
 0x3e5   : > { %v9520_v17 = vadd.f32 %v16629_v12, %v9467_v26  ;;  %7221 = vst.msk [vmem:[#allocation5 + $0xc9] sm:$0xff] %vm334_vm0, %v7204_v45  ;;  %v7202_v27 = vmax.f32 %v7186_v57, 0.0  ;;  %v16683_v34 = vadd.f32 %v12584_v40, %v7539_v3  ;;  %v7531_v63 = vadd.f32 %v7530_v16, %v16410_v31  ;;  %v9379_v3 = vld [vmem:[#allocation5 + $0x50] sm:$0xff] }
 0x3e6   : > { %v12553_v42 = vpop.f32.mrf.mxu0  ;;  %v9468_v12 = vadd.f32 %v9452_v55, %v9415_v46  ;;  %v9505_v13 = vmul.f32 %v16578_v21, %v16665_v8  ;;  %v9401_v52 = vmul.f32 %v16531_v22, %v16675_v6  ;;  %v7731_v30 = vpop.f32.mrf.mxu1  ;;  %v9363_v2 = vadd.f32 %v9347_v4, %v9310_v48 }
 0x3e7   : > { %v9538_v23 = vsel %vm334_vm0, %v9520_v17, 0.0  ;;  %7219 = vst.msk [vmem:[#allocation5 + $0xb1] sm:$0xff] %vm334_vm0, %v7202_v27  ;;  %v16694_v40 = vadd.f32 %v7715_v43, %v7531_v63  ;;  %v7542_v31 = vadd.f32 %v12553_v42, %v16426_v9  ;;  %v9081_v14 = vmul.f32 %v18106_v29, %v16603_v39  ;;  %v9432_v27 = vld [vmem:[#allocation5 + $0x51] sm:$0xff] }
 0x3e8   : > { %9539 = vadd.xlane.f32.xlu1 %v9538_v23  ;;  %v9521_v56 = vadd.f32 %v9505_v13, %v9468_v12  ;;  %v7533_v61 = vpop.f32.mrf.mxu0  ;;  %v9134_v44 = vmul.f32 %v18108_v33, %v16605_v58  ;;  %v12589_v38 = vpop.f32.mrf.mxu1  ;;  %v9417_v37 = vadd.f32 %v9401_v52, %v9363_v2  ;;  %v9454_v9 = vmul.f32 %v16536_v10, %v16691_v53  ;;  %v9485_v23 = vld [vmem:[#allocation5 + $0x52] sm:$0xff] }
 0x3e9   : > { %v16703_v49 = vadd.f32 %v12585_v18, %v7542_v31  ;;  %v7534_v43 = vadd.f32 %v7533_v61, %v16443_v15  ;;  %v9187_v1 = vmul.f32 %v16390_v35, %v16623_v19  ;;  %v9507_v15 = vmul.f32 %v16578_v21, %v16699_v59 }
 0x3ea   : > { %v9541_v26 = vsel %vm334_vm0, %v9521_v56, 0.0  ;;  %v12556_v32 = vpop.f32.mrf.mxu0  ;;  %v9150_v39 = vadd.f32 %v9134_v44, %v9081_v14  ;;  %v16711_v45 = vpop.f32.mrf.mxu1  ;;  %v9470_v18 = vadd.f32 %v9454_v9, %v9417_v37  ;;  %v9240_v16 = vmul.f32 %v16523_v5, %v16585_v25  ;;  %v16744_v44 = vld [vmem:[#allocation5 + $0x68] sm:$0xff] }
 0x3eb   : > { %9542 = vadd.xlane.f32.xlu0 %v9541_v26  ;;  %v16713_v58 = vadd.f32 %v7718_v60, %v7534_v43  ;;  %v7555_v57 = vadd.f32 %v12556_v32, %v16461_v24  ;;  %v9083_v19 = vmul.f32 %v18106_v29, %v16585_v25  ;;  %v9136_v46 = vmul.f32 %v18108_v33, %v16595_v11  ;;  %v16746_v43 = vld [vmem:[#allocation5 + $0x69] sm:$0xff] }
 0x3ec   : > { %v9203_v50 = vadd.f32 %v9187_v1, %v9150_v39  ;;  %v7546_v17 = vpop.f32.mrf.mxu0  ;;  %v16724_v60 = vpop.f32.mrf.mxu1  ;;  %v9523_v55 = vadd.f32 %v9507_v15, %v9470_v18  ;;  %v9293_v24 = vmul.f32 %v16558_v28, %v16595_v11  ;;  %v9189_v25 = vmul.f32 %v16390_v35, %v16597_v0  ;;  %v16753_v26 = vld [vmem:[#allocation5 + $0x6a] sm:$0xff] }
 0x3ed   : > { %v16726_v4 = vadd.f32 %v12588_v62, %v7555_v57  ;;  %v7547_v63 = vadd.f32 %v7546_v17, %v16472_v54  ;;  %v9152_v12 = vadd.f32 %v9136_v46, %v9083_v19  ;;  %v9242_v13 = vmul.f32 %v16523_v5, %v9379_v3 }
 0x3ee   : > { %v9256_v48 = vadd.f32 %v9240_v16, %v9203_v50  ;;  %v12557_v42 = vpop.f32.mrf.mxu0  ;;  %v16734_v52 = vpop.f32.mrf.mxu1  ;;  %v9547_v62 = vsel %vm334_vm0, %v9523_v55, 0.0  ;;  %v9346_v31 = vmul.f32 %v16616_v41, %v16597_v0  ;;  %v9400_v14 = vmul.f32 %v16531_v22, %v9379_v3 }
 0x3ef   : > { %v16739_v11 = vadd.f32 %v7731_v30, %v7547_v63  ;;  %v7558_v54 = vadd.f32 %v12557_v42, %v16483_v20  ;;  %9548 = vadd.xlane.f32.xlu1 %v9547_v62  ;;  %v9453_v56 = vmul.f32 %v16536_v10, %v9432_v27  ;;  %v9205_v61 = vadd.f32 %v9189_v25, %v9152_v12 }
 0x3f0   : > { %v9309_v2 = vadd.f32 %v9293_v24, %v9256_v48  ;;  %v7549_v37 = vpop.f32.mrf.mxu0  ;;  %v16748_v9 = vpop.f32.mrf.mxu1  ;;  %v9506_v0 = vmul.f32 %v16578_v21, %v9485_v23  ;;  %v9084_v20 = vmul.f32 %v18106_v29, %v16645_v51  ;;  %v9137_v32 = vmul.f32 %v18108_v33, %v16659_v36 }
 0x3f1   : > { %v16751_v30 = vadd.f32 %v12589_v38, %v7558_v54  ;;  %v9258_v1 = vadd.f32 %v9242_v13, %v9205_v61  ;;  %v9295_v18 = vmul.f32 %v16558_v28, %v9432_v27  ;;  %v9190_v15 = vmul.f32 %v16390_v35, %v16665_v8  ;;  %v16782_v54 = vld [vmem:[#allocation5 + $0x79] sm:$0xff] }
 0x3f2   : > { %v9362_v39 = vadd.f32 %v9346_v31, %v9309_v2  ;;  %v12560_v57 = vpop.f32.mrf.mxu0  ;;  %v16762_v50 = vpop.f32.mrf.mxu1  ;;  %v9348_v38 = vmul.f32 %v16616_v41, %v9485_v23  ;;  %v9402_v16 = vmul.f32 %v16531_v22, %v16744_v44  ;;  %v9455_v51 = vmul.f32 %v16536_v10, %v16746_v43  ;;  %v16780_v31 = vld [vmem:[#allocation5 + $0x78] sm:$0xff] }
 0x3f3   : > { %v9153_v17 = vadd.f32 %v9137_v32, %v9084_v20  ;;  %v9311_v19 = vadd.f32 %v9295_v18, %v9258_v1  ;;  %v9508_v46 = vmul.f32 %v16578_v21, %v16753_v26  ;;  %v9243_v8 = vmul.f32 %v16523_v5, %v16675_v6  ;;  %v16784_v2 = vld [vmem:[#allocation5 + $0x7a] sm:$0xff] }
 0x3f4   : > { %v9416_v36 = vadd.f32 %v9400_v14, %v9362_v39  ;;  %v7562_v55 = vpop.f32.mrf.mxu0  ;;  %v16773_v24 = vpop.f32.mrf.mxu1  ;;  %v7550_v48 = vadd.f32 %v7549_v37, %v16491_v47  ;;  %v7571_v42 = vadd.f32 %v12560_v57, %v16500_v7  ;;  %v9085_v12 = vmul.f32 %v18106_v29, %v9379_v3 }
 0x3f5   : > { %v9206_v63 = vadd.f32 %v9190_v15, %v9153_v17  ;;  %v9364_v13 = vadd.f32 %v9348_v38, %v9311_v19  ;;  %v9296_v62 = vmul.f32 %v16558_v28, %v16691_v53  ;;  %v9138_v14 = vmul.f32 %v18108_v33, %v9432_v27  ;;  %v16811_v17 = vld [vmem:[#allocation5 + $0x80] sm:$0xff] }
 0x3f6   : > { %v9469_v25 = vadd.f32 %v9453_v56, %v9416_v36  ;;  %v12561_v61 = vpop.f32.mrf.mxu0  ;;  %v16787_v20 = vpop.f32.mrf.mxu1  ;;  %v9349_v7 = vmul.f32 %v16616_v41, %v16699_v59  ;;  %v16792_v3 = vadd.f32 %v16711_v45, %v7550_v48  ;;  %v16795_v56 = vadd.f32 %v16724_v60, %v7571_v42 }
 0x3f7   : > { %v9259_v47 = vadd.f32 %v9243_v8, %v9206_v63  ;;  %v9418_v32 = vadd.f32 %v9402_v16, %v9364_v13  ;;  %v9154_v39 = vadd.f32 %v9138_v14, %v9085_v12  ;;  %v9191_v1 = vmul.f32 %v16390_v35, %v9485_v23  ;;  %v16817_v63 = vld [vmem:[#allocation5 + $0x81] sm:$0xff] }
 0x3f8   : > { %18111 = vst [vmem:[#allocation11_spill] sm:$0xff] %v16792_v3  ;;  %18112 = vst [vmem:[#allocation34_spill] sm:$0xff] %v16795_v56  ;;  %v9522_v37 = vadd.f32 %v9506_v0, %v9469_v25  ;;  %v16798_v18 = vpop.f32.mrf.mxu0  ;;  %v16800_v27 = vpop.f32.mrf.mxu1  ;;  %v9403_v57 = vmul.f32 %v16531_v22, %v16780_v31  ;;  %v9456_v45 = vmul.f32 %v16536_v10, %v16782_v54 }
 0x3f9   : > { %v9312_v15 = vadd.f32 %v9296_v62, %v9259_v47  ;;  %v9509_v60 = vmul.f32 %v16578_v21, %v16784_v2  ;;  %v9471_v38 = vadd.f32 %v9455_v51, %v9418_v32  ;;  %v9207_v16 = vadd.f32 %v9191_v1, %v9154_v39 }
 0x3fa   : > { %v9544_v0 = vsel %vm334_vm0, %v9522_v37, 0.0  ;;  %v9244_v23 = vmul.f32 %v16523_v5, %v16744_v44  ;;  %v16813_v36 = vpop.f32.mrf.mxu0  ;;  %v16815_v19 = vpop.f32.mrf.mxu1  ;;  %v9086_v48 = vmul.f32 %v18106_v29, %v16675_v6  ;;  %v9139_v51 = vmul.f32 %v18108_v33, %v16691_v53 }
 0x3fb   : > { %9545 = vadd.xlane.f32.xlu0 %v9544_v0  ;;  %v9365_v8 = vadd.f32 %v9349_v7, %v9312_v15  ;;  %v9192_v42 = vmul.f32 %v16390_v35, %v16699_v59  ;;  %v9524_v12 = vadd.f32 %v9508_v46, %v9471_v38  ;;  %v9297_v13 = vmul.f32 %v16558_v28, %v16746_v43  ;;  %v18113_v38 = vld [vmem:[#allocation19_spill] sm:$0xff] }
 0x3fc   : > { %v9260_v25 = vadd.f32 %v9244_v23, %v9207_v16  ;;  %v9350_v62 = vmul.f32 %v16616_v41, %v16753_v26  ;;  %v16829_v14 = vpop.f32.mrf.mxu0  ;;  %v16831_v47 = vpop.f32.mrf.mxu1  ;;  %v9404_v6 = vmul.f32 %v16531_v22, %v16811_v17  ;;  %v9155_v53 = vadd.f32 %v9139_v51, %v9086_v48  ;;  %v18114_v23 = vld [vmem:[#allocation30_spill] sm:$0xff]  ;;  %v16848_v51 = vld [vmem:[#allocation5 + $0x82] sm:$0xff] }
 0x3fd   : > { %v9419_v7 = vadd.f32 %v9403_v57, %v9365_v8  ;;  %v9245_v59 = vmul.f32 %v16523_v5, %v16780_v31  ;;  %v9550_v46 = vsel %vm334_vm0, %v9524_v12, 0.0  ;;  %v9457_v32 = vmul.f32 %v16536_v10, %v16817_v63 }
 0x3fe   : > { %v9313_v37 = vadd.f32 %v9297_v13, %v9260_v25  ;;  %v9298_v39 = vmul.f32 %v16558_v28, %v16782_v54  ;;  %v16842_v1 = vpop.f32.mrf.mxu0  ;;  %v16844_v15 = vpop.f32.mrf.mxu1  ;;  %v9208_v0 = vadd.f32 %v9192_v42, %v9155_v53  ;;  %v7563_v16 = vadd.f32 %v7562_v55, %v18113_v38  ;;  %v16852_v25 = vld [vmem:[#allocation5 + $0x90] sm:$0xff] }
 0x3ff   : > { %9551 = vadd.xlane.f32.xlu0 %v9550_v46  ;;  %v9472_v57 = vadd.f32 %v9456_v45, %v9419_v7  ;;  %v7574_v8 = vadd.f32 %v12561_v61, %v18114_v23  ;;  %v9351_v12 = vmul.f32 %v16616_v41, %v16784_v2  ;;  %v9087_v13 = vmul.f32 %v18106_v29, %v16744_v44  ;;  %v16864_v7 = vld [vmem:[#allocation5 + $0x92] sm:$0xff] }
 0x400   : > { %v9366_v48 = vadd.f32 %v9350_v62, %v9313_v37  ;;  %v9140_v46 = vmul.f32 %v18108_v33, %v16746_v43  ;;  %v16858_v45 = vpop.f32.mrf.mxu0  ;;  %v16860_v42 = vpop.f32.mrf.mxu1  ;;  %v9261_v61 = vadd.f32 %v9245_v59, %v9208_v0  ;;  %v16862_v62 = vld [vmem:[#allocation5 + $0x91] sm:$0xff]  ;;  %v16867_v53 = vadd.f32 %v16734_v52, %v7563_v16 }
 0x401   : > { %v9525_v55 = vadd.f32 %v9509_v60, %v9472_v57  ;;  %v16870_v37 = vadd.f32 %v16748_v9, %v7574_v8  ;;  %v9193_v43 = vmul.f32 %v16390_v35, %v16753_v26  ;;  %v9246_v23 = vmul.f32 %v16523_v5, %v16811_v17 }
 0x402   : > { %18115 = vst [vmem:[#allocation36_spill] sm:$0xff] %v16867_v53  ;;  %v9420_v44 = vadd.f32 %v9404_v6, %v9366_v48  ;;  %v9156_v38 = vadd.f32 %v9140_v46, %v9087_v13  ;;  %v16876_v60 = vpop.f32.mrf.mxu0  ;;  %v16878_v59 = vpop.f32.mrf.mxu1  ;;  %v9510_v52 = vmul.f32 %v16578_v21, %v16848_v51  ;;  %v9314_v0 = vadd.f32 %v9298_v39, %v9261_v61  ;;  %v16889_v48 = vld [vmem:[#allocation5 + $0x98] sm:$0xff] }
 0x403   : > { %18116 = vst [vmem:[#allocation15_spill] sm:$0xff] %v16870_v37  ;;  %v9553_v57 = vsel %vm334_vm0, %v9525_v55, 0.0  ;;  %v9405_v9 = vmul.f32 %v16531_v22, %v16852_v25  ;;  %v9458_v26 = vmul.f32 %v16536_v10, %v16862_v62  ;;  %v9511_v16 = vmul.f32 %v16578_v21, %v16864_v7  ;;  %v16895_v39 = vld [vmem:[#allocation5 + $0x99] sm:$0xff] }
 0x404   : > { %9554 = vadd.xlane.f32.xlu1 %v9553_v57  ;;  %v9473_v6 = vadd.f32 %v9457_v32, %v9420_v44  ;;  %v9209_v8 = vadd.f32 %v9193_v43, %v9156_v38  ;;  %v16891_v13 = vpop.f32.mrf.mxu0  ;;  %v16893_v46 = vpop.f32.mrf.mxu1  ;;  %v9367_v55 = vadd.f32 %v9351_v12, %v9314_v0  ;;  %v16897_v61 = vld [vmem:[#allocation5 + $0x9a] sm:$0xff]  ;;  %v18118_v57 = vld [vmem:[#allocation38_spill] sm:$0xff]  ;;  %v9088_v44 = vmul.f32 %v18106_v29, %v16780_v31 }
 0x405   : > { %18117 = vst [vmem:[#allocation31_spill] sm:$0xff] %v16893_v46  ;;  %v7566_v32 = vadd.f32 %v16798_v18, %v18118_v57  ;;  %v9141_v38 = vmul.f32 %v18108_v33, %v16782_v54  ;;  %v9299_v53 = vmul.f32 %v16558_v28, %v16817_v63  ;;  %v9194_v12 = vmul.f32 %v16390_v35, %v16784_v2 }
 0x406   : > { %v9526_v43 = vadd.f32 %v9510_v52, %v9473_v6  ;;  %v9262_v37 = vadd.f32 %v9246_v23, %v9209_v8  ;;  %v16909_v0 = vpop.f32.mrf.mxu0  ;;  %v16911_v56 = vpop.f32.mrf.mxu1  ;;  %v9421_v46 = vadd.f32 %v9405_v9, %v9367_v55  ;;  %v9352_v18 = vmul.f32 %v16616_v41, %v16848_v51 }
 0x407   : > { %18119 = vst [vmem:[#allocation10_spill] sm:$0xff] %v16911_v56  ;;  %v9406_v31 = vmul.f32 %v16531_v22, %v16889_v48  ;;  %v9157_v54 = vadd.f32 %v9141_v38, %v9088_v44  ;;  %v9459_v6 = vmul.f32 %v16536_v10, %v16895_v39  ;;  %v9512_v2 = vmul.f32 %v16578_v21, %v16897_v61  ;;  %v16933_v38 = vld [vmem:[#allocation5 + $0xa9] sm:$0xff] }
 0x408   : > { %v9556_v23 = vsel %vm334_vm0, %v9526_v43, 0.0  ;;  %v9315_v52 = vadd.f32 %v9299_v53, %v9262_v37  ;;  %v16922_v8 = vpop.f32.mrf.mxu0  ;;  %v16924_v57 = vpop.f32.mrf.mxu1  ;;  %v9474_v9 = vadd.f32 %v9458_v26, %v9421_v46  ;;  %v9247_v56 = vmul.f32 %v16523_v5, %v16852_v25  ;;  %v16931_v37 = vld [vmem:[#allocation5 + $0xa8] sm:$0xff] }
 0x409   : > { %18120 = vst [vmem:[#allocation35_spill] sm:$0xff] %v16924_v57  ;;  %9557 = vadd.xlane.f32.xlu0 %v9556_v23  ;;  %v9210_v55 = vadd.f32 %v9194_v12, %v9157_v54  ;;  %v16929_v44 = vadd.f32 %v16762_v50, %v7566_v32  ;;  %v18121_v43 = vld [vmem:[#allocation33_spill] sm:$0xff]  ;;  %v9089_v57 = vmul.f32 %v18106_v29, %v16811_v17 }
 0x40a   : > { %v9368_v53 = vadd.f32 %v9352_v18, %v9315_v52  ;;  %v7587_v3 = vadd.f32 %v16813_v36, %v18121_v43  ;;  %v9142_v26 = vmul.f32 %v18108_v33, %v16817_v63  ;;  %v16941_v46 = vpop.f32.mrf.mxu0  ;;  %v16943_v12 = vpop.f32.mrf.mxu1  ;;  %v9527_v50 = vadd.f32 %v9511_v16, %v9474_v9  ;;  %v16949_v23 = vld [vmem:[#allocation5 + $0xaa] sm:$0xff] }
 0x40b   : > { %18122 = vst [vmem:[#allocation27_spill] sm:$0xff] %v16943_v12  ;;  %v9263_v32 = vadd.f32 %v9247_v56, %v9210_v55  ;;  %v9300_v18 = vmul.f32 %v16558_v28, %v16862_v62  ;;  %v9353_v54 = vmul.f32 %v16616_v41, %v16864_v7  ;;  %v9195_v63 = vmul.f32 %v16390_v35, %v16848_v51 }
 0x40c   : > { %v9422_v36 = vadd.f32 %v9406_v31, %v9368_v53  ;;  %v16952_v17 = vadd.f32 %v16773_v24, %v7587_v3  ;;  %v9158_v52 = vadd.f32 %v9142_v26, %v9089_v57  ;;  %v16956_v43 = vpop.f32.mrf.mxu0  ;;  %v16958_v16 = vpop.f32.mrf.mxu1  ;;  %v9559_v56 = vsel %vm334_vm0, %v9527_v50, 0.0  ;;  %v16969_v53 = vld [vmem:[#allocation5 + $0xb0] sm:$0xff] }
 0x40d   : > { %18123 = vst [vmem:[#allocation21_spill] sm:$0xff] %v16958_v16  ;;  %v9316_v9 = vadd.f32 %v9300_v18, %v9263_v32  ;;  %v9407_v55 = vmul.f32 %v16531_v22, %v16931_v37  ;;  %v9460_v31 = vmul.f32 %v16536_v10, %v16933_v38  ;;  %9560 = vadd.xlane.f32.xlu1 %v9559_v56  ;;  %v16975_v18 = vld [vmem:[#allocation5 + $0xb1] sm:$0xff] }
 0x40e   : > { %v9475_v24 = vadd.f32 %v9459_v6, %v9422_v36  ;;  %v9513_v3 = vmul.f32 %v16578_v21, %v16949_v23  ;;  %v9211_v57 = vadd.f32 %v9195_v63, %v9158_v52  ;;  %v9248_v51 = vmul.f32 %v16523_v5, %v16889_v48  ;;  %v16971_v26 = vpop.f32.mrf.mxu0  ;;  %v16973_v50 = vpop.f32.mrf.mxu1 }
 0x40f   : > { %18124 = vst [vmem:[#allocation17_spill] sm:$0xff] %v16973_v50  ;;  %v9369_v32 = vadd.f32 %v9353_v54, %v9316_v9  ;;  %v9090_v56 = vmul.f32 %v18106_v29, %v16852_v25  ;;  %v9143_v6 = vmul.f32 %v18108_v33, %v16862_v62  ;;  %v9196_v36 = vmul.f32 %v16390_v35, %v16864_v7 }
 0x410   : > { %v9528_v52 = vadd.f32 %v9512_v2, %v9475_v24  ;;  %v9264_v63 = vadd.f32 %v9248_v51, %v9211_v57  ;;  %v9301_v16 = vmul.f32 %v16558_v28, %v16895_v39  ;;  %v9354_v50 = vmul.f32 %v16616_v41, %v16897_v61  ;;  %v16987_v54 = vpop.f32.mrf.mxu0  ;;  %v16989_v9 = vpop.f32.mrf.mxu1 }
 0x411   : > { %18125 = vst [vmem:[#allocation39_spill] sm:$0xff] %v16989_v9  ;;  %v9423_v12 = vadd.f32 %v9407_v55, %v9369_v32  ;;  %v9408_v29 = vmul.f32 %v16531_v22, %v16969_v53  ;;  %v9159_v33 = vadd.f32 %v9143_v6, %v9090_v56  ;;  %v9249_v35 = vmul.f32 %v16523_v5, %v16931_v37  ;;  %v18127_v32 = vld [vmem:[#allocation16_spill] sm:$0xff]  ;;  %v18128_v6 = vld [vmem:[#allocation18_spill] sm:$0xff]  ;;  %v17013_v9 = vld [vmem:[%s17909_s7] ss:$0 sm:$0xff] }
 0x412   : > { %v9562_v25 = vsel %vm334_vm0, %v9528_v52, 0.0  ;;  %v9317_v62 = vadd.f32 %v9301_v16, %v9264_v63  ;;  %v9461_v7 = vmul.f32 %v16536_v10, %v16975_v18  ;;  %v9302_v2 = vmul.f32 %v16558_v28, %v16933_v38  ;;  %v17000_v24 = vpop.f32.mrf.mxu0  ;;  %v17002_v57 = vpop.f32.mrf.mxu1 }
 0x413   : > { %18126 = vst [vmem:[#allocation12_spill] sm:$0xff] %v17002_v57  ;;  %9563 = vadd.xlane.f32.xlu0 %v9562_v25  ;;  %v9476_v55 = vadd.f32 %v9460_v31, %v9423_v12  ;;  %v9212_v51 = vadd.f32 %v9196_v36, %v9159_v33  ;;  %v7579_v56 = vadd.f32 %v16829_v14, %v18127_v32  ;;  %v17020_v12 = vld [vmem:[%s17909_s7 + $0x1] ss:$0 sm:$0xff]  ;;  %v17028_v36 = vld [vmem:[#allocation5 + $0xb2] sm:$0xff] }
 0x414   : > { %v7590_v52 = vadd.f32 %v16842_v1, %v18128_v6  ;;  %v9370_v16 = vadd.f32 %v9354_v50, %v9317_v62  ;;  %v9355_v63 = vmul.f32 %v16616_v41, %v16949_v23  ;;  %v9091_v25 = vmul.f32 %v17013_v9, %v16889_v48  ;;  %v17024_v1 = vpop.f32.mrf.mxu0  ;;  %v17026_v31 = vpop.f32.mrf.mxu1  ;;  %18129 = vst [vmem:[#allocation41_spill] sm:$0xff] %v17028_v36  ;;  %v17036_v6 = vld [vmem:[#allocation5 + $0xc0] sm:$0xff] }
 0x415   : > { %v9144_v14 = vmul.f32 %v17020_v12, %v16895_v39  ;;  %v9529_v50 = vadd.f32 %v9513_v3, %v9476_v55  ;;  %v9265_v33 = vadd.f32 %v9249_v35, %v9212_v51  ;;  %v17031_v62 = vadd.f32 %v16787_v20, %v7579_v56  ;;  %18130 = vst [vmem:[#allocation32_spill] sm:$0xff] %v17036_v6  ;;  %v17041_v39 = vld [vmem:[%s17909_s7 + $0x2] ss:$0 sm:$0xff] }
 0x416   : > { %v17034_v48 = vadd.f32 %v16800_v27, %v7590_v52  ;;  %v9424_v32 = vadd.f32 %v9408_v29, %v9370_v16  ;;  %v9197_v3 = vmul.f32 %v17041_v39, %v16897_v61  ;;  %v9250_v35 = vmul.f32 %v16523_v5, %v16969_v53  ;;  %v17047_v20 = vpop.f32.mrf.mxu0  ;;  %v17049_v55 = vpop.f32.mrf.mxu1  ;;  %v17054_v52 = vld [vmem:[#allocation5 + $0xc1] sm:$0xff] }
 0x417   : > { %v9160_v57 = vadd.f32 %v9144_v14, %v9091_v25  ;;  %18131 = vst [vmem:[#allocation24_spill] sm:$0xff] %v17049_v55  ;;  %v9565_v27 = vsel %vm334_vm0, %v9529_v50, 0.0  ;;  %v9318_v29 = vadd.f32 %v9302_v2, %v9265_v33  ;;  %v9514_v56 = vmul.f32 %v16578_v21, %v17028_v36  ;;  %v18132_v55 = vld [vmem:[#allocation13_spill] sm:$0xff] }
 0x418   : > { %9566 = vadd.xlane.f32.xlu1 %v9565_v27  ;;  %v9477_v51 = vadd.f32 %v9461_v7, %v9424_v32  ;;  %v17056_v25 = vpop.f32.mrf.mxu0  ;;  %v17058_v61 = vpop.f32.mrf.mxu1  ;;  %v9409_v14 = vmul.f32 %v16531_v22, %v17036_v6  ;;  %v7582_v50 = vadd.f32 %v16858_v45, %v18132_v55  ;;  %v17064_v33 = vld [vmem:[#allocation5 + $0xc2] sm:$0xff]  ;;  %v9303_v32 = vmul.f32 %v16558_v28, %v16975_v18 }
 0x419   : > { %v9213_v16 = vadd.f32 %v9197_v3, %v9160_v57  ;;  %v9371_v5 = vadd.f32 %v9355_v63, %v9318_v29  ;;  %18133 = vst [vmem:[#allocation20_spill] sm:$0xff] %v17064_v33  ;;  %v9462_v63 = vmul.f32 %v16536_v10, %v17054_v52  ;;  %v17074_v29 = vld [vmem:[#allocation5 + $0xc8] sm:$0xff] }
 0x41a   : > { %v9530_v2 = vadd.f32 %v9514_v56, %v9477_v51  ;;  %v17068_v27 = vpop.f32.mrf.mxu0  ;;  %v17070_v57 = vpop.f32.mrf.mxu1  ;;  %18134 = vst [vmem:[#allocation37_spill] sm:$0xff] %v17074_v29  ;;  %v17077_v6 = vadd.f32 %v16815_v19, %v7582_v50  ;;  %v9410_v19 = vmul.f32 %v16531_v22, %v17074_v29 }
 0x41b   : > { %v9266_v7 = vadd.f32 %v9250_v35, %v9213_v16  ;;  %v9425_v3 = vadd.f32 %v9409_v14, %v9371_v5  ;;  %v9356_v35 = vmul.f32 %v16616_v41, %v17028_v36  ;;  %v9515_v16 = vmul.f32 %v16578_v21, %v17064_v33  ;;  %v17088_v5 = vld [vmem:[#allocation5 + $0xc9] sm:$0xff] }
 0x41c   : > { %v9568_v45 = vsel %vm334_vm0, %v9530_v2, 0.0  ;;  %v17082_v28 = vpop.f32.mrf.mxu0  ;;  %v17084_v51 = vpop.f32.mrf.mxu1 }
 0x41d   : > { %v9319_v55 = vadd.f32 %v9303_v32, %v9266_v7  ;;  %9569 = vadd.xlane.f32.xlu0 %v9568_v45  ;;  %v9478_v56 = vadd.f32 %v9462_v63, %v9425_v3  ;;  %v17096_v32 = vld [vmem:[#allocation5 + $0xca] sm:$0xff]  ;;  %v9463_v3 = vmul.f32 %v16536_v10, %v17088_v5 }
 0x41e   : > { %v17092_v50 = vpop.f32.mrf.mxu0  ;;  %v17094_v2 = vpop.f32.mrf.mxu1  ;;  %v9516_v22 = vmul.f32 %v16578_v21, %v17096_v32 }
 0x41f   : > { %v9372_v14 = vadd.f32 %v9356_v35, %v9319_v55  ;;  %v9531_v7 = vadd.f32 %v9515_v16, %v9478_v56 }
 0x420   : > { %v7967_v63 = vpop.f32.mrf.mxu0  ;;  %v17100_v45 = vpop.f32.mrf.mxu1 }
 0x421   : > { %v9426_v36 = vadd.f32 %v9410_v19, %v9372_v14  ;;  %v9571_v41 = vsel %vm334_vm0, %v9531_v7, 0.0 }
 0x422   : > { %9572 = vadd.xlane.f32.xlu1 %v9571_v41  ;;  %v12680_v35 = vpop.f32.mrf.mxu0  ;;  %v17105_v29 = vpop.f32.mrf.mxu1 }
 0x423   : > { %v9479_v55 = vadd.f32 %v9463_v3, %v9426_v36  ;;  %18135 = vst [vmem:[#allocation28_spill] sm:$0xff] %v17105_v29 }
 0x424   : > { %v8318_v16 = vpop.f32.mrf.mxu0  ;;  %v17107_v33 = vpop.f32.mrf.mxu1 }
 0x425   : > { %v9532_v56 = vadd.f32 %v9516_v22, %v9479_v55  ;;  %18136 = vst [vmem:[#allocation26_spill] sm:$0xff] %v17107_v33 }
 0x426   : > { %v17110_v10 = vpop.f32.mrf.mxu0  ;;  %v17112_v19 = vpop.f32.mrf.mxu1 }
 0x427   : > { %v9574_v14 = vsel %vm334_vm0, %v9532_v56, 0.0  ;;  %18137 = vst [vmem:[#allocation23_spill] sm:$0xff] %v17112_v19 }
 0x428   : > { %9575 = vadd.xlane.f32.xlu0 %v9574_v14  ;;  %v17114_v7 = vpop.f32.mrf.mxu0  ;;  %v17116_v41 = vpop.f32.mrf.mxu1 }
 0x429   : > { %18138 = vst [vmem:[#allocation40_spill] sm:$0xff] %v17116_v41  ;;  %v7981_v41 = vadd.f32 %v16876_v60, %v16683_v34 }
 0x42a   : > { %v17118_v36 = vpop.f32.mrf.mxu0  ;;  %v17120_v21 = vpop.f32.mrf.mxu1 }
 0x42b   : > { %18139 = vst [vmem:[#allocation25_spill] sm:$0xff] %v17120_v21  ;;  %v7979_v21 = vadd.f32 %v16891_v13, %v16694_v40  ;;  %v8182_v40 = vadd.f32 %v16831_v47, %v7981_v41  ;;  %v7986_v13 = vadd.f32 %v16971_v26, %v16751_v30  ;;  %v9145_v47 = vmul.f32 %v17020_v12, %v16933_v38  ;;  %v18149_v41 = vld [vmem:[#allocation10_spill] sm:$0xff]  ;;  %v18151_v26 = vld [vmem:[#allocation36_spill] sm:$0xff] }
 0x42c   : > { %v17122_v3 = vpop.f32.mrf.mxu0  ;;  %v17124_v55 = vpop.f32.mrf.mxu1  ;;  %v18150_v30 = vld [vmem:[#allocation34_spill] sm:$0xff]  ;;  %v7993_v38 = vadd.f32 %v17068_v27, %v16952_v17 }
 0x42d   : > { %18140 = vst [vmem:[#allocation29_spill] sm:$0xff] %v17124_v55  ;;  %v7982_v55 = vadd.f32 %v16909_v0, %v16703_v49  ;;  %v8180_v49 = vadd.f32 %v16844_v15, %v7979_v21  ;;  %v18148_v15 = vld [vmem:[#allocation31_spill] sm:$0xff] }
 0x42e   : > { %v17126_v22 = vpop.f32.mrf.mxu0  ;;  %v17128_v56 = vpop.f32.mrf.mxu1 }
 0x42f   : > { %18141 = vst [vmem:[#allocation43_spill] sm:$0xff] %v17126_v22  ;;  %18142 = vst [vmem:[#allocation22_spill] sm:$0xff] %v17128_v56  ;;  %v7980_v56 = vadd.f32 %v16922_v8, %v16713_v58  ;;  %v8183_v58 = vadd.f32 %v16860_v42, %v7982_v55  ;;  %v18146_v8 = vld [vmem:[#allocation11_spill] sm:$0xff] }
 0x430   : > { %v17130_v33 = vpop.f32.mrf.mxu0  ;;  %v17132_v19 = vpop.f32.mrf.mxu1  ;;  %v18152_v55 = vld [vmem:[#allocation15_spill] sm:$0xff] }
 0x431   : > { %18143 = vst [vmem:[#allocation42_spill] sm:$0xff] %v17130_v33  ;;  %18144 = vst [vmem:[#allocation19_spill] sm:$0xff] %v17132_v19  ;;  %v7985_v19 = vadd.f32 %v16941_v46, %v16726_v4  ;;  %v8181_v0 = vadd.f32 %v16878_v59, %v7980_v56  ;;  %v7984_v4 = vadd.f32 %v16987_v54, %v18146_v8 }
 0x432   : > { %v17134_v14 = vpop.f32.mrf.mxu0  ;;  %v17136_v29 = vpop.f32.mrf.mxu1  ;;  %v7989_v59 = vadd.f32 %v17000_v24, %v18150_v30  ;;  %v7987_v54 = vadd.f32 %v17024_v1, %v18151_v26  ;;  %v7990_v56 = vadd.f32 %v17047_v20, %v18152_v55  ;;  %v18154_v24 = vld [vmem:[#allocation35_spill] sm:$0xff]  ;;  %v7991_v1 = vadd.f32 %v17082_v28, %v17031_v62  ;;  %v18156_v55 = vld [vmem:[#allocation21_spill] sm:$0xff] }
 0x433   : > { %18145 = vst [vmem:[#allocation30_spill] sm:$0xff] %v17136_v29  ;;  %v7983_v29 = vadd.f32 %v16956_v43, %v16739_v11  ;;  %v9092_v43 = vmul.f32 %v17013_v9, %v16931_v37  ;;  %v8186_v42 = vadd.f32 %v18148_v15, %v7985_v19  ;;  %v7988_v37 = vadd.f32 %v17056_v25, %v16929_v44  ;;  %v18157_v28 = vld [vmem:[#allocation17_spill] sm:$0xff] }
 0x434   : > { %v17146_v22 = vpop.f32.mrf.mxu0  ;;  %v17148_v33 = vpop.f32.mrf.mxu1  ;;  %v17195_v15 = vadd.f32 %v18154_v24, %v7986_v13  ;;  %v7994_v20 = vadd.f32 %v17092_v50, %v17034_v48  ;;  %v7992_v44 = vadd.f32 %v7967_v63, %v17077_v6  ;;  %v8383_v25 = vadd.f32 %v12680_v35, %v8182_v40  ;;  %v18155_v13 = vld [vmem:[#allocation27_spill] sm:$0xff]  ;;  %v18159_v35 = vld [vmem:[#allocation12_spill] sm:$0xff] }
 0x435   : > { %v17176_v21 = vadd.f32 %v18149_v41, %v7983_v29  ;;  %v9198_v29 = vmul.f32 %v17041_v39, %v16949_v23  ;;  %v9161_v41 = vadd.f32 %v9145_v47, %v9092_v43  ;;  %v9093_v30 = vmul.f32 %v17013_v9, %v16969_v53  ;;  %v18158_v50 = vld [vmem:[#allocation39_spill] sm:$0xff] }
 0x436   : > { %v17154_v34 = vpop.f32.mrf.mxu0  ;;  %v17156_v60 = vpop.f32.mrf.mxu1  ;;  %v9146_v23 = vmul.f32 %v17020_v12, %v16975_v18  ;;  %v8185_v26 = vadd.f32 %v18155_v13, %v7984_v4  ;;  %v17210_v62 = vadd.f32 %v18156_v55, %v7989_v59  ;;  %v17213_v48 = vadd.f32 %v18157_v28, %v7987_v54  ;;  %v18160_v4 = vld [vmem:[#allocation24_spill] sm:$0xff]  ;;  %v17244_v59 = vld [vmem:[%s17909_s7 + $0x1] ss:$0 sm:$0xff] }
 0x437   : > { %v8381_v6 = vadd.f32 %v8318_v16, %v8180_v49  ;;  %v17216_v63 = vadd.f32 %v18158_v50, %v7990_v56  ;;  %v17219_v40 = vadd.f32 %v18159_v35, %v7988_v37  ;;  %v17222_v53 = vadd.f32 %v17026_v31, %v7993_v38  ;;  %v17239_v31 = vld [vmem:[%s17909_s7] ss:$0 sm:$0xff]  ;;  %v13124_v37 = vld [vmem:[%s17909_s7 + $0x4] ss:$0 sm:$0xff] }
 0x438   : > { %v17166_v46 = vpop.f32.mrf.mxu0  ;;  %v17168_v11 = vpop.f32.mrf.mxu1  ;;  %v9214_v12 = vadd.f32 %v9198_v29, %v9161_v41  ;;  %v17227_v43 = vadd.f32 %v18160_v4, %v7991_v1  ;;  %v17230_v47 = vadd.f32 %v17058_v61, %v7994_v20  ;;  %v17233_v16 = vadd.f32 %v17070_v57, %v7992_v44  ;;  %18161 = vst [vmem:[#allocation16_spill] sm:$0xff] %v17239_v31  ;;  %v13123_v57 = vld [vmem:[%s17909_s7 + $0x3] ss:$0 sm:$0xff]  ;;  %v18163_v1 = vld [vmem:[#allocation20_spill] sm:$0xff] }
 0x439   : > { %18147 = vst [vmem:[#allocation38_spill] sm:$0xff] %v17168_v11  ;;  %v8384_v49 = vadd.f32 %v17110_v10, %v8183_v58  ;;  %v8585_v54 = vadd.f32 %v17084_v51, %v8383_v25  ;;  %v18162_v10 = vld [vmem:[#allocation32_spill] sm:$0xff]  ;;  %v9304_v38 = vmul.f32 %v13124_v37, %v17054_v52  ;;  %v9162_v29 = vadd.f32 %v9146_v23, %v9093_v30  ;;  %v18164_v20 = vld [vmem:[#allocation14_spill] sm:$0xff]  ;;  %v18165_v25 = vld [vmem:[#allocation41_spill] sm:$0xff] }
 0x43a   : > { %v17188_v8 = vpop.f32.mrf.mxu0  ;;  %v17190_v19 = vpop.f32.mrf.mxu1  ;;  %v9251_v58 = vmul.f32 %v13123_v57, %v18162_v10  ;;  %v8583_v24 = vadd.f32 %v17094_v2, %v8381_v6  ;;  %v8382_v51 = vadd.f32 %v17114_v7, %v8181_v0  ;;  %v9357_v44 = vmul.f32 %v18164_v20, %v18163_v1  ;;  %v17271_v2 = vld [vmem:[%s17909_s7 + $0x2] ss:$0 sm:$0xff] }
 0x43b   : > { %18153 = vst [vmem:[#allocation33_spill] sm:$0xff] %v17190_v19  ;;  %v9199_v41 = vmul.f32 %v17041_v39, %v18165_v25  ;;  %v8387_v13 = vadd.f32 %v17118_v36, %v8186_v42  ;;  %v9756_v35 = vmul.f32 %v17239_v31, %v18162_v10  ;;  %v9809_v30 = vmul.f32 %v17244_v59, %v17054_v52  ;;  %v18166_v39 = vld [vmem:[#allocation37_spill] sm:$0xff]  ;;  %v18168_v25 = vld [vmem:[#allocation26_spill] sm:$0xff] }
 0x43c   : > { %v17202_v17 = vpop.f32.mrf.mxu0  ;;  %v12776_v27 = vpop.f32.mrf.mxu1  ;;  %v9267_v50 = vadd.f32 %v9251_v58, %v9214_v12  ;;  %v8586_v7 = vadd.f32 %v17100_v45, %v8384_v49  ;;  %v9252_v23 = vmul.f32 %v13123_v57, %v18166_v39  ;;  %v9305_v36 = vmul.f32 %v13124_v37, %v17088_v5  ;;  %v17279_v42 = vld [vmem:[%s17908_s6] ss:$0 sm:$0xff] }
 0x43d   : > { %v9215_v52 = vadd.f32 %v9199_v41, %v9162_v29  ;;  %v17283_v4 = vmul.f32 %v18164_v20, %v17096_v32  ;;  %v9757_v45 = vmul.f32 %v17239_v31, %v18166_v39  ;;  %v9810_v49 = vmul.f32 %v17244_v59, %v17088_v5 }
 0x43e   : > { %v17224_v9 = vpop.f32.mrf.mxu0  ;;  %v8922_v18 = vpop.f32.mrf.mxu1  ;;  %v9862_v37 = vmul.f32 %v17271_v2, %v18163_v1  ;;  %v8385_v29 = vadd.f32 %v17122_v3, %v17176_v21  ;;  %v9320_v19 = vadd.f32 %v9304_v38, %v9267_v50  ;;  %v9825_v11 = vadd.f32 %v9809_v30, %v9756_v35  ;;  %v18170_v1 = vld [vmem:[#allocation42_spill] sm:$0xff]  ;;  %v18171_v30 = vld [vmem:[#allocation23_spill] sm:$0xff] }
 0x43f   : > { %v9826_v3 = vadd.f32 %v9810_v49, %v9757_v45  ;;  %v18173_v49 = vld [vmem:[#allocation25_spill] sm:$0xff] }
 0x440   : > { %v17247_v56 = vpop.f32.mrf.mxu0  ;;  %v12777_v61 = vpop.f32.mrf.mxu1 }
 0x442   : > { %v12744_v55 = vpop.f32.mrf.mxu0  ;;  %v8925_v28 = vpop.f32.mrf.mxu1 }
 0x443   : > { %v8786_v0 = vadd.f32 %v12744_v55, %v8585_v54  ;;  %v18167_v54 = vld [vmem:[#allocation28_spill] sm:$0xff]  ;;  %v8589_v55 = vadd.f32 %v18168_v25, %v8387_v13 }
 0x444   : > { %v8721_v6 = vpop.f32.mrf.mxu0  ;;  %v12780_v12 = vpop.f32.mrf.mxu1  ;;  %v8584_v57 = vadd.f32 %v18167_v54, %v8382_v51  ;;  %v9268_v54 = vadd.f32 %v9252_v23, %v9215_v52 }
 0x445   : > { %v8987_v10 = vadd.f32 %v12776_v27, %v8786_v0  ;;  %v8784_v58 = vadd.f32 %v8721_v6, %v8583_v24  ;;  %v9863_v27 = vmul.f32 %v17271_v2, %v17096_v32  ;;  %v18169_v24 = vld [vmem:[#allocation43_spill] sm:$0xff]  ;;  %v8386_v0 = vadd.f32 %v18170_v1, %v8185_v26 }
 0x446   : > { %v12745_v20 = vpop.f32.mrf.mxu0  ;;  %v8938_v41 = vpop.f32.mrf.mxu1  ;;  %v8388_v51 = vadd.f32 %v18169_v24, %v17195_v15  ;;  %v17307_v15 = vadd.f32 %v9862_v37, %v9825_v11 }
 0x447   : > { %v9010_v39 = vadd.f32 %v17279_v42, %v8987_v10  ;;  %v8985_v31 = vadd.f32 %v8922_v18, %v8784_v58  ;;  %v8787_v5 = vadd.f32 %v12745_v20, %v8586_v7  ;;  %v8587_v18 = vadd.f32 %v18171_v30, %v8385_v29  ;;  %v18174_v20 = vld [vmem:[#allocation29_spill] sm:$0xff] }
 0x448   : > { %v8724_v13 = vpop.f32.mrf.mxu0  ;;  %v12781_v6 = vpop.f32.mrf.mxu1  ;;  %v8391_v7 = vadd.f32 %v17134_v14, %v17210_v62  ;;  %v17305_v58 = vadd.f32 %v9357_v44, %v9320_v19  ;;  %v9321_v14 = vadd.f32 %v9305_v36, %v9268_v54  ;;  %v17313_v62 = vadd.f32 %v9863_v27, %v9826_v3  ;;  %v18175_v3 = vld [vmem:[#allocation22_spill] sm:$0xff] }
 0x449   : > { %v9026_v21 = vmax.f32 %v9010_v39, 0.0  ;;  %v9008_v38 = vadd.f32 %v17279_v42, %v8985_v31  ;;  %v8988_v50 = vadd.f32 %v12777_v61, %v8787_v5  ;;  %v8785_v35 = vadd.f32 %v8724_v13, %v8584_v57  ;;  %v18172_v61 = vld [vmem:[#allocation40_spill] sm:$0xff] }
 0x44a   : > { %v12748_v32 = vpop.f32.mrf.mxu0  ;;  %v8941_v10 = vpop.f32.mrf.mxu1  ;;  %v8590_v45 = vadd.f32 %v18172_v61, %v8388_v51  ;;  %v8588_v57 = vadd.f32 %v18173_v49, %v8386_v0  ;;  %v8593_v39 = vadd.f32 %v18174_v20, %v8391_v7  ;;  %v8390_v36 = vadd.f32 %v17166_v46, %v17219_v40 }
 0x44b   : > { %9043 = vst.msk [vmem:[#allocation5 + $0xf1] sm:$0xff] %vm334_vm0, %v9026_v21  ;;  %v9024_v26 = vmax.f32 %v9008_v38, 0.0  ;;  %v9011_v23 = vadd.f32 %v17279_v42, %v8988_v50  ;;  %v8986_v52 = vadd.f32 %v8925_v28, %v8785_v35  ;;  %v8790_v31 = vadd.f32 %v12748_v32, %v8589_v55  ;;  %v18178_v32 = vld [vmem:[#allocation38_spill] sm:$0xff] }
 0x44c   : > { %v8737_v25 = vpop.f32.mrf.mxu0  ;;  %v12784_v29 = vpop.f32.mrf.mxu1  ;;  %v8389_v28 = vadd.f32 %v17146_v22, %v17213_v48  ;;  %v8392_v55 = vadd.f32 %v17154_v34, %v17216_v63  ;;  %v8395_v0 = vadd.f32 %v17188_v8, %v17222_v53  ;;  %v8393_v22 = vadd.f32 %v17202_v17, %v17227_v43  ;;  %v18176_v53 = vld [vmem:[#allocation19_spill] sm:$0xff]  ;;  %v18177_v17 = vld [vmem:[#allocation30_spill] sm:$0xff] }
 0x44d   : > { %9041 = vst.msk [vmem:[#allocation5 + $0xd9] sm:$0xff] %vm334_vm0, %v9024_v26  ;;  %v9027_v11 = vmax.f32 %v9011_v23, 0.0  ;;  %v9009_v19 = vadd.f32 %v17279_v42, %v8986_v52  ;;  %v8991_v44 = vadd.f32 %v12780_v12, %v8790_v31  ;;  %v8788_v37 = vadd.f32 %v8737_v25, %v8587_v18  ;;  %v18179_v23 = vld [vmem:[#allocation33_spill] sm:$0xff] }
 0x44e   : > { %v12749_v5 = vpop.f32.mrf.mxu0  ;;  %v8954_v27 = vpop.f32.mrf.mxu1  ;;  %v8396_v34 = vadd.f32 %v17224_v9, %v17230_v47  ;;  %v8394_v46 = vadd.f32 %v17247_v56, %v17233_v16  ;;  %v8591_v8 = vadd.f32 %v18175_v3, %v8389_v28  ;;  %v8594_v21 = vadd.f32 %v18176_v53, %v8392_v55  ;;  %v17345_v47 = vld [vmem:[%s17909_s7 + $0x6] ss:$0 sm:$0xff]  ;;  %v13127_v53 = vld [vmem:[%s17909_s7 + $0x8] ss:$0 sm:$0xff] }
 0x44f   : > { %9044 = vst.msk [vmem:[#allocation5 + $0xf9] sm:$0xff] %vm334_vm0, %v9027_v11  ;;  %v9025_v24 = vmax.f32 %v9009_v19, 0.0  ;;  %v9014_v51 = vadd.f32 %v17279_v42, %v8991_v44  ;;  %v8989_v12 = vadd.f32 %v8938_v41, %v8788_v37  ;;  %v8791_v1 = vadd.f32 %v12749_v5, %v8590_v45  ;;  %v13125_v19 = vld [vmem:[%s17909_s7 + $0x6] ss:$0 sm:$0xff]  ;;  %v17396_v5 = vld [vmem:[%s17909_s7 + $0x4] ss:$0 sm:$0xff] }
 0x450   : > { %v8740_v48 = vpop.f32.mrf.mxu0  ;;  %v12785_v63 = vpop.f32.mrf.mxu1  ;;  %v8592_v43 = vadd.f32 %v18177_v17, %v8390_v36  ;;  %v17340_v9 = vadd.f32 %v17283_v4, %v9321_v14  ;;  %v17356_v4 = vld [vmem:[%s17909_s7 + $0x7] ss:$0 sm:$0xff]  ;;  %v8597_v18 = vadd.f32 %v17148_v33, %v8395_v0  ;;  %v8595_v7 = vadd.f32 %v17156_v60, %v8393_v22  ;;  %v17375_v60 = vld [vmem:[%s17909_s7 + $0x3] ss:$0 sm:$0xff] }
 0x451   : > { %9042 = vst.msk [vmem:[#allocation5 + $0xe1] sm:$0xff] %vm334_vm0, %v9025_v24  ;;  %v9030_v40 = vmax.f32 %v9014_v51, 0.0  ;;  %v9012_v41 = vadd.f32 %v17279_v42, %v8989_v12  ;;  %v8992_v13 = vadd.f32 %v12781_v6, %v8791_v1  ;;  %v8789_v54 = vadd.f32 %v8740_v48, %v8588_v57  ;;  %v13126_v12 = vld [vmem:[%s17909_s7 + $0x7] ss:$0 sm:$0xff] }
 0x452   : > { %v12752_v38 = vpop.f32.mrf.mxu0  ;;  %v17349_v35 = vld [vmem:[#allocation5 + $0xf0] sm:$0xff]  ;;  %v17361_v26 = vadd.f32 %v18178_v32, %v8396_v34  ;;  %v17364_v52 = vadd.f32 %v18179_v23, %v8394_v46  ;;  %v8957_v31 = vpop.f32.mrf.mxu1 }
 0x453   : > { %9047 = vst.msk [vmem:[#allocation5 + $0x121] sm:$0xff] %vm334_vm0, %v9030_v40  ;;  %v9028_v16 = vmax.f32 %v9012_v41, 0.0  ;;  %v9015_v56 = vadd.f32 %v17279_v42, %v8992_v13  ;;  %v8990_v6 = vadd.f32 %v8941_v10, %v8789_v54  ;;  %v8794_v50 = vadd.f32 %v12752_v38, %v8593_v39  ;;  %v17351_v30 = vld [vmem:[#allocation5 + $0xf1] sm:$0xff] }
 0x454   : > { %v8753_v10 = vpop.f32.mrf.mxu0  ;;  %v17366_v61 = vld [vmem:[#allocation5 + $0xd8] sm:$0xff]  ;;  %v12788_v11 = vpop.f32.mrf.mxu1  ;;  %v17389_v20 = vmul.f32 %v17356_v4, %v17351_v30 }
 0x455   : > { %9045 = vst.msk [vmem:[#allocation5 + $0x109] sm:$0xff] %vm334_vm0, %v9028_v16  ;;  %v9031_v45 = vmax.f32 %v9015_v56, 0.0  ;;  %v9013_v49 = vadd.f32 %v17279_v42, %v8990_v6  ;;  %v8995_v57 = vadd.f32 %v12784_v29, %v8794_v50  ;;  %v8792_v25 = vadd.f32 %v8753_v10, %v8591_v8  ;;  %v17370_v33 = vld [vmem:[#allocation5 + $0xd9] sm:$0xff] }
 0x456   : > { %v12753_v14 = vpop.f32.mrf.mxu0  ;;  %v9411_v44 = vmul.f32 %v13125_v19, %v17366_v61  ;;  %v9915_v37 = vmul.f32 %v17375_v60, %v17366_v61  ;;  %v17385_v29 = vmul.f32 %v17345_v47, %v17349_v35  ;;  %v9464_v1 = vmul.f32 %v13126_v12, %v17370_v33  ;;  %v8970_v3 = vpop.f32.mrf.mxu1 }
 0x457   : > { %9048 = vst.msk [vmem:[#allocation5 + $0x129] sm:$0xff] %vm334_vm0, %v9031_v45  ;;  %v9029_v39 = vmax.f32 %v9013_v49, 0.0  ;;  %v9018_v28 = vadd.f32 %v17279_v42, %v8995_v57  ;;  %v8993_v55 = vadd.f32 %v8954_v27, %v8792_v25  ;;  %v8795_v36 = vadd.f32 %v12753_v14, %v8594_v21  ;;  %v17431_v25 = vld [vmem:[%s17909_s7 + $0x5] ss:$0 sm:$0xff] }
 0x458   : > { %v8756_v24 = vpop.f32.mrf.mxu0  ;;  %v9427_v51 = vadd.f32 %v9411_v44, %v17305_v58  ;;  %v17403_v0 = vld [vmem:[#allocation5 + $0xda] sm:$0xff]  ;;  %v9931_v34 = vadd.f32 %v9915_v37, %v17307_v15  ;;  %v9968_v46 = vmul.f32 %v17396_v5, %v17370_v33  ;;  %v17414_v13 = vld [vmem:[#allocation5 + $0xe2] sm:$0xff] }
 0x459   : > { %v17405_v22 = vld [vmem:[#allocation5 + $0xe0] sm:$0xff]  ;;  %9046 = vst.msk [vmem:[#allocation5 + $0x111] sm:$0xff] %vm334_vm0, %v9029_v39  ;;  %v9034_v58 = vmax.f32 %v9018_v28, 0.0  ;;  %v9016_v48 = vadd.f32 %v17279_v42, %v8993_v55  ;;  %v8996_v40 = vadd.f32 %v12785_v63, %v8795_v36  ;;  %v8793_v41 = vadd.f32 %v8756_v24, %v8592_v43  ;;  %v17441_v24 = vld [vmem:[#allocation5 + $0xf2] sm:$0xff] }
 0x45a   : > { %v17407_v27 = vld [vmem:[#allocation5 + $0xe1] sm:$0xff]  ;;  %v12756_v54 = vpop.f32.mrf.mxu0  ;;  %v9480_v8 = vadd.f32 %v9464_v1, %v9427_v51  ;;  %v9517_v15 = vmul.f32 %v13127_v53, %v17403_v0  ;;  %v9412_v21 = vmul.f32 %v13125_v19, %v17405_v22  ;;  %v9518_v32 = vmul.f32 %v13127_v53, %v17414_v13  ;;  %v17446_v51 = vld [vmem:[%s17909_s7 + $0x8] ss:$0 sm:$0xff] }
 0x45b   : > { %v9465_v17 = vmul.f32 %v13126_v12, %v17407_v27  ;;  %9051 = vst.msk [vmem:[#allocation5 + $0x151] sm:$0xff] %vm334_vm0, %v9034_v58  ;;  %v9032_v38 = vmax.f32 %v9016_v48, 0.0  ;;  %v9019_v63 = vadd.f32 %v17279_v42, %v8996_v40  ;;  %v8994_v43 = vadd.f32 %v8957_v31, %v8793_v41  ;;  %v17454_v48 = vld [vmem:[#allocation5 + $0xf8] sm:$0xff] }
 0x45c   : > { %v8798_v16 = vadd.f32 %v12756_v54, %v8597_v18  ;;  %v8769_v56 = vpop.f32.mrf.mxu0  ;;  %v9533_v6 = vadd.f32 %v9517_v15, %v9480_v8  ;;  %v9428_v50 = vadd.f32 %v9412_v21, %v17340_v9  ;;  %v9984_v23 = vadd.f32 %v9968_v46, %v9931_v34  ;;  %v12789_v18 = vpop.f32.mrf.mxu1  ;;  %v10108_v21 = vld [vmem:[#allocation5 + $0xf9] sm:$0xff] }
 0x45d   : > { %9049 = vst.msk [vmem:[#allocation5 + $0x139] sm:$0xff] %vm334_vm0, %v9032_v38  ;;  %v9035_v10 = vmax.f32 %v9019_v63, 0.0  ;;  %v9017_v45 = vadd.f32 %v17279_v42, %v8994_v43  ;;  %v8796_v57 = vadd.f32 %v8769_v56, %v8595_v7  ;;  %v10021_v19 = vmul.f32 %v17431_v25, %v17403_v0  ;;  %v17467_v63 = vld [vmem:[#allocation5 + $0xfa] sm:$0xff] }
 0x45e   : > { %v8999_v49 = vadd.f32 %v12788_v11, %v8798_v16  ;;  %v9577_v31 = vsel %vm334_vm0, %v9533_v6, 0.0  ;;  %v12757_v14 = vpop.f32.mrf.mxu0  ;;  %v9481_v9 = vadd.f32 %v9465_v17, %v9428_v50  ;;  %v9916_v44 = vmul.f32 %v17375_v60, %v17405_v22  ;;  %v8973_v40 = vpop.f32.mrf.mxu1  ;;  %v18180_v43 = vld [vmem:[#allocation16_spill] sm:$0xff] }
 0x45f   : > { %9052 = vst.msk [vmem:[#allocation5 + $0x159] sm:$0xff] %vm334_vm0, %v9035_v10  ;;  %v9033_v11 = vmax.f32 %v9017_v45, 0.0  ;;  %v8997_v37 = vadd.f32 %v8970_v3, %v8796_v57  ;;  %9578 = vadd.xlane.f32.xlu1 %v9577_v31  ;;  %v8799_v39 = vadd.f32 %v12757_v14, %v17361_v26  ;;  %v10037_v36 = vadd.f32 %v10021_v19, %v9984_v23  ;;  %v10056_v57 = vld [vmem:[#allocation5 + $0x108] sm:$0xff] }
 0x460   : > { %v9022_v7 = vadd.f32 %v17279_v42, %v8999_v49  ;;  %v8772_v28 = vpop.f32.mrf.mxu0  ;;  %v9534_v55 = vadd.f32 %v9518_v32, %v9481_v9  ;;  %v9932_v12 = vadd.f32 %v9916_v44, %v17313_v62  ;;  %v9969_v1 = vmul.f32 %v17396_v5, %v17407_v27  ;;  %v10109_v31 = vld [vmem:[#allocation5 + $0x109] sm:$0xff] }
 0x461   : > { %9050 = vst.msk [vmem:[#allocation5 + $0x141] sm:$0xff] %vm334_vm0, %v9033_v11  ;;  %v9020_v26 = vadd.f32 %v17279_v42, %v8997_v37  ;;  %v9000_v46 = vadd.f32 %v12789_v18, %v8799_v39  ;;  %v8797_v58 = vadd.f32 %v8772_v28, %v17364_v52  ;;  %v10091_v54 = vadd.f32 %v17385_v29, %v10037_v36  ;;  %v17499_v36 = vld [vmem:[#allocation5 + $0x110] sm:$0xff] }
 0x462   : > { %v9038_v34 = vmax.f32 %v9022_v7, 0.0  ;;  %v9580_v41 = vsel %vm334_vm0, %v9534_v55, 0.0  ;;  %v9985_v3 = vadd.f32 %v9969_v1, %v9932_v12  ;;  %v10022_v62 = vmul.f32 %v17431_v25, %v17414_v13 }
 0x463   : > { %v9036_v8 = vmax.f32 %v9020_v26, 0.0  ;;  %v9023_v53 = vadd.f32 %v17279_v42, %v9000_v46  ;;  %v8998_v15 = vadd.f32 %v8973_v40, %v8797_v58  ;;  %9581 = vadd.xlane.f32.xlu0 %v9580_v41  ;;  %v10181_v52 = vmul.f32 %v17446_v51, %v17441_v24  ;;  %v17504_v26 = vld [vmem:[#allocation5 + $0x111] sm:$0xff] }
 0x464   : > { %9055 = vst.msk [vmem:[#allocation5 + $0x181] sm:$0xff] %vm334_vm0, %v9038_v34  ;;  %v10144_v17 = vadd.f32 %v17389_v20, %v10091_v54  ;;  %v10038_v38 = vadd.f32 %v10022_v62, %v9985_v3  ;;  %v10076_v29 = vmul.f32 %v17345_v47, %v17454_v48  ;;  %v9758_v16 = vmul.f32 %v18180_v43, %v17366_v61  ;;  %v17514_v54 = vld [vmem:[#allocation5 + $0x112] sm:$0xff] }
 0x465   : > { %9053 = vst.msk [vmem:[#allocation5 + $0x169] sm:$0xff] %vm334_vm0, %v9036_v8  ;;  %v9039_v56 = vmax.f32 %v9023_v53, 0.0  ;;  %v9021_v6 = vadd.f32 %v17279_v42, %v8998_v15  ;;  %v9811_v50 = vmul.f32 %v17244_v59, %v17370_v33  ;;  %v9864_v20 = vmul.f32 %v17271_v2, %v17403_v0  ;;  %v17521_v15 = vld [vmem:[#allocation5 + $0x120] sm:$0xff] }
 0x466   : > { %v10197_v32 = vadd.f32 %v10181_v52, %v10144_v17  ;;  %v10092_v23 = vadd.f32 %v10076_v29, %v10038_v38  ;;  %v10129_v10 = vmul.f32 %v17356_v4, %v10108_v21  ;;  %v10182_v61 = vmul.f32 %v17446_v51, %v17467_v63 }
 0x467   : > { %9056 = vst.msk [vmem:[#allocation5 + $0x189] sm:$0xff] %vm334_vm0, %v9039_v56  ;;  %v9037_v45 = vmax.f32 %v9021_v6, 0.0  ;;  %v9827_v49 = vadd.f32 %v9811_v50, %v9758_v16  ;;  %v9759_v33 = vmul.f32 %v18180_v43, %v17405_v22  ;;  %v9812_v0 = vmul.f32 %v17244_v59, %v17407_v27  ;;  %v10162_v22 = vld [vmem:[#allocation5 + $0x10a] sm:$0xff]  ;;  %v17529_v6 = vld [vmem:[#allocation5 + $0x121] sm:$0xff] }
 0x468   : > { %v10213_v42 = vsel %vm334_vm0, %v10197_v32, 0.0  ;;  %v10145_v18 = vadd.f32 %v10129_v10, %v10092_v23  ;;  %v9917_v9 = vmul.f32 %v17375_v60, %v17349_v35  ;;  %v9970_v19 = vmul.f32 %v17396_v5, %v17351_v30 }
 0x469   : > { %9054 = vst.msk [vmem:[#allocation5 + $0x171] sm:$0xff] %vm334_vm0, %v9037_v45  ;;  %10214 = vadd.xlane.f32.xlu0 %v10213_v42  ;;  %v9880_v14 = vadd.f32 %v9864_v20, %v9827_v49  ;;  %v10023_v44 = vmul.f32 %v17431_v25, %v17441_v24  ;;  %v10077_v7 = vmul.f32 %v17345_v47, %v10056_v57 }
 0x46a   : > { %v10198_v11 = vadd.f32 %v10182_v61, %v10145_v18  ;;  %v9828_v37 = vadd.f32 %v9812_v0, %v9759_v33  ;;  %v9865_v27 = vmul.f32 %v17271_v2, %v17414_v13  ;;  %v10130_v28 = vmul.f32 %v17356_v4, %v10109_v31  ;;  %v10164_v61 = vld [vmem:[#allocation5 + $0x122] sm:$0xff] }
 0x46b   : > { %v9933_v39 = vadd.f32 %v9917_v9, %v9880_v14  ;;  %v9918_v55 = vmul.f32 %v17375_v60, %v17454_v48  ;;  %v9760_v12 = vmul.f32 %v18180_v43, %v17349_v35  ;;  %v9813_v46 = vmul.f32 %v17244_v59, %v17351_v30  ;;  %v17541_v14 = vld [vmem:[#allocation5 + $0x128] sm:$0xff] }
 0x46c   : > { %v10216_v1 = vsel %vm334_vm0, %v10198_v11, 0.0  ;;  %v9881_v34 = vadd.f32 %v9865_v27, %v9828_v37  ;;  %v9866_v13 = vmul.f32 %v17271_v2, %v17441_v24  ;;  %v10183_v40 = vmul.f32 %v17446_v51, %v10162_v22  ;;  %v17543_v9 = vld [vmem:[#allocation5 + $0x129] sm:$0xff] }
 0x46d   : > { %10217 = vadd.xlane.f32.xlu1 %v10216_v1  ;;  %v9986_v58 = vadd.f32 %v9970_v19, %v9933_v39  ;;  %v9971_v41 = vmul.f32 %v17396_v5, %v10108_v21  ;;  %v10024_v35 = vmul.f32 %v17431_v25, %v17467_v63  ;;  %v10078_v62 = vmul.f32 %v17345_v47, %v17499_v36 }
 0x46e   : > { %v9934_v3 = vadd.f32 %v9918_v55, %v9881_v34  ;;  %v9829_v8 = vadd.f32 %v9813_v46, %v9760_v12  ;;  %v9919_v30 = vmul.f32 %v17375_v60, %v10056_v57  ;;  %v10131_v24 = vmul.f32 %v17356_v4, %v17504_v26  ;;  %v17552_v55 = vld [vmem:[#allocation5 + $0x12a] sm:$0xff] }
 0x46f   : > { %v10039_v53 = vadd.f32 %v10023_v44, %v9986_v58  ;;  %v9761_v52 = vmul.f32 %v18180_v43, %v17454_v48  ;;  %v9814_v17 = vmul.f32 %v17244_v59, %v10108_v21  ;;  %v10184_v29 = vmul.f32 %v17446_v51, %v17514_v54 }
 0x470   : > { %v9987_v38 = vadd.f32 %v9971_v41, %v9934_v3  ;;  %v9882_v16 = vadd.f32 %v9866_v13, %v9829_v8  ;;  %v9972_v56 = vmul.f32 %v17396_v5, %v10109_v31  ;;  %v9867_v32 = vmul.f32 %v17271_v2, %v17467_v63  ;;  %v17563_v3 = vld [vmem:[#allocation5 + $0x138] sm:$0xff] }
 0x471   : > { %v10093_v50 = vadd.f32 %v10077_v7, %v10039_v53  ;;  %v9830_v20 = vadd.f32 %v9814_v17, %v9761_v52  ;;  %v9920_v23 = vmul.f32 %v17375_v60, %v17499_v36  ;;  %v10025_v21 = vmul.f32 %v17431_v25, %v10162_v22 }
 0x472   : > { %v10040_v48 = vadd.f32 %v10024_v35, %v9987_v38  ;;  %v9935_v10 = vadd.f32 %v9919_v30, %v9882_v16  ;;  %v10079_v45 = vmul.f32 %v17345_v47, %v17521_v15  ;;  %v10132_v42 = vmul.f32 %v17356_v4, %v17529_v6 }
 0x473   : > { %v10146_v49 = vadd.f32 %v10130_v28, %v10093_v50  ;;  %v9883_v18 = vadd.f32 %v9867_v32, %v9830_v20  ;;  %v9762_v33 = vmul.f32 %v18180_v43, %v10056_v57  ;;  %v9815_v19 = vmul.f32 %v17244_v59, %v10109_v31  ;;  %v10166_v32 = vld [vmem:[#allocation5 + $0x13a] sm:$0xff] }
 0x474   : > { %v10094_v0 = vadd.f32 %v10078_v62, %v10040_v48  ;;  %v9988_v63 = vadd.f32 %v9972_v56, %v9935_v10  ;;  %v9868_v44 = vmul.f32 %v17271_v2, %v10162_v22  ;;  %v10185_v7 = vmul.f32 %v17446_v51, %v10164_v61  ;;  %v17565_v62 = vld [vmem:[#allocation5 + $0x139] sm:$0xff] }
 0x475   : > { %v10199_v11 = vadd.f32 %v10183_v40, %v10146_v49  ;;  %v9936_v37 = vadd.f32 %v9920_v23, %v9883_v18  ;;  %v9973_v27 = vmul.f32 %v17396_v5, %v17504_v26  ;;  %v10026_v57 = vmul.f32 %v17431_v25, %v17514_v54  ;;  %v10061_v49 = vld [vmem:[#allocation5 + $0x140] sm:$0xff] }
 0x476   : > { %v10147_v39 = vadd.f32 %v10131_v24, %v10094_v0  ;;  %v10041_v28 = vadd.f32 %v10025_v21, %v9988_v63  ;;  %v9831_v12 = vadd.f32 %v9815_v19, %v9762_v33  ;;  %v10080_v22 = vmul.f32 %v17345_v47, %v17541_v14 }
 0x477   : > { %v10219_v1 = vsel %vm334_vm0, %v10199_v11, 0.0  ;;  %v9989_v31 = vadd.f32 %v9973_v27, %v9936_v37  ;;  %v10133_v34 = vmul.f32 %v17356_v4, %v17543_v9  ;;  %v9921_v40 = vmul.f32 %v17375_v60, %v17521_v15 }
 0x478   : > { %10220 = vadd.xlane.f32.xlu0 %v10219_v1  ;;  %v10200_v46 = vadd.f32 %v10184_v29, %v10147_v39  ;;  %v10095_v13 = vadd.f32 %v10079_v45, %v10041_v28  ;;  %v9884_v58 = vadd.f32 %v9868_v44, %v9831_v12  ;;  %v10186_v35 = vmul.f32 %v17446_v51, %v17552_v55  ;;  %v17602_v1 = vld [vmem:[#allocation5 + $0x150] sm:$0xff] }
 0x479   : > { %v10042_v41 = vadd.f32 %v10026_v57, %v9989_v31  ;;  %v9763_v8 = vmul.f32 %v18180_v43, %v17499_v36  ;;  %v9816_v30 = vmul.f32 %v17244_v59, %v17504_v26  ;;  %v9974_v17 = vmul.f32 %v17396_v5, %v17529_v6  ;;  %v10167_v57 = vld [vmem:[#allocation5 + $0x142] sm:$0xff]  ;;  %v17604_v31 = vld [vmem:[#allocation5 + $0x151] sm:$0xff] }
 0x47a   : > { %v10222_v53 = vsel %vm334_vm0, %v10200_v46, 0.0  ;;  %v10148_v24 = vadd.f32 %v10132_v42, %v10095_v13  ;;  %v9937_v52 = vadd.f32 %v9921_v40, %v9884_v58  ;;  %v10027_v29 = vmul.f32 %v17431_v25, %v10164_v61  ;;  %v17586_v42 = vld [vmem:[#allocation5 + $0x141] sm:$0xff] }
 0x47b   : > { %10223 = vadd.xlane.f32.xlu1 %v10222_v53  ;;  %v10096_v38 = vadd.f32 %v10080_v22, %v10042_v41  ;;  %v9832_v16 = vadd.f32 %v9816_v30, %v9763_v8  ;;  %v9869_v56 = vmul.f32 %v17271_v2, %v17514_v54  ;;  %v10081_v26 = vmul.f32 %v17345_v47, %v17563_v3  ;;  %v17615_v8 = vld [vmem:[#allocation5 + $0x152] sm:$0xff] }
 0x47c   : > { %v10201_v50 = vadd.f32 %v10185_v7, %v10148_v24  ;;  %v9990_v36 = vadd.f32 %v9974_v17, %v9937_v52  ;;  %v10134_v20 = vmul.f32 %v17356_v4, %v17565_v62  ;;  %v9922_v10 = vmul.f32 %v17375_v60, %v17541_v14 }
 0x47d   : > { %v10149_v23 = vadd.f32 %v10133_v34, %v10096_v38  ;;  %v9885_v48 = vadd.f32 %v9869_v56, %v9832_v16  ;;  %v9764_v21 = vmul.f32 %v18180_v43, %v17521_v15  ;;  %v9817_v18 = vmul.f32 %v17244_v59, %v17529_v6  ;;  %v10116_v16 = vld [vmem:[#allocation5 + $0x159] sm:$0xff] }
 0x47e   : > { %v10225_v45 = vsel %vm334_vm0, %v10201_v50, 0.0  ;;  %v10043_v54 = vadd.f32 %v10027_v29, %v9990_v36  ;;  %v9870_v33 = vmul.f32 %v17271_v2, %v10164_v61  ;;  %v10187_v63 = vmul.f32 %v17446_v51, %v10166_v32  ;;  %v10063_v29 = vld [vmem:[#allocation5 + $0x158] sm:$0xff] }
 0x47f   : > { %10226 = vadd.xlane.f32.xlu0 %v10225_v45  ;;  %v10202_v0 = vadd.f32 %v10186_v35, %v10149_v23  ;;  %v9938_v19 = vadd.f32 %v9922_v10, %v9885_v48  ;;  %v9975_v44 = vmul.f32 %v17396_v5, %v17543_v9  ;;  %v10028_v11 = vmul.f32 %v17431_v25, %v17552_v55 }
 0x480   : > { %v10097_v15 = vadd.f32 %v10081_v26, %v10043_v54  ;;  %v9833_v7 = vadd.f32 %v9817_v18, %v9764_v21  ;;  %v9923_v37 = vmul.f32 %v17375_v60, %v17563_v3  ;;  %v10082_v61 = vmul.f32 %v17345_v47, %v10061_v49  ;;  %v10169_v26 = vld [vmem:[#allocation5 + $0x15a] sm:$0xff] }
 0x481   : > { %v10228_v6 = vsel %vm334_vm0, %v10202_v0, 0.0  ;;  %v9991_v27 = vadd.f32 %v9975_v44, %v9938_v19  ;;  %v10135_v39 = vmul.f32 %v17356_v4, %v17586_v42  ;;  %v9765_v22 = vmul.f32 %v18180_v43, %v17541_v14 }
 0x482   : > { %10229 = vadd.xlane.f32.xlu1 %v10228_v6  ;;  %v10150_v28 = vadd.f32 %v10134_v20, %v10097_v15  ;;  %v9886_v12 = vadd.f32 %v9870_v33, %v9833_v7  ;;  %v9818_v34 = vmul.f32 %v17244_v59, %v17543_v9  ;;  %v9976_v13 = vmul.f32 %v17396_v5, %v17565_v62  ;;  %v17643_v7 = vld [vmem:[#allocation5 + $0x169] sm:$0xff] }
 0x483   : > { %v10044_v46 = vadd.f32 %v10028_v11, %v9991_v27  ;;  %v10029_v58 = vmul.f32 %v17431_v25, %v10166_v32  ;;  %v9871_v40 = vmul.f32 %v17271_v2, %v17552_v55  ;;  %v9924_v53 = vmul.f32 %v17375_v60, %v10061_v49 }
 0x484   : > { %v10203_v41 = vadd.f32 %v10187_v63, %v10150_v28  ;;  %v9939_v35 = vadd.f32 %v9923_v37, %v9886_v12  ;;  %v9834_v30 = vadd.f32 %v9818_v34, %v9765_v22  ;;  %v10188_v24 = vmul.f32 %v17446_v51, %v10167_v57 }
 0x485   : > { %v10098_v14 = vadd.f32 %v10082_v61, %v10044_v46  ;;  %v10083_v9 = vmul.f32 %v17345_v47, %v17602_v1  ;;  %v10136_v52 = vmul.f32 %v17356_v4, %v17604_v31  ;;  %v9766_v56 = vmul.f32 %v18180_v43, %v17563_v3 }
 0x486   : > { %v10231_v17 = vsel %vm334_vm0, %v10203_v41, 0.0  ;;  %v9992_v38 = vadd.f32 %v9976_v13, %v9939_v35  ;;  %v9887_v55 = vadd.f32 %v9871_v40, %v9834_v30  ;;  %v10189_v36 = vmul.f32 %v17446_v51, %v17615_v8  ;;  %v17657_v41 = vld [vmem:[#allocation5 + $0x16a] sm:$0xff] }
 0x487   : > { %10232 = vadd.xlane.f32.xlu0 %v10231_v17  ;;  %v10151_v50 = vadd.f32 %v10135_v39, %v10098_v14  ;;  %v9819_v20 = vmul.f32 %v17244_v59, %v17565_v62  ;;  %v9872_v23 = vmul.f32 %v17271_v2, %v10166_v32  ;;  %v9977_v21 = vmul.f32 %v17396_v5, %v17586_v42  ;;  %v17637_v62 = vld [vmem:[#allocation5 + $0x168] sm:$0xff] }
 0x488   : > { %v10045_v48 = vadd.f32 %v10029_v58, %v9992_v38  ;;  %v9940_v10 = vadd.f32 %v9924_v53, %v9887_v55  ;;  %v10030_v45 = vmul.f32 %v17431_v25, %v10167_v57  ;;  %v10084_v3 = vmul.f32 %v17345_v47, %v10063_v29  ;;  %v10065_v58 = vld [vmem:[#allocation5 + $0x170] sm:$0xff] }
 0x489   : > { %v10204_v54 = vadd.f32 %v10188_v24, %v10151_v50  ;;  %v10137_v18 = vmul.f32 %v17356_v4, %v10116_v16  ;;  %v9835_v33 = vadd.f32 %v9819_v20, %v9766_v56  ;;  %v10190_v19 = vmul.f32 %v17446_v51, %v10169_v26 }
 0x48a   : > { %v10099_v0 = vadd.f32 %v10083_v9, %v10045_v48  ;;  %v9993_v63 = vadd.f32 %v9977_v21, %v9940_v10  ;;  %v9767_v32 = vmul.f32 %v18180_v43, %v10061_v49  ;;  %v9925_v11 = vmul.f32 %v17375_v60, %v17602_v1  ;;  %v10118_v9 = vld [vmem:[#allocation5 + $0x171] sm:$0xff] }
 0x48b   : > { %v10234_v44 = vsel %vm334_vm0, %v10204_v54, 0.0  ;;  %v9888_v15 = vadd.f32 %v9872_v23, %v9835_v33  ;;  %v9820_v37 = vmul.f32 %v17244_v59, %v17586_v42  ;;  %v9978_v61 = vmul.f32 %v17396_v5, %v17604_v31  ;;  %v10171_v10 = vld [vmem:[#allocation5 + $0x172] sm:$0xff]  ;;  %v10067_v54 = vld [vmem:[#allocation5 + $0x188] sm:$0xff] }
 0x48c   : > { %10235 = vadd.xlane.f32.xlu1 %v10234_v44  ;;  %v10152_v6 = vadd.f32 %v10136_v52, %v10099_v0  ;;  %v10046_v27 = vadd.f32 %v10030_v45, %v9993_v63  ;;  %v10031_v49 = vmul.f32 %v17431_v25, %v17615_v8  ;;  %v10085_v28 = vmul.f32 %v17345_v47, %v17637_v62 }
 0x48d   : > { %v9941_v39 = vadd.f32 %v9925_v11, %v9888_v15  ;;  %v9836_v12 = vadd.f32 %v9820_v37, %v9767_v32  ;;  %v9873_v22 = vmul.f32 %v17271_v2, %v10167_v57  ;;  %v10138_v42 = vmul.f32 %v17356_v4, %v17643_v7  ;;  %v10120_v32 = vld [vmem:[#allocation5 + $0x189] sm:$0xff] }
 0x48e   : > { %v10205_v34 = vadd.f32 %v10189_v36, %v10152_v6  ;;  %v10100_v46 = vadd.f32 %v10084_v3, %v10046_v27  ;;  %v9926_v13 = vmul.f32 %v17375_v60, %v10063_v29  ;;  %v9769_v30 = vmul.f32 %v18180_v43, %v10063_v29 }
 0x48f   : > { %v9994_v40 = vadd.f32 %v9978_v61, %v9941_v39  ;;  %v9889_v35 = vadd.f32 %v9873_v22, %v9836_v12  ;;  %v9822_v53 = vmul.f32 %v17244_v59, %v10116_v16  ;;  %v9979_v57 = vmul.f32 %v17396_v5, %v10116_v16 }
 0x490   : > { %v10237_v14 = vsel %vm334_vm0, %v10205_v34, 0.0  ;;  %v10153_v24 = vadd.f32 %v10137_v18, %v10100_v46  ;;  %v9875_v52 = vmul.f32 %v17271_v2, %v10169_v26  ;;  %v9928_v56 = vmul.f32 %v17375_v60, %v10065_v58  ;;  %v10173_v46 = vld [vmem:[#allocation5 + $0x18a] sm:$0xff] }
 0x491   : > { %10238 = vadd.xlane.f32.xlu0 %v10237_v14  ;;  %v10047_v17 = vadd.f32 %v10031_v49, %v9994_v40  ;;  %v9942_v38 = vadd.f32 %v9926_v13, %v9889_v35  ;;  %v9838_v55 = vadd.f32 %v9822_v53, %v9769_v30  ;;  %v10191_v29 = vmul.f32 %v17446_v51, %v17657_v41  ;;  %v10066_v40 = vld [vmem:[#allocation5 + $0x180] sm:$0xff] }
 0x492   : > { %v10206_v50 = vadd.f32 %v10190_v19, %v10153_v24  ;;  %v10032_v36 = vmul.f32 %v17431_v25, %v10169_v26  ;;  %v10086_v20 = vmul.f32 %v17345_v47, %v10065_v58  ;;  %v10139_v16 = vmul.f32 %v17356_v4, %v10118_v9 }
 0x493   : > { %v10101_v23 = vadd.f32 %v10085_v28, %v10047_v17  ;;  %v9995_v48 = vadd.f32 %v9979_v57, %v9942_v38  ;;  %v9891_v21 = vadd.f32 %v9875_v52, %v9838_v55  ;;  %v9768_v3 = vmul.f32 %v18180_v43, %v17602_v1  ;;  %v10069_v17 = vld [vmem:[#allocation5 + $0x1a0] sm:$0xff] }
 0x494   : > { %v10240_v45 = vsel %vm334_vm0, %v10206_v50, 0.0  ;;  %v9821_v18 = vmul.f32 %v17244_v59, %v17604_v31  ;;  %v9874_v26 = vmul.f32 %v17271_v2, %v17615_v8  ;;  %v9981_v19 = vmul.f32 %v17396_v5, %v10118_v9 }
 0x495   : > { %10241 = vadd.xlane.f32.xlu1 %v10240_v45  ;;  %v10154_v33 = vadd.f32 %v10138_v42, %v10101_v23  ;;  %v10048_v0 = vadd.f32 %v10032_v36, %v9995_v48  ;;  %v9944_v63 = vadd.f32 %v9928_v56, %v9891_v21  ;;  %v10192_v44 = vmul.f32 %v17446_v51, %v10171_v10  ;;  %v10122_v48 = vld [vmem:[#allocation5 + $0x1a1] sm:$0xff] }
 0x496   : > { %v10034_v15 = vmul.f32 %v17431_v25, %v10171_v10  ;;  %v9837_v11 = vadd.f32 %v9821_v18, %v9768_v3  ;;  %v9927_v1 = vmul.f32 %v17375_v60, %v17637_v62  ;;  %v10088_v8 = vmul.f32 %v17345_v47, %v10067_v54  ;;  %v10175_v45 = vld [vmem:[#allocation5 + $0x1a2] sm:$0xff]  ;;  %v10068_v18 = vld [vmem:[#allocation5 + $0x198] sm:$0xff] }
 0x497   : > { %v10207_v37 = vadd.f32 %v10191_v29, %v10154_v33  ;;  %v10102_v31 = vadd.f32 %v10086_v20, %v10048_v0  ;;  %v9997_v6 = vadd.f32 %v9981_v19, %v9944_v63  ;;  %v10141_v27 = vmul.f32 %v17356_v4, %v10120_v32 }
 0x498   : > { %v9890_v61 = vadd.f32 %v9874_v26, %v9837_v11  ;;  %v9771_v49 = vmul.f32 %v18180_v43, %v10065_v58  ;;  %v9824_v39 = vmul.f32 %v17244_v59, %v10118_v9  ;;  %v9980_v34 = vmul.f32 %v17396_v5, %v17643_v7  ;;  %v10119_v9 = vld [vmem:[#allocation5 + $0x181] sm:$0xff] }
 0x499   : > { %v10243_v28 = vsel %vm334_vm0, %v10207_v37, 0.0  ;;  %v10155_v12 = vadd.f32 %v10139_v16, %v10102_v31  ;;  %v10050_v22 = vadd.f32 %v10034_v15, %v9997_v6  ;;  %v10033_v13 = vmul.f32 %v17431_v25, %v17657_v41 }
 0x49a   : > { %10244 = vadd.xlane.f32.xlu0 %v10243_v28  ;;  %v9943_v42 = vadd.f32 %v9927_v1, %v9890_v61  ;;  %v9840_v35 = vadd.f32 %v9824_v39, %v9771_v49  ;;  %v9877_v30 = vmul.f32 %v17271_v2, %v10171_v10  ;;  %v9930_v14 = vmul.f32 %v17375_v60, %v10067_v54  ;;  %v10121_v1 = vld [vmem:[#allocation5 + $0x199] sm:$0xff] }
 0x49b   : > { %v10208_v58 = vadd.f32 %v10192_v44, %v10155_v12  ;;  %v10104_v53 = vadd.f32 %v10088_v8, %v10050_v22  ;;  %v9770_v24 = vmul.f32 %v18180_v43, %v17637_v62  ;;  %v9823_v38 = vmul.f32 %v17244_v59, %v17643_v7  ;;  %v10172_v43 = vld [vmem:[#allocation5 + $0x182] sm:$0xff]  ;;  %v10174_v8 = vld [vmem:[#allocation5 + $0x19a] sm:$0xff] }
 0x49c   : > { %v9996_v57 = vadd.f32 %v9980_v34, %v9943_v42  ;;  %v9893_v52 = vadd.f32 %v9877_v30, %v9840_v35  ;;  %v9876_v55 = vmul.f32 %v17271_v2, %v17657_v41  ;;  %v10194_v29 = vmul.f32 %v17446_v51, %v10173_v46  ;;  %v9540_v42 = vpop.xlane.xlu1 %9539 }
 0x49d   : > { %v10246_v56 = vsel %vm334_vm0, %v10208_v58, 0.0  ;;  %v10157_v50 = vadd.f32 %v10141_v27, %v10104_v53  ;;  %v10087_v36 = vmul.f32 %v17345_v47, %v10066_v40  ;;  %v9983_v23 = vmul.f32 %v17396_v5, %v10120_v32 }
 0x49e   : > { %10247 = vadd.xlane.f32.xlu1 %v10246_v56  ;;  %v10049_v20 = vadd.f32 %v10033_v13, %v9996_v57  ;;  %v9946_v62 = vadd.f32 %v9930_v14, %v9893_v52  ;;  %v9839_v16 = vadd.f32 %v9823_v38, %v9770_v24  ;;  %v10140_v59 = vmul.f32 %v17356_v4, %v10119_v9  ;;  %v9537_v13 = vpop.xlane.xlu0 %9536 }
 0x49f   : > { %v10210_v10 = vadd.f32 %v10194_v29, %v10157_v50  ;;  %v10036_v2 = vmul.f32 %v17431_v25, %v10173_v46  ;;  %v10090_v7 = vmul.f32 %v17345_v47, %v10069_v17  ;;  %v9929_v3 = vmul.f32 %v17375_v60, %v10066_v40 }
 0x4a0   : > { %v10103_v41 = vadd.f32 %v10087_v36, %v10049_v20  ;;  %v9999_v21 = vadd.f32 %v9983_v23, %v9946_v62  ;;  %v9892_v54 = vadd.f32 %v9876_v55, %v9839_v16  ;;  %v10193_v33 = vmul.f32 %v17446_v51, %v10172_v43 }
 0x4a1   : > { %v10252_v26 = vsel %vm334_vm0, %v10210_v10, 0.0  ;;  %v10143_v0 = vmul.f32 %v17356_v4, %v10122_v48  ;;  %v9982_v44 = vmul.f32 %v17396_v5, %v10119_v9  ;;  %v10196_v15 = vmul.f32 %v17446_v51, %v10175_v45 }
 0x4a2   : > { %10253 = vadd.xlane.f32.xlu0 %v10252_v26  ;;  %v10156_v63 = vadd.f32 %v10140_v59, %v10103_v41  ;;  %v10052_v19 = vadd.f32 %v10036_v2, %v9999_v21  ;;  %v9945_v32 = vadd.f32 %v9929_v3, %v9892_v54  ;;  %v10089_v11 = vmul.f32 %v17345_v47, %v10068_v18  ;;  %v9543_v40 = vpop.xlane.xlu0 %9542 }
 0x4a3   : > { %v10035_v6 = vmul.f32 %v17431_v25, %v10172_v43  ;;  %v10142_v39 = vmul.f32 %v17356_v4, %v10121_v1  ;;  %v10195_v12 = vmul.f32 %v17446_v51, %v10174_v8  ;;  %v11260_v25 = vld [vmem:[#allocation6] ss:$0 sm:$0xff]  ;;  %v9549_v4 = vpop.xlane.xlu1 %9548  ;;  %v9641_v18 = vlaneseq }
 0x4a4   : > { %v10209_v37 = vadd.f32 %v10193_v33, %v10156_v63  ;;  %v10106_v60 = vadd.f32 %v10090_v7, %v10052_v19  ;;  %v9998_v31 = vadd.f32 %v9982_v44, %v9945_v32 }
 0x4a5   : > { %v9642_v19 = vand.u32 127, %v9641_v18  ;;  %v9644_v1 = vshrl.u32 %v9641_v18, 7 }
 0x4a6   : > { %v10249_v27 = vsel %vm334_vm0, %v10209_v37, 0.0  ;;  %v10159_v61 = vadd.f32 %v10143_v0, %v10106_v60  ;;  %v10051_v49 = vadd.f32 %v10035_v6, %v9998_v31  ;;  %v9546_v30 = vpop.xlane.xlu0 %9545 }
 0x4a7   : > { %10250 = vadd.xlane.f32.xlu1 %v10249_v27  ;;  %v9555_v35 = vpop.xlane.xlu1 %9554  ;;  %v9647_v60 = vadd.s32 4294967288, %v9642_v19 }
 0x4a8   : > { %v10212_v28 = vadd.f32 %v10196_v15, %v10159_v61  ;;  %v10105_v5 = vadd.f32 %v10089_v11, %v10051_v49  ;;  %v17747_v61 = vsub.s32 %v9642_v19, %v9644_v1 }
 0x4aa   : > { %v10258_v47 = vsel %vm334_vm0, %v10212_v28, 0.0  ;;  %v10158_v22 = vadd.f32 %v10142_v39, %v10105_v5  ;;  %v9552_v53 = vpop.xlane.xlu0 %9551  ;;  %v17749_v39 = vsub.s32 %v9647_v60, %v9644_v1 }
 0x4ab   : > { %10259 = vadd.xlane.f32.xlu0 %v10258_v47  ;;  %v9561_v58 = vpop.xlane.xlu1 %9560 }
 0x4ac   : > { %v10211_v34 = vadd.f32 %v10195_v12, %v10158_v22 }
 0x4ae   : > { %v10255_v46 = vsel %vm334_vm0, %v10211_v34, 0.0  ;;  %v9558_v14 = vpop.xlane.xlu0 %9557 }
 0x4af   : > { %10256 = vadd.xlane.f32.xlu1 %v10255_v46  ;;  %v9567_v51 = vpop.xlane.xlu1 %9566 }
 0x4b2   : > { %v9564_v57 = vpop.xlane.xlu0 %9563 }
 0x4b3   : > { %v9573_v24 = vpop.xlane.xlu1 %9572 }
 0x4b6   : > { %v9570_v52 = vpop.xlane.xlu0 %9569 }
 0x4ba   : > { %v9576_v38 = vpop.xlane.xlu0 %9575 }
 0x4c0   : > { %9590 = vperm.xlu1 %12834, %v11260_v25  }
 0x4c1   : > { %10268 = vperm.xlu0 %12833, %v11260_v25  }
 0x4e8   : > { %v9579_v9 = vpop.xlane.xlu1 %9578 }
 0x4ec   : > { %v9582_v56 = vpop.xlane.xlu0 %9581 }
 0x4f2   : > { %v10215_v29 = vpop.xlane.xlu0 %10214 }
 0x4f6   : > { %v10218_v17 = vpop.xlane.xlu1 %10217 }
 0x501   : > { %v10221_v20 = vpop.xlane.xlu0 %10220 }
 0x504   : > { %v17719_v55 = vpop.xlane.xlu1 %10223 }
 0x508   : > { %v17727_v62 = vpop.xlane.xlu0 %10226 }
 0x50b   : > { %v17721_v50 = vpop.xlane.xlu1 %10229 }
 0x510   : > { %v17731_v48 = vpop.xlane.xlu0 %10232 }
 0x515   : > { %v17723_v36 = vpop.xlane.xlu1 %10235 }
 0x51a   : > { %v17735_v10 = vpop.xlane.xlu0 %10238 }
 0x51e   : > { %v17725_v43 = vpop.xlane.xlu1 %10241 }
 0x523   : > { %v17739_v2 = vpop.xlane.xlu0 %10244 }
 0x527   : > { %v17729_v23 = vpop.xlane.xlu1 %10247 }
 0x52b   : > { %v17741_v54 = vpop.xlane.xlu0 %10253 }
 0x530   : > { %v17733_v16 = vpop.xlane.xlu1 %10250 }
 0x534   : > { %v17743_v44 = vpop.xlane.xlu0 %10259 }
 0x538   : > { %v17737_v59 = vpop.xlane.xlu1 %10256 }
 0x53c   : > { %v9591_v7 = vpop.permute.xlu1 %9590  ;;  %v17745_v6 = vpop.permute.xlu0 %10268 }
 0x53d   : > { %v9593_v41 = vadd.f32 %v9591_v7, %v9537_v13  ;;  %v9594_v21 = vadd.f32 %v9591_v7, %v9540_v42  ;;  %v9595_v45 = vadd.f32 %v9591_v7, %v9543_v40  ;;  %v9596_v3 = vadd.f32 %v9591_v7, %v9546_v30 }
 0x53e   : > { %v9597_v26 = vadd.f32 %v9591_v7, %v9549_v4  ;;  %v9598_v33 = vadd.f32 %v9591_v7, %v9552_v53  ;;  %v9599_v0 = vadd.f32 %v9591_v7, %v9555_v35  ;;  %v9600_v63 = vadd.f32 %v9591_v7, %v9558_v14 }
 0x53f   : > { %13051 = vtanh.f32 %v9593_v41  ;;  %v9601_v32 = vadd.f32 %v9591_v7, %v9561_v58  ;;  %v9602_v15 = vadd.f32 %v9591_v7, %v9564_v57  ;;  %v9603_v11 = vadd.f32 %v9591_v7, %v9567_v51 }
 0x540   : > { %13053 = vtanh.f32 %v9594_v21  ;;  %v9604_v37 = vadd.f32 %v9591_v7, %v9570_v52  ;;  %v9605_v31 = vadd.f32 %v9591_v7, %v9573_v24  ;;  %v9606_v8 = vadd.f32 %v9591_v7, %v9576_v38 }
 0x541   : > { %13055 = vtanh.f32 %v9595_v45  ;;  %v9607_v27 = vadd.f32 %v9591_v7, %v9579_v9  ;;  %v9608_v49 = vadd.f32 %v9591_v7, %v9582_v56  ;;  %v10271_v28 = vadd.f32 %v17745_v6, %v10215_v29 }
 0x542   : > { %13057 = vtanh.f32 %v9596_v3  ;;  %v10272_v12 = vadd.f32 %v17745_v6, %v10218_v17  ;;  %v10273_v34 = vadd.f32 %v17745_v6, %v10221_v20  ;;  %v10274_v42 = vadd.f32 %v17745_v6, %v17719_v55 }
 0x543   : > { %13059 = vtanh.f32 %v9597_v26  ;;  %v10275_v4 = vadd.f32 %v17745_v6, %v17727_v62  ;;  %v10276_v53 = vadd.f32 %v17745_v6, %v17721_v50  ;;  %v10277_v24 = vadd.f32 %v17745_v6, %v17731_v48 }
 0x544   : > { %13061 = vtanh.f32 %v9598_v33  ;;  %v10278_v17 = vadd.f32 %v17745_v6, %v17723_v36  ;;  %v10279_v50 = vadd.f32 %v17745_v6, %v17735_v10  ;;  %v10280_v48 = vadd.f32 %v17745_v6, %v17725_v43 }
 0x545   : > { %13063 = vtanh.f32 %v9599_v0  ;;  %v10281_v21 = vadd.f32 %v17745_v6, %v17739_v2  ;;  %v10282_v18 = vadd.f32 %v17745_v6, %v17729_v23  ;;  %v10283_v2 = vadd.f32 %v17745_v6, %v17733_v16 }
 0x546   : > { %13065 = vtanh.f32 %v9600_v63  ;;  %v10284_v23 = vadd.f32 %v17745_v6, %v17741_v54  ;;  %v10285_v1 = vadd.f32 %v17745_v6, %v17737_v59  ;;  %v10286_v54 = vadd.f32 %v17745_v6, %v17743_v44 }
 0x547   : > { %13067 = vtanh.f32 %v9601_v32 }
 0x548   : > { %13069 = vtanh.f32 %v9602_v15 }
 0x549   : > { %13071 = vtanh.f32 %v9603_v11 }
 0x54a   : > { %13073 = vtanh.f32 %v9604_v37 }
 0x54b   : > { %13075 = vtanh.f32 %v9605_v31 }
 0x54c   : > { %v13052_v5 = vpop.eup %13051  ;;  %13077 = vtanh.f32 %v9606_v8 }
 0x54d   : > { %v13054_v47 = vpop.eup %13053  ;;  %13079 = vtanh.f32 %v9607_v27  ;;  %v9646_v22 = vrot.slane %v13052_v5, %v17747_v61 }
 0x54e   : > { %v13056_v46 = vpop.eup %13055  ;;  %13081 = vtanh.f32 %v9608_v49  ;;  %v9651_v25 = vrot.slane %v13054_v47, %v17749_v39 }
 0x54f   : > { %v13058_v13 = vpop.eup %13057  ;;  %v9657_v40 = vrot.slane %v13056_v46, %v17747_v61  ;;  %13083 = vtanh.f32 %v10271_v28 }
 0x550   : > { %v13060_v35 = vpop.eup %13059  ;;  %v9653_v30 = vsel %vm9652_vm2, %v9651_v25, %v9646_v22  ;;  %v9661_v58 = vrot.slane %v13058_v13, %v17749_v39  ;;  %13085 = vtanh.f32 %v10272_v12 }
 0x551   : > { %v13062_v51 = vpop.eup %13061  ;;  %v9666_v14 = vrot.slane %v13060_v35, %v17747_v61  ;;  %13087 = vtanh.f32 %v10273_v34 }
 0x552   : > { %v13064_v57 = vpop.eup %13063  ;;  %v9662_v9 = vsel %vm9652_vm2, %v9661_v58, %v9657_v40  ;;  %v9670_v52 = vrot.slane %v13062_v51, %v17749_v39  ;;  %13089 = vtanh.f32 %v10274_v42 }
 0x553   : > { %v13066_v38 = vpop.eup %13065  ;;  %v9675_v55 = vrot.slane %v13064_v57, %v17747_v61  ;;  %v9718_v56 = vsel %vm9717_vm3, %v9662_v9, %v9653_v30  ;;  %13091 = vtanh.f32 %v10275_v4 }
 0x554   : > { %v13068_v29 = vpop.eup %13067  ;;  %v9671_v20 = vsel %vm9652_vm2, %v9670_v52, %v9666_v14  ;;  %v9679_v62 = vrot.slane %v13066_v38, %v17749_v39  ;;  %13093 = vtanh.f32 %v10276_v53 }
 0x555   : > { %v13070_v36 = vpop.eup %13069  ;;  %v9684_v7 = vrot.slane %v13068_v29, %v17747_v61  ;;  %v9720_v41 = vsel %vm9719_vm4, %v9671_v20, %v9718_v56  ;;  %13095 = vtanh.f32 %v10277_v24 }
 0x556   : > { %v13072_v10 = vpop.eup %13071  ;;  %v9680_v45 = vsel %vm9652_vm2, %v9679_v62, %v9675_v55  ;;  %v9688_v3 = vrot.slane %v13070_v36, %v17749_v39  ;;  %13097 = vtanh.f32 %v10278_v17 }
 0x557   : > { %v13074_v43 = vpop.eup %13073  ;;  %v9693_v26 = vrot.slane %v13072_v10, %v17747_v61  ;;  %v9722_v33 = vsel %vm9721_vm5, %v9680_v45, %v9720_v41  ;;  %13099 = vtanh.f32 %v10279_v50 }
 0x558   : > { %v13076_v0 = vpop.eup %13075  ;;  %v9689_v63 = vsel %vm9652_vm2, %v9688_v3, %v9684_v7  ;;  %v9697_v19 = vrot.slane %v13074_v43, %v17749_v39  ;;  %13101 = vtanh.f32 %v10280_v48 }
 0x559   : > { %v13078_v32 = vpop.eup %13077  ;;  %v9702_v15 = vrot.slane %v13076_v0, %v17747_v61  ;;  %v9724_v11 = vsel %vm9723_vm6, %v9689_v63, %v9722_v33  ;;  %13103 = vtanh.f32 %v10281_v21 }
 0x55a   : > { %v13080_v16 = vpop.eup %13079  ;;  %v9698_v37 = vsel %vm9652_vm2, %v9697_v19, %v9693_v26  ;;  %v9706_v60 = vrot.slane %v13078_v32, %v17749_v39  ;;  %13105 = vtanh.f32 %v10282_v18 }
 0x55b   : > { %v13082_v31 = vpop.eup %13081  ;;  %v9711_v8 = vrot.slane %v13080_v16, %v17747_v61  ;;  %v9726_v27 = vsel %vm9725_vm7, %v9698_v37, %v9724_v11  ;;  %13107 = vtanh.f32 %v10283_v2 }
 0x55c   : > { %v13084_v49 = vpop.eup %13083  ;;  %v9707_v59 = vsel %vm9652_vm2, %v9706_v60, %v9702_v15  ;;  %v9715_v28 = vrot.slane %v13082_v31, %v17749_v39  ;;  %13109 = vtanh.f32 %v10284_v23 }
 0x55d   : > { %v13086_v5 = vpop.eup %13085  ;;  %v9728_v12 = vsel %vm9727_vm8, %v9707_v59, %v9726_v27  ;;  %13111 = vtanh.f32 %v10285_v1  ;;  %v10322_v44 = vrot.slane %v13084_v49, %v17747_v61 }
 0x55e   : > { %v13088_v6 = vpop.eup %13087  ;;  %v9716_v47 = vsel %vm9652_vm2, %v9715_v28, %v9711_v8  ;;  %13113 = vtanh.f32 %v10286_v54  ;;  %v10326_v22 = vrot.slane %v13086_v5, %v17749_v39 }
 0x55f   : > { %v13090_v34 = vpop.eup %13089  ;;  %v9730_v46 = vsel %vm9729_vm9, %v9716_v47, %v9728_v12  ;;  %v10331_v25 = vrot.slane %v13088_v6, %v17747_v61 }
 0x560   : > { %v13092_v42 = vpop.eup %13091  ;;  %9733 = vst.msk [vmem:[%s17817_s15] sm:$0xff] %vm9732_vm10, %v9730_v46  ;;  %v10327_v13 = vsel %vm9652_vm2, %v10326_v22, %v10322_v44  ;;  %v10335_v40 = vrot.slane %v13090_v34, %v17749_v39 }
 0x561   : > { %v13094_v4 = vpop.eup %13093  ;;  %v10340_v35 = vrot.slane %v13092_v42, %v17747_v61 }
 0x562   : > { %v13096_v30 = vpop.eup %13095  ;;  %v10336_v58 = vsel %vm9652_vm2, %v10335_v40, %v10331_v25  ;;  %v10344_v53 = vrot.slane %v13094_v4, %v17749_v39 }
 0x563   : > { %v13098_v51 = vpop.eup %13097  ;;  %v10349_v14 = vrot.slane %v13096_v30, %v17747_v61  ;;  %v10391_v24 = vsel %vm9717_vm3, %v10336_v58, %v10327_v13 }
 0x564   : > { %v13100_v57 = vpop.eup %13099  ;;  %v10345_v9 = vsel %vm9652_vm2, %v10344_v53, %v10340_v35  ;;  %v10353_v52 = vrot.slane %v13098_v51, %v17749_v39 }
 0x565   : > { %v13102_v17 = vpop.eup %13101  ;;  %v10358_v38 = vrot.slane %v13100_v57, %v17747_v61  ;;  %v10392_v55 = vsel %vm9719_vm4, %v10345_v9, %v10391_v24 }
 0x566   : > { %v13104_v56 = vpop.eup %13103  ;;  %v10354_v50 = vsel %vm9652_vm2, %v10353_v52, %v10349_v14  ;;  %v10362_v29 = vrot.slane %v13102_v17, %v17749_v39 }
 0x567   : > { %v13106_v20 = vpop.eup %13105  ;;  %v10367_v62 = vrot.slane %v13104_v56, %v17747_v61  ;;  %v10393_v48 = vsel %vm9721_vm5, %v10354_v50, %v10392_v55 }
 0x568   : > { %v13108_v36 = vpop.eup %13107  ;;  %v10363_v7 = vsel %vm9652_vm2, %v10362_v29, %v10358_v38  ;;  %v10371_v41 = vrot.slane %v13106_v20, %v17749_v39 }
 0x569   : > { %v13110_v21 = vpop.eup %13109  ;;  %v10376_v10 = vrot.slane %v13108_v36, %v17747_v61  ;;  %v10394_v45 = vsel %vm9723_vm6, %v10363_v7, %v10393_v48 }
 0x56a   : > { %v13112_v3 = vpop.eup %13111  ;;  %v10372_v18 = vsel %vm9652_vm2, %v10371_v41, %v10367_v62  ;;  %v10380_v43 = vrot.slane %v13110_v21, %v17749_v39 }
 0x56b   : > { %v13114_v26 = vpop.eup %13113  ;;  %v10385_v33 = vrot.slane %v13112_v3, %v17747_v61  ;;  %v10395_v2 = vsel %vm9725_vm7, %v10372_v18, %v10394_v45 }
 0x56c   : > { %v10381_v0 = vsel %vm9652_vm2, %v10380_v43, %v10376_v10  ;;  %v10389_v63 = vrot.slane %v13114_v26, %v17749_v39 }
 0x56d   : > { %v10396_v19 = vsel %vm9727_vm8, %v10381_v0, %v10395_v2 }
 0x56e   : > { %v10390_v61 = vsel %vm9652_vm2, %v10389_v63, %v10385_v33 }
 0x56f   : > { %v10397_v23 = vsel %vm9729_vm9, %v10390_v61, %v10396_v19 }
 0x570   : > { %10399 = vst.msk [vmem:[%s17817_s15 + $0x8] sm:$0xff] %vm9732_vm10, %v10397_v23 }
 0x571   : > { %13141 = shalt.err (!%p13138_p3)
}
 0x572   : > { %s13142_s29 = scalar_lea.hbm %s17852_s24, 256  ;;  %s13146_s15 = scalar_lea.hbm %s17911_s9, 512 }
 0x573   : > { %p13143_p4 = scmp.ne.s32.totalorder %s17852_s24, %s13142_s29  ;;  %p13147_p9 = scmp.lt.s32.totalorder %s17852_s24, %s17911_s9 }
 0x574   : > { %p13148_p10 = scmp.lt.s32.totalorder %s13146_s15, %s13142_s29 }
 0x575   : > { %p13144_p7 = pnand %p13143_p4, %p13286_p5 }
 0x576   : > { %p13149_p11 = por %p13148_p10, %p13147_p9 }
 0x577   : > { %p13145_p8 = pneg %p13144_p7 }
 0x579   : > { %p13150_p12 = pnand %p13149_p11, %p13145_p8 }
 0x57b   : > { %13153 = shalt.err (!%p13150_p12)
}
 0x57c   : > { %s13193_s23 = smov 128   ;;  %s13194_s25 = smov 8  }
 0x57d   : > { %12790 = dma.vmem_to_hbm [thread:$0]  (%p13286_p5), %s17854_s18, 256, %s17852_s24, %s17862_s8, %s13193_s23, %s13193_s23, %s13194_s25  }
 0x57e PF: > { %p12796_p13 = scmp.ge.s32.totalorder %s13188_s14, 2  ;;  %s10429_s26 = sand.u32 1, %s13176_s11  }
 0x57f   : > { %s10430_s27 = scalar_lea.sflag [#allocation8], %s10429_s26 }
 0x580   : > { %p12793_p0 = pnand %p12796_p13, %p13290_p6 }
 0x582   : > { %p12794_p1 = pneg %p12793_p0 }
 0x584   : > { %13171 = dma.done.wait (%p12794_p1), %s10430_s27, 256  }
 0x585   : > { %13173 = vsyncadd (%p12794_p1), %s10430_s27, 4294967040  ;;  %p21_p2 = scmp.ge.s32.totalorder %s13273_s16, 4   ;;  %s18181_s11 = smov %s13180_s12 }
 0x586   : > { %s18182_s12 = smov %s13184_s13  ;;  %s18183_s13 = smov %s13284_s19 }
 0x587   : > { %s18184_s14 = smov %s13273_s16  ;;  %23 = sbr.rel (!%p21_p2) target bundleno = 6 (0x6), region = 127 }
 0x58c   :  { %10435 = vsyncpa [#allocation8], 1 }
 0x58d   :  { %10437 = vsyncpa [#allocation8 + $0x1], 1 }

</bundles_post_ra>
